<compile_context>
chip_gen: v7x
topology: tpu7x:2x2x1
jax: 0.10.0
libtpu: 0.0.40
codegen_flags: <defaults>
</compile_context>

<pallas_src>
import jax
import jax.numpy as jnp
from jax import lax
from jax.experimental import pallas as pl
from jax.experimental.pallas import tpu as pltpu

_EPS = 1e-5


# ---------------------------------------------------------------------------
# Fused kernel builder (geometry baked in at trace time).
# ---------------------------------------------------------------------------
def _build_kernel(n, cin, cout, h, w):
    hp, wp = h + 2, w + 2
    mp = n * hp * wp                       # flattened padded pixel count
    mp_pad = ((mp + 127) // 128) * 128     # lane-padded (full-vreg) width
    pad = wp + 1                           # largest |flat tap offset|
    lbuf = mp_pad + 2 * pad                # staging buffer incl. zero margins
    inv_m = 1.0 / float(n * h * w)         # BN counts valid pixels only

    def kernel(x_ref, w1_ref, w2_ref, w3_ref, g_ref, b_ref, mrow_ref,
               mcol_ref, out_ref, xbuf, buf_a, buf_b, stk):
        mask = mrow_ref[...]               # (1, mp_pad) f32, 1.0 at valid px
        mcol = mcol_ref[...]               # (mp_pad, 1) f32

        def conv3x3(src, w2d, ci):
            # Stack the 9 shifted tap slices -> one K = 9*ci MXU contraction.
            for t in range(9):
                kh, kw = divmod(t, 3)
                off = kh * wp + kw         # == pad + (kh-1)*wp + (kw-1)
                stk[t * ci:(t + 1) * ci, :] = src[:, off:off + mp_pad]
            return jnp.dot(w2d, stk[0:9 * ci, :],
                           preferred_element_type=jnp.float32)

        def bn(acc, stage):
            # Masked single-pass stats; both reductions ride the MXU (f32).
            sums = jnp.dot(jnp.concatenate([acc, acc * acc], axis=0), mcol,
                           preferred_element_type=jnp.float32)   # (2*Co, 1)
            mean = sums[:cout] * inv_m
            var = sums[cout:] * inv_m - mean * mean
            scale = g_ref[stage] * lax.rsqrt(var + _EPS)          # EUP rsqrt
            shift = b_ref[stage] - mean * scale
            return acc * scale + shift

        # ---- init: full zero of the tiny x buffer, margins-only elsewhere --
        xbuf[...] = jnp.zeros((cin, lbuf), jnp.bfloat16)
        zm = jnp.zeros((cout, pad), jnp.bfloat16)
        buf_a[:, 0:pad] = zm
        buf_a[:, pad + mp_pad:lbuf] = zm
        buf_b[:, 0:pad] = zm
        buf_b[:, pad + mp_pad:lbuf] = zm

        # ---- gather NCHW x straight into the margined, zero-ringed buffer --
        for nn in range(n):
            xim = x_ref[nn].astype(jnp.bfloat16)        # (cin, h, w)
            base = pad + nn * hp * wp + wp + 1
            for hh in range(h):
                xbuf[:, base + hh * wp:base + hh * wp + w] = xim[:, hh, :]

        # ---- stage 1:  y1 = relu(bn1(conv1(x))) ----------------------------
        y1 = jnp.maximum(bn(conv3x3(xbuf, w1_ref[...], cin), 0), 0.0) * mask
        buf_a[:, pad:pad + mp_pad] = y1.astype(jnp.bfloat16)

        # ---- stage 2:  y2 = relu(bn2(conv2(y1))) ---------------------------
        y2 = jnp.maximum(bn(conv3x3(buf_a, w2_ref[...], cout), 1), 0.0) * mask
        buf_b[:, pad:pad + mp_pad] = y2.astype(jnp.bfloat16)

        # ---- stage 3:  out = relu(bn3(conv3(y2)) + y1) ---------------------
        y3 = bn(conv3x3(buf_b, w3_ref[...], cout), 2)
        res = buf_a[:, pad:pad + mp_pad].astype(jnp.float32)   # reload y1
        outv = jnp.maximum(y3 + res, 0.0)      # no ring re-mask needed

        # scatter valid pixels straight into the NCHW output (no post glue)
        for nn in range(n):
            base = nn * hp * wp + wp + 1
            for hh in range(h):
                out_ref[nn, :, hh, :] = outv[:, base + hh * wp:
                                             base + hh * wp + w]

    return kernel, mp, mp_pad, pad, lbuf


# ---------------------------------------------------------------------------
# One-time packing (outside jit): weights -> (Co, 9*Ci) bf16 tap matrices,
# BN affine params, and the valid-pixel masks (row form for the re-zeroing
# multiply, column form for the MXU-based BN reduction).
# ---------------------------------------------------------------------------
def pack_inputs(params, x_shape):
    n, cin, h, w = x_shape
    cout = params["l1"][0].shape[0]
    hp, wp = h + 2, w + 2
    mp = n * hp * wp
    mp_pad = ((mp + 127) // 128) * 128

    def taps(wgt):   # torch (Co,Ci,3,3) -> (Co, 9*Ci), column = (kh*3+kw)*Ci+ci
        co, ci = wgt.shape[0], wgt.shape[1]
        return jnp.transpose(wgt, (0, 2, 3, 1)).reshape(co, 9 * ci
                                                        ).astype(jnp.bfloat16)

    gam = jnp.stack([params[k][2] for k in ("l1", "l2", "l3")]
                    ).reshape(3, cout, 1).astype(jnp.float32)
    bet = jnp.stack([params[k][3] for k in ("l1", "l2", "l3")]
                    ).reshape(3, cout, 1).astype(jnp.float32)
    # Conv biases intentionally NOT packed: a per-channel constant added
    # before training-mode BN cancels exactly.
    valid = jnp.zeros((n, hp, wp), jnp.float32
                      ).at[:, 1:h + 1, 1:w + 1].set(1.0).reshape(1, mp)
    mrow = jnp.zeros((1, mp_pad), jnp.float32).at[:, :mp].set(valid)
    return {"w1": taps(params["l1"][0]), "w2": taps(params["l2"][0]),
            "w3": taps(params["l3"][0]), "gamma": gam, "beta": bet,
            "mask_row": mrow, "mask_col": mrow.reshape(mp_pad, 1)}


# ---------------------------------------------------------------------------
# residual_block forward (Pallas).  x is NCHW; output is NCHW.  The jitted
# body is exactly one pallas_call - no layout glue on the activation path.
# ---------------------------------------------------------------------------
def residual_block_pallas(x_nchw, packed):
    n, cin, h, w = x_nchw.shape
    cout = packed["gamma"].shape[1]
    kernel, mp, mp_pad, pad, lbuf = _build_kernel(n, cin, cout, h, w)
    ci_max = max(cin, cout)
    vmem = pl.BlockSpec(memory_space=pltpu.MemorySpace.VMEM)
    return pl.pallas_call(
        kernel,
        out_shape=jax.ShapeDtypeStruct((n, cout, h, w), jnp.float32),
        in_specs=[vmem] * 8,
        out_specs=vmem,
        scratch_shapes=[
            pltpu.VMEM((cin, lbuf), jnp.bfloat16),           # margined x
            pltpu.VMEM((cout, lbuf), jnp.bfloat16),          # margined y1
            pltpu.VMEM((cout, lbuf), jnp.bfloat16),          # margined y2
            pltpu.VMEM((9 * ci_max, mp_pad), jnp.bfloat16),  # stacked taps
        ],
    )(x_nchw, packed["w1"], packed["w2"], packed["w3"], packed["gamma"],
      packed["beta"], packed["mask_row"], packed["mask_col"])


# ---------------------------------------------------------------------------
# Pure-JAX references.  conv_dtype=float32 is the exact module spec;
# conv_dtype=bfloat16 mirrors the kernel's MXU input precision (f32 accum,
# f32 BN) for a tight correctness check.
# ---------------------------------------------------------------------------
def _bn_ref(y, gamma, beta):
    mean = jnp.mean(y, axis=(0, 1, 2), keepdims=True)
    var = jnp.mean((y - mean) ** 2, axis=(0, 1, 2), keepdims=True)
    return (y - mean) * lax.rsqrt(var + _EPS) * gamma + beta


def _conv_ref(x_nhwc, wgt, bias, conv_dtype):
    w_hwio = jnp.transpose(wgt, (2, 3, 1, 0)).astype(conv_dtype)
    y = lax.conv_general_dilated(
        x_nhwc.astype(conv_dtype), w_hwio, window_strides=(1, 1),
        padding="SAME", dimension_numbers=("NHWC", "HWIO", "NHWC"),
        preferred_element_type=jnp.float32)
    return y + bias


def residual_block_ref(x_nchw, params, conv_dtype=jnp.float32):
    x = jnp.transpose(x_nchw, (0, 2, 3, 1)).astype(jnp.float32)
    w1, b1, g1, be1 = params["l1"]
    w2, b2, g2, be2 = params["l2"]
    w3, b3, g3, be3 = params["l3"]
    h1 = jax.nn.relu(_bn_ref(_conv_ref(x, w1, b1, conv_dtype), g1, be1))
    h1s = h1.astype(conv_dtype).astype(jnp.float32)   # staging-buffer rounding
    h2 = jax.nn.relu(_bn_ref(_conv_ref(h1s, w2, b2, conv_dtype), g2, be2))
    h2s = h2.astype(conv_dtype).astype(jnp.float32)
    h3 = _bn_ref(_conv_ref(h2s, w3, b3, conv_dtype), g3, be3)
    out = jax.nn.relu(h3 + h1s)
    return jnp.transpose(out, (0, 3, 1, 2))


# ---------------------------------------------------------------------------
def init_params(key, cin, cout):
    params = {}
    chans = [(cin, cout), (cout, cout), (cout, cout)]
    for i, (ci, co) in enumerate(chans):
        key, kw, kb, kg, kbe = jax.random.split(key, 5)
        fan_in = ci * 9
        bound = 1.0 / jnp.sqrt(fan_in)
        wgt = jax.random.uniform(kw, (co, ci, 3, 3), jnp.float32, -bound, bound)
        bias = jax.random.uniform(kb, (co,), jnp.float32, -bound, bound)
        gamma = 1.0 + 0.1 * jax.random.normal(kg, (co,), jnp.float32)
        beta = 0.1 * jax.random.normal(kbe, (co,), jnp.float32)
        params[f"l{i + 1}"] = (wgt, bias, gamma, beta)
    return params


if __name__ == "__main__":
    key = jax.random.PRNGKey(0)
    kx, kp = jax.random.split(key)

    N, Cin, Cout, H, W = 2, 4, 8, 16, 16
    x = jax.random.normal(kx, (N, Cin, H, W), jnp.float32)
    params = init_params(kp, Cin, Cout)
    packed = pack_inputs(params, x.shape)            # one-time, outside jit

    run = jax.jit(residual_block_pallas)
    out = jax.block_until_ready(run(x, packed))
    assert out.shape == (N, Cout, H, W)

    # Tight check vs a reference that mirrors the kernel's bf16 MXU inputs
    # (f32 accumulation / f32 BN), then a looser sanity check vs the exact
    # f32 module spec (error budget = bf16 rounding of the conv operands).
    ref_bf16 = residual_block_ref(x, params, conv_dtype=jnp.bfloat16)
    ref_f32 = residual_block_ref(x, params, conv_dtype=jnp.float32)
    err_bf16 = float(jnp.max(jnp.abs(out - ref_bf16)))
    err_f32 = float(jnp.max(jnp.abs(out - ref_f32)))
    assert jnp.allclose(out, ref_bf16, atol=1e-2, rtol=1e-2), err_bf16
    assert jnp.allclose(out, ref_f32, atol=4e-2, rtol=4e-2), err_f32

    print("KERNEL_OK")
</pallas_src>

<mosaic_0001>
module attributes {stable_mosaic.version = 11 : i64} {
  func.func @kernel(%arg0: memref<2x4x16x16xf32, #tpu.memory_space<vmem>>, %arg1: memref<8x36xbf16, #tpu.memory_space<vmem>>, %arg2: memref<8x72xbf16, #tpu.memory_space<vmem>>, %arg3: memref<8x72xbf16, #tpu.memory_space<vmem>>, %arg4: memref<3x8x1xf32, #tpu.memory_space<vmem>>, %arg5: memref<3x8x1xf32, #tpu.memory_space<vmem>>, %arg6: memref<1x768xf32, #tpu.memory_space<vmem>>, %arg7: memref<768x1xf32, #tpu.memory_space<vmem>>, %arg8: memref<2x8x16x16xf32, #tpu.memory_space<vmem>>, %arg9: memref<4x806xbf16, #tpu.memory_space<vmem>>, %arg10: memref<8x806xbf16, #tpu.memory_space<vmem>>, %arg11: memref<8x806xbf16, #tpu.memory_space<vmem>>, %arg12: memref<72x768xbf16, #tpu.memory_space<vmem>>) attributes {dimension_semantics = [], scalar_prefetch = 0 : i64, scratch_operands = 4 : i64, tpu.core_type = #tpu.core_type<tc>} {
    %c0 = arith.constant 0 : index
    %c0_0 = arith.constant 0 : index
    %0 = vector.load %arg6[%c0, %c0_0] : memref<1x768xf32, #tpu.memory_space<vmem>>, vector<1x768xf32>
    %c0_1 = arith.constant 0 : index
    %c0_2 = arith.constant 0 : index
    %1 = vector.load %arg7[%c0_1, %c0_2] : memref<768x1xf32, #tpu.memory_space<vmem>>, vector<768x1xf32>
    %cst = arith.constant 0.000000e+00 : bf16
    %2 = vector.broadcast %cst : bf16 to vector<4x806xbf16>
    %c0_3 = arith.constant 0 : index
    %c0_4 = arith.constant 0 : index
    %3 = vector.load %arg9[%c0_3, %c0_4] : memref<4x806xbf16, #tpu.memory_space<vmem>>, vector<4x806xbf16>
    tpu.vector_store %arg9[%c0_3, %c0_4], %2 {strides = array<i32>} : memref<4x806xbf16, #tpu.memory_space<vmem>>, vector<4x806xbf16>,
    %cst_5 = arith.constant 0.000000e+00 : bf16
    %4 = vector.broadcast %cst_5 : bf16 to vector<8x19xbf16>
    %c0_6 = arith.constant 0 : index
    %c0_7 = arith.constant 0 : index
    %5 = vector.load %arg10[%c0_6, %c0_7] : memref<8x806xbf16, #tpu.memory_space<vmem>>, vector<8x19xbf16>
    tpu.vector_store %arg10[%c0_6, %c0_7], %4 {strides = array<i32>} : memref<8x806xbf16, #tpu.memory_space<vmem>>, vector<8x19xbf16>,
    %c0_8 = arith.constant 0 : index
    %c787 = arith.constant 787 : index
    %6 = vector.load %arg10[%c0_8, %c787] : memref<8x806xbf16, #tpu.memory_space<vmem>>, vector<8x19xbf16>
    tpu.vector_store %arg10[%c0_8, %c787], %4 {strides = array<i32>} : memref<8x806xbf16, #tpu.memory_space<vmem>>, vector<8x19xbf16>,
    %c0_9 = arith.constant 0 : index
    %c0_10 = arith.constant 0 : index
    %7 = vector.load %arg11[%c0_9, %c0_10] : memref<8x806xbf16, #tpu.memory_space<vmem>>, vector<8x19xbf16>
    tpu.vector_store %arg11[%c0_9, %c0_10], %4 {strides = array<i32>} : memref<8x806xbf16, #tpu.memory_space<vmem>>, vector<8x19xbf16>,
    %c0_11 = arith.constant 0 : index
    %c787_12 = arith.constant 787 : index
    %8 = vector.load %arg11[%c0_11, %c787_12] : memref<8x806xbf16, #tpu.memory_space<vmem>>, vector<8x19xbf16>
    tpu.vector_store %arg11[%c0_11, %c787_12], %4 {strides = array<i32>} : memref<8x806xbf16, #tpu.memory_space<vmem>>, vector<8x19xbf16>,
    %c0_13 = arith.constant 0 : index
    %c0_14 = arith.constant 0 : index
    %c0_15 = arith.constant 0 : index
    %c0_16 = arith.constant 0 : index
    %9 = vector.load %arg0[%c0_13, %c0_14, %c0_15, %c0_16] : memref<2x4x16x16xf32, #tpu.memory_space<vmem>>, vector<1x4x16x16xf32>
    %10 = vector.shape_cast %9 : vector<1x4x16x16xf32> to vector<4x16x16xf32>
    %11 = arith.truncf %10 : vector<4x16x16xf32> to vector<4x16x16xbf16>
    %12 = vector.extract_strided_slice %11 {offsets = [0, 0, 0], sizes = [4, 1, 16], strides = [1, 1, 1]} : vector<4x16x16xbf16> to vector<4x1x16xbf16>
    %13 = vector.shape_cast %12 : vector<4x1x16xbf16> to vector<4x16xbf16>
    %c0_17 = arith.constant 0 : index
    %c38 = arith.constant 38 : index
    %14 = vector.load %arg9[%c0_17, %c38] : memref<4x806xbf16, #tpu.memory_space<vmem>>, vector<4x16xbf16>
    tpu.vector_store %arg9[%c0_17, %c38], %13 {strides = array<i32>} : memref<4x806xbf16, #tpu.memory_space<vmem>>, vector<4x16xbf16>,
    %15 = vector.extract_strided_slice %11 {offsets = [0, 1, 0], sizes = [4, 1, 16], strides = [1, 1, 1]} : vector<4x16x16xbf16> to vector<4x1x16xbf16>
    %16 = vector.shape_cast %15 : vector<4x1x16xbf16> to vector<4x16xbf16>
    %c0_18 = arith.constant 0 : index
    %c56 = arith.constant 56 : index
    %17 = vector.load %arg9[%c0_18, %c56] : memref<4x806xbf16, #tpu.memory_space<vmem>>, vector<4x16xbf16>
    tpu.vector_store %arg9[%c0_18, %c56], %16 {strides = array<i32>} : memref<4x806xbf16, #tpu.memory_space<vmem>>, vector<4x16xbf16>,
    %18 = vector.extract_strided_slice %11 {offsets = [0, 2, 0], sizes = [4, 1, 16], strides = [1, 1, 1]} : vector<4x16x16xbf16> to vector<4x1x16xbf16>
    %19 = vector.shape_cast %18 : vector<4x1x16xbf16> to vector<4x16xbf16>
    %c0_19 = arith.constant 0 : index
    %c74 = arith.constant 74 : index
    %20 = vector.load %arg9[%c0_19, %c74] : memref<4x806xbf16, #tpu.memory_space<vmem>>, vector<4x16xbf16>
    tpu.vector_store %arg9[%c0_19, %c74], %19 {strides = array<i32>} : memref<4x806xbf16, #tpu.memory_space<vmem>>, vector<4x16xbf16>,
    %21 = vector.extract_strided_slice %11 {offsets = [0, 3, 0], sizes = [4, 1, 16], strides = [1, 1, 1]} : vector<4x16x16xbf16> to vector<4x1x16xbf16>
    %22 = vector.shape_cast %21 : vector<4x1x16xbf16> to vector<4x16xbf16>
    %c0_20 = arith.constant 0 : index
    %c92 = arith.constant 92 : index
    %23 = vector.load %arg9[%c0_20, %c92] : memref<4x806xbf16, #tpu.memory_space<vmem>>, vector<4x16xbf16>
    tpu.vector_store %arg9[%c0_20, %c92], %22 {strides = array<i32>} : memref<4x806xbf16, #tpu.memory_space<vmem>>, vector<4x16xbf16>,
    %24 = vector.extract_strided_slice %11 {offsets = [0, 4, 0], sizes = [4, 1, 16], strides = [1, 1, 1]} : vector<4x16x16xbf16> to vector<4x1x16xbf16>
    %25 = vector.shape_cast %24 : vector<4x1x16xbf16> to vector<4x16xbf16>
    %c0_21 = arith.constant 0 : index
    %c110 = arith.constant 110 : index
    %26 = vector.load %arg9[%c0_21, %c110] : memref<4x806xbf16, #tpu.memory_space<vmem>>, vector<4x16xbf16>
    tpu.vector_store %arg9[%c0_21, %c110], %25 {strides = array<i32>} : memref<4x806xbf16, #tpu.memory_space<vmem>>, vector<4x16xbf16>,
    %27 = vector.extract_strided_slice %11 {offsets = [0, 5, 0], sizes = [4, 1, 16], strides = [1, 1, 1]} : vector<4x16x16xbf16> to vector<4x1x16xbf16>
    %28 = vector.shape_cast %27 : vector<4x1x16xbf16> to vector<4x16xbf16>
    %c0_22 = arith.constant 0 : index
    %c128 = arith.constant 128 : index
    %29 = vector.load %arg9[%c0_22, %c128] : memref<4x806xbf16, #tpu.memory_space<vmem>>, vector<4x16xbf16>
    tpu.vector_store %arg9[%c0_22, %c128], %28 {strides = array<i32>} : memref<4x806xbf16, #tpu.memory_space<vmem>>, vector<4x16xbf16>,
    %30 = vector.extract_strided_slice %11 {offsets = [0, 6, 0], sizes = [4, 1, 16], strides = [1, 1, 1]} : vector<4x16x16xbf16> to vector<4x1x16xbf16>
    %31 = vector.shape_cast %30 : vector<4x1x16xbf16> to vector<4x16xbf16>
    %c0_23 = arith.constant 0 : index
    %c146 = arith.constant 146 : index
    %32 = vector.load %arg9[%c0_23, %c146] : memref<4x806xbf16, #tpu.memory_space<vmem>>, vector<4x16xbf16>
    tpu.vector_store %arg9[%c0_23, %c146], %31 {strides = array<i32>} : memref<4x806xbf16, #tpu.memory_space<vmem>>, vector<4x16xbf16>,
    %33 = vector.extract_strided_slice %11 {offsets = [0, 7, 0], sizes = [4, 1, 16], strides = [1, 1, 1]} : vector<4x16x16xbf16> to vector<4x1x16xbf16>
    %34 = vector.shape_cast %33 : vector<4x1x16xbf16> to vector<4x16xbf16>
    %c0_24 = arith.constant 0 : index
    %c164 = arith.constant 164 : index
    %35 = vector.load %arg9[%c0_24, %c164] : memref<4x806xbf16, #tpu.memory_space<vmem>>, vector<4x16xbf16>
    tpu.vector_store %arg9[%c0_24, %c164], %34 {strides = array<i32>} : memref<4x806xbf16, #tpu.memory_space<vmem>>, vector<4x16xbf16>,
    %36 = vector.extract_strided_slice %11 {offsets = [0, 8, 0], sizes = [4, 1, 16], strides = [1, 1, 1]} : vector<4x16x16xbf16> to vector<4x1x16xbf16>
    %37 = vector.shape_cast %36 : vector<4x1x16xbf16> to vector<4x16xbf16>
    %c0_25 = arith.constant 0 : index
    %c182 = arith.constant 182 : index
    %38 = vector.load %arg9[%c0_25, %c182] : memref<4x806xbf16, #tpu.memory_space<vmem>>, vector<4x16xbf16>
    tpu.vector_store %arg9[%c0_25, %c182], %37 {strides = array<i32>} : memref<4x806xbf16, #tpu.memory_space<vmem>>, vector<4x16xbf16>,
    %39 = vector.extract_strided_slice %11 {offsets = [0, 9, 0], sizes = [4, 1, 16], strides = [1, 1, 1]} : vector<4x16x16xbf16> to vector<4x1x16xbf16>
    %40 = vector.shape_cast %39 : vector<4x1x16xbf16> to vector<4x16xbf16>
    %c0_26 = arith.constant 0 : index
    %c200 = arith.constant 200 : index
    %41 = vector.load %arg9[%c0_26, %c200] : memref<4x806xbf16, #tpu.memory_space<vmem>>, vector<4x16xbf16>
    tpu.vector_store %arg9[%c0_26, %c200], %40 {strides = array<i32>} : memref<4x806xbf16, #tpu.memory_space<vmem>>, vector<4x16xbf16>,
    %42 = vector.extract_strided_slice %11 {offsets = [0, 10, 0], sizes = [4, 1, 16], strides = [1, 1, 1]} : vector<4x16x16xbf16> to vector<4x1x16xbf16>
    %43 = vector.shape_cast %42 : vector<4x1x16xbf16> to vector<4x16xbf16>
    %c0_27 = arith.constant 0 : index
    %c218 = arith.constant 218 : index
    %44 = vector.load %arg9[%c0_27, %c218] : memref<4x806xbf16, #tpu.memory_space<vmem>>, vector<4x16xbf16>
    tpu.vector_store %arg9[%c0_27, %c218], %43 {strides = array<i32>} : memref<4x806xbf16, #tpu.memory_space<vmem>>, vector<4x16xbf16>,
    %45 = vector.extract_strided_slice %11 {offsets = [0, 11, 0], sizes = [4, 1, 16], strides = [1, 1, 1]} : vector<4x16x16xbf16> to vector<4x1x16xbf16>
    %46 = vector.shape_cast %45 : vector<4x1x16xbf16> to vector<4x16xbf16>
    %c0_28 = arith.constant 0 : index
    %c236 = arith.constant 236 : index
    %47 = vector.load %arg9[%c0_28, %c236] : memref<4x806xbf16, #tpu.memory_space<vmem>>, vector<4x16xbf16>
    tpu.vector_store %arg9[%c0_28, %c236], %46 {strides = array<i32>} : memref<4x806xbf16, #tpu.memory_space<vmem>>, vector<4x16xbf16>,
    %48 = vector.extract_strided_slice %11 {offsets = [0, 12, 0], sizes = [4, 1, 16], strides = [1, 1, 1]} : vector<4x16x16xbf16> to vector<4x1x16xbf16>
    %49 = vector.shape_cast %48 : vector<4x1x16xbf16> to vector<4x16xbf16>
    %c0_29 = arith.constant 0 : index
    %c254 = arith.constant 254 : index
    %50 = vector.load %arg9[%c0_29, %c254] : memref<4x806xbf16, #tpu.memory_space<vmem>>, vector<4x16xbf16>
    tpu.vector_store %arg9[%c0_29, %c254], %49 {strides = array<i32>} : memref<4x806xbf16, #tpu.memory_space<vmem>>, vector<4x16xbf16>,
    %51 = vector.extract_strided_slice %11 {offsets = [0, 13, 0], sizes = [4, 1, 16], strides = [1, 1, 1]} : vector<4x16x16xbf16> to vector<4x1x16xbf16>
    %52 = vector.shape_cast %51 : vector<4x1x16xbf16> to vector<4x16xbf16>
    %c0_30 = arith.constant 0 : index
    %c272 = arith.constant 272 : index
    %53 = vector.load %arg9[%c0_30, %c272] : memref<4x806xbf16, #tpu.memory_space<vmem>>, vector<4x16xbf16>
    tpu.vector_store %arg9[%c0_30, %c272], %52 {strides = array<i32>} : memref<4x806xbf16, #tpu.memory_space<vmem>>, vector<4x16xbf16>,
    %54 = vector.extract_strided_slice %11 {offsets = [0, 14, 0], sizes = [4, 1, 16], strides = [1, 1, 1]} : vector<4x16x16xbf16> to vector<4x1x16xbf16>
    %55 = vector.shape_cast %54 : vector<4x1x16xbf16> to vector<4x16xbf16>
    %c0_31 = arith.constant 0 : index
    %c290 = arith.constant 290 : index
    %56 = vector.load %arg9[%c0_31, %c290] : memref<4x806xbf16, #tpu.memory_space<vmem>>, vector<4x16xbf16>
    tpu.vector_store %arg9[%c0_31, %c290], %55 {strides = array<i32>} : memref<4x806xbf16, #tpu.memory_space<vmem>>, vector<4x16xbf16>,
    %57 = vector.extract_strided_slice %11 {offsets = [0, 15, 0], sizes = [4, 1, 16], strides = [1, 1, 1]} : vector<4x16x16xbf16> to vector<4x1x16xbf16>
    %58 = vector.shape_cast %57 : vector<4x1x16xbf16> to vector<4x16xbf16>
    %c0_32 = arith.constant 0 : index
    %c308 = arith.constant 308 : index
    %59 = vector.load %arg9[%c0_32, %c308] : memref<4x806xbf16, #tpu.memory_space<vmem>>, vector<4x16xbf16>
    tpu.vector_store %arg9[%c0_32, %c308], %58 {strides = array<i32>} : memref<4x806xbf16, #tpu.memory_space<vmem>>, vector<4x16xbf16>,
    %c1 = arith.constant 1 : index
    %c0_33 = arith.constant 0 : index
    %c0_34 = arith.constant 0 : index
    %c0_35 = arith.constant 0 : index
    %60 = vector.load %arg0[%c1, %c0_33, %c0_34, %c0_35] : memref<2x4x16x16xf32, #tpu.memory_space<vmem>>, vector<1x4x16x16xf32>
    %61 = vector.shape_cast %60 : vector<1x4x16x16xf32> to vector<4x16x16xf32>
    %62 = arith.truncf %61 : vector<4x16x16xf32> to vector<4x16x16xbf16>
    %63 = vector.extract_strided_slice %62 {offsets = [0, 0, 0], sizes = [4, 1, 16], strides = [1, 1, 1]} : vector<4x16x16xbf16> to vector<4x1x16xbf16>
    %64 = vector.shape_cast %63 : vector<4x1x16xbf16> to vector<4x16xbf16>
    %c0_36 = arith.constant 0 : index
    %c362 = arith.constant 362 : index
    %65 = vector.load %arg9[%c0_36, %c362] : memref<4x806xbf16, #tpu.memory_space<vmem>>, vector<4x16xbf16>
    tpu.vector_store %arg9[%c0_36, %c362], %64 {strides = array<i32>} : memref<4x806xbf16, #tpu.memory_space<vmem>>, vector<4x16xbf16>,
    %66 = vector.extract_strided_slice %62 {offsets = [0, 1, 0], sizes = [4, 1, 16], strides = [1, 1, 1]} : vector<4x16x16xbf16> to vector<4x1x16xbf16>
    %67 = vector.shape_cast %66 : vector<4x1x16xbf16> to vector<4x16xbf16>
    %c0_37 = arith.constant 0 : index
    %c380 = arith.constant 380 : index
    %68 = vector.load %arg9[%c0_37, %c380] : memref<4x806xbf16, #tpu.memory_space<vmem>>, vector<4x16xbf16>
    tpu.vector_store %arg9[%c0_37, %c380], %67 {strides = array<i32>} : memref<4x806xbf16, #tpu.memory_space<vmem>>, vector<4x16xbf16>,
    %69 = vector.extract_strided_slice %62 {offsets = [0, 2, 0], sizes = [4, 1, 16], strides = [1, 1, 1]} : vector<4x16x16xbf16> to vector<4x1x16xbf16>
    %70 = vector.shape_cast %69 : vector<4x1x16xbf16> to vector<4x16xbf16>
    %c0_38 = arith.constant 0 : index
    %c398 = arith.constant 398 : index
    %71 = vector.load %arg9[%c0_38, %c398] : memref<4x806xbf16, #tpu.memory_space<vmem>>, vector<4x16xbf16>
    tpu.vector_store %arg9[%c0_38, %c398], %70 {strides = array<i32>} : memref<4x806xbf16, #tpu.memory_space<vmem>>, vector<4x16xbf16>,
    %72 = vector.extract_strided_slice %62 {offsets = [0, 3, 0], sizes = [4, 1, 16], strides = [1, 1, 1]} : vector<4x16x16xbf16> to vector<4x1x16xbf16>
    %73 = vector.shape_cast %72 : vector<4x1x16xbf16> to vector<4x16xbf16>
    %c0_39 = arith.constant 0 : index
    %c416 = arith.constant 416 : index
    %74 = vector.load %arg9[%c0_39, %c416] : memref<4x806xbf16, #tpu.memory_space<vmem>>, vector<4x16xbf16>
    tpu.vector_store %arg9[%c0_39, %c416], %73 {strides = array<i32>} : memref<4x806xbf16, #tpu.memory_space<vmem>>, vector<4x16xbf16>,
    %75 = vector.extract_strided_slice %62 {offsets = [0, 4, 0], sizes = [4, 1, 16], strides = [1, 1, 1]} : vector<4x16x16xbf16> to vector<4x1x16xbf16>
    %76 = vector.shape_cast %75 : vector<4x1x16xbf16> to vector<4x16xbf16>
    %c0_40 = arith.constant 0 : index
    %c434 = arith.constant 434 : index
    %77 = vector.load %arg9[%c0_40, %c434] : memref<4x806xbf16, #tpu.memory_space<vmem>>, vector<4x16xbf16>
    tpu.vector_store %arg9[%c0_40, %c434], %76 {strides = array<i32>} : memref<4x806xbf16, #tpu.memory_space<vmem>>, vector<4x16xbf16>,
    %78 = vector.extract_strided_slice %62 {offsets = [0, 5, 0], sizes = [4, 1, 16], strides = [1, 1, 1]} : vector<4x16x16xbf16> to vector<4x1x16xbf16>
    %79 = vector.shape_cast %78 : vector<4x1x16xbf16> to vector<4x16xbf16>
    %c0_41 = arith.constant 0 : index
    %c452 = arith.constant 452 : index
    %80 = vector.load %arg9[%c0_41, %c452] : memref<4x806xbf16, #tpu.memory_space<vmem>>, vector<4x16xbf16>
    tpu.vector_store %arg9[%c0_41, %c452], %79 {strides = array<i32>} : memref<4x806xbf16, #tpu.memory_space<vmem>>, vector<4x16xbf16>,
    %81 = vector.extract_strided_slice %62 {offsets = [0, 6, 0], sizes = [4, 1, 16], strides = [1, 1, 1]} : vector<4x16x16xbf16> to vector<4x1x16xbf16>
    %82 = vector.shape_cast %81 : vector<4x1x16xbf16> to vector<4x16xbf16>
    %c0_42 = arith.constant 0 : index
    %c470 = arith.constant 470 : index
    %83 = vector.load %arg9[%c0_42, %c470] : memref<4x806xbf16, #tpu.memory_space<vmem>>, vector<4x16xbf16>
    tpu.vector_store %arg9[%c0_42, %c470], %82 {strides = array<i32>} : memref<4x806xbf16, #tpu.memory_space<vmem>>, vector<4x16xbf16>,
    %84 = vector.extract_strided_slice %62 {offsets = [0, 7, 0], sizes = [4, 1, 16], strides = [1, 1, 1]} : vector<4x16x16xbf16> to vector<4x1x16xbf16>
    %85 = vector.shape_cast %84 : vector<4x1x16xbf16> to vector<4x16xbf16>
    %c0_43 = arith.constant 0 : index
    %c488 = arith.constant 488 : index
    %86 = vector.load %arg9[%c0_43, %c488] : memref<4x806xbf16, #tpu.memory_space<vmem>>, vector<4x16xbf16>
    tpu.vector_store %arg9[%c0_43, %c488], %85 {strides = array<i32>} : memref<4x806xbf16, #tpu.memory_space<vmem>>, vector<4x16xbf16>,
    %87 = vector.extract_strided_slice %62 {offsets = [0, 8, 0], sizes = [4, 1, 16], strides = [1, 1, 1]} : vector<4x16x16xbf16> to vector<4x1x16xbf16>
    %88 = vector.shape_cast %87 : vector<4x1x16xbf16> to vector<4x16xbf16>
    %c0_44 = arith.constant 0 : index
    %c506 = arith.constant 506 : index
    %89 = vector.load %arg9[%c0_44, %c506] : memref<4x806xbf16, #tpu.memory_space<vmem>>, vector<4x16xbf16>
    tpu.vector_store %arg9[%c0_44, %c506], %88 {strides = array<i32>} : memref<4x806xbf16, #tpu.memory_space<vmem>>, vector<4x16xbf16>,
    %90 = vector.extract_strided_slice %62 {offsets = [0, 9, 0], sizes = [4, 1, 16], strides = [1, 1, 1]} : vector<4x16x16xbf16> to vector<4x1x16xbf16>
    %91 = vector.shape_cast %90 : vector<4x1x16xbf16> to vector<4x16xbf16>
    %c0_45 = arith.constant 0 : index
    %c524 = arith.constant 524 : index
    %92 = vector.load %arg9[%c0_45, %c524] : memref<4x806xbf16, #tpu.memory_space<vmem>>, vector<4x16xbf16>
    tpu.vector_store %arg9[%c0_45, %c524], %91 {strides = array<i32>} : memref<4x806xbf16, #tpu.memory_space<vmem>>, vector<4x16xbf16>,
    %93 = vector.extract_strided_slice %62 {offsets = [0, 10, 0], sizes = [4, 1, 16], strides = [1, 1, 1]} : vector<4x16x16xbf16> to vector<4x1x16xbf16>
    %94 = vector.shape_cast %93 : vector<4x1x16xbf16> to vector<4x16xbf16>
    %c0_46 = arith.constant 0 : index
    %c542 = arith.constant 542 : index
    %95 = vector.load %arg9[%c0_46, %c542] : memref<4x806xbf16, #tpu.memory_space<vmem>>, vector<4x16xbf16>
    tpu.vector_store %arg9[%c0_46, %c542], %94 {strides = array<i32>} : memref<4x806xbf16, #tpu.memory_space<vmem>>, vector<4x16xbf16>,
    %96 = vector.extract_strided_slice %62 {offsets = [0, 11, 0], sizes = [4, 1, 16], strides = [1, 1, 1]} : vector<4x16x16xbf16> to vector<4x1x16xbf16>
    %97 = vector.shape_cast %96 : vector<4x1x16xbf16> to vector<4x16xbf16>
    %c0_47 = arith.constant 0 : index
    %c560 = arith.constant 560 : index
    %98 = vector.load %arg9[%c0_47, %c560] : memref<4x806xbf16, #tpu.memory_space<vmem>>, vector<4x16xbf16>
    tpu.vector_store %arg9[%c0_47, %c560], %97 {strides = array<i32>} : memref<4x806xbf16, #tpu.memory_space<vmem>>, vector<4x16xbf16>,
    %99 = vector.extract_strided_slice %62 {offsets = [0, 12, 0], sizes = [4, 1, 16], strides = [1, 1, 1]} : vector<4x16x16xbf16> to vector<4x1x16xbf16>
    %100 = vector.shape_cast %99 : vector<4x1x16xbf16> to vector<4x16xbf16>
    %c0_48 = arith.constant 0 : index
    %c578 = arith.constant 578 : index
    %101 = vector.load %arg9[%c0_48, %c578] : memref<4x806xbf16, #tpu.memory_space<vmem>>, vector<4x16xbf16>
    tpu.vector_store %arg9[%c0_48, %c578], %100 {strides = array<i32>} : memref<4x806xbf16, #tpu.memory_space<vmem>>, vector<4x16xbf16>,
    %102 = vector.extract_strided_slice %62 {offsets = [0, 13, 0], sizes = [4, 1, 16], strides = [1, 1, 1]} : vector<4x16x16xbf16> to vector<4x1x16xbf16>
    %103 = vector.shape_cast %102 : vector<4x1x16xbf16> to vector<4x16xbf16>
    %c0_49 = arith.constant 0 : index
    %c596 = arith.constant 596 : index
    %104 = vector.load %arg9[%c0_49, %c596] : memref<4x806xbf16, #tpu.memory_space<vmem>>, vector<4x16xbf16>
    tpu.vector_store %arg9[%c0_49, %c596], %103 {strides = array<i32>} : memref<4x806xbf16, #tpu.memory_space<vmem>>, vector<4x16xbf16>,
    %105 = vector.extract_strided_slice %62 {offsets = [0, 14, 0], sizes = [4, 1, 16], strides = [1, 1, 1]} : vector<4x16x16xbf16> to vector<4x1x16xbf16>
    %106 = vector.shape_cast %105 : vector<4x1x16xbf16> to vector<4x16xbf16>
    %c0_50 = arith.constant 0 : index
    %c614 = arith.constant 614 : index
    %107 = vector.load %arg9[%c0_50, %c614] : memref<4x806xbf16, #tpu.memory_space<vmem>>, vector<4x16xbf16>
    tpu.vector_store %arg9[%c0_50, %c614], %106 {strides = array<i32>} : memref<4x806xbf16, #tpu.memory_space<vmem>>, vector<4x16xbf16>,
    %108 = vector.extract_strided_slice %62 {offsets = [0, 15, 0], sizes = [4, 1, 16], strides = [1, 1, 1]} : vector<4x16x16xbf16> to vector<4x1x16xbf16>
    %109 = vector.shape_cast %108 : vector<4x1x16xbf16> to vector<4x16xbf16>
    %c0_51 = arith.constant 0 : index
    %c632 = arith.constant 632 : index
    %110 = vector.load %arg9[%c0_51, %c632] : memref<4x806xbf16, #tpu.memory_space<vmem>>, vector<4x16xbf16>
    tpu.vector_store %arg9[%c0_51, %c632], %109 {strides = array<i32>} : memref<4x806xbf16, #tpu.memory_space<vmem>>, vector<4x16xbf16>,
    %c0_52 = arith.constant 0 : index
    %c0_53 = arith.constant 0 : index
    %111 = vector.load %arg1[%c0_52, %c0_53] : memref<8x36xbf16, #tpu.memory_space<vmem>>, vector<8x36xbf16>
    %c0_54 = arith.constant 0 : index
    %c0_55 = arith.constant 0 : index
    %112 = vector.load %arg9[%c0_54, %c0_55] : memref<4x806xbf16, #tpu.memory_space<vmem>>, vector<4x768xbf16>
    %c0_56 = arith.constant 0 : index
    %c0_57 = arith.constant 0 : index
    %113 = vector.load %arg12[%c0_56, %c0_57] : memref<72x768xbf16, #tpu.memory_space<vmem>>, vector<4x768xbf16>
    tpu.vector_store %arg12[%c0_56, %c0_57], %112 {strides = array<i32>} : memref<72x768xbf16, #tpu.memory_space<vmem>>, vector<4x768xbf16>,
    %c0_58 = arith.constant 0 : index
    %c1_59 = arith.constant 1 : index
    %114 = vector.load %arg9[%c0_58, %c1_59] : memref<4x806xbf16, #tpu.memory_space<vmem>>, vector<4x768xbf16>
    %c4 = arith.constant 4 : index
    %c0_60 = arith.constant 0 : index
    %115 = vector.load %arg12[%c4, %c0_60] : memref<72x768xbf16, #tpu.memory_space<vmem>>, vector<4x768xbf16>
    tpu.vector_store %arg12[%c4, %c0_60], %114 {strides = array<i32>} : memref<72x768xbf16, #tpu.memory_space<vmem>>, vector<4x768xbf16>,
    %c0_61 = arith.constant 0 : index
    %c2 = arith.constant 2 : index
    %116 = vector.load %arg9[%c0_61, %c2] : memref<4x806xbf16, #tpu.memory_space<vmem>>, vector<4x768xbf16>
    %c8 = arith.constant 8 : index
    %c0_62 = arith.constant 0 : index
    %117 = vector.load %arg12[%c8, %c0_62] : memref<72x768xbf16, #tpu.memory_space<vmem>>, vector<4x768xbf16>
    tpu.vector_store %arg12[%c8, %c0_62], %116 {strides = array<i32>} : memref<72x768xbf16, #tpu.memory_space<vmem>>, vector<4x768xbf16>,
    %c0_63 = arith.constant 0 : index
    %c18 = arith.constant 18 : index
    %118 = vector.load %arg9[%c0_63, %c18] : memref<4x806xbf16, #tpu.memory_space<vmem>>, vector<4x768xbf16>
    %c12 = arith.constant 12 : index
    %c0_64 = arith.constant 0 : index
    %119 = vector.load %arg12[%c12, %c0_64] : memref<72x768xbf16, #tpu.memory_space<vmem>>, vector<4x768xbf16>
    tpu.vector_store %arg12[%c12, %c0_64], %118 {strides = array<i32>} : memref<72x768xbf16, #tpu.memory_space<vmem>>, vector<4x768xbf16>,
    %c0_65 = arith.constant 0 : index
    %c19 = arith.constant 19 : index
    %120 = vector.load %arg9[%c0_65, %c19] : memref<4x806xbf16, #tpu.memory_space<vmem>>, vector<4x768xbf16>
    %c16 = arith.constant 16 : index
    %c0_66 = arith.constant 0 : index
    %121 = vector.load %arg12[%c16, %c0_66] : memref<72x768xbf16, #tpu.memory_space<vmem>>, vector<4x768xbf16>
    tpu.vector_store %arg12[%c16, %c0_66], %120 {strides = array<i32>} : memref<72x768xbf16, #tpu.memory_space<vmem>>, vector<4x768xbf16>,
    %c0_67 = arith.constant 0 : index
    %c20 = arith.constant 20 : index
    %122 = vector.load %arg9[%c0_67, %c20] : memref<4x806xbf16, #tpu.memory_space<vmem>>, vector<4x768xbf16>
    %c20_68 = arith.constant 20 : index
    %c0_69 = arith.constant 0 : index
    %123 = vector.load %arg12[%c20_68, %c0_69] : memref<72x768xbf16, #tpu.memory_space<vmem>>, vector<4x768xbf16>
    tpu.vector_store %arg12[%c20_68, %c0_69], %122 {strides = array<i32>} : memref<72x768xbf16, #tpu.memory_space<vmem>>, vector<4x768xbf16>,
    %c0_70 = arith.constant 0 : index
    %c36 = arith.constant 36 : index
    %124 = vector.load %arg9[%c0_70, %c36] : memref<4x806xbf16, #tpu.memory_space<vmem>>, vector<4x768xbf16>
    %c24 = arith.constant 24 : index
    %c0_71 = arith.constant 0 : index
    %125 = vector.load %arg12[%c24, %c0_71] : memref<72x768xbf16, #tpu.memory_space<vmem>>, vector<4x768xbf16>
    tpu.vector_store %arg12[%c24, %c0_71], %124 {strides = array<i32>} : memref<72x768xbf16, #tpu.memory_space<vmem>>, vector<4x768xbf16>,
    %c0_72 = arith.constant 0 : index
    %c37 = arith.constant 37 : index
    %126 = vector.load %arg9[%c0_72, %c37] : memref<4x806xbf16, #tpu.memory_space<vmem>>, vector<4x768xbf16>
    %c28 = arith.constant 28 : index
    %c0_73 = arith.constant 0 : index
    %127 = vector.load %arg12[%c28, %c0_73] : memref<72x768xbf16, #tpu.memory_space<vmem>>, vector<4x768xbf16>
    tpu.vector_store %arg12[%c28, %c0_73], %126 {strides = array<i32>} : memref<72x768xbf16, #tpu.memory_space<vmem>>, vector<4x768xbf16>,
    %c0_74 = arith.constant 0 : index
    %c38_75 = arith.constant 38 : index
    %128 = vector.load %arg9[%c0_74, %c38_75] : memref<4x806xbf16, #tpu.memory_space<vmem>>, vector<4x768xbf16>
    %c32 = arith.constant 32 : index
    %c0_76 = arith.constant 0 : index
    %129 = vector.load %arg12[%c32, %c0_76] : memref<72x768xbf16, #tpu.memory_space<vmem>>, vector<4x768xbf16>
    tpu.vector_store %arg12[%c32, %c0_76], %128 {strides = array<i32>} : memref<72x768xbf16, #tpu.memory_space<vmem>>, vector<4x768xbf16>,
    %c0_77 = arith.constant 0 : index
    %c0_78 = arith.constant 0 : index
    %130 = vector.load %arg12[%c0_77, %c0_78] : memref<72x768xbf16, #tpu.memory_space<vmem>>, vector<36x768xbf16>
    %cst_79 = arith.constant dense<0.000000e+00> : vector<8x768xf32>
    %131 = tpu.matmul %111, %130, %cst_79 {dimension_numbers = #tpu.dot_dimension_numbers<[1], [0], [0], [1], [0, 0, 1, 1], [], []>} : vector<8x36xbf16>, vector<36x768xbf16>, vector<8x768xf32> -> vector<8x768xf32>
    %132 = arith.mulf %131, %131 : vector<8x768xf32>
    %133 = tpu.concatenate %131, %132 in 0 : vector<8x768xf32>, vector<8x768xf32> -> vector<16x768xf32>
    %cst_80 = arith.constant dense<0.000000e+00> : vector<16x1xf32>
    %134 = tpu.matmul %133, %1, %cst_80 {dimension_numbers = #tpu.dot_dimension_numbers<[1], [0], [0], [1], [0, 0, 1, 1], [], []>} : vector<16x768xf32>, vector<768x1xf32>, vector<16x1xf32> -> vector<16x1xf32>
    %135 = vector.extract_strided_slice %134 {offsets = [0, 0], sizes = [8, 1], strides = [1, 1]} : vector<16x1xf32> to vector<8x1xf32>
    %cst_81 = arith.constant 0.001953125 : f32
    %136 = vector.broadcast %cst_81 : f32 to vector<8x1xf32>
    %137 = arith.mulf %135, %136 : vector<8x1xf32>
    %138 = vector.extract_strided_slice %134 {offsets = [8, 0], sizes = [8, 1], strides = [1, 1]} : vector<16x1xf32> to vector<8x1xf32>
    %cst_82 = arith.constant 0.001953125 : f32
    %139 = vector.broadcast %cst_82 : f32 to vector<8x1xf32>
    %140 = arith.mulf %138, %139 : vector<8x1xf32>
    %141 = arith.mulf %137, %137 : vector<8x1xf32>
    %142 = arith.subf %140, %141 : vector<8x1xf32>
    %c0_83 = arith.constant 0 : index
    %c0_84 = arith.constant 0 : index
    %c0_85 = arith.constant 0 : index
    %143 = vector.load %arg4[%c0_83, %c0_84, %c0_85] : memref<3x8x1xf32, #tpu.memory_space<vmem>>, vector<1x8x1xf32>
    %144 = vector.shape_cast %143 : vector<1x8x1xf32> to vector<8x1xf32>
    %cst_86 = arith.constant 9.99999974E-6 : f32
    %145 = vector.broadcast %cst_86 : f32 to vector<8x1xf32>
    %146 = arith.addf %142, %145 : vector<8x1xf32>
    %147 = math.rsqrt %146 : vector<8x1xf32>
    %148 = arith.mulf %144, %147 : vector<8x1xf32>
    %c0_87 = arith.constant 0 : index
    %c0_88 = arith.constant 0 : index
    %c0_89 = arith.constant 0 : index
    %149 = vector.load %arg5[%c0_87, %c0_88, %c0_89] : memref<3x8x1xf32, #tpu.memory_space<vmem>>, vector<1x8x1xf32>
    %150 = vector.shape_cast %149 : vector<1x8x1xf32> to vector<8x1xf32>
    %151 = arith.mulf %137, %148 : vector<8x1xf32>
    %152 = arith.subf %150, %151 : vector<8x1xf32>
    %153 = vector.broadcast %148 : vector<8x1xf32> to vector<8x768xf32>
    %154 = arith.mulf %131, %153 : vector<8x768xf32>
    %155 = vector.broadcast %152 : vector<8x1xf32> to vector<8x768xf32>
    %156 = arith.addf %154, %155 : vector<8x768xf32>
    %cst_90 = arith.constant 0.000000e+00 : f32
    %157 = vector.broadcast %cst_90 : f32 to vector<8x768xf32>
    %158 = arith.maximumf %156, %157 : vector<8x768xf32>
    %159 = vector.broadcast %0 : vector<1x768xf32> to vector<8x768xf32>
    %160 = arith.mulf %158, %159 : vector<8x768xf32>
    %161 = arith.truncf %160 : vector<8x768xf32> to vector<8x768xbf16>
    %c0_91 = arith.constant 0 : index
    %c19_92 = arith.constant 19 : index
    %162 = vector.load %arg10[%c0_91, %c19_92] : memref<8x806xbf16, #tpu.memory_space<vmem>>, vector<8x768xbf16>
    tpu.vector_store %arg10[%c0_91, %c19_92], %161 {strides = array<i32>} : memref<8x806xbf16, #tpu.memory_space<vmem>>, vector<8x768xbf16>,
    %c0_93 = arith.constant 0 : index
    %c0_94 = arith.constant 0 : index
    %163 = vector.load %arg2[%c0_93, %c0_94] : memref<8x72xbf16, #tpu.memory_space<vmem>>, vector<8x72xbf16>
    %c0_95 = arith.constant 0 : index
    %c0_96 = arith.constant 0 : index
    %164 = vector.load %arg10[%c0_95, %c0_96] : memref<8x806xbf16, #tpu.memory_space<vmem>>, vector<8x768xbf16>
    %c0_97 = arith.constant 0 : index
    %c0_98 = arith.constant 0 : index
    %165 = vector.load %arg12[%c0_97, %c0_98] : memref<72x768xbf16, #tpu.memory_space<vmem>>, vector<8x768xbf16>
    tpu.vector_store %arg12[%c0_97, %c0_98], %164 {strides = array<i32>} : memref<72x768xbf16, #tpu.memory_space<vmem>>, vector<8x768xbf16>,
    %c0_99 = arith.constant 0 : index
    %c1_100 = arith.constant 1 : index
    %166 = vector.load %arg10[%c0_99, %c1_100] : memref<8x806xbf16, #tpu.memory_space<vmem>>, vector<8x768xbf16>
    %c8_101 = arith.constant 8 : index
    %c0_102 = arith.constant 0 : index
    %167 = vector.load %arg12[%c8_101, %c0_102] : memref<72x768xbf16, #tpu.memory_space<vmem>>, vector<8x768xbf16>
    tpu.vector_store %arg12[%c8_101, %c0_102], %166 {strides = array<i32>} : memref<72x768xbf16, #tpu.memory_space<vmem>>, vector<8x768xbf16>,
    %c0_103 = arith.constant 0 : index
    %c2_104 = arith.constant 2 : index
    %168 = vector.load %arg10[%c0_103, %c2_104] : memref<8x806xbf16, #tpu.memory_space<vmem>>, vector<8x768xbf16>
    %c16_105 = arith.constant 16 : index
    %c0_106 = arith.constant 0 : index
    %169 = vector.load %arg12[%c16_105, %c0_106] : memref<72x768xbf16, #tpu.memory_space<vmem>>, vector<8x768xbf16>
    tpu.vector_store %arg12[%c16_105, %c0_106], %168 {strides = array<i32>} : memref<72x768xbf16, #tpu.memory_space<vmem>>, vector<8x768xbf16>,
    %c0_107 = arith.constant 0 : index
    %c18_108 = arith.constant 18 : index
    %170 = vector.load %arg10[%c0_107, %c18_108] : memref<8x806xbf16, #tpu.memory_space<vmem>>, vector<8x768xbf16>
    %c24_109 = arith.constant 24 : index
    %c0_110 = arith.constant 0 : index
    %171 = vector.load %arg12[%c24_109, %c0_110] : memref<72x768xbf16, #tpu.memory_space<vmem>>, vector<8x768xbf16>
    tpu.vector_store %arg12[%c24_109, %c0_110], %170 {strides = array<i32>} : memref<72x768xbf16, #tpu.memory_space<vmem>>, vector<8x768xbf16>,
    %c0_111 = arith.constant 0 : index
    %c19_112 = arith.constant 19 : index
    %172 = vector.load %arg10[%c0_111, %c19_112] : memref<8x806xbf16, #tpu.memory_space<vmem>>, vector<8x768xbf16>
    %c32_113 = arith.constant 32 : index
    %c0_114 = arith.constant 0 : index
    %173 = vector.load %arg12[%c32_113, %c0_114] : memref<72x768xbf16, #tpu.memory_space<vmem>>, vector<8x768xbf16>
    tpu.vector_store %arg12[%c32_113, %c0_114], %172 {strides = array<i32>} : memref<72x768xbf16, #tpu.memory_space<vmem>>, vector<8x768xbf16>,
    %c0_115 = arith.constant 0 : index
    %c20_116 = arith.constant 20 : index
    %174 = vector.load %arg10[%c0_115, %c20_116] : memref<8x806xbf16, #tpu.memory_space<vmem>>, vector<8x768xbf16>
    %c40 = arith.constant 40 : index
    %c0_117 = arith.constant 0 : index
    %175 = vector.load %arg12[%c40, %c0_117] : memref<72x768xbf16, #tpu.memory_space<vmem>>, vector<8x768xbf16>
    tpu.vector_store %arg12[%c40, %c0_117], %174 {strides = array<i32>} : memref<72x768xbf16, #tpu.memory_space<vmem>>, vector<8x768xbf16>,
    %c0_118 = arith.constant 0 : index
    %c36_119 = arith.constant 36 : index
    %176 = vector.load %arg10[%c0_118, %c36_119] : memref<8x806xbf16, #tpu.memory_space<vmem>>, vector<8x768xbf16>
    %c48 = arith.constant 48 : index
    %c0_120 = arith.constant 0 : index
    %177 = vector.load %arg12[%c48, %c0_120] : memref<72x768xbf16, #tpu.memory_space<vmem>>, vector<8x768xbf16>
    tpu.vector_store %arg12[%c48, %c0_120], %176 {strides = array<i32>} : memref<72x768xbf16, #tpu.memory_space<vmem>>, vector<8x768xbf16>,
    %c0_121 = arith.constant 0 : index
    %c37_122 = arith.constant 37 : index
    %178 = vector.load %arg10[%c0_121, %c37_122] : memref<8x806xbf16, #tpu.memory_space<vmem>>, vector<8x768xbf16>
    %c56_123 = arith.constant 56 : index
    %c0_124 = arith.constant 0 : index
    %179 = vector.load %arg12[%c56_123, %c0_124] : memref<72x768xbf16, #tpu.memory_space<vmem>>, vector<8x768xbf16>
    tpu.vector_store %arg12[%c56_123, %c0_124], %178 {strides = array<i32>} : memref<72x768xbf16, #tpu.memory_space<vmem>>, vector<8x768xbf16>,
    %c0_125 = arith.constant 0 : index
    %c38_126 = arith.constant 38 : index
    %180 = vector.load %arg10[%c0_125, %c38_126] : memref<8x806xbf16, #tpu.memory_space<vmem>>, vector<8x768xbf16>
    %c64 = arith.constant 64 : index
    %c0_127 = arith.constant 0 : index
    %181 = vector.load %arg12[%c64, %c0_127] : memref<72x768xbf16, #tpu.memory_space<vmem>>, vector<8x768xbf16>
    tpu.vector_store %arg12[%c64, %c0_127], %180 {strides = array<i32>} : memref<72x768xbf16, #tpu.memory_space<vmem>>, vector<8x768xbf16>,
    %c0_128 = arith.constant 0 : index
    %c0_129 = arith.constant 0 : index
    %182 = vector.load %arg12[%c0_128, %c0_129] : memref<72x768xbf16, #tpu.memory_space<vmem>>, vector<72x768xbf16>
    %cst_130 = arith.constant dense<0.000000e+00> : vector<8x768xf32>
    %183 = tpu.matmul %163, %182, %cst_130 {dimension_numbers = #tpu.dot_dimension_numbers<[1], [0], [0], [1], [0, 0, 1, 1], [], []>} : vector<8x72xbf16>, vector<72x768xbf16>, vector<8x768xf32> -> vector<8x768xf32>
    %184 = arith.mulf %183, %183 : vector<8x768xf32>
    %185 = tpu.concatenate %183, %184 in 0 : vector<8x768xf32>, vector<8x768xf32> -> vector<16x768xf32>
    %cst_131 = arith.constant dense<0.000000e+00> : vector<16x1xf32>
    %186 = tpu.matmul %185, %1, %cst_131 {dimension_numbers = #tpu.dot_dimension_numbers<[1], [0], [0], [1], [0, 0, 1, 1], [], []>} : vector<16x768xf32>, vector<768x1xf32>, vector<16x1xf32> -> vector<16x1xf32>
    %187 = vector.extract_strided_slice %186 {offsets = [0, 0], sizes = [8, 1], strides = [1, 1]} : vector<16x1xf32> to vector<8x1xf32>
    %cst_132 = arith.constant 0.001953125 : f32
    %188 = vector.broadcast %cst_132 : f32 to vector<8x1xf32>
    %189 = arith.mulf %187, %188 : vector<8x1xf32>
    %190 = vector.extract_strided_slice %186 {offsets = [8, 0], sizes = [8, 1], strides = [1, 1]} : vector<16x1xf32> to vector<8x1xf32>
    %cst_133 = arith.constant 0.001953125 : f32
    %191 = vector.broadcast %cst_133 : f32 to vector<8x1xf32>
    %192 = arith.mulf %190, %191 : vector<8x1xf32>
    %193 = arith.mulf %189, %189 : vector<8x1xf32>
    %194 = arith.subf %192, %193 : vector<8x1xf32>
    %c1_134 = arith.constant 1 : index
    %c0_135 = arith.constant 0 : index
    %c0_136 = arith.constant 0 : index
    %195 = vector.load %arg4[%c1_134, %c0_135, %c0_136] : memref<3x8x1xf32, #tpu.memory_space<vmem>>, vector<1x8x1xf32>
    %196 = vector.shape_cast %195 : vector<1x8x1xf32> to vector<8x1xf32>
    %cst_137 = arith.constant 9.99999974E-6 : f32
    %197 = vector.broadcast %cst_137 : f32 to vector<8x1xf32>
    %198 = arith.addf %194, %197 : vector<8x1xf32>
    %199 = math.rsqrt %198 : vector<8x1xf32>
    %200 = arith.mulf %196, %199 : vector<8x1xf32>
    %c1_138 = arith.constant 1 : index
    %c0_139 = arith.constant 0 : index
    %c0_140 = arith.constant 0 : index
    %201 = vector.load %arg5[%c1_138, %c0_139, %c0_140] : memref<3x8x1xf32, #tpu.memory_space<vmem>>, vector<1x8x1xf32>
    %202 = vector.shape_cast %201 : vector<1x8x1xf32> to vector<8x1xf32>
    %203 = arith.mulf %189, %200 : vector<8x1xf32>
    %204 = arith.subf %202, %203 : vector<8x1xf32>
    %205 = vector.broadcast %200 : vector<8x1xf32> to vector<8x768xf32>
    %206 = arith.mulf %183, %205 : vector<8x768xf32>
    %207 = vector.broadcast %204 : vector<8x1xf32> to vector<8x768xf32>
    %208 = arith.addf %206, %207 : vector<8x768xf32>
    %cst_141 = arith.constant 0.000000e+00 : f32
    %209 = vector.broadcast %cst_141 : f32 to vector<8x768xf32>
    %210 = arith.maximumf %208, %209 : vector<8x768xf32>
    %211 = vector.broadcast %0 : vector<1x768xf32> to vector<8x768xf32>
    %212 = arith.mulf %210, %211 : vector<8x768xf32>
    %213 = arith.truncf %212 : vector<8x768xf32> to vector<8x768xbf16>
    %c0_142 = arith.constant 0 : index
    %c19_143 = arith.constant 19 : index
    %214 = vector.load %arg11[%c0_142, %c19_143] : memref<8x806xbf16, #tpu.memory_space<vmem>>, vector<8x768xbf16>
    tpu.vector_store %arg11[%c0_142, %c19_143], %213 {strides = array<i32>} : memref<8x806xbf16, #tpu.memory_space<vmem>>, vector<8x768xbf16>,
    %c0_144 = arith.constant 0 : index
    %c0_145 = arith.constant 0 : index
    %215 = vector.load %arg3[%c0_144, %c0_145] : memref<8x72xbf16, #tpu.memory_space<vmem>>, vector<8x72xbf16>
    %c0_146 = arith.constant 0 : index
    %c0_147 = arith.constant 0 : index
    %216 = vector.load %arg11[%c0_146, %c0_147] : memref<8x806xbf16, #tpu.memory_space<vmem>>, vector<8x768xbf16>
    %c0_148 = arith.constant 0 : index
    %c0_149 = arith.constant 0 : index
    %217 = vector.load %arg12[%c0_148, %c0_149] : memref<72x768xbf16, #tpu.memory_space<vmem>>, vector<8x768xbf16>
    tpu.vector_store %arg12[%c0_148, %c0_149], %216 {strides = array<i32>} : memref<72x768xbf16, #tpu.memory_space<vmem>>, vector<8x768xbf16>,
    %c0_150 = arith.constant 0 : index
    %c1_151 = arith.constant 1 : index
    %218 = vector.load %arg11[%c0_150, %c1_151] : memref<8x806xbf16, #tpu.memory_space<vmem>>, vector<8x768xbf16>
    %c8_152 = arith.constant 8 : index
    %c0_153 = arith.constant 0 : index
    %219 = vector.load %arg12[%c8_152, %c0_153] : memref<72x768xbf16, #tpu.memory_space<vmem>>, vector<8x768xbf16>
    tpu.vector_store %arg12[%c8_152, %c0_153], %218 {strides = array<i32>} : memref<72x768xbf16, #tpu.memory_space<vmem>>, vector<8x768xbf16>,
    %c0_154 = arith.constant 0 : index
    %c2_155 = arith.constant 2 : index
    %220 = vector.load %arg11[%c0_154, %c2_155] : memref<8x806xbf16, #tpu.memory_space<vmem>>, vector<8x768xbf16>
    %c16_156 = arith.constant 16 : index
    %c0_157 = arith.constant 0 : index
    %221 = vector.load %arg12[%c16_156, %c0_157] : memref<72x768xbf16, #tpu.memory_space<vmem>>, vector<8x768xbf16>
    tpu.vector_store %arg12[%c16_156, %c0_157], %220 {strides = array<i32>} : memref<72x768xbf16, #tpu.memory_space<vmem>>, vector<8x768xbf16>,
    %c0_158 = arith.constant 0 : index
    %c18_159 = arith.constant 18 : index
    %222 = vector.load %arg11[%c0_158, %c18_159] : memref<8x806xbf16, #tpu.memory_space<vmem>>, vector<8x768xbf16>
    %c24_160 = arith.constant 24 : index
    %c0_161 = arith.constant 0 : index
    %223 = vector.load %arg12[%c24_160, %c0_161] : memref<72x768xbf16, #tpu.memory_space<vmem>>, vector<8x768xbf16>
    tpu.vector_store %arg12[%c24_160, %c0_161], %222 {strides = array<i32>} : memref<72x768xbf16, #tpu.memory_space<vmem>>, vector<8x768xbf16>,
    %c0_162 = arith.constant 0 : index
    %c19_163 = arith.constant 19 : index
    %224 = vector.load %arg11[%c0_162, %c19_163] : memref<8x806xbf16, #tpu.memory_space<vmem>>, vector<8x768xbf16>
    %c32_164 = arith.constant 32 : index
    %c0_165 = arith.constant 0 : index
    %225 = vector.load %arg12[%c32_164, %c0_165] : memref<72x768xbf16, #tpu.memory_space<vmem>>, vector<8x768xbf16>
    tpu.vector_store %arg12[%c32_164, %c0_165], %224 {strides = array<i32>} : memref<72x768xbf16, #tpu.memory_space<vmem>>, vector<8x768xbf16>,
    %c0_166 = arith.constant 0 : index
    %c20_167 = arith.constant 20 : index
    %226 = vector.load %arg11[%c0_166, %c20_167] : memref<8x806xbf16, #tpu.memory_space<vmem>>, vector<8x768xbf16>
    %c40_168 = arith.constant 40 : index
    %c0_169 = arith.constant 0 : index
    %227 = vector.load %arg12[%c40_168, %c0_169] : memref<72x768xbf16, #tpu.memory_space<vmem>>, vector<8x768xbf16>
    tpu.vector_store %arg12[%c40_168, %c0_169], %226 {strides = array<i32>} : memref<72x768xbf16, #tpu.memory_space<vmem>>, vector<8x768xbf16>,
    %c0_170 = arith.constant 0 : index
    %c36_171 = arith.constant 36 : index
    %228 = vector.load %arg11[%c0_170, %c36_171] : memref<8x806xbf16, #tpu.memory_space<vmem>>, vector<8x768xbf16>
    %c48_172 = arith.constant 48 : index
    %c0_173 = arith.constant 0 : index
    %229 = vector.load %arg12[%c48_172, %c0_173] : memref<72x768xbf16, #tpu.memory_space<vmem>>, vector<8x768xbf16>
    tpu.vector_store %arg12[%c48_172, %c0_173], %228 {strides = array<i32>} : memref<72x768xbf16, #tpu.memory_space<vmem>>, vector<8x768xbf16>,
    %c0_174 = arith.constant 0 : index
    %c37_175 = arith.constant 37 : index
    %230 = vector.load %arg11[%c0_174, %c37_175] : memref<8x806xbf16, #tpu.memory_space<vmem>>, vector<8x768xbf16>
    %c56_176 = arith.constant 56 : index
    %c0_177 = arith.constant 0 : index
    %231 = vector.load %arg12[%c56_176, %c0_177] : memref<72x768xbf16, #tpu.memory_space<vmem>>, vector<8x768xbf16>
    tpu.vector_store %arg12[%c56_176, %c0_177], %230 {strides = array<i32>} : memref<72x768xbf16, #tpu.memory_space<vmem>>, vector<8x768xbf16>,
    %c0_178 = arith.constant 0 : index
    %c38_179 = arith.constant 38 : index
    %232 = vector.load %arg11[%c0_178, %c38_179] : memref<8x806xbf16, #tpu.memory_space<vmem>>, vector<8x768xbf16>
    %c64_180 = arith.constant 64 : index
    %c0_181 = arith.constant 0 : index
    %233 = vector.load %arg12[%c64_180, %c0_181] : memref<72x768xbf16, #tpu.memory_space<vmem>>, vector<8x768xbf16>
    tpu.vector_store %arg12[%c64_180, %c0_181], %232 {strides = array<i32>} : memref<72x768xbf16, #tpu.memory_space<vmem>>, vector<8x768xbf16>,
    %c0_182 = arith.constant 0 : index
    %c0_183 = arith.constant 0 : index
    %234 = vector.load %arg12[%c0_182, %c0_183] : memref<72x768xbf16, #tpu.memory_space<vmem>>, vector<72x768xbf16>
    %cst_184 = arith.constant dense<0.000000e+00> : vector<8x768xf32>
    %235 = tpu.matmul %215, %234, %cst_184 {dimension_numbers = #tpu.dot_dimension_numbers<[1], [0], [0], [1], [0, 0, 1, 1], [], []>} : vector<8x72xbf16>, vector<72x768xbf16>, vector<8x768xf32> -> vector<8x768xf32>
    %236 = arith.mulf %235, %235 : vector<8x768xf32>
    %237 = tpu.concatenate %235, %236 in 0 : vector<8x768xf32>, vector<8x768xf32> -> vector<16x768xf32>
    %cst_185 = arith.constant dense<0.000000e+00> : vector<16x1xf32>
    %238 = tpu.matmul %237, %1, %cst_185 {dimension_numbers = #tpu.dot_dimension_numbers<[1], [0], [0], [1], [0, 0, 1, 1], [], []>} : vector<16x768xf32>, vector<768x1xf32>, vector<16x1xf32> -> vector<16x1xf32>
    %239 = vector.extract_strided_slice %238 {offsets = [0, 0], sizes = [8, 1], strides = [1, 1]} : vector<16x1xf32> to vector<8x1xf32>
    %cst_186 = arith.constant 0.001953125 : f32
    %240 = vector.broadcast %cst_186 : f32 to vector<8x1xf32>
    %241 = arith.mulf %239, %240 : vector<8x1xf32>
    %242 = vector.extract_strided_slice %238 {offsets = [8, 0], sizes = [8, 1], strides = [1, 1]} : vector<16x1xf32> to vector<8x1xf32>
    %cst_187 = arith.constant 0.001953125 : f32
    %243 = vector.broadcast %cst_187 : f32 to vector<8x1xf32>
    %244 = arith.mulf %242, %243 : vector<8x1xf32>
    %245 = arith.mulf %241, %241 : vector<8x1xf32>
    %246 = arith.subf %244, %245 : vector<8x1xf32>
    %c2_188 = arith.constant 2 : index
    %c0_189 = arith.constant 0 : index
    %c0_190 = arith.constant 0 : index
    %247 = vector.load %arg4[%c2_188, %c0_189, %c0_190] : memref<3x8x1xf32, #tpu.memory_space<vmem>>, vector<1x8x1xf32>
    %248 = vector.shape_cast %247 : vector<1x8x1xf32> to vector<8x1xf32>
    %cst_191 = arith.constant 9.99999974E-6 : f32
    %249 = vector.broadcast %cst_191 : f32 to vector<8x1xf32>
    %250 = arith.addf %246, %249 : vector<8x1xf32>
    %251 = math.rsqrt %250 : vector<8x1xf32>
    %252 = arith.mulf %248, %251 : vector<8x1xf32>
    %c2_192 = arith.constant 2 : index
    %c0_193 = arith.constant 0 : index
    %c0_194 = arith.constant 0 : index
    %253 = vector.load %arg5[%c2_192, %c0_193, %c0_194] : memref<3x8x1xf32, #tpu.memory_space<vmem>>, vector<1x8x1xf32>
    %254 = vector.shape_cast %253 : vector<1x8x1xf32> to vector<8x1xf32>
    %255 = arith.mulf %241, %252 : vector<8x1xf32>
    %256 = arith.subf %254, %255 : vector<8x1xf32>
    %257 = vector.broadcast %252 : vector<8x1xf32> to vector<8x768xf32>
    %258 = arith.mulf %235, %257 : vector<8x768xf32>
    %259 = vector.broadcast %256 : vector<8x1xf32> to vector<8x768xf32>
    %260 = arith.addf %258, %259 : vector<8x768xf32>
    %c0_195 = arith.constant 0 : index
    %c19_196 = arith.constant 19 : index
    %261 = vector.load %arg10[%c0_195, %c19_196] : memref<8x806xbf16, #tpu.memory_space<vmem>>, vector<8x768xbf16>
    %262 = arith.extf %261 : vector<8x768xbf16> to vector<8x768xf32>
    %263 = arith.addf %260, %262 : vector<8x768xf32>
    %cst_197 = arith.constant 0.000000e+00 : f32
    %264 = vector.broadcast %cst_197 : f32 to vector<8x768xf32>
    %265 = arith.maximumf %263, %264 : vector<8x768xf32>
    %266 = vector.extract_strided_slice %265 {offsets = [0, 19], sizes = [8, 16], strides = [1, 1]} : vector<8x768xf32> to vector<8x16xf32>
    %c0_198 = arith.constant 0 : index
    %c0_199 = arith.constant 0 : index
    %c0_200 = arith.constant 0 : index
    %c0_201 = arith.constant 0 : index
    %267 = vector.load %arg8[%c0_198, %c0_199, %c0_200, %c0_201] : memref<2x8x16x16xf32, #tpu.memory_space<vmem>>, vector<1x8x1x16xf32>
    %268 = vector.shape_cast %267 : vector<1x8x1x16xf32> to vector<8x16xf32>
    %269 = vector.shape_cast %266 : vector<8x16xf32> to vector<1x8x1x16xf32>
    tpu.vector_store %arg8[%c0_198, %c0_199, %c0_200, %c0_201], %269 {strides = array<i32>} : memref<2x8x16x16xf32, #tpu.memory_space<vmem>>, vector<1x8x1x16xf32>,
    %270 = vector.extract_strided_slice %265 {offsets = [0, 37], sizes = [8, 16], strides = [1, 1]} : vector<8x768xf32> to vector<8x16xf32>
    %c0_202 = arith.constant 0 : index
    %c0_203 = arith.constant 0 : index
    %c1_204 = arith.constant 1 : index
    %c0_205 = arith.constant 0 : index
    %271 = vector.load %arg8[%c0_202, %c0_203, %c1_204, %c0_205] : memref<2x8x16x16xf32, #tpu.memory_space<vmem>>, vector<1x8x1x16xf32>
    %272 = vector.shape_cast %271 : vector<1x8x1x16xf32> to vector<8x16xf32>
    %273 = vector.shape_cast %270 : vector<8x16xf32> to vector<1x8x1x16xf32>
    tpu.vector_store %arg8[%c0_202, %c0_203, %c1_204, %c0_205], %273 {strides = array<i32>} : memref<2x8x16x16xf32, #tpu.memory_space<vmem>>, vector<1x8x1x16xf32>,
    %274 = vector.extract_strided_slice %265 {offsets = [0, 55], sizes = [8, 16], strides = [1, 1]} : vector<8x768xf32> to vector<8x16xf32>
    %c0_206 = arith.constant 0 : index
    %c0_207 = arith.constant 0 : index
    %c2_208 = arith.constant 2 : index
    %c0_209 = arith.constant 0 : index
    %275 = vector.load %arg8[%c0_206, %c0_207, %c2_208, %c0_209] : memref<2x8x16x16xf32, #tpu.memory_space<vmem>>, vector<1x8x1x16xf32>
    %276 = vector.shape_cast %275 : vector<1x8x1x16xf32> to vector<8x16xf32>
    %277 = vector.shape_cast %274 : vector<8x16xf32> to vector<1x8x1x16xf32>
    tpu.vector_store %arg8[%c0_206, %c0_207, %c2_208, %c0_209], %277 {strides = array<i32>} : memref<2x8x16x16xf32, #tpu.memory_space<vmem>>, vector<1x8x1x16xf32>,
    %278 = vector.extract_strided_slice %265 {offsets = [0, 73], sizes = [8, 16], strides = [1, 1]} : vector<8x768xf32> to vector<8x16xf32>
    %c0_210 = arith.constant 0 : index
    %c0_211 = arith.constant 0 : index
    %c3 = arith.constant 3 : index
    %c0_212 = arith.constant 0 : index
    %279 = vector.load %arg8[%c0_210, %c0_211, %c3, %c0_212] : memref<2x8x16x16xf32, #tpu.memory_space<vmem>>, vector<1x8x1x16xf32>
    %280 = vector.shape_cast %279 : vector<1x8x1x16xf32> to vector<8x16xf32>
    %281 = vector.shape_cast %278 : vector<8x16xf32> to vector<1x8x1x16xf32>
    tpu.vector_store %arg8[%c0_210, %c0_211, %c3, %c0_212], %281 {strides = array<i32>} : memref<2x8x16x16xf32, #tpu.memory_space<vmem>>, vector<1x8x1x16xf32>,
    %282 = vector.extract_strided_slice %265 {offsets = [0, 91], sizes = [8, 16], strides = [1, 1]} : vector<8x768xf32> to vector<8x16xf32>
    %c0_213 = arith.constant 0 : index
    %c0_214 = arith.constant 0 : index
    %c4_215 = arith.constant 4 : index
    %c0_216 = arith.constant 0 : index
    %283 = vector.load %arg8[%c0_213, %c0_214, %c4_215, %c0_216] : memref<2x8x16x16xf32, #tpu.memory_space<vmem>>, vector<1x8x1x16xf32>
    %284 = vector.shape_cast %283 : vector<1x8x1x16xf32> to vector<8x16xf32>
    %285 = vector.shape_cast %282 : vector<8x16xf32> to vector<1x8x1x16xf32>
    tpu.vector_store %arg8[%c0_213, %c0_214, %c4_215, %c0_216], %285 {strides = array<i32>} : memref<2x8x16x16xf32, #tpu.memory_space<vmem>>, vector<1x8x1x16xf32>,
    %286 = vector.extract_strided_slice %265 {offsets = [0, 109], sizes = [8, 16], strides = [1, 1]} : vector<8x768xf32> to vector<8x16xf32>
    %c0_217 = arith.constant 0 : index
    %c0_218 = arith.constant 0 : index
    %c5 = arith.constant 5 : index
    %c0_219 = arith.constant 0 : index
    %287 = vector.load %arg8[%c0_217, %c0_218, %c5, %c0_219] : memref<2x8x16x16xf32, #tpu.memory_space<vmem>>, vector<1x8x1x16xf32>
    %288 = vector.shape_cast %287 : vector<1x8x1x16xf32> to vector<8x16xf32>
    %289 = vector.shape_cast %286 : vector<8x16xf32> to vector<1x8x1x16xf32>
    tpu.vector_store %arg8[%c0_217, %c0_218, %c5, %c0_219], %289 {strides = array<i32>} : memref<2x8x16x16xf32, #tpu.memory_space<vmem>>, vector<1x8x1x16xf32>,
    %290 = vector.extract_strided_slice %265 {offsets = [0, 127], sizes = [8, 16], strides = [1, 1]} : vector<8x768xf32> to vector<8x16xf32>
    %c0_220 = arith.constant 0 : index
    %c0_221 = arith.constant 0 : index
    %c6 = arith.constant 6 : index
    %c0_222 = arith.constant 0 : index
    %291 = vector.load %arg8[%c0_220, %c0_221, %c6, %c0_222] : memref<2x8x16x16xf32, #tpu.memory_space<vmem>>, vector<1x8x1x16xf32>
    %292 = vector.shape_cast %291 : vector<1x8x1x16xf32> to vector<8x16xf32>
    %293 = vector.shape_cast %290 : vector<8x16xf32> to vector<1x8x1x16xf32>
    tpu.vector_store %arg8[%c0_220, %c0_221, %c6, %c0_222], %293 {strides = array<i32>} : memref<2x8x16x16xf32, #tpu.memory_space<vmem>>, vector<1x8x1x16xf32>,
    %294 = vector.extract_strided_slice %265 {offsets = [0, 145], sizes = [8, 16], strides = [1, 1]} : vector<8x768xf32> to vector<8x16xf32>
    %c0_223 = arith.constant 0 : index
    %c0_224 = arith.constant 0 : index
    %c7 = arith.constant 7 : index
    %c0_225 = arith.constant 0 : index
    %295 = vector.load %arg8[%c0_223, %c0_224, %c7, %c0_225] : memref<2x8x16x16xf32, #tpu.memory_space<vmem>>, vector<1x8x1x16xf32>
    %296 = vector.shape_cast %295 : vector<1x8x1x16xf32> to vector<8x16xf32>
    %297 = vector.shape_cast %294 : vector<8x16xf32> to vector<1x8x1x16xf32>
    tpu.vector_store %arg8[%c0_223, %c0_224, %c7, %c0_225], %297 {strides = array<i32>} : memref<2x8x16x16xf32, #tpu.memory_space<vmem>>, vector<1x8x1x16xf32>,
    %298 = vector.extract_strided_slice %265 {offsets = [0, 163], sizes = [8, 16], strides = [1, 1]} : vector<8x768xf32> to vector<8x16xf32>
    %c0_226 = arith.constant 0 : index
    %c0_227 = arith.constant 0 : index
    %c8_228 = arith.constant 8 : index
    %c0_229 = arith.constant 0 : index
    %299 = vector.load %arg8[%c0_226, %c0_227, %c8_228, %c0_229] : memref<2x8x16x16xf32, #tpu.memory_space<vmem>>, vector<1x8x1x16xf32>
    %300 = vector.shape_cast %299 : vector<1x8x1x16xf32> to vector<8x16xf32>
    %301 = vector.shape_cast %298 : vector<8x16xf32> to vector<1x8x1x16xf32>
    tpu.vector_store %arg8[%c0_226, %c0_227, %c8_228, %c0_229], %301 {strides = array<i32>} : memref<2x8x16x16xf32, #tpu.memory_space<vmem>>, vector<1x8x1x16xf32>,
    %302 = vector.extract_strided_slice %265 {offsets = [0, 181], sizes = [8, 16], strides = [1, 1]} : vector<8x768xf32> to vector<8x16xf32>
    %c0_230 = arith.constant 0 : index
    %c0_231 = arith.constant 0 : index
    %c9 = arith.constant 9 : index
    %c0_232 = arith.constant 0 : index
    %303 = vector.load %arg8[%c0_230, %c0_231, %c9, %c0_232] : memref<2x8x16x16xf32, #tpu.memory_space<vmem>>, vector<1x8x1x16xf32>
    %304 = vector.shape_cast %303 : vector<1x8x1x16xf32> to vector<8x16xf32>
    %305 = vector.shape_cast %302 : vector<8x16xf32> to vector<1x8x1x16xf32>
    tpu.vector_store %arg8[%c0_230, %c0_231, %c9, %c0_232], %305 {strides = array<i32>} : memref<2x8x16x16xf32, #tpu.memory_space<vmem>>, vector<1x8x1x16xf32>,
    %306 = vector.extract_strided_slice %265 {offsets = [0, 199], sizes = [8, 16], strides = [1, 1]} : vector<8x768xf32> to vector<8x16xf32>
    %c0_233 = arith.constant 0 : index
    %c0_234 = arith.constant 0 : index
    %c10 = arith.constant 10 : index
    %c0_235 = arith.constant 0 : index
    %307 = vector.load %arg8[%c0_233, %c0_234, %c10, %c0_235] : memref<2x8x16x16xf32, #tpu.memory_space<vmem>>, vector<1x8x1x16xf32>
    %308 = vector.shape_cast %307 : vector<1x8x1x16xf32> to vector<8x16xf32>
    %309 = vector.shape_cast %306 : vector<8x16xf32> to vector<1x8x1x16xf32>
    tpu.vector_store %arg8[%c0_233, %c0_234, %c10, %c0_235], %309 {strides = array<i32>} : memref<2x8x16x16xf32, #tpu.memory_space<vmem>>, vector<1x8x1x16xf32>,
    %310 = vector.extract_strided_slice %265 {offsets = [0, 217], sizes = [8, 16], strides = [1, 1]} : vector<8x768xf32> to vector<8x16xf32>
    %c0_236 = arith.constant 0 : index
    %c0_237 = arith.constant 0 : index
    %c11 = arith.constant 11 : index
    %c0_238 = arith.constant 0 : index
    %311 = vector.load %arg8[%c0_236, %c0_237, %c11, %c0_238] : memref<2x8x16x16xf32, #tpu.memory_space<vmem>>, vector<1x8x1x16xf32>
    %312 = vector.shape_cast %311 : vector<1x8x1x16xf32> to vector<8x16xf32>
    %313 = vector.shape_cast %310 : vector<8x16xf32> to vector<1x8x1x16xf32>
    tpu.vector_store %arg8[%c0_236, %c0_237, %c11, %c0_238], %313 {strides = array<i32>} : memref<2x8x16x16xf32, #tpu.memory_space<vmem>>, vector<1x8x1x16xf32>,
    %314 = vector.extract_strided_slice %265 {offsets = [0, 235], sizes = [8, 16], strides = [1, 1]} : vector<8x768xf32> to vector<8x16xf32>
    %c0_239 = arith.constant 0 : index
    %c0_240 = arith.constant 0 : index
    %c12_241 = arith.constant 12 : index
    %c0_242 = arith.constant 0 : index
    %315 = vector.load %arg8[%c0_239, %c0_240, %c12_241, %c0_242] : memref<2x8x16x16xf32, #tpu.memory_space<vmem>>, vector<1x8x1x16xf32>
    %316 = vector.shape_cast %315 : vector<1x8x1x16xf32> to vector<8x16xf32>
    %317 = vector.shape_cast %314 : vector<8x16xf32> to vector<1x8x1x16xf32>
    tpu.vector_store %arg8[%c0_239, %c0_240, %c12_241, %c0_242], %317 {strides = array<i32>} : memref<2x8x16x16xf32, #tpu.memory_space<vmem>>, vector<1x8x1x16xf32>,
    %318 = vector.extract_strided_slice %265 {offsets = [0, 253], sizes = [8, 16], strides = [1, 1]} : vector<8x768xf32> to vector<8x16xf32>
    %c0_243 = arith.constant 0 : index
    %c0_244 = arith.constant 0 : index
    %c13 = arith.constant 13 : index
    %c0_245 = arith.constant 0 : index
    %319 = vector.load %arg8[%c0_243, %c0_244, %c13, %c0_245] : memref<2x8x16x16xf32, #tpu.memory_space<vmem>>, vector<1x8x1x16xf32>
    %320 = vector.shape_cast %319 : vector<1x8x1x16xf32> to vector<8x16xf32>
    %321 = vector.shape_cast %318 : vector<8x16xf32> to vector<1x8x1x16xf32>
    tpu.vector_store %arg8[%c0_243, %c0_244, %c13, %c0_245], %321 {strides = array<i32>} : memref<2x8x16x16xf32, #tpu.memory_space<vmem>>, vector<1x8x1x16xf32>,
    %322 = vector.extract_strided_slice %265 {offsets = [0, 271], sizes = [8, 16], strides = [1, 1]} : vector<8x768xf32> to vector<8x16xf32>
    %c0_246 = arith.constant 0 : index
    %c0_247 = arith.constant 0 : index
    %c14 = arith.constant 14 : index
    %c0_248 = arith.constant 0 : index
    %323 = vector.load %arg8[%c0_246, %c0_247, %c14, %c0_248] : memref<2x8x16x16xf32, #tpu.memory_space<vmem>>, vector<1x8x1x16xf32>
    %324 = vector.shape_cast %323 : vector<1x8x1x16xf32> to vector<8x16xf32>
    %325 = vector.shape_cast %322 : vector<8x16xf32> to vector<1x8x1x16xf32>
    tpu.vector_store %arg8[%c0_246, %c0_247, %c14, %c0_248], %325 {strides = array<i32>} : memref<2x8x16x16xf32, #tpu.memory_space<vmem>>, vector<1x8x1x16xf32>,
    %326 = vector.extract_strided_slice %265 {offsets = [0, 289], sizes = [8, 16], strides = [1, 1]} : vector<8x768xf32> to vector<8x16xf32>
    %c0_249 = arith.constant 0 : index
    %c0_250 = arith.constant 0 : index
    %c15 = arith.constant 15 : index
    %c0_251 = arith.constant 0 : index
    %327 = vector.load %arg8[%c0_249, %c0_250, %c15, %c0_251] : memref<2x8x16x16xf32, #tpu.memory_space<vmem>>, vector<1x8x1x16xf32>
    %328 = vector.shape_cast %327 : vector<1x8x1x16xf32> to vector<8x16xf32>
    %329 = vector.shape_cast %326 : vector<8x16xf32> to vector<1x8x1x16xf32>
    tpu.vector_store %arg8[%c0_249, %c0_250, %c15, %c0_251], %329 {strides = array<i32>} : memref<2x8x16x16xf32, #tpu.memory_space<vmem>>, vector<1x8x1x16xf32>,
    %330 = vector.extract_strided_slice %265 {offsets = [0, 343], sizes = [8, 16], strides = [1, 1]} : vector<8x768xf32> to vector<8x16xf32>
    %c1_252 = arith.constant 1 : index
    %c0_253 = arith.constant 0 : index
    %c0_254 = arith.constant 0 : index
    %c0_255 = arith.constant 0 : index
    %331 = vector.load %arg8[%c1_252, %c0_253, %c0_254, %c0_255] : memref<2x8x16x16xf32, #tpu.memory_space<vmem>>, vector<1x8x1x16xf32>
    %332 = vector.shape_cast %331 : vector<1x8x1x16xf32> to vector<8x16xf32>
    %333 = vector.shape_cast %330 : vector<8x16xf32> to vector<1x8x1x16xf32>
    tpu.vector_store %arg8[%c1_252, %c0_253, %c0_254, %c0_255], %333 {strides = array<i32>} : memref<2x8x16x16xf32, #tpu.memory_space<vmem>>, vector<1x8x1x16xf32>,
    %334 = vector.extract_strided_slice %265 {offsets = [0, 361], sizes = [8, 16], strides = [1, 1]} : vector<8x768xf32> to vector<8x16xf32>
    %c1_256 = arith.constant 1 : index
    %c0_257 = arith.constant 0 : index
    %c1_258 = arith.constant 1 : index
    %c0_259 = arith.constant 0 : index
    %335 = vector.load %arg8[%c1_256, %c0_257, %c1_258, %c0_259] : memref<2x8x16x16xf32, #tpu.memory_space<vmem>>, vector<1x8x1x16xf32>
    %336 = vector.shape_cast %335 : vector<1x8x1x16xf32> to vector<8x16xf32>
    %337 = vector.shape_cast %334 : vector<8x16xf32> to vector<1x8x1x16xf32>
    tpu.vector_store %arg8[%c1_256, %c0_257, %c1_258, %c0_259], %337 {strides = array<i32>} : memref<2x8x16x16xf32, #tpu.memory_space<vmem>>, vector<1x8x1x16xf32>,
    %338 = vector.extract_strided_slice %265 {offsets = [0, 379], sizes = [8, 16], strides = [1, 1]} : vector<8x768xf32> to vector<8x16xf32>
    %c1_260 = arith.constant 1 : index
    %c0_261 = arith.constant 0 : index
    %c2_262 = arith.constant 2 : index
    %c0_263 = arith.constant 0 : index
    %339 = vector.load %arg8[%c1_260, %c0_261, %c2_262, %c0_263] : memref<2x8x16x16xf32, #tpu.memory_space<vmem>>, vector<1x8x1x16xf32>
    %340 = vector.shape_cast %339 : vector<1x8x1x16xf32> to vector<8x16xf32>
    %341 = vector.shape_cast %338 : vector<8x16xf32> to vector<1x8x1x16xf32>
    tpu.vector_store %arg8[%c1_260, %c0_261, %c2_262, %c0_263], %341 {strides = array<i32>} : memref<2x8x16x16xf32, #tpu.memory_space<vmem>>, vector<1x8x1x16xf32>,
    %342 = vector.extract_strided_slice %265 {offsets = [0, 397], sizes = [8, 16], strides = [1, 1]} : vector<8x768xf32> to vector<8x16xf32>
    %c1_264 = arith.constant 1 : index
    %c0_265 = arith.constant 0 : index
    %c3_266 = arith.constant 3 : index
    %c0_267 = arith.constant 0 : index
    %343 = vector.load %arg8[%c1_264, %c0_265, %c3_266, %c0_267] : memref<2x8x16x16xf32, #tpu.memory_space<vmem>>, vector<1x8x1x16xf32>
    %344 = vector.shape_cast %343 : vector<1x8x1x16xf32> to vector<8x16xf32>
    %345 = vector.shape_cast %342 : vector<8x16xf32> to vector<1x8x1x16xf32>
    tpu.vector_store %arg8[%c1_264, %c0_265, %c3_266, %c0_267], %345 {strides = array<i32>} : memref<2x8x16x16xf32, #tpu.memory_space<vmem>>, vector<1x8x1x16xf32>,
    %346 = vector.extract_strided_slice %265 {offsets = [0, 415], sizes = [8, 16], strides = [1, 1]} : vector<8x768xf32> to vector<8x16xf32>
    %c1_268 = arith.constant 1 : index
    %c0_269 = arith.constant 0 : index
    %c4_270 = arith.constant 4 : index
    %c0_271 = arith.constant 0 : index
    %347 = vector.load %arg8[%c1_268, %c0_269, %c4_270, %c0_271] : memref<2x8x16x16xf32, #tpu.memory_space<vmem>>, vector<1x8x1x16xf32>
    %348 = vector.shape_cast %347 : vector<1x8x1x16xf32> to vector<8x16xf32>
    %349 = vector.shape_cast %346 : vector<8x16xf32> to vector<1x8x1x16xf32>
    tpu.vector_store %arg8[%c1_268, %c0_269, %c4_270, %c0_271], %349 {strides = array<i32>} : memref<2x8x16x16xf32, #tpu.memory_space<vmem>>, vector<1x8x1x16xf32>,
    %350 = vector.extract_strided_slice %265 {offsets = [0, 433], sizes = [8, 16], strides = [1, 1]} : vector<8x768xf32> to vector<8x16xf32>
    %c1_272 = arith.constant 1 : index
    %c0_273 = arith.constant 0 : index
    %c5_274 = arith.constant 5 : index
    %c0_275 = arith.constant 0 : index
    %351 = vector.load %arg8[%c1_272, %c0_273, %c5_274, %c0_275] : memref<2x8x16x16xf32, #tpu.memory_space<vmem>>, vector<1x8x1x16xf32>
    %352 = vector.shape_cast %351 : vector<1x8x1x16xf32> to vector<8x16xf32>
    %353 = vector.shape_cast %350 : vector<8x16xf32> to vector<1x8x1x16xf32>
    tpu.vector_store %arg8[%c1_272, %c0_273, %c5_274, %c0_275], %353 {strides = array<i32>} : memref<2x8x16x16xf32, #tpu.memory_space<vmem>>, vector<1x8x1x16xf32>,
    %354 = vector.extract_strided_slice %265 {offsets = [0, 451], sizes = [8, 16], strides = [1, 1]} : vector<8x768xf32> to vector<8x16xf32>
    %c1_276 = arith.constant 1 : index
    %c0_277 = arith.constant 0 : index
    %c6_278 = arith.constant 6 : index
    %c0_279 = arith.constant 0 : index
    %355 = vector.load %arg8[%c1_276, %c0_277, %c6_278, %c0_279] : memref<2x8x16x16xf32, #tpu.memory_space<vmem>>, vector<1x8x1x16xf32>
    %356 = vector.shape_cast %355 : vector<1x8x1x16xf32> to vector<8x16xf32>
    %357 = vector.shape_cast %354 : vector<8x16xf32> to vector<1x8x1x16xf32>
    tpu.vector_store %arg8[%c1_276, %c0_277, %c6_278, %c0_279], %357 {strides = array<i32>} : memref<2x8x16x16xf32, #tpu.memory_space<vmem>>, vector<1x8x1x16xf32>,
    %358 = vector.extract_strided_slice %265 {offsets = [0, 469], sizes = [8, 16], strides = [1, 1]} : vector<8x768xf32> to vector<8x16xf32>
    %c1_280 = arith.constant 1 : index
    %c0_281 = arith.constant 0 : index
    %c7_282 = arith.constant 7 : index
    %c0_283 = arith.constant 0 : index
    %359 = vector.load %arg8[%c1_280, %c0_281, %c7_282, %c0_283] : memref<2x8x16x16xf32, #tpu.memory_space<vmem>>, vector<1x8x1x16xf32>
    %360 = vector.shape_cast %359 : vector<1x8x1x16xf32> to vector<8x16xf32>
    %361 = vector.shape_cast %358 : vector<8x16xf32> to vector<1x8x1x16xf32>
    tpu.vector_store %arg8[%c1_280, %c0_281, %c7_282, %c0_283], %361 {strides = array<i32>} : memref<2x8x16x16xf32, #tpu.memory_space<vmem>>, vector<1x8x1x16xf32>,
    %362 = vector.extract_strided_slice %265 {offsets = [0, 487], sizes = [8, 16], strides = [1, 1]} : vector<8x768xf32> to vector<8x16xf32>
    %c1_284 = arith.constant 1 : index
    %c0_285 = arith.constant 0 : index
    %c8_286 = arith.constant 8 : index
    %c0_287 = arith.constant 0 : index
    %363 = vector.load %arg8[%c1_284, %c0_285, %c8_286, %c0_287] : memref<2x8x16x16xf32, #tpu.memory_space<vmem>>, vector<1x8x1x16xf32>
    %364 = vector.shape_cast %363 : vector<1x8x1x16xf32> to vector<8x16xf32>
    %365 = vector.shape_cast %362 : vector<8x16xf32> to vector<1x8x1x16xf32>
    tpu.vector_store %arg8[%c1_284, %c0_285, %c8_286, %c0_287], %365 {strides = array<i32>} : memref<2x8x16x16xf32, #tpu.memory_space<vmem>>, vector<1x8x1x16xf32>,
    %366 = vector.extract_strided_slice %265 {offsets = [0, 505], sizes = [8, 16], strides = [1, 1]} : vector<8x768xf32> to vector<8x16xf32>
    %c1_288 = arith.constant 1 : index
    %c0_289 = arith.constant 0 : index
    %c9_290 = arith.constant 9 : index
    %c0_291 = arith.constant 0 : index
    %367 = vector.load %arg8[%c1_288, %c0_289, %c9_290, %c0_291] : memref<2x8x16x16xf32, #tpu.memory_space<vmem>>, vector<1x8x1x16xf32>
    %368 = vector.shape_cast %367 : vector<1x8x1x16xf32> to vector<8x16xf32>
    %369 = vector.shape_cast %366 : vector<8x16xf32> to vector<1x8x1x16xf32>
    tpu.vector_store %arg8[%c1_288, %c0_289, %c9_290, %c0_291], %369 {strides = array<i32>} : memref<2x8x16x16xf32, #tpu.memory_space<vmem>>, vector<1x8x1x16xf32>,
    %370 = vector.extract_strided_slice %265 {offsets = [0, 523], sizes = [8, 16], strides = [1, 1]} : vector<8x768xf32> to vector<8x16xf32>
    %c1_292 = arith.constant 1 : index
    %c0_293 = arith.constant 0 : index
    %c10_294 = arith.constant 10 : index
    %c0_295 = arith.constant 0 : index
    %371 = vector.load %arg8[%c1_292, %c0_293, %c10_294, %c0_295] : memref<2x8x16x16xf32, #tpu.memory_space<vmem>>, vector<1x8x1x16xf32>
    %372 = vector.shape_cast %371 : vector<1x8x1x16xf32> to vector<8x16xf32>
    %373 = vector.shape_cast %370 : vector<8x16xf32> to vector<1x8x1x16xf32>
    tpu.vector_store %arg8[%c1_292, %c0_293, %c10_294, %c0_295], %373 {strides = array<i32>} : memref<2x8x16x16xf32, #tpu.memory_space<vmem>>, vector<1x8x1x16xf32>,
    %374 = vector.extract_strided_slice %265 {offsets = [0, 541], sizes = [8, 16], strides = [1, 1]} : vector<8x768xf32> to vector<8x16xf32>
    %c1_296 = arith.constant 1 : index
    %c0_297 = arith.constant 0 : index
    %c11_298 = arith.constant 11 : index
    %c0_299 = arith.constant 0 : index
    %375 = vector.load %arg8[%c1_296, %c0_297, %c11_298, %c0_299] : memref<2x8x16x16xf32, #tpu.memory_space<vmem>>, vector<1x8x1x16xf32>
    %376 = vector.shape_cast %375 : vector<1x8x1x16xf32> to vector<8x16xf32>
    %377 = vector.shape_cast %374 : vector<8x16xf32> to vector<1x8x1x16xf32>
    tpu.vector_store %arg8[%c1_296, %c0_297, %c11_298, %c0_299], %377 {strides = array<i32>} : memref<2x8x16x16xf32, #tpu.memory_space<vmem>>, vector<1x8x1x16xf32>,
    %378 = vector.extract_strided_slice %265 {offsets = [0, 559], sizes = [8, 16], strides = [1, 1]} : vector<8x768xf32> to vector<8x16xf32>
    %c1_300 = arith.constant 1 : index
    %c0_301 = arith.constant 0 : index
    %c12_302 = arith.constant 12 : index
    %c0_303 = arith.constant 0 : index
    %379 = vector.load %arg8[%c1_300, %c0_301, %c12_302, %c0_303] : memref<2x8x16x16xf32, #tpu.memory_space<vmem>>, vector<1x8x1x16xf32>
    %380 = vector.shape_cast %379 : vector<1x8x1x16xf32> to vector<8x16xf32>
    %381 = vector.shape_cast %378 : vector<8x16xf32> to vector<1x8x1x16xf32>
    tpu.vector_store %arg8[%c1_300, %c0_301, %c12_302, %c0_303], %381 {strides = array<i32>} : memref<2x8x16x16xf32, #tpu.memory_space<vmem>>, vector<1x8x1x16xf32>,
    %382 = vector.extract_strided_slice %265 {offsets = [0, 577], sizes = [8, 16], strides = [1, 1]} : vector<8x768xf32> to vector<8x16xf32>
    %c1_304 = arith.constant 1 : index
    %c0_305 = arith.constant 0 : index
    %c13_306 = arith.constant 13 : index
    %c0_307 = arith.constant 0 : index
    %383 = vector.load %arg8[%c1_304, %c0_305, %c13_306, %c0_307] : memref<2x8x16x16xf32, #tpu.memory_space<vmem>>, vector<1x8x1x16xf32>
    %384 = vector.shape_cast %383 : vector<1x8x1x16xf32> to vector<8x16xf32>
    %385 = vector.shape_cast %382 : vector<8x16xf32> to vector<1x8x1x16xf32>
    tpu.vector_store %arg8[%c1_304, %c0_305, %c13_306, %c0_307], %385 {strides = array<i32>} : memref<2x8x16x16xf32, #tpu.memory_space<vmem>>, vector<1x8x1x16xf32>,
    %386 = vector.extract_strided_slice %265 {offsets = [0, 595], sizes = [8, 16], strides = [1, 1]} : vector<8x768xf32> to vector<8x16xf32>
    %c1_308 = arith.constant 1 : index
    %c0_309 = arith.constant 0 : index
    %c14_310 = arith.constant 14 : index
    %c0_311 = arith.constant 0 : index
    %387 = vector.load %arg8[%c1_308, %c0_309, %c14_310, %c0_311] : memref<2x8x16x16xf32, #tpu.memory_space<vmem>>, vector<1x8x1x16xf32>
    %388 = vector.shape_cast %387 : vector<1x8x1x16xf32> to vector<8x16xf32>
    %389 = vector.shape_cast %386 : vector<8x16xf32> to vector<1x8x1x16xf32>
    tpu.vector_store %arg8[%c1_308, %c0_309, %c14_310, %c0_311], %389 {strides = array<i32>} : memref<2x8x16x16xf32, #tpu.memory_space<vmem>>, vector<1x8x1x16xf32>,
    %390 = vector.extract_strided_slice %265 {offsets = [0, 613], sizes = [8, 16], strides = [1, 1]} : vector<8x768xf32> to vector<8x16xf32>
    %c1_312 = arith.constant 1 : index
    %c0_313 = arith.constant 0 : index
    %c15_314 = arith.constant 15 : index
    %c0_315 = arith.constant 0 : index
    %391 = vector.load %arg8[%c1_312, %c0_313, %c15_314, %c0_315] : memref<2x8x16x16xf32, #tpu.memory_space<vmem>>, vector<1x8x1x16xf32>
    %392 = vector.shape_cast %391 : vector<1x8x1x16xf32> to vector<8x16xf32>
    %393 = vector.shape_cast %390 : vector<8x16xf32> to vector<1x8x1x16xf32>
    tpu.vector_store %arg8[%c1_312, %c0_313, %c15_314, %c0_315], %393 {strides = array<i32>} : memref<2x8x16x16xf32, #tpu.memory_space<vmem>>, vector<1x8x1x16xf32>,
    return
  }
}

</mosaic_0001>

<bundles_post_ra>
// kernel: residual_block_pallas.1
= control target key start
LH: loop header
LB: loop body
LE: loop exit
PB: predicated region body
PF: predicated region fallthrough
CT: control target
= control target key end

     0   :  { %v160_v3 = vlaneseq  ;;  %v6981_v7 = vmov 1983009808   ;;  %vm218_vm0 = vcmask 1041409   ;;  %vm221_vm1 = vcmask 1042434   ;;  %s10205_s0 = inlined_call_operand.vmem [shape: f32[2,4,16,16], index: 0, kind: input, shape index: {}]   ;;  %s10206_s1 = inlined_call_operand.vmem [shape: bf16[8,36], index: 1, kind: input, shape index: {}]   ;;  %s10207_s2 = inlined_call_operand.vmem [shape: bf16[8,72], index: 2, kind: input, shape index: {}]   ;;  %s10208_s3 = inlined_call_operand.vmem [shape: bf16[8,72], index: 3, kind: input, shape index: {}]   ;;  %s10209_s4 = inlined_call_operand.vmem [shape: f32[3,8,1], index: 4, kind: input, shape index: {}]   ;;  %s10210_s5 = inlined_call_operand.vmem [shape: f32[3,8,1], index: 5, kind: input, shape index: {}]   ;;  %s10211_s6 = inlined_call_operand.vmem [shape: f32[1,768], index: 6, kind: input, shape index: {}]   ;;  %s10212_s7 = inlined_call_operand.vmem [shape: f32[768,1], index: 7, kind: input, shape index: {}]   ;;  %s10213_s8 = inlined_call_operand.hbm [shape: f32[2,8,16,16], index: 8, kind: output, shape index: {}]  }
   0x1   :  { %v7099_v0 = vld [vmem:[%s10205_s0 + $0x8] sm:$0xff]  ;;  %v7104_v1 = vld [vmem:[%s10205_s0 + $0x10] sm:$0xff]  ;;  %v7109_v2 = vld [vmem:[%s10205_s0 + $0x18] sm:$0xff]  ;;  %v158_v8 = vunpack.c.l.s4 %v6981_v7 }
   0x2   :  { %v7114_v4 = vld [vmem:[%s10205_s0 + $0x28] sm:$0xff]  ;;  %v147_v5 = vld [vmem:[%s10205_s0 + $0x30] sm:$0xff]  ;;  %v148_v6 = vld [vmem:[%s10205_s0 + $0x38] sm:$0xff]  ;;  %v150_v9 = vpack.c.bf16 %v7109_v2, %v7104_v1  ;;  %v7124_v11 = vshrl.u32 %v160_v3, 7  ;;  %v6070_v16 = vpack.c.bf16 %v7099_v0, %v7099_v0  ;;  %v6071_v17 = vpack.c.bf16 %v7109_v2, %v7109_v2 }
   0x3   :  { %v152_v10 = vpack.c.bf16 %v148_v6, %v147_v5  ;;  %v7129_v12 = vld [vmem:[%s10205_s0] sm:$0xff]  ;;  %v7137_v14 = vld [vmem:[%s10205_s0 + $0x48] sm:$0xff]  ;;  %v159_v15 = vunpack.c.0.s8 %v158_v8  ;;  %v6072_v18 = vpack.c.bf16 %v7114_v4, %v7114_v4  ;;  %v6076_v19 = vld [vmem:[%s10205_s0 + $0x50] sm:$0xff]  ;;  %v6073_v22 = vpack.c.bf16 %v148_v6, %v148_v6 }
   0x4   :  { %10295 = vst [vmem:[#allocation9_spill] sm:$0xff] %v7124_v11  ;;  %v6074_v13 = vld [vmem:[%s10205_s0 + $0x40] sm:$0xff]  ;;  %v7151_v20 = vld [vmem:[%s10205_s0 + $0x58] sm:$0xff]  ;;  %v149_v23 = vpack.c.bf16 %v7099_v0, %v7129_v12  ;;  %v7161_v24 = vld [vmem:[%s10205_s0 + $0x68] sm:$0xff]  ;;  %v6082_v32 = vpack.c.bf16 %v7137_v14, %v7137_v14 }
   0x5   :  { %v6078_v21 = vld [vmem:[%s10205_s0 + $0x60] sm:$0xff]  ;;  %v6080_v25 = vld [vmem:[%s10205_s0 + $0x70] sm:$0xff]  ;;  %v7169_v26 = vld [vmem:[%s10205_s0 + $0x78] sm:$0xff]  ;;  %v672_v27 = vpack.c.bf16 %v7137_v14, %v6074_v13  ;;  %v673_v28 = vpack.c.bf16 %v7151_v20, %v6076_v19  ;;  %v7174_v29 = vsub.s32 %v159_v15, %v7124_v11  ;;  %v6083_v33 = vpack.c.bf16 %v7151_v20, %v7151_v20 }
   0x6   :  { %v674_v30 = vpack.c.bf16 %v7161_v24, %v6078_v21  ;;  %v7180_v31 = vld [vmem:[%s10205_s0 + $0x20] sm:$0xff] }
   0x7   :  { %13 = vsyncpa [#allocation7], 0  ;;  %vm224_vm2 = vcmask 1043459   ;;  %v675_v34 = vpack.c.bf16 %v7169_v26, %v6080_v25  ;;  %v6084_v35 = vpack.c.bf16 %v7161_v24, %v7161_v24  ;;  %v151_v36 = vpack.c.bf16 %v7114_v4, %v7180_v31  ;;  %s6982_s0 = smov 108   ;;  %s6983_s15 = smov 54  }
   0x8   :  { %v6085_v37 = vpack.c.bf16 %v7169_v26, %v7169_v26  ;;  %v7194_v38 = vrot.slane %v152_v10, %v7174_v29  ;;  %v7197_v39 = vrot.slane %v6070_v16, %v7174_v29  ;;  %v7200_v40 = vrot.slane %v6071_v17, %v7174_v29  ;;  %s6984_s16 = smov 14   ;;  %s6985_s17 = smov 72  }
   0x9   :  { %v7203_v41 = vrot.slane %v6072_v18, %v7174_v29  ;;  %v437_v42 = vrot.slane %v6073_v22, %v7174_v29  ;;  %v7207_v43 = vrot.slane %v672_v27, %v7174_v29  ;;  %v7210_v44 = vrot.slane %v673_v28, %v7174_v29  ;;  %s6986_s18 = smov 90   ;;  %s6987_s19 = smov 124  }
   0xa   :  { %v7213_v45 = vrot.slane %v674_v30, %v7174_v29  ;;  %v444_v46 = vrot.slane %v7197_v39, %v7174_v29  ;;  %v451_v47 = vrot.slane %v7200_v40, %v7174_v29  ;;  %v547_v49 = vcombine.high %v7200_v40, %v7200_v40  ;;  %s6988_s20 = smov 106   ;;  %s6989_s21 = smov 18  }
   0xb   :  { %v458_v48 = vrot.slane %v7203_v41, %v7174_v29  ;;  %v465_v50 = vrot.slane %v437_v42, %v7174_v29  ;;  %v548_v51 = vcombine.high %v7203_v41, %v7203_v41  ;;  %v549_v52 = vcombine.high %v437_v42, %v437_v42  ;;  %s6990_s22 = smov 36   ;;  %s6991_s23 = smov 32  }
   0xc   :  { %v7227_v53 = vrot.slane %v675_v34, %v7174_v29  ;;  %v466_v54 = vunpack.c.l.b16 %v444_v46  ;;  %v467_v55 = vunpack.c.l.b16 %v451_v47  ;;  %v714_v57 = vrot.slane %v7207_v43, %v7174_v29  ;;  %s6992_s24 = smov 126   ;;  %s6993_s25 = smov 16  }
   0xd   :  { %v468_v56 = vunpack.c.l.b16 %v458_v48  ;;  %v469_v58 = vunpack.c.l.b16 %v465_v50  ;;  %v7232_v59 = vrot.slane %v549_v52, %v7174_v29  ;;  %v721_v60 = vrot.slane %v7210_v44, %v7174_v29  ;;  %s6994_s26 = smov 34   ;;  %s6995_s27 = smov 52  }
   0xe   :  { %v728_v61 = vrot.slane %v7213_v45, %v7174_v29  ;;  %v527_v62 = vrot.slane %v466_v54, 3  ;;  %v528_v63 = vrot.slane %v467_v55, 2  ;;  %v470_v5 = vrot.slane %v467_v55, 7  ;;  %s6996_s28 = smov 38   ;;  %s6997_s29 = smov 56  }
   0xf   :  { %v530_v3 = vrot.slane %v468_v56, 1  ;;  %v472_v6 = vrot.slane %v468_v56, 6  ;;  %v474_v7 = vrot.slane %v469_v58, 5  ;;  %v735_v8 = vrot.slane %v7227_v53, %v7174_v29  ;;  %s6998_s30 = smov 50   ;;  %s6999_s9 = smov 68  }
  0x10   :  { %v7240_v10 = vunpack.c.l.b16 %v714_v57  ;;  %v529_v13 = vsel %vm218_vm0, %v528_v63, %v527_v62  ;;  %v471_v15 = vsel %vm218_vm0, %v470_v5, %v466_v54  ;;  %v7244_v16 = vunpack.c.l.b16 %v721_v60  ;;  %s7000_s10 = smov 74   ;;  %s7001_s11 = smov 122  }
  0x11   :  { %v7246_v17 = vunpack.c.l.b16 %v728_v61  ;;  %v531_v18 = vsel %vm221_vm1, %v530_v3, %v529_v13  ;;  %v473_v19 = vsel %vm221_vm1, %v472_v6, %v471_v15  ;;  %v7250_v21 = vunpack.c.l.b16 %v735_v8  ;;  %s7002_s12 = smov 92   ;;  %s7003_s13 = smov 86  }
  0x12   :  { %v783_v22 = vrot.slane %v7240_v10, 2  ;;  %v532_v25 = vsel %vm224_vm2, %v469_v58, %v531_v18  ;;  %v475_v27 = vsel %vm224_vm2, %v474_v7, %v473_v19  ;;  %v784_v28 = vrot.slane %v7244_v16, 1  ;;  %s7004_s14 = smov 110  }
  0x13   :  { %v823_v30 = vcombine.high %v7213_v45, %v7213_v45  ;;  %v533_v34 = vpack.c.b16 %v532_v25, %v532_v25  ;;  %v476_v42 = vpack.c.b16 %v475_v27, %v475_v27  ;;  %v787_v46 = vrot.slane %v7250_v21, 7 }
  0x14   :  { %v489_v47 = vrot.slane %v466_v54, 1  ;;  %v785_v48 = vsel %vm218_vm0, %v784_v28, %v783_v22  ;;  %v491_v50 = vrot.slane %v468_v56, 7  ;;  %v493_v52 = vrot.slane %v469_v58, 6 }
  0x15   :  { %v508_v57 = vrot.slane %v466_v54, 2  ;;  %v540_v60 = vrot.slane %v533_v34, %v7174_v29  ;;  %v483_v61 = vrot.slane %v476_v42, %v7174_v29  ;;  %v786_v62 = vsel %vm221_vm1, %v7246_v17, %v785_v48 }
  0x16   :  { %v490_v63 = vsel %vm218_vm0, %v467_v55, %v489_v47  ;;  %v788_v3 = vsel %vm224_vm2, %v787_v46, %v786_v62  ;;  %v509_v6 = vrot.slane %v467_v55, 1  ;;  %v512_v7 = vrot.slane %v469_v58, 7 }
  0x17   :  { %v492_v5 = vsel %vm221_vm1, %v491_v50, %v490_v63  ;;  %541 = vrot.lane.b32.xlu0 %v540_v60, %s6982_s0  ;;  %484 = vrot.lane.b32.xlu1 %v483_v61, %s6983_s15  ;;  %v789_v54 = vpack.c.b16 %v788_v3, %v788_v3  ;;  %v7273_v13 = vrot.slane %v149_v23, %v7174_v29  ;;  %v759_v15 = vrot.slane %v7240_v10, 1  ;;  %s7005_s15 = smov 104  }
  0x18   :  { %v494_v8 = vsel %vm224_vm2, %v493_v52, %v492_v5  ;;  %v510_v55 = vsel %vm218_vm0, %v509_v6, %v508_v57  ;;  %v7281_v58 = vrot.slane %v150_v9, %v7174_v29  ;;  %v7287_v19 = vrot.slane %v151_v36, %v7174_v29 }
  0x19   :  { %v495_v18 = vpack.c.b16 %v494_v8, %v494_v8  ;;  %v796_v0 = vrot.slane %v789_v54, %v7174_v29  ;;  %v511_v12 = vsel %vm221_vm1, %v468_v56, %v510_v55  ;;  %v296_v23 = vcombine.high %v7273_v13, %v7273_v13 }
  0x1a   :  { %v299_v22 = vcombine.high %v7194_v38, %v7194_v38  ;;  %v513_v2 = vsel %vm224_vm2, %v512_v7, %v511_v12  ;;  %v297_v9 = vcombine.high %v7281_v58, %v7281_v58  ;;  %v298_v4 = vcombine.high %v7287_v19, %v7287_v19 }
  0x1b   :  { %v502_v1 = vrot.slane %v495_v18, %v7174_v29  ;;  %797 = vrot.lane.b32.xlu0 %v796_v0, %s6984_s16  ;;  %v514_v31 = vpack.c.b16 %v513_v2, %v513_v2  ;;  %v306_v36 = vrot.slane %v296_v23, %v7174_v29  ;;  %v760_v25 = vsel %vm218_vm0, %v7244_v16, %v759_v15  ;;  %s7006_s16 = smov 30  }
  0x1c   :  { %v327_v56 = vrot.slane %v299_v22, %v7174_v29  ;;  %v313_v27 = vrot.slane %v297_v9, %v7174_v29  ;;  %v320_v28 = vrot.slane %v298_v4, %v7174_v29  ;;  %v761_v34 = vrot.slane %v7246_v17, 7 }
  0x1d   :  { %503 = vrot.lane.b32.xlu1 %v502_v1, %s6985_s17  ;;  %v763_v42 = vrot.slane %v7250_v21, 6  ;;  %v521_v46 = vrot.slane %v514_v31, %v7174_v29  ;;  %v7310_v47 = vunpack.c.l.b16 %v306_v36  ;;  %v740_v50 = vrot.slane %v7244_v16, 7  ;;  %s7007_s17 = smov 12  }
  0x1e   :  { %v7312_v48 = vunpack.c.l.b16 %v327_v56  ;;  %v7315_v52 = vunpack.c.l.b16 %v313_v27  ;;  %v7317_v57 = vunpack.c.l.b16 %v320_v28  ;;  %v762_v60 = vsel %vm221_vm1, %v761_v34, %v760_v25 }
  0x1f   :  { %v742_v61 = vrot.slane %v7246_v17, 6  ;;  %v368_v62 = vrot.slane %v7310_v47, 2  ;;  %v764_v3 = vsel %vm224_vm2, %v763_v42, %v762_v60  ;;  %v387_v5 = vrot.slane %v7310_v47, 3 }
  0x20   :  { %v372_v63 = vrot.slane %v7312_v48, 7  ;;  %v369_v6 = vrot.slane %v7315_v52, 1  ;;  %v765_v7 = vpack.c.b16 %v764_v3, %v764_v3  ;;  %v388_v54 = vrot.slane %v7315_v52, 2 }
  0x21   :  { %522 = vrot.lane.b32.xlu1 %v521_v46, %s6986_s18  ;;  %v390_v8 = vrot.slane %v7317_v57, 1  ;;  %v741_v15 = vsel %vm218_vm0, %v740_v50, %v7240_v10  ;;  %v744_v18 = vrot.slane %v7250_v21, 5  ;;  %v546_v55 = vcombine.high %v7197_v39, %v7197_v39 }
  0x22   :  { %v563_v0 = vrot.slane %v547_v49, %v7174_v29  ;;  %v370_v12 = vsel %vm218_vm0, %v369_v6, %v368_v62  ;;  %v772_v23 = vrot.slane %v765_v7, %v7174_v29  ;;  %v389_v22 = vsel %vm218_vm0, %v388_v54, %v387_v5 }
  0x23   :  { %v743_v1 = vsel %vm221_vm1, %v742_v61, %v741_v15  ;;  %v371_v2 = vsel %vm221_vm1, %v7317_v57, %v370_v12  ;;  %v391_v9 = vsel %vm221_vm1, %v390_v8, %v389_v22  ;;  %v556_v4 = vrot.slane %v546_v55, %v7174_v29 }
  0x24   :  { %v745_v39 = vsel %vm224_vm2, %v744_v18, %v743_v1  ;;  %v373_v40 = vsel %vm224_vm2, %v372_v63, %v371_v2  ;;  %v392_v49 = vsel %vm224_vm2, %v7312_v48, %v391_v9  ;;  %v570_v36 = vrot.slane %v548_v51, %v7174_v29 }
  0x25   :  { %773 = vrot.lane.b32.xlu1 %v772_v23, %s6987_s19  ;;  %v746_v31 = vpack.c.b16 %v745_v39, %v745_v39  ;;  %v374_v56 = vpack.c.b16 %v373_v40, %v373_v40  ;;  %v393_v25 = vpack.c.b16 %v392_v49, %v392_v49  ;;  %v578_v27 = vunpack.c.l.b16 %v556_v4  ;;  %s7008_s19 = smov 48  }
  0x26   :  { %v579_v28 = vunpack.c.l.b16 %v563_v0  ;;  %v580_v42 = vunpack.c.l.b16 %v570_v36  ;;  %v581_v46 = vunpack.c.l.b16 %v7232_v59  ;;  %v802_v50 = vrot.slane %v7240_v10, 3 }
  0x27   :  { %v753_v34 = vrot.slane %v746_v31, %v7174_v29  ;;  %v381_v60 = vrot.slane %v374_v56, %v7174_v29  ;;  %v400_v61 = vrot.slane %v393_v25, %v7174_v29  ;;  %v803_v63 = vrot.slane %v7244_v16, 2 }
  0x28   :  { %v582_v62 = vrot.slane %v579_v28, 7  ;;  %v584_v41 = vrot.slane %v580_v42, 6  ;;  %v586_v51 = vrot.slane %v581_v46, 5  ;;  %v805_v3 = vrot.slane %v7246_v17, 1 }
  0x29   :  { %754 = vrot.lane.b32.xlu1 %v753_v34, %s6988_s20  ;;  %v625_v5 = vrot.slane %v578_v27, 2  ;;  %382 = vrot.lane.b32.xlu0 %v381_v60, %s6989_s21  ;;  %v804_v10 = vsel %vm218_vm0, %v803_v63, %v802_v50  ;;  %v626_v6 = vrot.slane %v579_v28, 1  ;;  %v629_v7 = vrot.slane %v581_v46, 7  ;;  %s7010_s20 = smov 66   ;;  %s7011_s21 = smov 120  }
  0x2a   :  { %v583_v59 = vsel %vm218_vm0, %v582_v62, %v578_v27  ;;  %v806_v8 = vsel %vm221_vm1, %v805_v3, %v804_v10  ;;  %v606_v16 = vrot.slane %v578_v27, 1  ;;  %v608_v15 = vrot.slane %v580_v42, 7 }
  0x2b   :  { %v585_v54 = vsel %vm221_vm1, %v584_v41, %v583_v59  ;;  %v807_v17 = vsel %vm224_vm2, %v7250_v21, %v806_v8  ;;  %v627_v55 = vsel %vm218_vm0, %v626_v6, %v625_v5  ;;  %v610_v0 = vrot.slane %v581_v46, 6 }
  0x2c   :  { %v587_v18 = vsel %vm224_vm2, %v586_v51, %v585_v54  ;;  %v808_v23 = vpack.c.b16 %v807_v17, %v807_v17  ;;  %v628_v22 = vsel %vm221_vm1, %v580_v42, %v627_v55  ;;  %v607_v1 = vsel %vm218_vm0, %v579_v28, %v606_v16 }
  0x2d   :  { %v588_v12 = vpack.c.b16 %v587_v18, %v587_v18  ;;  %401 = vrot.lane.b32.xlu0 %v400_v61, %s6990_s22  ;;  %v630_v2 = vsel %vm224_vm2, %v629_v7, %v628_v22  ;;  %v609_v9 = vsel %vm221_vm1, %v608_v15, %v607_v1  ;;  %v644_v39 = vrot.slane %v578_v27, 3  ;;  %s7012_s22 = smov 84  }
  0x2e   :  { %v645_v4 = vrot.slane %v579_v28, 2  ;;  %v815_v21 = vrot.slane %v808_v23, %v7174_v29  ;;  %v631_v49 = vpack.c.b16 %v630_v2, %v630_v2  ;;  %v611_v31 = vsel %vm224_vm2, %v610_v0, %v609_v9 }
  0x2f   :  { %v595_v40 = vrot.slane %v588_v12, %v7174_v29  ;;  %v612_v36 = vpack.c.b16 %v611_v31, %v611_v31  ;;  %v647_v25 = vrot.slane %v580_v42, 1  ;;  %v191_v34 = vrot.slane %v7273_v13, %v7174_v29 }
  0x30   :  { %v646_v56 = vsel %vm218_vm0, %v645_v4, %v644_v39  ;;  %816 = vrot.lane.b32.xlu1 %v815_v21, %s6991_s23  ;;  %v638_v50 = vrot.slane %v631_v49, %v7174_v29  ;;  %v198_v27 = vrot.slane %v7281_v58, %v7174_v29  ;;  %v205_v28 = vrot.slane %v7287_v19, %v7174_v29  ;;  %s7013_s23 = smov 102  }
  0x31   :  { %v212_v60 = vrot.slane %v7194_v38, %v7174_v29  ;;  %596 = vrot.lane.b32.xlu0 %v595_v40, %s6992_s24  ;;  %v619_v42 = vrot.slane %v612_v36, %v7174_v29  ;;  %v648_v13 = vsel %vm221_vm1, %v647_v25, %v646_v56  ;;  %v7389_v61 = vunpack.c.l.b16 %v191_v34 }
  0x32   :  { %v821_v62 = vcombine.high %v7207_v43, %v7207_v43  ;;  %v649_v58 = vsel %vm224_vm2, %v581_v46, %v648_v13  ;;  %v7394_v63 = vunpack.c.l.b16 %v198_v27  ;;  %v7396_v19 = vunpack.c.l.b16 %v205_v28 }
  0x33   :  { %v7398_v41 = vunpack.c.l.b16 %v212_v60  ;;  %v650_v38 = vpack.c.b16 %v649_v58, %v649_v58  ;;  %v822_v51 = vcombine.high %v7210_v44, %v7210_v44  ;;  %v824_v3 = vcombine.high %v7227_v53, %v7227_v53 }
  0x34   :  { %v831_v5 = vrot.slane %v821_v62, %v7174_v29  ;;  %620 = vrot.lane.b32.xlu1 %v619_v42, %s6993_s25  ;;  %v217_v43 = vrot.slane %v7394_v63, 7  ;;  %v220_v46 = vrot.slane %v7396_v19, 6  ;;  %v845_v10 = vrot.slane %v823_v30, %v7174_v29  ;;  %s7014_s25 = smov 127  }
  0x35   :  { %v223_v59 = vrot.slane %v7398_v41, 5  ;;  %639 = vrot.lane.b32.xlu0 %v638_v50, %s6994_s26  ;;  %v657_v44 = vrot.slane %v650_v38, %v7174_v29  ;;  %v838_v53 = vrot.slane %v822_v51, %v7174_v29  ;;  %v852_v6 = vrot.slane %v824_v3, %v7174_v29  ;;  %s7015_s26 = smov 109  }
  0x36   :  { %v7415_v7 = vunpack.c.l.b16 %v831_v5  ;;  %v219_v54 = vsel %vm218_vm0, %v217_v43, %v7389_v61  ;;  %v7419_v8 = vunpack.c.l.b16 %v845_v10  ;;  %v239_v16 = vrot.slane %v7389_v61, 1 }
  0x37   :  { %v241_v45 = vrot.slane %v7396_v19, 7  ;;  %v222_v30 = vsel %vm221_vm1, %v220_v46, %v219_v54  ;;  %v7424_v15 = vunpack.c.l.b16 %v838_v53  ;;  %v7426_v18 = vunpack.c.l.b16 %v852_v6 }
  0x38   :  { %v243_v17 = vrot.slane %v7398_v41, 6  ;;  %v225_v55 = vsel %vm224_vm2, %v223_v59, %v222_v30  ;;  %v859_v0 = vrot.slane %v7419_v8, 6  ;;  %v240_v12 = vsel %vm218_vm0, %v7394_v63, %v239_v16 }
  0x39   :  { %v876_v23 = vrot.slane %v7415_v7, 1  ;;  %658 = vrot.lane.b32.xlu0 %v657_v44, %s6995_s27  ;;  %v226_v22 = vpack.c.b16 %v225_v55, %v225_v55  ;;  %v857_v1 = vrot.slane %v7424_v15, 7  ;;  %v861_v2 = vrot.slane %v7426_v18, 5  ;;  %s7016_s27 = smov 91  }
  0x3a   :  { %v242_v9 = vsel %vm221_vm1, %v241_v45, %v240_v12  ;;  %v878_v40 = vrot.slane %v7419_v8, 7  ;;  %v880_v21 = vrot.slane %v7426_v18, 6  ;;  %v7449_v56 = vrot.slane %v6082_v32, %v7174_v29 }
  0x3b   :  { %v244_v39 = vsel %vm224_vm2, %v243_v17, %v242_v9  ;;  %v877_v4 = vsel %vm218_vm0, %v7424_v15, %v876_v23  ;;  %v233_v49 = vrot.slane %v226_v22, %v7174_v29  ;;  %v858_v31 = vsel %vm218_vm0, %v857_v1, %v7415_v7 }
  0x3c   :  { %v245_v36 = vpack.c.b16 %v244_v39, %v244_v39  ;;  %v860_v25 = vsel %vm221_vm1, %v859_v0, %v858_v31  ;;  %v879_v34 = vsel %vm221_vm1, %v878_v40, %v877_v4  ;;  %v7457_v50 = vrot.slane %v6083_v33, %v7174_v29 }
  0x3d   :  { %v7463_v27 = vrot.slane %v6084_v35, %v7174_v29  ;;  %234 = vrot.lane.b32.xlu0 %v233_v49, %s6996_s28  ;;  %v862_v14 = vsel %vm224_vm2, %v861_v2, %v860_v25  ;;  %v881_v28 = vsel %vm224_vm2, %v880_v21, %v879_v34  ;;  %v7472_v20 = vrot.slane %v6085_v37, %v7174_v29  ;;  %s7022_s28 = smov 111  }
  0x3e   :  { %v252_v32 = vrot.slane %v245_v36, %v7174_v29  ;;  %v863_v33 = vpack.c.b16 %v862_v14, %v862_v14  ;;  %v882_v60 = vpack.c.b16 %v881_v28, %v881_v28  ;;  %v971_v24 = vrot.slane %v7449_v56, %v7174_v29 }
  0x3f   :  { %v978_v35 = vrot.slane %v7457_v50, %v7174_v29  ;;  %v985_v42 = vrot.slane %v7463_v27, %v7174_v29  ;;  %v992_v13 = vrot.slane %v7472_v20, %v7174_v29  ;;  %v258_v62 = vrot.slane %v7389_v61, 2 }
  0x40   :  { %v259_v26 = vrot.slane %v7394_v63, 1  ;;  %v870_v37 = vrot.slane %v863_v33, %v7174_v29  ;;  %v889_v58 = vrot.slane %v882_v60, %v7174_v29  ;;  %v7486_v38 = vunpack.c.l.b16 %v971_v24 }
  0x41   :  { %v7488_v51 = vunpack.c.l.b16 %v978_v35  ;;  %253 = vrot.lane.b32.xlu0 %v252_v32, %s6997_s29  ;;  %v7490_v3 = vunpack.c.l.b16 %v985_v42  ;;  %v7492_v5 = vunpack.c.l.b16 %v992_v13  ;;  %v262_v46 = vrot.slane %v7398_v41, 7  ;;  %s7023_s29 = smov 1  }
  0x42   :  { %v260_v43 = vsel %vm218_vm0, %v259_v26, %v258_v62  ;;  %871 = vrot.lane.b32.xlu1 %v870_v37, %s6998_s30  ;;  %v895_v44 = vrot.slane %v7415_v7, 2  ;;  %v896_v53 = vrot.slane %v7424_v15, 1  ;;  %v899_v45 = vrot.slane %v7426_v18, 7  ;;  %s7025_s30 = smov 75  }
  0x43   :  { %v997_v59 = vrot.slane %v7488_v51, 7  ;;  %v261_v10 = vsel %vm221_vm1, %v7396_v19, %v260_v43  ;;  %v999_v6 = vrot.slane %v7490_v3, 6  ;;  %v1001_v54 = vrot.slane %v7492_v5, 5 }
  0x44   :  { %v263_v16 = vsel %vm224_vm2, %v262_v46, %v261_v10  ;;  %v897_v55 = vsel %vm218_vm0, %v896_v53, %v895_v44  ;;  %v277_v0 = vrot.slane %v7389_v61, 3  ;;  %v278_v22 = vrot.slane %v7394_v63, 2 }
  0x45   :  { %v998_v30 = vsel %vm218_vm0, %v997_v59, %v7486_v38  ;;  %v264_v17 = vpack.c.b16 %v263_v16, %v263_v16  ;;  %v898_v23 = vsel %vm221_vm1, %v7419_v8, %v897_v55  ;;  %v280_v1 = vrot.slane %v7396_v19, 1 }
  0x46   :  { %v1000_v12 = vsel %vm221_vm1, %v999_v6, %v998_v30  ;;  %890 = vrot.lane.b32.xlu1 %v889_v58, %s6999_s9  ;;  %v900_v39 = vsel %vm224_vm2, %v899_v45, %v898_v23  ;;  %v914_v4 = vrot.slane %v7415_v7, 3  ;;  %v279_v21 = vsel %vm218_vm0, %v278_v22, %v277_v0  ;;  %s7026_s9 = smov 57  }
  0x47   :  { %v1002_v2 = vsel %vm224_vm2, %v1001_v54, %v1000_v12  ;;  %v271_v9 = vrot.slane %v264_v17, %v7174_v29  ;;  %v901_v40 = vpack.c.b16 %v900_v39, %v900_v39  ;;  %v915_v49 = vrot.slane %v7424_v15, 2 }
  0x48   :  { %v1003_v61 = vpack.c.b16 %v1002_v2, %v1002_v2  ;;  %v281_v63 = vsel %vm221_vm1, %v280_v1, %v279_v21  ;;  %v917_v19 = vrot.slane %v7419_v8, 1  ;;  %v332_v31 = vrot.slane %v7315_v52, 7 }
  0x49   :  { %v334_v36 = vrot.slane %v7317_v57, 6  ;;  %v908_v34 = vrot.slane %v901_v40, %v7174_v29  ;;  %v282_v7 = vsel %vm224_vm2, %v7398_v41, %v281_v63  ;;  %v916_v14 = vsel %vm218_vm0, %v915_v49, %v914_v4 }
  0x4a   :  { %v1010_v25 = vrot.slane %v1003_v61, %v7174_v29  ;;  %272 = vrot.lane.b32.xlu1 %v271_v9, %s7000_s10  ;;  %v283_v15 = vpack.c.b16 %v282_v7, %v282_v7  ;;  %v918_v32 = vsel %vm221_vm1, %v917_v19, %v916_v14  ;;  %v333_v8 = vsel %vm218_vm0, %v332_v31, %v7310_v47  ;;  %s7027_s10 = smov 39  }
  0x4b   :  { %v336_v28 = vrot.slane %v7312_v48, 5  ;;  %v919_v33 = vsel %vm224_vm2, %v7426_v18, %v918_v32  ;;  %v335_v60 = vsel %vm221_vm1, %v334_v36, %v333_v8  ;;  %v1021_v41 = vrot.slane %v7486_v38, 1 }
  0x4c   :  { %1011 = vrot.lane.b32.xlu0 %v1010_v25, %s7001_s11  ;;  %v1023_v24 = vrot.slane %v7490_v3, 7  ;;  %v290_v35 = vrot.slane %v283_v15, %v7174_v29  ;;  %v920_v42 = vpack.c.b16 %v919_v33, %v919_v33  ;;  %v1025_v62 = vrot.slane %v7492_v5, 6  ;;  %s7029_s11 = smov 113  }
  0x4d   :  { %v337_v13 = vsel %vm224_vm2, %v336_v28, %v335_v60  ;;  %v1022_v37 = vsel %vm218_vm0, %v7488_v51, %v1021_v41  ;;  %v1040_v58 = vrot.slane %v7486_v38, 2  ;;  %v1041_v18 = vrot.slane %v7488_v51, 1 }
  0x4e   :  { %v338_v26 = vpack.c.b16 %v337_v13, %v337_v13  ;;  %291 = vrot.lane.b32.xlu1 %v290_v35, %s7002_s12  ;;  %v927_v43 = vrot.slane %v920_v42, %v7174_v29  ;;  %v1024_v46 = vsel %vm221_vm1, %v1023_v24, %v1022_v37  ;;  %v1044_v59 = vrot.slane %v7492_v5, 7 }
  0x4f   :  { %v1059_v10 = vrot.slane %v7486_v38, 3  ;;  %v1026_v53 = vsel %vm224_vm2, %v1025_v62, %v1024_v46  ;;  %v1042_v6 = vsel %vm218_vm0, %v1041_v18, %v1040_v58  ;;  %v1060_v54 = vrot.slane %v7488_v51, 2 }
  0x50   :  { %909 = vrot.lane.b32.xlu0 %v908_v34, %s7003_s13  ;;  %v345_v44 = vrot.slane %v338_v26, %v7174_v29  ;;  %v1027_v16 = vpack.c.b16 %v1026_v53, %v1026_v53  ;;  %v1043_v45 = vsel %vm221_vm1, %v7490_v3, %v1042_v6  ;;  %v1062_v30 = vrot.slane %v7490_v3, 1  ;;  %s10291_s13 = smov 95  }
  0x51   :  { %v1078_v17 = vcombine.high %v7449_v56, %v7449_v56  ;;  %v1045_v38 = vsel %vm224_vm2, %v1044_v59, %v1043_v45  ;;  %v1061_v55 = vsel %vm218_vm0, %v1060_v54, %v1059_v10  ;;  %v1079_v0 = vcombine.high %v7457_v50, %v7457_v50 }
  0x52   :  { %v1080_v12 = vcombine.high %v7463_v27, %v7463_v27  ;;  %346 = vrot.lane.b32.xlu1 %v345_v44, %s7004_s14  ;;  %v1034_v51 = vrot.slane %v1027_v16, %v7174_v29  ;;  %v1046_v23 = vpack.c.b16 %v1045_v38, %v1045_v38  ;;  %v1063_v3 = vsel %vm221_vm1, %v1062_v30, %v1061_v55 }
  0x53   :  { %v1081_v56 = vcombine.high %v7472_v20, %v7472_v20  ;;  %v1064_v22 = vsel %vm224_vm2, %v7492_v5, %v1063_v3  ;;  %v1088_v50 = vrot.slane %v1078_v17, %v7174_v29  ;;  %v1095_v27 = vrot.slane %v1079_v0, %v7174_v29 }
  0x54   :  { %928 = vrot.lane.b32.xlu0 %v927_v43, %s7005_s15  ;;  %v1102_v1 = vrot.slane %v1080_v12, %v7174_v29  ;;  %v1053_v2 = vrot.slane %v1046_v23, %v7174_v29  ;;  %v1065_v9 = vpack.c.b16 %v1064_v22, %v1064_v22  ;;  %v353_v5 = vrot.slane %v7317_v57, 7  ;;  %s7031_s15 = smov 41  }
  0x55   :  { %v1109_v39 = vrot.slane %v1081_v56, %v7174_v29  ;;  %v1110_v4 = vunpack.c.l.b16 %v1088_v50  ;;  %v1111_v61 = vunpack.c.l.b16 %v1095_v27  ;;  %v355_v49 = vrot.slane %v7312_v48, 6 }
  0x56   :  { %v1112_v40 = vunpack.c.l.b16 %v1102_v1  ;;  %1054 = vrot.lane.b32.xlu1 %v1053_v2, %s7006_s16  ;;  %v1072_v20 = vrot.slane %v1065_v9, %v7174_v29  ;;  %v351_v43 = vrot.slane %v7310_v47, 1  ;;  %v10236_v44 = vmov 0   ;;  %s7032_s16 = smov 3  }
  0x57   :  { %v1113_v21 = vunpack.c.l.b16 %v1109_v39  ;;  %v1114_v63 = vrot.slane %v1111_v61, 7  ;;  %v1171_v31 = vrot.slane %v1110_v4, 3  ;;  %v1172_v36 = vrot.slane %v1111_v61, 2  ;;  %128 = vst [vmem:[#allocation2] sm:$0xff] %v10236_v44  ;;  %1844 = vmatprep.mubr.bf16.mxu0 %v10236_v44  ;;  %6901 = vset.pattern.permute.xlu1 %v10236_v44 }
  0x58   :  { %1035 = vrot.lane.b32.xlu0 %v1034_v51, %s7007_s17  ;;  %v1116_v19 = vrot.slane %v1112_v40, 6  ;;  %v1174_v34 = vrot.slane %v1112_v40, 1  ;;  %v1133_v7 = vrot.slane %v1110_v4, 1  ;;  %v1135_v14 = vrot.slane %v1112_v40, 7  ;;  %s7033_s17 = smov 23  }
  0x59   :  { %v1118_v25 = vrot.slane %v1113_v21, 5  ;;  %v1115_v15 = vsel %vm218_vm0, %v1114_v63, %v1110_v4  ;;  %v1173_v32 = vsel %vm218_vm0, %v1172_v36, %v1171_v31  ;;  %v1137_v8 = vrot.slane %v1113_v21, 6  ;;  %6902 = vset.pattern.permute.xlu0 %v10236_v44 }
  0x5a   :  { %v1152_v28 = vrot.slane %v1110_v4, 2  ;;  %v1117_v57 = vsel %vm221_vm1, %v1116_v19, %v1115_v15  ;;  %v1175_v48 = vsel %vm221_vm1, %v1174_v34, %v1173_v32  ;;  %v1134_v33 = vsel %vm218_vm0, %v1111_v61, %v1133_v7 }
  0x5b   :  { %v1153_v60 = vrot.slane %v1111_v61, 1  ;;  %v1119_v41 = vsel %vm224_vm2, %v1118_v25, %v1117_v57  ;;  %v1176_v24 = vsel %vm224_vm2, %v1113_v21, %v1175_v48  ;;  %v1136_v35 = vsel %vm221_vm1, %v1135_v14, %v1134_v33 }
  0x5c   :  { %1073 = vrot.lane.b32.xlu0 %v1072_v20, %s7008_s19  ;;  %v1156_v42 = vrot.slane %v1113_v21, 7  ;;  %v1120_v13 = vpack.c.b16 %v1119_v41, %v1119_v41  ;;  %v1177_v62 = vpack.c.b16 %v1176_v24, %v1176_v24  ;;  %v1138_v26 = vsel %vm224_vm2, %v1137_v8, %v1136_v35  ;;  %s10285_s19 = smov 115  }
  0x5d   :  { %v1154_v37 = vsel %vm218_vm0, %v1153_v60, %v1152_v28  ;;  %v1139_v58 = vpack.c.b16 %v1138_v26, %v1138_v26  ;;  %v352_v6 = vsel %vm218_vm0, %v7315_v52, %v351_v43  ;;  %vm366_vm3 = vcmask 123904  }
  0x5e   :  { %v1155_v18 = vsel %vm221_vm1, %v1112_v40, %v1154_v37  ;;  %v1127_v46 = vrot.slane %v1120_v13, %v7174_v29  ;;  %v1184_v59 = vrot.slane %v1177_v62, %v7174_v29  ;;  %v354_v54 = vsel %vm221_vm1, %v353_v5, %v352_v6 }
  0x5f   :  { %v1157_v10 = vsel %vm224_vm2, %v1156_v42, %v1155_v18  ;;  %v1146_v47 = vrot.slane %v1139_v58, %v7174_v29  ;;  %v356_v45 = vsel %vm224_vm2, %v355_v49, %v354_v54  ;;  %vm129_vm4 = vcmask 1041408  }
  0x60   :  { %v1158_v53 = vpack.c.b16 %v1157_v10, %v1157_v10  ;;  %1128 = vrot.lane.b32.xlu1 %v1127_v46, %s7010_s20  ;;  %1185 = vrot.lane.b32.xlu0 %v1184_v59, %s7011_s21  ;;  %v357_v30 = vpack.c.b16 %v356_v45, %v356_v45  ;;  %vm130_vm5 = vcmask 1043458   ;;  %vm132_vm6 = vcmask 308228   ;;  %s7035_s20 = smov 97   ;;  %s7037_s21 = smov 61  }
  0x61   :  { %vm131_vm7 = vmor %vm130_vm5, %vm129_vm4  ;;  %vm385_vm9 = vcmask 271504   ;;  %vm404_vm10 = vcmask 419104   ;;  %vm487_vm11 = vcmask 566704   ;;  %vm506_vm12 = vcmask 714304  }
  0x62   :  { %v1165_v16 = vrot.slane %v1158_v53, %v7174_v29  ;;  %v364_v52 = vrot.slane %v357_v30, %v7174_v29  ;;  %vm133_vm8 = vmor %vm132_vm6, %vm131_vm7  ;;  %vm525_vm13 = vcmask 861904   ;;  %vm544_vm14 = vcmask 1009504  }
  0x63   :  { %134 = vst.msk [vmem:[#allocation2 + $0x8] sm:$0x3f] %vm133_vm8, %v10236_v44  ;;  %vm602_vm15 = vcmask 1042416   ;;  %vm603_vm0 = vcmask 109570   ;;  %vm599_vm1 = vcmask 1031168   ;;  %vm642_vm5 = vcmask 402704  }
  0x64   :  { %1147 = vrot.lane.b32.xlu1 %v1146_v47, %s7012_s22  ;;  %1166 = vrot.lane.b32.xlu0 %v1165_v16, %s7013_s23  ;;  %367 = vst.msk [vmem:[#allocation2 + $0x2] sm:$0x3] %vm366_vm3, %v364_v52  ;;  %vm604_vm2 = vmor %vm603_vm0, %vm602_vm15  ;;  %vm623_vm3 = vcmask 255104   ;;  %vm779_vm6 = vcmask 1042400   ;;  %vm780_vm7 = vcmask 93186   ;;  %vm661_vm8 = vcmask 550304  }
  0x65   :  { %vm256_vm15 = vcmask 583104   ;;  %vm874_vm0 = vcmask 533904   ;;  %s10287_s22 = smov 43   ;;  %s7039_s23 = smov 5  }
  0x89   :  { %v485_v17 = vpop.permute.xlu1 %484  ;;  %v542_v55 = vpop.permute.xlu0 %541 }
  0x8d   :  { %v798_v12 = vpop.permute.xlu0 %797 }
  0x8f   :  { %v504_v38 = vpop.permute.xlu1 %503 }
  0x93   :  { %v523_v0 = vpop.permute.xlu1 %522 }
  0x97   :  { %v774_v51 = vpop.permute.xlu1 %773 }
  0x98   :  { %v775_v39 = vrot.slane %v774_v51, 6 }
  0x9b   :  { %v383_v23 = vpop.permute.xlu0 %382  ;;  %v755_v3 = vpop.permute.xlu1 %754 }
  0x9c   :  { %386 = vst.msk [vmem:[#allocation2 + $0x2] sm:$0x3] %vm385_vm9, %v383_v23  ;;  %vm776_vm9 = vcmask 1014784  }
  0x9d   :  { %v777_v61 = vsel %vm776_vm9, %v775_v39, %v774_v51  ;;  %vm349_vm9 = vcmask 1025904  }
  0x9f   :  { %v402_v56 = vpop.permute.xlu0 %401 }
  0xa0   :  { %405 = vst.msk [vmem:[#allocation2 + $0x2] sm:$0x3] %vm404_vm10, %v402_v56  ;;  %vm757_vm10 = vcmask 993104  }
  0xa1   :  { %488 = vst.msk [vmem:[#allocation2 + $0x2] sm:$0x3] %vm487_vm11, %v485_v17  ;;  %vm781_vm11 = vmor %vm780_vm7, %vm779_vm6  ;;  %vm912_vm6 = vcmask 829104   ;;  %vm1017_vm7 = vcmask 1042384  }
  0xa2   :  { %507 = vst.msk [vmem:[#allocation2 + $0x2] sm:$0x3] %vm506_vm12, %v504_v38  ;;  %v817_v22 = vpop.permute.xlu1 %816  ;;  %vm800_vm12 = vcmask 238704  }
  0xa3   :  { %526 = vst.msk [vmem:[#allocation2 + $0x2] sm:$0x3] %vm525_vm13, %v523_v0  ;;  %v597_v50 = vpop.permute.xlu0 %596  ;;  %vm237_vm13 = vcmask 435504  }
  0xa4   :  { %545 = vst.msk [vmem:[#allocation2 + $0x2] sm:$0x3] %vm544_vm14, %v542_v55  ;;  %v598_v27 = vrot.slane %v597_v50, 6  ;;  %vm819_vm14 = vcmask 386304  }
  0xa6   :  { %v600_v1 = vsel %vm599_vm1, %v598_v27, %v597_v50  ;;  %v621_v2 = vpop.permute.xlu1 %620 }
  0xa7   :  { %605 = vst.msk [vmem:[#allocation2 + $0x2] sm:$0xf] %vm604_vm2, %v600_v1  ;;  %v640_v9 = vpop.permute.xlu0 %639  ;;  %vm893_vm2 = vcmask 681504  }
  0xa8   :  { %624 = vst.msk [vmem:[#allocation2 + $0x4] sm:$0x3] %vm623_vm3, %v621_v2  ;;  %vm275_vm3 = vcmask 730704  }
  0xa9   :  { %643 = vst.msk [vmem:[#allocation2 + $0x4] sm:$0x3] %vm642_vm5, %v640_v9  ;;  %vm294_vm5 = vcmask 878304  }
  0xab   :  { %v659_v4 = vpop.permute.xlu0 %658 }
  0xac   :  { %662 = vst.msk [vmem:[#allocation2 + $0x4] sm:$0x3] %vm661_vm8, %v659_v4  ;;  %vm1018_vm8 = vcmask 76802  }
  0xad   :  { %758 = vst.msk [vmem:[#allocation2 + $0x4] sm:$0x3] %vm757_vm10, %v755_v3  ;;  %vm1014_vm10 = vcmask 998400  }
  0xae   :  { %782 = vst.msk [vmem:[#allocation2 + $0x4] sm:$0xf] %vm781_vm11, %v777_v61  ;;  %vm931_vm11 = vcmask 976704   ;;  %v48_v61 = vld [vmem:[%s10212_s7 + $0x80] sm:$0xff] }
  0xaf   :  { %v235_v40 = vpop.permute.xlu0 %234  ;;  %801 = vst.msk [vmem:[#allocation2 + $0x6] sm:$0x3] %vm800_vm12, %v798_v12  ;;  %vm1019_vm12 = vmor %vm1018_vm8, %vm1017_vm7  ;;  %vm1169_vm7 = vcmask 960304  }
  0xb0   :  { %238 = vst.msk [vmem:[#allocation2] sm:$0x3] %vm237_vm13, %v235_v40  ;;  %vm1038_vm13 = vcmask 222304   ;;  %v49_v40 = vld [vmem:[%s10212_s7 + $0x88] sm:$0xff] }
  0xb1   :  { %820 = vst.msk [vmem:[#allocation2 + $0x6] sm:$0x3] %vm819_vm14, %v817_v22  ;;  %vm1057_vm14 = vcmask 369904  }
  0xb3   :  { %v254_v20 = vpop.permute.xlu0 %253 }
  0xb4   :  { %v872_v21 = vpop.permute.xlu1 %871  ;;  %257 = vst.msk [vmem:[#allocation2] sm:$0x3] %vm256_vm15, %v254_v20  ;;  %vm1076_vm15 = vcmask 517504   ;;  %v32_v20 = vld [vmem:[%s10212_s7] sm:$0xff] }
  0xb5   :  { %875 = vst.msk [vmem:[#allocation2 + $0x6] sm:$0x3] %vm874_vm0, %v872_v21  ;;  %vm1131_vm0 = vcmask 665104   ;;  %v7669_v21 = vpack.c.bf16 %v49_v40, %v48_v61 }
  0xb7   :  { %6544 = vmatprep.subr.bf16.mxu1 %v7669_v21 }
  0xb8   :  { %v891_v5 = vpop.permute.xlu1 %890 }
  0xb9   :  { %894 = vst.msk [vmem:[#allocation2 + $0x6] sm:$0x3] %vm893_vm2, %v891_v5  ;;  %vm1188_vm2 = vcmask 982016   ;;  %v50_v5 = vld [vmem:[%s10212_s7 + $0x90] sm:$0xff] }
  0xbc   :  { %v273_v49 = vpop.permute.xlu1 %272 }
  0xbd   :  { %276 = vst.msk [vmem:[#allocation2] sm:$0x3] %vm275_vm3, %v273_v49  ;;  %vm1191_vm3 = vcmask 1042368   ;;  %v51_v49 = vld [vmem:[%s10212_s7 + $0x98] sm:$0xff] }
  0xbe   :  { %v1012_v63 = vpop.permute.xlu0 %1011 }
  0xbf   :  { %v1013_v36 = vrot.slane %v1012_v63, 6 }
  0xc0   :  { %v292_v19 = vpop.permute.xlu1 %291 }
  0xc1   :  { %295 = vst.msk [vmem:[#allocation2] sm:$0x3] %vm294_vm5, %v292_v19  ;;  %v1015_v7 = vsel %vm1014_vm10, %v1013_v36, %v1012_v63  ;;  %vm1192_vm5 = vcmask 60418   ;;  %v7682_v19 = vpack.c.bf16 %v51_v49, %v50_v5  ;;  %v35_v36 = vld [vmem:[%s10212_s7 + $0x18] sm:$0xff]  ;;  %vm1276_vm10 = vcmask 1039360  }
  0xc2   :  { %v910_v31 = vpop.permute.xlu0 %909  ;;  %vm1193_vm8 = vmor %vm1192_vm5, %vm1191_vm3  ;;  %vm137_vm3 = vcmask 306328   ;;  %vm2282_vm5 = vcmask 1043608  }
  0xc3   :  { %913 = vst.msk [vmem:[#allocation2 + $0x6] sm:$0x3] %vm912_vm6, %v910_v31  ;;  %vm1150_vm6 = vcmask 812704   ;;  %v34_v31 = vld [vmem:[%s10212_s7 + $0x10] sm:$0xff] }
  0xc4   :  { %v347_v25 = vpop.permute.xlu1 %346 }
  0xc5   :  { %350 = vst.msk [vmem:[#allocation2] sm:$0x3] %vm349_vm9, %v347_v25  ;;  %v52_v25 = vld [vmem:[%s10212_s7 + $0xa0] sm:$0xff]  ;;  %vm1274_vm9 = vcmask 1043456  }
  0xc6   :  { %v929_v34 = vpop.permute.xlu0 %928 }
  0xc7   :  { %932 = vst.msk [vmem:[#allocation2 + $0x6] sm:$0x3] %vm931_vm11, %v929_v34  ;;  %v53_v34 = vld [vmem:[%s10212_s7 + $0xa8] sm:$0xff]  ;;  %vm1452_vm11 = vcmask 891904  }
  0xc8   :  { %1020 = vst.msk [vmem:[#allocation2 + $0x6] sm:$0xf] %vm1019_vm12, %v1015_v7  ;;  %v1055_v15 = vpop.permute.xlu1 %1054  ;;  %v7698_v7 = vpack.c.bf16 %v35_v36, %v34_v31  ;;  %vm1393_vm12 = vcmask 900096  }
  0xca   :  { %v1036_v14 = vpop.permute.xlu0 %1035 }
  0xcb   :  { %1039 = vst.msk [vmem:[#allocation2 + $0x8] sm:$0x3] %vm1038_vm13, %v1036_v14  ;;  %v7701_v14 = vpack.c.bf16 %v53_v34, %v52_v25  ;;  %vm1570_vm13 = vcmask 752640  }
  0xcc   :  { %1058 = vst.msk [vmem:[#allocation2 + $0x8] sm:$0x3] %vm1057_vm14, %v1055_v15  ;;  %v36_v15 = vld [vmem:[%s10212_s7 + $0x20] sm:$0xff]  ;;  %vm1511_vm14 = vcmask 883712  }
  0xce   :  { %v1074_v32 = vpop.permute.xlu0 %1073 }
  0xcf   :  { %v1196_v8 = vld [vmem:[#allocation2] sm:$0xff]  ;;  %1077 = vst.msk [vmem:[#allocation2 + $0x8] sm:$0x3] %vm1076_vm15, %v1074_v32  ;;  %v37_v32 = vld [vmem:[%s10212_s7 + $0x28] sm:$0xff]  ;;  %vm1688_vm15 = vcmask 736256  }
  0xd0   :  { %v1200_v28 = vcombine.high %v1196_v8, %v1196_v8  ;;  %6087 = vst.sshfl [vmem:[#allocation5] sm:$0xf pattern:$0x76325410] %v1196_v8  ;;  %v1299_v57 = vrot.slane %v1196_v8, %v7174_v29  ;;  %v1232_v42 = vcombine.low %v1196_v8, %v1196_v8  ;;  %v54_v8 = vld [vmem:[%s10212_s7 + $0xb0] sm:$0xff] }
  0xd2   :  { %6088 = vst.sshfl [vmem:[#allocation5 + $0x8] sm:$0xf pattern:$0x76325410] %v1200_v28  ;;  %1322 = vrot.lane.b32.xlu1 %v1299_v57, %s6992_s24  ;;  %1264 = vrot.lane.b32.xlu0 %v1299_v57, %s7014_s25  ;;  %v1129_v48 = vpop.permute.xlu1 %1128  ;;  %v1186_v33 = vpop.permute.xlu0 %1185  ;;  %v1306_v13 = vrot.slane %v1200_v28, %v7174_v29  ;;  %v1239_v62 = vrot.slane %v1232_v42, %v7174_v29  ;;  %v55_v28 = vld [vmem:[%s10212_s7 + $0xb8] sm:$0xff] }
  0xd3   :  { %1132 = vst.msk [vmem:[#allocation2 + $0x8] sm:$0x3] %vm1131_vm0, %v1129_v48  ;;  %v1187_v60 = vrot.slane %v1186_v33, 6  ;;  %v7719_v48 = vpack.c.bf16 %v55_v28, %v54_v8  ;;  %vm1629_vm0 = vcmask 744448  }
  0xd5   :  { %v1189_v41 = vsel %vm1188_vm2, %v1187_v60, %v1186_v33  ;;  %v38_v33 = vld [vmem:[%s10212_s7 + $0x30] sm:$0xff]  ;;  %v39_v60 = vld [vmem:[%s10212_s7 + $0x38] sm:$0xff]  ;;  %vm1790_vm2 = vcmask 293888  }
  0xd6   :  { %1439 = vrot.lane.b32.xlu1 %v1299_v57, %s7015_s26  ;;  %1382 = vrot.lane.b32.xlu0 %v1299_v57, %s7004_s14  ;;  %v1148_v24 = vpop.permute.xlu1 %1147  ;;  %v1167_v35 = vpop.permute.xlu0 %1166 }
  0xd7   :  { %1151 = vst.msk [vmem:[#allocation2 + $0x8] sm:$0x3] %vm1150_vm6, %v1148_v24  ;;  %v57_v24 = vld [vmem:[%s10212_s7 + $0xc8] sm:$0xff]  ;;  %vm2283_vm6 = vcmask 1047556  }
  0xd8   :  { %1170 = vst.msk [vmem:[#allocation2 + $0x8] sm:$0x3] %vm1169_vm7, %v1167_v35  ;;  %v7734_v35 = vpack.c.bf16 %v39_v60, %v38_v33  ;;  %vm2272_vm7 = vcmask 154624  }
  0xd9   :  { %1194 = vst.msk [vmem:[#allocation2 + $0x8] sm:$0xf] %vm1193_vm8, %v1189_v41  ;;  %v56_v41 = vld [vmem:[%s10212_s7 + $0xc0] sm:$0xff]  ;;  %vm8309_vm8 = vmor %vm2283_vm6, %vm2282_vm5 }
  0xda   :  { %1557 = vrot.lane.b32.xlu1 %v1299_v57, %s7002_s12  ;;  %1500 = vrot.lane.b32.xlu0 %v1299_v57, %s6982_s0  ;;  %v7737_v42 = vpack.c.bf16 %v57_v24, %v56_v41 }
  0xde   :  { %1675 = vrot.lane.b32.xlu1 %v1299_v57, %s6986_s18  ;;  %1618 = vrot.lane.b32.xlu0 %v1299_v57, %s7016_s27  ;;  %v7716_v57 = vpack.c.bf16 %v37_v32, %v36_v15 }
  0xe0   :  { %v6086_v26 = vld.sshfl [vmem:[#allocation2 + $0x8] sm:$0x33 pattern:$0x76325410] }
  0xe1   :  { %1227 = vst [vmem:[#allocation5 + $0x10] sm:$0x33] %v6086_v26  ;;  %v1289_v37 = vld [vmem:[#allocation2 + $0x8] sm:$0x3f]  ;;  %v58_v26 = vld [vmem:[%s10212_s7 + $0xd0] sm:$0xff] }
  0xe2   :  { %1324 = vrot.lane.b32.xlu0 %v1306_v13, %s6992_s24  ;;  %1262 = vrot.lane.b32.xlu1 %v1239_v62, %s7014_s25  ;;  %v1229_v58 = vld [vmem:[#allocation2 + $0x8] sm:$0x3f]  ;;  %v1314_v18 = vrot.slane %v1289_v37, %v7174_v29  ;;  %v1307_v12 = vcombine.high %v1289_v37, %v1289_v37  ;;  %v59_v37 = vld [vmem:[%s10212_s7 + $0xd8] sm:$0xff] }
  0xe3   :  { %v1261_v43 = vrot.slane %v1229_v58, %v7174_v29  ;;  %v1247_v46 = vcombine.low %v1229_v58, %v1229_v58  ;;  %v1406_v59 = vld [vmem:[#allocation2 + $0x8] sm:$0x3f] }
  0xe4   :  { %v1347_v10 = vld [vmem:[#allocation2 + $0x8] sm:$0x3f]  ;;  %v1431_v53 = vrot.slane %v1406_v59, %v7174_v29  ;;  %v1321_v23 = vrot.slane %v1307_v12, %v7174_v29  ;;  %v1424_v56 = vcombine.high %v1406_v59, %v1406_v59  ;;  %v60_v59 = vld [vmem:[%s10212_s7 + $0xe0] sm:$0xff] }
  0xe5   :  { %v1254_v6 = vrot.slane %v1247_v46, %v7174_v29  ;;  %v1365_v47 = vcombine.low %v1347_v10, %v1347_v10  ;;  %v1524_v54 = vld [vmem:[#allocation2 + $0x8] sm:$0x3f]  ;;  %v1379_v50 = vrot.slane %v1347_v10, %v7174_v29  ;;  %v43_v46 = vld [vmem:[%s10212_s7 + $0x58] sm:$0xff] }
  0xe6   :  { %1441 = vrot.lane.b32.xlu0 %v1306_v13, %s7015_s26  ;;  %1380 = vrot.lane.b32.xlu1 %v1239_v62, %s7004_s14  ;;  %v1465_v16 = vld [vmem:[#allocation2 + $0x8] sm:$0x3f]  ;;  %v1549_v45 = vrot.slane %v1524_v54, %v7174_v29  ;;  %v1438_v22 = vrot.slane %v1424_v56, %v7174_v29  ;;  %v1542_v27 = vcombine.high %v1524_v54, %v1524_v54 }
  0xe7   :  { %v1372_v30 = vrot.slane %v1365_v47, %v7174_v29  ;;  %v1483_v52 = vcombine.low %v1465_v16, %v1465_v16  ;;  %v1642_v17 = vld [vmem:[#allocation2 + $0x8] sm:$0x3f]  ;;  %v1497_v2 = vrot.slane %v1465_v16, %v7174_v29  ;;  %v44_v47 = vld [vmem:[%s10212_s7 + $0x60] sm:$0xff]  ;;  %v62_v16 = vld [vmem:[%s10212_s7 + $0xf0] sm:$0xff] }
  0xe8   :  { %v1583_v38 = vld [vmem:[#allocation2 + $0x8] sm:$0x3f]  ;;  %v1667_v55 = vrot.slane %v1642_v17, %v7174_v29  ;;  %v1556_v1 = vrot.slane %v1542_v27, %v7174_v29  ;;  %v1660_v9 = vcombine.high %v1642_v17, %v1642_v17 }
  0xe9   :  { %v1490_v0 = vrot.slane %v1483_v52, %v7174_v29  ;;  %v1601_v51 = vcombine.low %v1583_v38, %v1583_v38  ;;  %v1615_v4 = vrot.slane %v1583_v38, %v7174_v29  ;;  %v61_v10 = vld [vmem:[%s10212_s7 + $0xe8] sm:$0xff] }
  0xea   :  { %1559 = vrot.lane.b32.xlu0 %v1306_v13, %s7002_s12  ;;  %1498 = vrot.lane.b32.xlu1 %v1239_v62, %s6982_s0  ;;  %v1674_v39 = vrot.slane %v1660_v9, %v7174_v29  ;;  %v45_v54 = vld [vmem:[%s10212_s7 + $0x68] sm:$0xff] }
  0xeb   :  { %v1608_v3 = vrot.slane %v1601_v51, %v7174_v29  ;;  %v33_v29 = vld [vmem:[%s10212_s7 + $0x8] sm:$0xff] }
  0xec   :  { %v7680_v63 = vpack.c.bf16 %v33_v29, %v32_v20 }
  0xee   :  { %1677 = vrot.lane.b32.xlu0 %v1306_v13, %s6986_s18  ;;  %1616 = vrot.lane.b32.xlu1 %v1239_v62, %s7016_s27  ;;  %v40_v13 = vld [vmem:[%s10212_s7 + $0x40] sm:$0xff]  ;;  %v41_v62 = vld [vmem:[%s10212_s7 + $0x48] sm:$0xff] }
  0xef   :  { %6546 = vmatpush3.bf16.msra.mxu1 %v7680_v63  ;;  %v7752_v58 = vpack.c.bf16 %v41_v62, %v40_v13 }
  0xf0   :  { %6548 = vmatprep.subr.bf16.mxu1 %v7682_v19 }
  0xf2   :  { %1326 = vrot.lane.b32.xlu0 %v1314_v18, %s6992_s24  ;;  %1268 = vrot.lane.b32.xlu1 %v1261_v43, %s7014_s25  ;;  %v7755_v18 = vpack.c.bf16 %v59_v37, %v58_v26  ;;  %v42_v43 = vld [vmem:[%s10212_s7 + $0x50] sm:$0xff] }
  0xf3   :  { %6550 = vmatpush3.bf16.msra.mxu1 %v7698_v7 }
  0xf4   :  { %6552 = vmatprep.subr.bf16.mxu1 %v7701_v14 }
  0xf6   :  { %1443 = vrot.lane.b32.xlu0 %v1431_v53, %s7015_s26  ;;  %1266 = vrot.lane.b32.xlu1 %v1254_v6, %s7014_s25  ;;  %v7770_v53 = vpack.c.bf16 %v43_v46, %v42_v43  ;;  %v7773_v6 = vpack.c.bf16 %v61_v10, %v60_v59 }
  0xf7   :  { %6554 = vmatpush3.bf16.msra.mxu1 %v7716_v57 }
  0xf8   :  { %6556 = vmatprep.subr.bf16.mxu1 %v7719_v48 }
  0xfa   :  { %1561 = vrot.lane.b32.xlu0 %v1549_v45, %s7002_s12  ;;  %1384 = vrot.lane.b32.xlu1 %v1372_v30, %s7004_s14  ;;  %v63_v45 = vld [vmem:[%s10212_s7 + $0xf8] sm:$0xff]  ;;  %v7788_v30 = vpack.c.bf16 %v45_v54, %v44_v47 }
  0xfb   :  { %6558 = vmatpush3.bf16.msra.mxu1 %v7734_v35  ;;  %v7791_v52 = vpack.c.bf16 %v63_v45, %v62_v16 }
  0xfc   :  { %6560 = vmatprep.subr.bf16.mxu1 %v7737_v42 }
  0xfd   :  { %10296 = vst [vmem:[#allocation10_spill] sm:$0xff] %v7791_v52 }
  0xfe   :  { %1679 = vrot.lane.b32.xlu0 %v1667_v55, %s6986_s18  ;;  %1502 = vrot.lane.b32.xlu1 %v1490_v0, %s6982_s0 }
  0xff   :  { %6562 = vmatpush3.bf16.msra.mxu1 %v7752_v58 }
 0x100   :  { %6564 = vmatprep.subr.bf16.mxu1 %v7755_v18 }
 0x102   :  { %1328 = vrot.lane.b32.xlu0 %v1321_v23, %s6992_s24  ;;  %1620 = vrot.lane.b32.xlu1 %v1608_v3, %s7016_s27 }
 0x103   :  { %6566 = vmatpush3.bf16.msra.mxu1 %v7770_v53 }
 0x104   :  { %6568 = vmatprep.subr.bf16.mxu1 %v7773_v6 }
 0x106   :  { %1445 = vrot.lane.b32.xlu0 %v1438_v22, %s7015_s26  ;;  %1386 = vrot.lane.b32.xlu1 %v1379_v50, %s7004_s14 }
 0x107   :  { %6570 = vmatpush3.bf16.msra.mxu1 %v7788_v30 }
 0x108   :  { %6572 = vmatprep.subr.bf16.mxu1 %v7791_v52 }
 0x10a   :  { %1563 = vrot.lane.b32.xlu0 %v1556_v1, %s7002_s12  ;;  %1504 = vrot.lane.b32.xlu1 %v1497_v2, %s6982_s0 }
 0x10e   :  { %1681 = vrot.lane.b32.xlu0 %v1674_v39, %s6986_s18  ;;  %1622 = vrot.lane.b32.xlu1 %v1615_v4, %s7016_s27 }
 0x144   :  { %v1323_v17 = vpop.permute.xlu1 %1322  ;;  %v7795_v38 = vpop.permute.xlu0 %1264 }
 0x145   :  { %v1330_v50 = vrot.slane %v1323_v17, 4  ;;  %v1271_v27 = vrot.slane %v7795_v38, 4 }
 0x148   :  { %v1440_v55 = vpop.permute.xlu1 %1439  ;;  %v7797_v0 = vpop.permute.xlu0 %1382 }
 0x149   :  { %v1447_v29 = vrot.slane %v1440_v55, 4  ;;  %v1389_v5 = vrot.slane %v7797_v0, 4 }
 0x14c   :  { %v1558_v12 = vpop.permute.xlu1 %1557  ;;  %v7799_v51 = vpop.permute.xlu0 %1500 }
 0x14d   :  { %v1565_v28 = vrot.slane %v1558_v12, 4  ;;  %v1507_v33 = vrot.slane %v7799_v51, 4 }
 0x150   :  { %v1676_v23 = vpop.permute.xlu1 %1675  ;;  %v7801_v3 = vpop.permute.xlu0 %1618 }
 0x151   :  { %v1683_v46 = vrot.slane %v1676_v23, 4  ;;  %v1625_v59 = vrot.slane %v7801_v3, 4 }
 0x154   :  { %v7803_v56 = vpop.permute.xlu0 %1324  ;;  %v1263_v22 = vpop.permute.xlu1 %1262 }
 0x155   :  { %v1331_v1 = vrot.slane %v7803_v56, 4  ;;  %v1270_v2 = vrot.slane %v1263_v22, 4 }
 0x157   :  { %v1334_v9 = vsel %vm1274_vm9, %v1330_v50, %v1331_v1  ;;  %v1275_v39 = vsel %vm1274_vm9, %v1270_v2, %v1271_v27 }
 0x158   :  { %v1335_v4 = vsel %vm599_vm1, %v1323_v17, %v1334_v9  ;;  %v1277_v61 = vsel %vm1276_vm10, %v1263_v22, %v1275_v39  ;;  %v1442_v40 = vpop.permute.xlu0 %1441  ;;  %v1381_v20 = vpop.permute.xlu1 %1380 }
 0x159   :  { %1343 = vst [vmem:[#allocation5 + $0x18] sm:$0x33] %v1335_v4  ;;  %1285 = vst [vmem:[#allocation5] sm:$0xcc] %v1277_v61  ;;  %v1448_v49 = vrot.slane %v1442_v40, 4  ;;  %v1388_v31 = vrot.slane %v1381_v20, 4 }
 0x15b   :  { %v1451_v36 = vsel %vm1274_vm9, %v1447_v29, %v1448_v49  ;;  %v1392_v25 = vsel %vm1274_vm9, %v1388_v31, %v1389_v5 }
 0x15c   :  { %v1453_v34 = vsel %vm1452_vm11, %v1440_v55, %v1451_v36  ;;  %v1394_v15 = vsel %vm1393_vm12, %v1381_v20, %v1392_v25  ;;  %v7820_v32 = vpop.permute.xlu0 %1559  ;;  %v1499_v8 = vpop.permute.xlu1 %1498 }
 0x15d   :  { %1461 = vst [vmem:[#allocation5 + $0x30] sm:$0x33] %v1453_v34  ;;  %1402 = vst [vmem:[#allocation5 + $0x18] sm:$0xcc] %v1394_v15  ;;  %v1566_v60 = vrot.slane %v7820_v32, 4  ;;  %v1506_v41 = vrot.slane %v1499_v8, 4 }
 0x15f   :  { %v1569_v24 = vsel %vm1274_vm9, %v1565_v28, %v1566_v60  ;;  %v1510_v13 = vsel %vm1274_vm9, %v1506_v41, %v1507_v33 }
 0x160   :  { %v1571_v62 = vsel %vm1570_vm13, %v1558_v12, %v1569_v24  ;;  %v1512_v26 = vsel %vm1511_vm14, %v1499_v8, %v1510_v13  ;;  %v7830_v37 = vpop.permute.xlu0 %1677  ;;  %v1617_v43 = vpop.permute.xlu1 %1616 }
 0x161   :  { %1579 = vst [vmem:[#allocation5 + $0x48] sm:$0x33] %v1571_v62  ;;  %1520 = vst [vmem:[#allocation5 + $0x30] sm:$0xcc] %v1512_v26  ;;  %v1684_v10 = vrot.slane %v7830_v37, 4  ;;  %v1624_v47 = vrot.slane %v1617_v43, 4 }
 0x163   :  { %v1687_v54 = vsel %vm1274_vm9, %v1683_v46, %v1684_v10  ;;  %v1628_v16 = vsel %vm1274_vm9, %v1624_v47, %v1625_v59 }
 0x164   :  { %v1689_v45 = vsel %vm1688_vm15, %v1676_v23, %v1687_v54  ;;  %v1630_v17 = vsel %vm1629_vm0, %v1617_v43, %v1628_v16  ;;  %v7840_v55 = vpop.permute.xlu0 %1326  ;;  %v1269_v12 = vpop.permute.xlu1 %1268  ;;  %v6927_v22 = vld [vmem:[#allocation5 + $0x4] ss:$24 sps:$4 sm:$0xff]   ;;  %v6929_v50 = vld [vmem:[#allocation5] ss:$24 sps:$4 sm:$0xff]  }
 0x165   :  { %1697 = vst [vmem:[#allocation5 + $0x60] sm:$0x33] %v1689_v45  ;;  %1638 = vst [vmem:[#allocation5 + $0x48] sm:$0xcc] %v1630_v17  ;;  %v1332_v2 = vrot.slane %v7840_v55, 4  ;;  %1812 = vmatprep.subr.bf16.mxu0 %v6927_v22  ;;  %v1273_v61 = vrot.slane %v1269_v12, 4 }
 0x166   :  { %1813 = vmatpush1.bf16.msra.mxu0 %v6929_v50 }
 0x167   :  { %v1336_v9 = vsel %vm1274_vm9, %v1331_v1, %v1332_v2 }
 0x168   :  { %v1337_v39 = vsel %vm599_vm1, %v7803_v56, %v1336_v9  ;;  %v7846_v4 = vpop.permute.xlu0 %1443  ;;  %v1267_v23 = vpop.permute.xlu1 %1266 }
 0x169   :  { %1344 = vst [vmem:[#allocation5 + $0x20] sm:$0x33] %v1337_v39  ;;  %v1449_v20 = vrot.slane %v7846_v4, 4  ;;  %v1272_v29 = vrot.slane %v1267_v23, 4 }
 0x16b   :  { %v1454_v31 = vsel %vm1274_vm9, %v1448_v49, %v1449_v20  ;;  %v1278_v1 = vsel %vm1274_vm9, %v1271_v27, %v1272_v29  ;;  %v1280_v36 = vsel %vm1274_vm9, %v1272_v29, %v1273_v61 }
 0x16c   :  { %v1455_v56 = vsel %vm1452_vm11, %v1442_v40, %v1454_v31  ;;  %v1279_v25 = vsel %vm1276_vm10, %v7795_v38, %v1278_v1  ;;  %v1281_v34 = vsel %vm1276_vm10, %v1267_v23, %v1280_v36  ;;  %v7860_v15 = vpop.permute.xlu0 %1561  ;;  %v1385_v8 = vpop.permute.xlu1 %1384  ;;  %v6930_v28 = vld [vmem:[#allocation5 + $0x34] ss:$24 sps:$4 sm:$0xff]   ;;  %v6932_v41 = vld [vmem:[#allocation5 + $0x30] ss:$24 sps:$4 sm:$0xff]   ;;  %v1712_v24 = vld [vmem:[#allocation5 + $0x60] sm:$0x33] }
 0x16d   :  { %1462 = vst [vmem:[#allocation5 + $0x38] sm:$0x33] %v1455_v56  ;;  %1286 = vst [vmem:[#allocation5 + $0x8] sm:$0xcc] %v1279_v25  ;;  %v1567_v49 = vrot.slane %v7860_v15, 4  ;;  %v1390_v27 = vrot.slane %v1385_v8, 4  ;;  %1814 = vmatprep.subr.bf16.mxu0 %v6930_v28  ;;  %v6102_v13 = vcombine.high %v1712_v24, %v1712_v24  ;;  %v6101_v40 = vcombine.low %v1712_v24, %v1712_v24 }
 0x16e   :  { %1287 = vst [vmem:[#allocation5 + $0x10] sm:$0xcc] %v1281_v34  ;;  %1815 = vmatpush1.bf16.msra.mxu0 %v6932_v41 }
 0x16f   :  { %v1572_v62 = vsel %vm1274_vm9, %v1566_v60, %v1567_v49  ;;  %v1395_v38 = vsel %vm1274_vm9, %v1389_v5, %v1390_v27  ;;  %6107 = vmatprep.subr.msk.bf16.mxu0 %vm129_vm4, %v6102_v13  ;;  %v1795_v16 = vsel %vm129_vm4, %v6101_v40, 0 }
 0x170   :  { %v1573_v26 = vsel %vm1570_vm13, %v7820_v32, %v1572_v62  ;;  %v1396_v43 = vsel %vm1393_vm12, %v7797_v0, %v1395_v38  ;;  %v7871_v46 = vpop.permute.xlu0 %1679  ;;  %v1503_v47 = vpop.permute.xlu1 %1502  ;;  %v7883_v0 = vld [vmem:[%s10206_s1] sm:$0xf]  ;;  %s7024_s1 = smov 93  }
 0x171   :  { %1580 = vst [vmem:[#allocation5 + $0x50] sm:$0x33] %v1573_v26  ;;  %1403 = vst [vmem:[#allocation5 + $0x20] sm:$0xcc] %v1396_v43  ;;  %v1685_v60 = vrot.slane %v7871_v46, 4  ;;  %v1508_v54 = vrot.slane %v1503_v47, 4 }
 0x172   :  { %1817 = vmatpush1.bf16.msra.mxu0 %v1795_v16 }
 0x173   :  { %v1690_v5 = vsel %vm1274_vm9, %v1684_v10, %v1685_v60  ;;  %v1513_v32 = vsel %vm1274_vm9, %v1507_v33, %v1508_v54 }
 0x174   :  { %v1691_v45 = vsel %vm1688_vm15, %v7830_v37, %v1690_v5  ;;  %v1514_v17 = vsel %vm1511_vm14, %v7799_v51, %v1513_v32  ;;  %v1329_v12 = vpop.permute.xlu0 %1328  ;;  %v1621_v22 = vpop.permute.xlu1 %1620 }
 0x175   :  { %1698 = vst [vmem:[#allocation5 + $0x68] sm:$0x33] %v1691_v45  ;;  %1521 = vst [vmem:[#allocation5 + $0x38] sm:$0xcc] %v1514_v17  ;;  %v1333_v10 = vrot.slane %v1329_v12, 4  ;;  %v1626_v50 = vrot.slane %v1621_v22, 4  ;;  %6108 = vmatmul.mubr.msk.bf16.vlgmr.msra.gmra.mrb[0].mxu0 %vm1790_vm2, %v7883_v0 }
 0x176   :  { %1885 = vmatprep.mubr.bf16.mxu0 %v10236_v44  ;;  %v80_v17 = vld [vmem:[%s10212_s7 + $0x180] sm:$0xff]  ;;  %v81_v12 = vld [vmem:[%s10212_s7 + $0x188] sm:$0xff] }
 0x177   :  { %v1338_v33 = vsel %vm1274_vm9, %v1332_v2, %v1333_v10  ;;  %v1631_v9 = vsel %vm1274_vm9, %v1625_v59, %v1626_v50 }
 0x178   :  { %v1339_v51 = vsel %vm599_vm1, %v7840_v55, %v1338_v33  ;;  %v1632_v37 = vsel %vm1629_vm0, %v7801_v3, %v1631_v9  ;;  %v1446_v39 = vpop.permute.xlu0 %1445  ;;  %v1387_v23 = vpop.permute.xlu1 %1386  ;;  %v6935_v61 = vld [vmem:[#allocation5 + $0xc] ss:$24 sps:$4 sm:$0xff]   ;;  %v6937_v29 = vld [vmem:[#allocation5 + $0x8] ss:$24 sps:$4 sm:$0xff]  }
 0x179   :  { %1345 = vst [vmem:[#allocation5 + $0x28] sm:$0x33] %v1339_v51  ;;  %1639 = vst [vmem:[#allocation5 + $0x50] sm:$0xcc] %v1632_v37  ;;  %v1450_v31 = vrot.slane %v1446_v39, 4  ;;  %v1391_v2 = vrot.slane %v1387_v23, 4  ;;  %1853 = vmatprep.subr.bf16.mxu0 %v6935_v61 }
 0x17a   :  { %1854 = vmatpush1.bf16.msra.mxu0 %v6937_v29  ;;  %v64_v33 = vld [vmem:[%s10212_s7 + $0x100] sm:$0xff]  ;;  %v65_v9 = vld [vmem:[%s10212_s7 + $0x108] sm:$0xff]  ;;  %v82_v51 = vld [vmem:[%s10212_s7 + $0x190] sm:$0xff] }
 0x17b   :  { %v1456_v59 = vsel %vm1274_vm9, %v1449_v20, %v1450_v31  ;;  %v1397_v1 = vsel %vm1274_vm9, %v1390_v27, %v1391_v2  ;;  %v83_v37 = vld [vmem:[%s10212_s7 + $0x198] sm:$0xff]  ;;  %v7944_v23 = vpack.c.bf16 %v65_v9, %v64_v33  ;;  %v66_v29 = vld [vmem:[%s10212_s7 + $0x110] sm:$0xff]  ;;  %v84_v2 = vld [vmem:[%s10212_s7 + $0x1a0] sm:$0xff] }
 0x17c   :  { %v1457_v55 = vsel %vm1452_vm11, %v7846_v4, %v1456_v59  ;;  %v1398_v3 = vsel %vm1393_vm12, %v1385_v8, %v1397_v1  ;;  %v1564_v36 = vpop.permute.xlu0 %1563  ;;  %v1505_v56 = vpop.permute.xlu1 %1504  ;;  %v1713_v24 = vld [vmem:[#allocation5 + $0x68] sm:$0x33]  ;;  %v7947_v61 = vpack.c.bf16 %v83_v37, %v82_v51  ;;  %v67_v31 = vld [vmem:[%s10212_s7 + $0x118] sm:$0xff] }
 0x17d   :  { %1463 = vst [vmem:[#allocation5 + $0x40] sm:$0x33] %v1457_v55  ;;  %1404 = vst [vmem:[#allocation5 + $0x28] sm:$0xcc] %v1398_v3  ;;  %v1568_v25 = vrot.slane %v1564_v36, 4  ;;  %v1509_v34 = vrot.slane %v1505_v56, 4  ;;  %v6104_v26 = vcombine.high %v1713_v24, %v1713_v24  ;;  %v6103_v43 = vcombine.low %v1713_v24, %v1713_v24 }
 0x17e   :  { %v85_v59 = vld [vmem:[%s10212_s7 + $0x1a8] sm:$0xff]  ;;  %v7964_v1 = vpack.c.bf16 %v67_v31, %v66_v29  ;;  %v46_v3 = vld [vmem:[%s10212_s7 + $0x70] sm:$0xff]  ;;  %v68_v36 = vld [vmem:[%s10212_s7 + $0x120] sm:$0xff] }
 0x17f   :  { %v1574_v28 = vsel %vm1274_vm9, %v1567_v49, %v1568_v25  ;;  %v1515_v41 = vsel %vm1274_vm9, %v1508_v54, %v1509_v34  ;;  %v1801_v16 = vsel %vm129_vm4, %v6103_v43, 0  ;;  %v7967_v55 = vpack.c.bf16 %v85_v59, %v84_v2  ;;  %v69_v25 = vld [vmem:[%s10212_s7 + $0x128] sm:$0xff]  ;;  %v112_v24 = vld [vmem:[%s10212_s7 + $0x280] sm:$0xff]  ;;  %v94_v33 = vld [vmem:[%s10212_s7 + $0x1f0] sm:$0xff] }
 0x180   :  { %v1575_v20 = vsel %vm1570_vm13, %v7860_v15, %v1574_v28  ;;  %v1516_v27 = vsel %vm1511_vm14, %v1503_v47, %v1515_v41  ;;  %v1682_v13 = vpop.permute.xlu0 %1681  ;;  %v1623_v4 = vpop.permute.xlu1 %1622  ;;  %v6938_v40 = vld [vmem:[#allocation5 + $0x3c] ss:$24 sps:$4 sm:$0xff]   ;;  %v6940_v8 = vld [vmem:[#allocation5 + $0x38] ss:$24 sps:$4 sm:$0xff]   ;;  %v7985_v34 = vpack.c.bf16 %v69_v25, %v68_v36  ;;  %v97_v2 = vld [vmem:[%s10212_s7 + $0x208] sm:$0xff] }
 0x181   :  { %1581 = vst [vmem:[#allocation5 + $0x58] sm:$0x33] %v1575_v20  ;;  %1522 = vst [vmem:[#allocation5 + $0x40] sm:$0xcc] %v1516_v27  ;;  %v1686_v62 = vrot.slane %v1682_v13, 4  ;;  %v1627_v38 = vrot.slane %v1623_v4, 4  ;;  %1855 = vmatprep.subr.bf16.mxu0 %v6938_v40 }
 0x182   :  { %1856 = vmatpush1.bf16.msra.mxu0 %v6940_v8  ;;  %v86_v28 = vld [vmem:[%s10212_s7 + $0x1b0] sm:$0xff]  ;;  %v87_v41 = vld [vmem:[%s10212_s7 + $0x1b8] sm:$0xff]  ;;  %v113_v27 = vld [vmem:[%s10212_s7 + $0x288] sm:$0xff] }
 0x183   :  { %v1692_v49 = vsel %vm1274_vm9, %v1685_v60, %v1686_v62  ;;  %v1633_v54 = vsel %vm1274_vm9, %v1626_v50, %v1627_v38  ;;  %6109 = vmatprep.subr.msk.bf16.mxu0 %vm129_vm4, %v6104_v26  ;;  %v7929_v50 = vpack.c.bf16 %v81_v12, %v80_v17  ;;  %v7998_v20 = vpack.c.bf16 %v87_v41, %v86_v28  ;;  %v70_v13 = vld [vmem:[%s10212_s7 + $0x130] sm:$0xff]  ;;  %v71_v4 = vld [vmem:[%s10212_s7 + $0x138] sm:$0xff]  ;;  %v88_v62 = vld [vmem:[%s10212_s7 + $0x1c0] sm:$0xff] }
 0x184   :  { %v1693_v15 = vsel %vm1688_vm15, %v7871_v46, %v1692_v49  ;;  %v1634_v47 = vsel %vm1629_vm0, %v1621_v22, %v1633_v54  ;;  %v6943_v5 = vld [vmem:[#allocation5 + $0x14] ss:$24 sps:$4 sm:$0xff]   ;;  %v6945_v32 = vld [vmem:[#allocation5 + $0x10] ss:$24 sps:$4 sm:$0xff]   ;;  %v8009_v40 = vpack.c.bf16 %v113_v27, %v112_v24  ;;  %v8011_v8 = vpack.c.bf16 %v71_v4, %v70_v13  ;;  %v72_v43 = vld [vmem:[%s10212_s7 + $0x140] sm:$0xff] }
 0x185   :  { %1699 = vst [vmem:[#allocation5 + $0x70] sm:$0x33] %v1693_v15  ;;  %1640 = vst [vmem:[#allocation5 + $0x58] sm:$0xcc] %v1634_v47  ;;  %v89_v38 = vld [vmem:[%s10212_s7 + $0x1c8] sm:$0xff]  ;;  %v90_v15 = vld [vmem:[%s10212_s7 + $0x1d0] sm:$0xff] }
 0x186   :  { %1858 = vmatpush1.bf16.msra.mxu0 %v1801_v16  ;;  %10298 = vst [vmem:[#allocation12_spill] sm:$0xff] %v8009_v40  ;;  %v8022_v26 = vpack.c.bf16 %v89_v38, %v88_v62  ;;  %v73_v49 = vld [vmem:[%s10212_s7 + $0x148] sm:$0xff]  ;;  %v91_v47 = vld [vmem:[%s10212_s7 + $0x1d8] sm:$0xff]  ;;  %v76_v12 = vld [vmem:[%s10212_s7 + $0x160] sm:$0xff] }
 0x187   :  { %1894 = vmatprep.subr.bf16.mxu0 %v6943_v5  ;;  %v8030_v54 = vpack.c.bf16 %v73_v49, %v72_v43  ;;  %v8039_v16 = vpack.c.bf16 %v91_v47, %v90_v15  ;;  %v74_v5 = vld [vmem:[%s10212_s7 + $0x150] sm:$0xff]  ;;  %v95_v9 = vld [vmem:[%s10212_s7 + $0x1f8] sm:$0xff]  ;;  %v96_v31 = vld [vmem:[%s10212_s7 + $0x200] sm:$0xff] }
 0x188   :  { %v8075_v51 = vpack.c.bf16 %v95_v9, %v94_v33  ;;  %v78_v37 = vld [vmem:[%s10212_s7 + $0x170] sm:$0xff]  ;;  %v8102_v36 = vpack.c.bf16 %v97_v2, %v96_v31  ;;  %v99_v24 = vld [vmem:[%s10212_s7 + $0x218] sm:$0xff]  ;;  %v116_v4 = vld [vmem:[%s10212_s7 + $0x2a0] sm:$0xff] }
 0x189   :  { %6110 = vmatmul.mubr.msk.bf16.vlgmr.msra.gmra.mrb[4].mxu0 %vm1790_vm2, %v7883_v0  ;;  %v114_v59 = vld [vmem:[%s10212_s7 + $0x290] sm:$0xff]  ;;  %v117_v62 = vld [vmem:[%s10212_s7 + $0x2a8] sm:$0xff]  ;;  %v100_v47 = vld [vmem:[%s10212_s7 + $0x220] sm:$0xff] }
 0x18a   :  { %1895 = vmatpush1.bf16.msra.mxu0 %v6945_v32  ;;  %1926 = vmatprep.mubr.bf16.mxu0 %v10236_v44  ;;  %v75_v32 = vld [vmem:[%s10212_s7 + $0x158] sm:$0xff]  ;;  %10300 = vst [vmem:[#allocation14_spill] sm:$0xff] %v8075_v51  ;;  %10302 = vst [vmem:[#allocation16_spill] sm:$0xff] %v8102_v36  ;;  %v98_v41 = vld [vmem:[%s10212_s7 + $0x210] sm:$0xff]  ;;  %v8130_v15 = vpack.c.bf16 %v117_v62, %v116_v4 }
 0x18b   :  { %v8125_v43 = vpack.c.bf16 %v99_v24, %v98_v41  ;;  %v103_v33 = vld [vmem:[%s10212_s7 + $0x238] sm:$0xff]  ;;  %v120_v9 = vld [vmem:[%s10212_s7 + $0x2c0] sm:$0xff] }
 0x18c   :  { %v6946_v60 = vld [vmem:[#allocation5 + $0x44] ss:$24 sps:$4 sm:$0xff]   ;;  %v6948_v46 = vld [vmem:[#allocation5 + $0x40] ss:$24 sps:$4 sm:$0xff]   ;;  %v1714_v45 = vld [vmem:[#allocation5 + $0x70] sm:$0x33] }
 0x18d   :  { %1896 = vmatprep.subr.bf16.mxu0 %v6946_v60  ;;  %v6106_v22 = vcombine.high %v1714_v45, %v1714_v45  ;;  %v6105_v10 = vcombine.low %v1714_v45, %v1714_v45  ;;  %v8048_v60 = vpack.c.bf16 %v75_v32, %v74_v5  ;;  %v93_v45 = vld [vmem:[%s10212_s7 + $0x1e8] sm:$0xff]  ;;  %10304 = vst [vmem:[#allocation18_spill] sm:$0xff] %v8125_v43  ;;  %10305 = vst [vmem:[#allocation19_spill] sm:$0xff] %v8130_v15  ;;  %v118_v32 = vld [vmem:[%s10212_s7 + $0x2b0] sm:$0xff] }
 0x18e   :  { %1897 = vmatpush1.bf16.msra.mxu0 %v6948_v46  ;;  %v92_v46 = vld [vmem:[%s10212_s7 + $0x1e0] sm:$0xff]  ;;  %v101_v5 = vld [vmem:[%s10212_s7 + $0x228] sm:$0xff]  ;;  %v123_v41 = vld [vmem:[%s10212_s7 + $0x2d8] sm:$0xff] }
 0x18f   :  { %6111 = vmatprep.subr.msk.bf16.mxu0 %vm129_vm4, %v6106_v22  ;;  %v1807_v39 = vsel %vm129_vm4, %v6105_v10, 0  ;;  %v8057_v17 = vpack.c.bf16 %v93_v45, %v92_v46  ;;  %v77_v22 = vld [vmem:[%s10212_s7 + $0x168] sm:$0xff]  ;;  %v119_v46 = vld [vmem:[%s10212_s7 + $0x2b8] sm:$0xff]  ;;  %v8145_v45 = vpack.c.bf16 %v101_v5, %v100_v47  ;;  %v104_v2 = vld [vmem:[%s10212_s7 + $0x240] sm:$0xff]  ;;  %vm135_vm4 = vcmask 150528  }
 0x190   :  { %v8066_v10 = vpack.c.bf16 %v77_v22, %v76_v12  ;;  %v8148_v12 = vpack.c.bf16 %v119_v46, %v118_v32  ;;  %v102_v22 = vld [vmem:[%s10212_s7 + $0x230] sm:$0xff]  ;;  %v107_v4 = vld [vmem:[%s10212_s7 + $0x258] sm:$0xff]  ;;  %v124_v62 = vld [vmem:[%s10212_s7 + $0x2e0] sm:$0xff] }
 0x191   :  { %10306 = vst [vmem:[#allocation20_spill] sm:$0xff] %v8145_v45  ;;  %v108_v46 = vld [vmem:[%s10212_s7 + $0x260] sm:$0xff] }
 0x192   :  { %1899 = vmatpush1.bf16.msra.mxu0 %v1807_v39  ;;  %10299 = vst [vmem:[#allocation13_spill] sm:$0xff] %v8066_v10  ;;  %v79_v39 = vld [vmem:[%s10212_s7 + $0x178] sm:$0xff]  ;;  %10307 = vst [vmem:[#allocation21_spill] sm:$0xff] %v8148_v12 }
 0x193   :  { %6576 = vmatprep.subr.bf16.mxu0 %v7929_v50  ;;  %v8085_v29 = vpack.c.bf16 %v79_v39, %v78_v37  ;;  %v121_v37 = vld [vmem:[%s10212_s7 + $0x2c8] sm:$0xff]  ;;  %v8163_v39 = vpack.c.bf16 %v103_v33, %v102_v22 }
 0x194   :  { %v8166_v31 = vpack.c.bf16 %v121_v37, %v120_v9  ;;  %v109_v22 = vld [vmem:[%s10212_s7 + $0x268] sm:$0xff]  ;;  %v126_v37 = vld [vmem:[%s10212_s7 + $0x2f0] sm:$0xff] }
 0x195   :  { %6112 = vmatmul.mubr.msk.bf16.vlgmr.msra.gmra.mrb[8].mxu0 %vm1790_vm2, %v7883_v0  ;;  %v47_v0 = vld [vmem:[%s10212_s7 + $0x78] sm:$0xff]  ;;  %10301 = vst [vmem:[#allocation15_spill] sm:$0xff] %v8085_v29  ;;  %10308 = vst [vmem:[#allocation22_spill] sm:$0xff] %v8163_v39  ;;  %vm2714_vm2 = vcmask 588800  }
 0x196   :  { %6578 = vmatpush3.bf16.msra.mxu0 %v7944_v23  ;;  %v7980_v56 = vpack.c.bf16 %v47_v0, %v46_v3  ;;  %v115_v3 = vld [vmem:[%s10212_s7 + $0x298] sm:$0xff]  ;;  %10309 = vst [vmem:[#allocation23_spill] sm:$0xff] %v8166_v31 }
 0x197   :  { %6580 = vmatprep.subr.bf16.mxu0 %v7947_v61  ;;  %v8106_v28 = vpack.c.bf16 %v115_v3, %v114_v59  ;;  %v105_v59 = vld [vmem:[%s10212_s7 + $0x248] sm:$0xff]  ;;  %v122_v3 = vld [vmem:[%s10212_s7 + $0x2d0] sm:$0xff] }
 0x198   :  { %10297 = vst [vmem:[#allocation11_spill] sm:$0xff] %v7980_v56  ;;  %6574 = vmatpush3.bf16.msra.mxu1 %v7980_v56  ;;  %v8181_v24 = vpack.c.bf16 %v105_v59, %v104_v2  ;;  %v127_v2 = vld [vmem:[%s10212_s7 + $0x2f8] sm:$0xff] }
 0x199   :  { %6608 = vmatprep.subr.bf16.mxu1 %v8009_v40  ;;  %10303 = vst [vmem:[#allocation17_spill] sm:$0xff] %v8106_v28 }
 0x19a   :  { %6582 = vmatpush3.bf16.msra.mxu0 %v7964_v1  ;;  %10310 = vst [vmem:[#allocation24_spill] sm:$0xff] %v8181_v24 }
 0x19b   :  { %6584 = vmatprep.subr.bf16.mxu0 %v7967_v55 }
 0x19e   :  { %6586 = vmatpush3.bf16.msra.mxu0 %v7985_v34 }
 0x19f   :  { %6588 = vmatprep.subr.bf16.mxu0 %v7998_v20 }
 0x1a2   :  { %6590 = vmatpush3.bf16.msra.mxu0 %v8011_v8 }
 0x1a3   :  { %6592 = vmatprep.subr.bf16.mxu0 %v8022_v26 }
 0x1a6   :  { %6594 = vmatpush3.bf16.msra.mxu0 %v8030_v54 }
 0x1a7   :  { %6596 = vmatprep.subr.bf16.mxu0 %v8039_v16 }
 0x1aa   :  { %6598 = vmatpush3.bf16.msra.mxu0 %v8048_v60 }
 0x1ab   :  { %6600 = vmatprep.subr.bf16.mxu0 %v8057_v17 }
 0x1ae   :  { %6602 = vmatpush3.bf16.msra.mxu0 %v8066_v10 }
 0x1af   :  { %6604 = vmatprep.subr.bf16.mxu0 %v8075_v51 }
 0x1b2   :  { %6606 = vmatpush3.bf16.msra.mxu0 %v8085_v29 }
 0x248   :  { %v8100_v0 = vpop.f32.mrb[0].mxu0 }
 0x249   :  { %v8104_v25 = vpop.f32.mrb[1].mxu0  ;;  %v1935_v49 = vmul.f32 %v8100_v0, %v8100_v0 }
 0x24a   :  { %v1936_v27 = vmul.f32 %v8104_v25, %v8104_v25  ;;  %v1850_v13 = vpop.f32.mrb[2].mxu0  ;;  %2005 = vmatprep.mubr.f32.mxu1 %v8104_v25 }
 0x24b   :  { %v1851_v38 = vpop.f32.mrb[3].mxu0  ;;  %2006 = vmatmul.mubr.f32.vlgmr.msra.gmra.mrb[0].mxu1 %v8100_v0  ;;  %v106_v13 = vld [vmem:[%s10212_s7 + $0x250] sm:$0xff] }
 0x24c   :  { %2010 = vmatprep.mubr.f32.mxu1 %v1936_v27  ;;  %6610 = vmatpush3.bf16.msra.mxu1 %v8102_v36  ;;  %v8184_v27 = vpack.c.bf16 %v123_v41, %v122_v3  ;;  %v125_v38 = vld [vmem:[%s10212_s7 + $0x2e8] sm:$0xff]  ;;  %v8201_v47 = vpack.c.bf16 %v107_v4, %v106_v13  ;;  %v8225_v3 = vpack.c.bf16 %v109_v22, %v108_v46  ;;  %v110_v4 = vld [vmem:[%s10212_s7 + $0x270] sm:$0xff] }
 0x24d   :  { %6612 = vmatprep.subr.bf16.mxu1 %v8106_v28  ;;  %v8206_v32 = vpack.c.bf16 %v125_v38, %v124_v62  ;;  %v8230_v13 = vpack.c.bf16 %v127_v2, %v126_v37  ;;  %v111_v62 = vld [vmem:[%s10212_s7 + $0x278] sm:$0xff]  ;;  %s10289_s7 = smov 21  }
 0x24e   :  { %10311 = vst [vmem:[#allocation25_spill] sm:$0xff] %v8184_v27  ;;  %10312 = vst [vmem:[#allocation26_spill] sm:$0xff] %v8201_v47  ;;  %v8239_v38 = vpack.c.bf16 %v111_v62, %v110_v4 }
 0x24f   :  { %2011 = vmatmul.mubr.f32.gmra.mrb[2].mxu1 %v1935_v49  ;;  %10313 = vst [vmem:[#allocation27_spill] sm:$0xff] %v8206_v32  ;;  %10314 = vst [vmem:[#allocation28_spill] sm:$0xff] %v8225_v3 }
 0x250   :  { %6614 = vmatpush3.bf16.msra.mxu1 %v8125_v43  ;;  %10315 = vst [vmem:[#allocation29_spill] sm:$0xff] %v8230_v13  ;;  %10316 = vst [vmem:[#allocation30_spill] sm:$0xff] %v8239_v38 }
 0x251   :  { %6616 = vmatprep.subr.bf16.mxu1 %v8130_v15 }
 0x254   :  { %6618 = vmatpush3.bf16.msra.mxu1 %v8145_v45 }
 0x255   :  { %6620 = vmatprep.subr.bf16.mxu1 %v8148_v12 }
 0x258   :  { %6622 = vmatpush3.bf16.msra.mxu1 %v8163_v39 }
 0x259   :  { %6624 = vmatprep.subr.bf16.mxu1 %v8166_v31 }
 0x25c   :  { %v8198_v49 = vpop.f32.mrb[4].mxu0  ;;  %6626 = vmatpush3.bf16.msra.mxu1 %v8181_v24 }
 0x25d   :  { %v8203_v5 = vpop.f32.mrb[5].mxu0  ;;  %6628 = vmatprep.subr.bf16.mxu1 %v8184_v27  ;;  %v1937_v41 = vmul.f32 %v8198_v49, %v8198_v49 }
 0x25e   :  { %v1938_v33 = vmul.f32 %v8203_v5, %v8203_v5  ;;  %v1891_v9 = vpop.f32.mrb[6].mxu0  ;;  %2080 = vmatprep.mubr.f32.mxu0 %v8203_v5 }
 0x25f   :  { %v1892_v59 = vpop.f32.mrb[7].mxu0  ;;  %2081 = vmatmul.mubr.f32.vlgmr.msra.gmra.mrb[12].mxu0 %v8198_v49 }
 0x260   :  { %2085 = vmatprep.mubr.f32.mxu0 %v1938_v33  ;;  %6630 = vmatpush3.bf16.msra.mxu1 %v8201_v47 }
 0x261   :  { %6632 = vmatprep.subr.bf16.mxu1 %v8206_v32 }
 0x263   :  { %2086 = vmatmul.mubr.f32.gmra.mrb[14].mxu0 %v1937_v41 }
 0x264   :  { %6634 = vmatpush3.bf16.msra.mxu1 %v8225_v3  ;;  %2769 = vmatprep.mubr.bf16.mxu0 %v10236_v44 }
 0x265   :  { %6636 = vmatprep.subr.bf16.mxu1 %v8230_v13 }
 0x268   :  { %v8243_v46 = vpop.f32.mrb[8].mxu0  ;;  %6638 = vmatpush3.bf16.msra.mxu1 %v8239_v38 }
 0x269   :  { %v8246_v22 = vpop.f32.mrb[9].mxu0  ;;  %v1939_v2 = vmul.f32 %v8243_v46, %v8243_v46 }
 0x26a   :  { %v1940_v33 = vmul.f32 %v8246_v22, %v8246_v22  ;;  %v1932_v9 = vpop.f32.mrb[10].mxu0  ;;  %2155 = vmatprep.mubr.f32.mxu1 %v8246_v22 }
 0x26b   :  { %v1933_v37 = vpop.f32.mrb[11].mxu0  ;;  %2156 = vmatmul.mubr.f32.vlgmr.msra.gmra.mrb[4].mxu1 %v8243_v46 }
 0x26c   :  { %2160 = vmatprep.mubr.f32.mxu1 %v1940_v33 }
 0x26f   :  { %2161 = vmatmul.mubr.f32.gmra.mrb[6].mxu1 %v1939_v2 }
 0x270   :  { %2851 = vmatprep.mubr.bf16.mxu1 %v10236_v44 }
 0x31e   :  { %v6233_v59 = vpop.f32.mrb[0].mxu1 }
 0x31f   :  { %v6234_v41 = vpop.f32.mrb[1].mxu1 }
 0x320   :  { %v6235_v4 = vadd.f32 %v6234_v41, %v6233_v59 }
 0x322   :  { %v6236_v62 = vpop.f32.mrb[2].mxu1 }
 0x323   :  { %v6237_v38 = vpop.f32.mrb[3].mxu1 }
 0x324   :  { %v6238_v13 = vadd.f32 %v6237_v38, %v6236_v62 }
 0x332   :  { %v6271_v3 = vpop.f32.mrb[12].mxu0 }
 0x333   :  { %v6272_v9 = vpop.f32.mrb[13].mxu0 }
 0x334   :  { %v6273_v32 = vadd.f32 %v6272_v9, %v6271_v3  ;;  %v8276_v3 = vsub.s32 1, %v7124_v11  ;;  %v2216_v9 = vsub.s32 2, %v7124_v11 }
 0x336   :  { %v2083_v47 = vadd.f32 %v6273_v32, %v6235_v4  ;;  %v6274_v37 = vpop.f32.mrb[14].mxu0  ;;  %v2170_v32 = vld [vmem:[%s10209_s4] sm:$0xff]  ;;  %10319 = vst [vmem:[#allocation32_spill] sm:$0xff] %v8276_v3 }
 0x337   :  { %v6275_v27 = vpop.f32.mrb[15].mxu0 }
 0x338   :  { %v6276_v24 = vadd.f32 %v6275_v27, %v6274_v37  ;;  %v2220_v37 = vsub.s32 3, %v7124_v11 }
 0x33a   :  { %v2088_v33 = vadd.f32 %v6276_v24, %v6238_v13 }
 0x33e   :  { %v6309_v31 = vpop.f32.mrb[4].mxu1 }
 0x33f   :  { %v6310_v39 = vpop.f32.mrb[5].mxu1 }
 0x340   :  { %v6311_v12 = vadd.f32 %v6310_v39, %v6309_v31 }
 0x342   :  { %v2158_v2 = vadd.f32 %v6311_v12, %v2083_v47  ;;  %v6312_v45 = vpop.f32.mrb[6].mxu1  ;;  %v2174_v12 = vld [vmem:[%s10210_s5] sm:$0xff]  ;;  %v8273_v47 = vsub.s32 0, %v7124_v11 }
 0x343   :  { %v6313_v44 = vpop.f32.mrb[7].mxu1 }
 0x344   :  { %v2166_v15 = vmul.f32 0.001953125, %v2158_v2  ;;  %v6314_v43 = vadd.f32 %v6313_v44, %v6312_v45  ;;  %v10317_v44 = vmov 0   ;;  %10318 = vst [vmem:[#allocation31_spill] sm:$0xff] %v8273_v47 }
 0x345   :  { %138 = vst.msk [vmem:[#allocation3 + $0x18] sm:$0xf] %vm137_vm3, %v10317_v44  ;;  %140 = vst.msk [vmem:[#allocation4 + $0x18] sm:$0xf] %vm137_vm3, %v10317_v44 }
 0x346   :  { %v2163_v59 = vadd.f32 %v6314_v43, %v2088_v33  ;;  %v2168_v41 = vmul.f32 %v2166_v15, %v2166_v15  ;;  %136 = vst.msk [vmem:[#allocation3] sm:$0xf] %vm135_vm4, %v10317_v44  ;;  %139 = vst.msk [vmem:[#allocation4] sm:$0xf] %vm135_vm4, %v10317_v44  ;;  %v2228_v43 = vsub.s32 5, %v7124_v11 }
 0x348   :  { %v2167_v28 = vmul.f32 0.001953125, %v2163_v59 }
 0x34a   :  { %v2169_v38 = vsub.f32 %v2167_v28, %v2168_v41  ;;  %v2224_v28 = vsub.s32 4, %v7124_v11 }
 0x34c   :  { %v2171_v62 = vadd.f32 1e-05, %v2169_v38 }
 0x34e   :  { %6951 = vrsqrt.f32 %v2171_v62 }
 0x358   :  { %v6952_v27 = vpop.eup %6951 }
 0x359   :  { %v2173_v24 = vmul.f32 %v6952_v27, %v2170_v32 }
 0x35b   :  { %2179 = vperm.xlu1 %6901, %v2173_v24   ;;  %v2175_v39 = vmul.f32 %v2173_v24, %v2166_v15  ;;  %v31_v15 = vld [vmem:[%s10211_s6] sm:$0x3f]  ;;  %s7017_s6 = smov 19  }
 0x35c   :  { %v8278_v13 = vrot.slane %v31_v15, %v2224_v28  ;;  %v8280_v4 = vrot.slane %v31_v15, %v2228_v43  ;;  %v8289_v62 = vrot.slane %v31_v15, %v8273_v47  ;;  %v8292_v32 = vrot.slane %v31_v15, %v8276_v3 }
 0x35d   :  { %v2176_v31 = vsub.f32 %v2174_v12, %v2175_v39 }
 0x35e   :  { %10320 = vst [vmem:[#allocation33_spill] sm:$0xff] %v8278_v13  ;;  %10321 = vst [vmem:[#allocation34_spill] sm:$0xff] %v8280_v4 }
 0x35f   :  { %2190 = vperm.xlu0 %6902, %v2176_v31   ;;  %10322 = vst [vmem:[#allocation35_spill] sm:$0xff] %v8289_v62  ;;  %10323 = vst [vmem:[#allocation36_spill] sm:$0xff] %v8292_v32 }
 0x3da   :  { %v2180_v45 = vpop.permute.xlu1 %2179 }
 0x3db   :  { %v2186_v33 = vmul.f32 %v2180_v45, %v8243_v46  ;;  %v2187_v2 = vmul.f32 %v2180_v45, %v8246_v22  ;;  %v2182_v59 = vmul.f32 %v2180_v45, %v8100_v0  ;;  %v2183_v41 = vmul.f32 %v2180_v45, %v8104_v25 }
 0x3dc   :  { %v2184_v27 = vmul.f32 %v2180_v45, %v8198_v49  ;;  %v2185_v24 = vmul.f32 %v2180_v45, %v8203_v5  ;;  %v8296_v0 = vrot.slane %v31_v15, %v2216_v9  ;;  %v8298_v25 = vrot.slane %v31_v15, %v2220_v37 }
 0x3de   :  { %v2191_v38 = vpop.permute.xlu0 %2190  ;;  %10324 = vst [vmem:[#allocation37_spill] sm:$0xff] %v8296_v0  ;;  %10325 = vst [vmem:[#allocation38_spill] sm:$0xff] %v8298_v25 }
 0x3df   :  { %v2197_v12 = vadd.f32 %v2191_v38, %v2186_v33  ;;  %v2198_v39 = vadd.f32 %v2191_v38, %v2187_v2  ;;  %v2193_v46 = vadd.f32 %v2191_v38, %v2182_v59  ;;  %v2194_v31 = vadd.f32 %v2191_v38, %v2183_v41 }
 0x3e0   :  { %v2195_v22 = vadd.f32 %v2191_v38, %v2184_v27  ;;  %v2196_v28 = vadd.f32 %v2191_v38, %v2185_v24 }
 0x3e1   :  { %v2203_v43 = vmax.f32 %v2197_v12, 0.0  ;;  %v2204_v47 = vmax.f32 %v2198_v39, 0.0  ;;  %v2199_v11 = vmax.f32 %v2193_v46, 0.0  ;;  %v2200_v36 = vmax.f32 %v2194_v31, 0.0 }
 0x3e2   :  { %v2201_v3 = vmax.f32 %v2195_v22, 0.0  ;;  %v2202_v29 = vmax.f32 %v2196_v28, 0.0 }
 0x3e3   :  { %v2240_v49 = vmul.f32 %v8278_v13, %v2203_v43  ;;  %v2241_v5 = vmul.f32 %v8280_v4, %v2204_v47  ;;  %v2236_v45 = vmul.f32 %v8289_v62, %v2199_v11  ;;  %v2237_v33 = vmul.f32 %v8292_v32, %v2200_v36 }
 0x3e4   :  { %v2238_v2 = vmul.f32 %v8296_v0, %v2201_v3  ;;  %v2239_v9 = vmul.f32 %v8298_v25, %v2202_v29  ;;  %v10326_v3 = vmov 0 }
 0x3e5   :  { %v6197_v15 = vpack.c.bf16 %v2241_v5, %v2240_v49  ;;  %v6195_v37 = vpack.c.bf16 %v2237_v33, %v2236_v45  ;;  %v10327_v3 = vsel %vm8309_vm8, 4294967295, %v10326_v3 }
 0x3e6   :  { %v6196_v59 = vpack.c.bf16 %v2239_v9, %v2238_v2  ;;  %10328 = vst [vmem:[#allocation39_spill] sm:$0xff] %v10327_v3 }
 0x3e7   :  { %2267 = vrot.lane.b32.xlu0 %v6197_v15, %s7017_s6  ;;  %2263 = vrot.lane.b32.xlu1 %v6195_v37, %s7017_s6 }
 0x3eb   :  { %2265 = vrot.lane.b32.xlu1 %v6196_v59, %s7017_s6 }
 0x459   :  { %v2268_v47 = vpop.permute.xlu0 %2267  ;;  %v2264_v11 = vpop.permute.xlu1 %2263 }
 0x45a   :  { %v2271_v36 = vrot.slane %v2268_v47, 4  ;;  %v2269_v29 = vrot.slane %v2264_v11, 4 }
 0x45c   :  { %2288 = vst.msk [vmem:[#allocation3 + $0x18] sm:$0xf] %vm135_vm4, %v2271_v36  ;;  %v2273_v41 = vsel %vm2272_vm7, %v2269_v29, %v2264_v11 }
 0x45d   :  { %2285 = vst.msk [vmem:[#allocation3] sm:$0xff] %vm8309_vm8, %v2273_v41  ;;  %v2266_v38 = vpop.permute.xlu1 %2265 }
 0x45e   :  { %v2270_v27 = vrot.slane %v2266_v38, 4 }
 0x460   :  { %v2274_v24 = vsel %vm1274_vm9, %v2269_v29, %v2270_v27  ;;  %v2276_v12 = vsel %vm1274_vm9, %v2270_v27, %v2271_v36 }
 0x461   :  { %v8320_v39 = vsel %vm2272_vm7, %v2274_v24, %v2266_v38  ;;  %v8323_v46 = vsel %vm2272_vm7, %v2276_v12, %v2268_v47 }
 0x462   :  { %2286 = vst [vmem:[#allocation3 + $0x8] sm:$0xff] %v8320_v39  ;;  %2287 = vst [vmem:[#allocation3 + $0x10] sm:$0xff] %v8323_v46  ;;  %2306 = vrot.lane.b32.xlu0 %v8320_v39, %s7014_s25 }
 0x463   :  { %v2299_v22 = vld [vmem:[#allocation3 + $0x18] sm:$0xf] }
 0x464   :  { %v2290_v31 = vld [vmem:[#allocation3] sm:$0xff]  ;;  %v2331_v28 = vld [vmem:[#allocation3 + $0x18] sm:$0xf] }
 0x465   :  { %2304 = vrot.lane.b32.xlu1 %v2290_v31, %s7014_s25  ;;  %v2363_v43 = vld [vmem:[#allocation3 + $0x18] sm:$0xf] }
 0x466   :  { %2338 = vrot.lane.b32.xlu0 %v8320_v39, %s6992_s24  ;;  %v2395_v49 = vld [vmem:[#allocation3 + $0x18] sm:$0xf] }
 0x467   :  { %v2427_v5 = vld [vmem:[#allocation3 + $0x18] sm:$0xf] }
 0x468   :  { %v2459_v45 = vld [vmem:[#allocation3 + $0x18] sm:$0xf] }
 0x469   :  { %2336 = vrot.lane.b32.xlu1 %v2290_v31, %s6992_s24  ;;  %v2491_v33 = vld [vmem:[#allocation3 + $0x18] sm:$0xf] }
 0x46a   :  { %2370 = vrot.lane.b32.xlu0 %v8320_v39, %s7004_s14  ;;  %v2523_v2 = vld [vmem:[#allocation3 + $0x18] sm:$0xf] }
 0x46d   :  { %2368 = vrot.lane.b32.xlu1 %v2290_v31, %s7004_s14 }
 0x46e   :  { %2402 = vrot.lane.b32.xlu0 %v8320_v39, %s7015_s26 }
 0x471   :  { %2400 = vrot.lane.b32.xlu1 %v2290_v31, %s7015_s26 }
 0x472   :  { %2434 = vrot.lane.b32.xlu0 %v8320_v39, %s6982_s0 }
 0x475   :  { %2432 = vrot.lane.b32.xlu1 %v2290_v31, %s6982_s0 }
 0x476   :  { %2466 = vrot.lane.b32.xlu0 %v8320_v39, %s7002_s12 }
 0x479   :  { %2464 = vrot.lane.b32.xlu1 %v2290_v31, %s7002_s12 }
 0x47a   :  { %2498 = vrot.lane.b32.xlu0 %v8320_v39, %s7016_s27 }
 0x47d   :  { %2496 = vrot.lane.b32.xlu1 %v2290_v31, %s7016_s27 }
 0x47e   :  { %2530 = vrot.lane.b32.xlu0 %v8320_v39, %s6986_s18 }
 0x481   :  { %2528 = vrot.lane.b32.xlu1 %v2290_v31, %s6986_s18 }
 0x482   :  { %2310 = vrot.lane.b32.xlu0 %v2299_v22, %s7014_s25 }
 0x485   :  { %2342 = vrot.lane.b32.xlu1 %v2331_v28, %s6992_s24 }
 0x486   :  { %2374 = vrot.lane.b32.xlu0 %v2363_v43, %s7004_s14 }
 0x489   :  { %2406 = vrot.lane.b32.xlu1 %v2395_v49, %s7015_s26 }
 0x48a   :  { %2438 = vrot.lane.b32.xlu0 %v2427_v5, %s6982_s0 }
 0x48d   :  { %2470 = vrot.lane.b32.xlu1 %v2459_v45, %s7002_s12 }
 0x48e   :  { %2372 = vrot.lane.b32.xlu0 %v8323_v46, %s7004_s14 }
 0x491   :  { %2308 = vrot.lane.b32.xlu1 %v8323_v46, %s7014_s25 }
 0x492   :  { %2436 = vrot.lane.b32.xlu0 %v8323_v46, %s6982_s0 }
 0x495   :  { %2340 = vrot.lane.b32.xlu1 %v8323_v46, %s6992_s24 }
 0x496   :  { %2500 = vrot.lane.b32.xlu0 %v8323_v46, %s7016_s27 }
 0x499   :  { %2404 = vrot.lane.b32.xlu1 %v8323_v46, %s7015_s26 }
 0x49a   :  { %2502 = vrot.lane.b32.xlu0 %v2491_v33, %s7016_s27 }
 0x49d   :  { %2468 = vrot.lane.b32.xlu1 %v8323_v46, %s7002_s12 }
 0x49e   :  { %2534 = vrot.lane.b32.xlu0 %v2523_v2, %s6986_s18 }
 0x4a1   :  { %2532 = vrot.lane.b32.xlu1 %v8323_v46, %s6986_s18 }
 0x4d4   :  { %v8375_v9 = vpop.permute.xlu0 %2306 }
 0x4d5   :  { %v10256_v59 = vrot.slane %v8375_v9, 4 }
 0x4d7   :  { %v2305_v15 = vpop.permute.xlu1 %2304 }
 0x4d8   :  { %v2312_v37 = vrot.slane %v2305_v15, 4  ;;  %v8378_v47 = vpop.permute.xlu0 %2338 }
 0x4d9   :  { %v10253_v12 = vrot.slane %v8378_v47, 4 }
 0x4da   :  { %v2316_v11 = vsel %vm1274_vm9, %v2312_v37, %v10256_v59 }
 0x4db   :  { %v2337_v36 = vpop.permute.xlu1 %2336  ;;  %v2317_v29 = vsel %vm1276_vm10, %v2305_v15, %v2316_v11 }
 0x4dc   :  { %v2344_v41 = vrot.slane %v2337_v36, 4  ;;  %v8384_v38 = vpop.permute.xlu0 %2370  ;;  %v6117_v27 = vcombine.high %v2290_v31, %v2317_v29  ;;  %v6116_v24 = vcombine.low %v2290_v31, %v2317_v29 }
 0x4dd   :  { %v10254_v49 = vrot.slane %v8384_v38, 4  ;;  %v10330_v32 = vrot.slane %v8384_v38, 4 }
 0x4de   :  { %2737 = vmatprep.subr.bf16.mxu0 %v6117_v27  ;;  %v2348_v43 = vsel %vm1274_vm9, %v2344_v41, %v10253_v12 }
 0x4df   :  { %v2369_v22 = vpop.permute.xlu1 %2368  ;;  %2738 = vmatpush1.bf16.msra.mxu0 %v6116_v24  ;;  %v2349_v31 = vsel %vm599_vm1, %v2337_v36, %v2348_v43 }
 0x4e0   :  { %v2376_v28 = vrot.slane %v2369_v22, 4  ;;  %v8391_v5 = vpop.permute.xlu0 %2402 }
 0x4e1   :  { %v10255_v41 = vrot.slane %v8391_v5, 4 }
 0x4e2   :  { %v2380_v45 = vsel %vm1274_vm9, %v2376_v28, %v10254_v49 }
 0x4e3   :  { %v2401_v33 = vpop.permute.xlu1 %2400  ;;  %v2381_v2 = vsel %vm1393_vm12, %v2369_v22, %v2380_v45 }
 0x4e4   :  { %v2408_v15 = vrot.slane %v2401_v33, 4  ;;  %v8398_v37 = vpop.permute.xlu0 %2434  ;;  %v6123_v11 = vcombine.high %v2349_v31, %v2381_v2  ;;  %v6122_v29 = vcombine.low %v2349_v31, %v2381_v2 }
 0x4e5   :  { %v10257_v36 = vrot.slane %v8398_v37, 4 }
 0x4e6   :  { %2739 = vmatprep.subr.bf16.mxu0 %v6123_v11  ;;  %v2412_v28 = vsel %vm1274_vm9, %v2408_v15, %v10255_v41 }
 0x4e7   :  { %v2433_v27 = vpop.permute.xlu1 %2432  ;;  %2740 = vmatpush1.bf16.msra.mxu0 %v6122_v29  ;;  %v2413_v45 = vsel %vm1452_vm11, %v2401_v33, %v2412_v28 }
 0x4e8   :  { %v2440_v24 = vrot.slane %v2433_v27, 4  ;;  %v8405_v43 = vpop.permute.xlu0 %2466 }
 0x4e9   :  { %v10260_v15 = vrot.slane %v8405_v43, 4 }
 0x4ea   :  { %v2444_v22 = vsel %vm1274_vm9, %v2440_v24, %v10257_v36 }
 0x4eb   :  { %v2465_v31 = vpop.permute.xlu1 %2464  ;;  %v2445_v2 = vsel %vm1511_vm14, %v2433_v27, %v2444_v22 }
 0x4ec   :  { %v2472_v11 = vrot.slane %v2465_v31, 4  ;;  %v8412_v29 = vpop.permute.xlu0 %2498  ;;  %v6129_v12 = vcombine.high %v2413_v45, %v2445_v2  ;;  %v6128_v49 = vcombine.low %v2413_v45, %v2445_v2 }
 0x4ed   :  { %v10263_v33 = vrot.slane %v8412_v29, 4 }
 0x4ee   :  { %2741 = vmatprep.subr.bf16.mxu0 %v6129_v12  ;;  %v2476_v24 = vsel %vm1274_vm9, %v2472_v11, %v10260_v15 }
 0x4ef   :  { %v2497_v41 = vpop.permute.xlu1 %2496  ;;  %2742 = vmatpush1.bf16.msra.mxu0 %v6128_v49  ;;  %v2477_v22 = vsel %vm1570_vm13, %v2465_v31, %v2476_v24 }
 0x4f0   :  { %v2504_v59 = vrot.slane %v2497_v41, 4  ;;  %v8419_v28 = vpop.permute.xlu0 %2530 }
 0x4f1   :  { %v10262_v49 = vrot.slane %v8419_v28, 4 }
 0x4f2   :  { %v2508_v27 = vsel %vm1274_vm9, %v2504_v59, %v10263_v33 }
 0x4f3   :  { %v2529_v45 = vpop.permute.xlu1 %2528  ;;  %v2509_v12 = vsel %vm1629_vm0, %v2497_v41, %v2508_v27 }
 0x4f4   :  { %v2536_v2 = vrot.slane %v2529_v45, 4  ;;  %v2311_v36 = vpop.permute.xlu0 %2310  ;;  %v6135_v3 = vcombine.high %v2477_v22, %v2509_v12  ;;  %v6134_v4 = vcombine.low %v2477_v22, %v2509_v12  ;;  %v8436_v22 = vld [vmem:[%s10207_s2] sm:$0xf]  ;;  %s7036_s2 = smov 79  }
 0x4f6   :  { %v2540_v11 = vsel %vm1274_vm9, %v2536_v2, %v10262_v49  ;;  %2743 = vmatprep.subr.bf16.mxu0 %v6135_v3  ;;  %v2315_v2 = vrot.slane %v2311_v36, 4 }
 0x4f7   :  { %v2343_v15 = vpop.permute.xlu1 %2342  ;;  %v2541_v13 = vsel %vm1688_vm15, %v2529_v45, %v2540_v11  ;;  %2744 = vmatpush1.bf16.msra.mxu0 %v6134_v4 }
 0x4f8   :  { %v2375_v59 = vpop.permute.xlu0 %2374  ;;  %v6141_v31 = vcombine.high %v2541_v13, %v2541_v13  ;;  %v6140_v24 = vcombine.low %v2541_v13, %v2541_v13 }
 0x4fa   :  { %6146 = vmatprep.subr.msk.bf16.mxu0 %vm1274_vm9, %v6141_v31  ;;  %v2720_v41 = vsel %vm1274_vm9, %v6140_v24, 0  ;;  %v2379_v24 = vrot.slane %v2375_v59, 4  ;;  %v2347_v59 = vrot.slane %v2343_v15, 4 }
 0x4fb   :  { %v2407_v27 = vpop.permute.xlu1 %2406  ;;  %2746 = vmatpush1.bf16.msra.mxu0 %v2720_v41  ;;  %v10329_v41 = vrot.slane %v8375_v9, 4 }
 0x4fc   :  { %v2439_v3 = vpop.permute.xlu0 %2438  ;;  %v2411_v56 = vrot.slane %v2407_v27, 4 }
 0x4fe   :  { %6147 = vmatmul.mubr.msk.bf16.vlgmr.msra.gmra.mrb[16].mxu0 %vm2714_vm2, %v8436_v22 }
 0x4ff   :  { %v8440_v4 = vpop.permute.xlu1 %2470  ;;  %2810 = vmatprep.mubr.bf16.mxu0 %v10317_v44 }
 0x500   :  { %v2373_v13 = vpop.permute.xlu0 %2372 }
 0x501   :  { %v2378_v45 = vrot.slane %v2373_v13, 4 }
 0x503   :  { %v2309_v12 = vpop.permute.xlu1 %2308  ;;  %v2382_v62 = vsel %vm1274_vm9, %v10330_v32, %v2378_v45  ;;  %v2384_v36 = vsel %vm1274_vm9, %v2378_v45, %v2379_v24 }
 0x504   :  { %v2314_v11 = vrot.slane %v2309_v12, 4  ;;  %v2437_v31 = vpop.permute.xlu0 %2436  ;;  %v2383_v15 = vsel %vm1393_vm12, %v8384_v38, %v2382_v62  ;;  %v2385_v27 = vsel %vm1393_vm12, %v2373_v13, %v2384_v36 }
 0x505   :  { %v2442_v40 = vrot.slane %v2437_v31, 4 }
 0x506   :  { %v2318_v49 = vsel %vm1274_vm9, %v10329_v41, %v2314_v11  ;;  %v2320_v33 = vsel %vm1274_vm9, %v2314_v11, %v2315_v2  ;;  %v2443_v2 = vrot.slane %v2439_v3, 4 }
 0x507   :  { %v2319_v25 = vsel %vm1276_vm10, %v8375_v9, %v2318_v49  ;;  %v2321_v0 = vsel %vm1276_vm10, %v2309_v12, %v2320_v33  ;;  %v2341_v44 = vpop.permute.xlu1 %2340  ;;  %v10331_v9 = vrot.slane %v8378_v47, 4 }
 0x508   :  { %v2346_v51 = vrot.slane %v2341_v44, 4  ;;  %v2501_v10 = vpop.permute.xlu0 %2500  ;;  %v6119_v41 = vcombine.high %v8320_v39, %v2319_v25  ;;  %v6121_v11 = vcombine.high %v8323_v46, %v2321_v0  ;;  %v6118_v32 = vcombine.low %v8320_v39, %v2319_v25 }
 0x509   :  { %v6120_v52 = vcombine.low %v8323_v46, %v2321_v0  ;;  %v10332_v0 = vrot.slane %v8398_v37, 4  ;;  %v2506_v46 = vrot.slane %v2501_v10, 4  ;;  %v2448_v12 = vsel %vm1274_vm9, %v2442_v40, %v2443_v2 }
 0x50a   :  { %v2350_v33 = vsel %vm1274_vm9, %v10331_v9, %v2346_v51  ;;  %v2352_v49 = vsel %vm1274_vm9, %v2346_v51, %v2347_v59  ;;  %2778 = vmatprep.subr.bf16.mxu0 %v6119_v41  ;;  %2819 = vmatprep.subr.bf16.mxu1 %v6121_v11  ;;  %v10333_v59 = vrot.slane %v8391_v5, 4  ;;  %v2449_v2 = vsel %vm1511_vm14, %v2437_v31, %v2448_v12 }
 0x50b   :  { %v2351_v3 = vsel %vm599_vm1, %v8378_v47, %v2350_v33  ;;  %v2353_v45 = vsel %vm599_vm1, %v2341_v44, %v2352_v49  ;;  %v2405_v25 = vpop.permute.xlu1 %2404  ;;  %v2446_v39 = vsel %vm1274_vm9, %v10332_v0, %v2442_v40  ;;  %2779 = vmatpush1.bf16.msra.mxu0 %v6118_v32  ;;  %2820 = vmatpush1.bf16.msra.mxu1 %v6120_v52  ;;  %v2475_v44 = vrot.slane %v8440_v4, 4 }
 0x50c   :  { %v2410_v51 = vrot.slane %v2405_v25, 4  ;;  %v2503_v62 = vpop.permute.xlu0 %2502  ;;  %v6125_v38 = vcombine.high %v2351_v3, %v2383_v15  ;;  %v6127_v13 = vcombine.high %v2353_v45, %v2385_v27  ;;  %v6124_v36 = vcombine.low %v2351_v3, %v2383_v15 }
 0x50d   :  { %v2507_v24 = vrot.slane %v2503_v62, 4  ;;  %v6126_v47 = vcombine.low %v2353_v45, %v2385_v27  ;;  %v2447_v11 = vsel %vm1511_vm14, %v8398_v37, %v2446_v39  ;;  %v10334_v4 = vrot.slane %v8412_v29, 4 }
 0x50e   :  { %v2414_v41 = vsel %vm1274_vm9, %v10333_v59, %v2410_v51  ;;  %v2416_v9 = vsel %vm1274_vm9, %v2410_v51, %v2411_v56  ;;  %2780 = vmatprep.subr.bf16.mxu0 %v6125_v38  ;;  %2821 = vmatprep.subr.bf16.mxu1 %v6127_v13 }
 0x50f   :  { %v2415_v52 = vsel %vm1452_vm11, %v8391_v5, %v2414_v41  ;;  %v2417_v40 = vsel %vm1452_vm11, %v2405_v25, %v2416_v9  ;;  %v2469_v32 = vpop.permute.xlu1 %2468  ;;  %v2510_v33 = vsel %vm1274_vm9, %v10334_v4, %v2506_v46  ;;  %2781 = vmatpush1.bf16.msra.mxu0 %v6124_v36  ;;  %v2512_v56 = vsel %vm1274_vm9, %v2506_v46, %v2507_v24  ;;  %v10340_v4 = vld [vmem:[#allocation11_spill] sm:$0xff] }
 0x510   :  { %v2474_v49 = vrot.slane %v2469_v32, 4  ;;  %v2535_v15 = vpop.permute.xlu0 %2534  ;;  %2822 = vmatpush1.bf16.msra.mxu1 %v6126_v47  ;;  %v6131_v37 = vcombine.high %v2415_v52, %v2447_v11  ;;  %v6133_v27 = vcombine.high %v2417_v40, %v2449_v2  ;;  %v6130_v3 = vcombine.low %v2415_v52, %v2447_v11 }
 0x511   :  { %v6132_v45 = vcombine.low %v2417_v40, %v2449_v2  ;;  %v10335_v5 = vrot.slane %v8405_v43, 4  ;;  %v2511_v0 = vsel %vm1629_vm0, %v8412_v29, %v2510_v33  ;;  %v2513_v12 = vsel %vm1629_vm0, %v2501_v10, %v2512_v56  ;;  %v10341_v33 = vld [vmem:[#allocation12_spill] sm:$0xff] }
 0x512   :  { %v2480_v31 = vsel %vm1274_vm9, %v2474_v49, %v2475_v44  ;;  %2782 = vmatprep.subr.bf16.mxu0 %v6131_v37  ;;  %2823 = vmatprep.subr.bf16.mxu1 %v6133_v27  ;;  %v2539_v62 = vrot.slane %v2535_v15, 4  ;;  %v10336_v29 = vrot.slane %v8419_v28, 4 }
 0x513   :  { %v2478_v25 = vsel %vm1274_vm9, %v10335_v5, %v2474_v49  ;;  %v2481_v46 = vsel %vm1570_vm13, %v2469_v32, %v2480_v31  ;;  %v2533_v51 = vpop.permute.xlu1 %2532  ;;  %2783 = vmatpush1.bf16.msra.mxu0 %v6130_v3  ;;  %v10339_v32 = vld [vmem:[#allocation14_spill] sm:$0xff]  ;;  %v10342_v49 = vld [vmem:[#allocation15_spill] sm:$0xff]  ;;  %v10343_v5 = vld [vmem:[#allocation16_spill] sm:$0xff] }
 0x514   :  { %v2479_v39 = vsel %vm1570_vm13, %v8405_v43, %v2478_v25  ;;  %v2538_v38 = vrot.slane %v2533_v51, 4  ;;  %2824 = vmatpush1.bf16.msra.mxu1 %v6132_v45  ;;  %v6139_v36 = vcombine.high %v2481_v46, %v2513_v12  ;;  %v6138_v47 = vcombine.low %v2481_v46, %v2513_v12  ;;  %v10344_v25 = vld [vmem:[#allocation17_spill] sm:$0xff]  ;;  %v10345_v31 = vld [vmem:[#allocation18_spill] sm:$0xff]  ;;  %v10350_v12 = vld [vmem:[#allocation23_spill] sm:$0xff] }
 0x515   :  { %v6137_v13 = vcombine.high %v2479_v39, %v2511_v0  ;;  %v6136_v24 = vcombine.low %v2479_v39, %v2511_v0  ;;  %v10346_v0 = vld [vmem:[#allocation19_spill] sm:$0xff]  ;;  %v10347_v39 = vld [vmem:[#allocation20_spill] sm:$0xff]  ;;  %v10348_v46 = vld [vmem:[#allocation21_spill] sm:$0xff] }
 0x516   :  { %v2542_v44 = vsel %vm1274_vm9, %v10336_v29, %v2538_v38  ;;  %v2544_v59 = vsel %vm1274_vm9, %v2538_v38, %v2539_v62  ;;  %2825 = vmatprep.subr.bf16.mxu1 %v6139_v36  ;;  %v10351_v62 = vld [vmem:[#allocation24_spill] sm:$0xff]  ;;  %v10352_v38 = vld [vmem:[#allocation25_spill] sm:$0xff] }
 0x517   :  { %2784 = vmatprep.subr.bf16.mxu0 %v6137_v13  ;;  %v2543_v43 = vsel %vm1688_vm15, %v8419_v28, %v2542_v44  ;;  %v2545_v10 = vsel %vm1688_vm15, %v2533_v51, %v2544_v59  ;;  %v10337_v28 = vld [vmem:[#allocation10_spill] sm:$0xff]  ;;  %v10355_v36 = vld [vmem:[#allocation28_spill] sm:$0xff] }
 0x518   :  { %2785 = vmatpush1.bf16.msra.mxu0 %v6136_v24  ;;  %v6143_v41 = vcombine.high %v2543_v43, %v2543_v43  ;;  %v6142_v9 = vcombine.low %v2543_v43, %v2543_v43  ;;  %2826 = vmatpush1.bf16.msra.mxu1 %v6138_v47  ;;  %v6145_v11 = vcombine.high %v2545_v10, %v2545_v10  ;;  %v10349_v51 = vld [vmem:[#allocation22_spill] sm:$0xff]  ;;  %v10354_v24 = vld [vmem:[#allocation27_spill] sm:$0xff]  ;;  %v10356_v47 = vld [vmem:[#allocation29_spill] sm:$0xff] }
 0x519   :  { %v6144_v52 = vcombine.low %v2545_v10, %v2545_v10  ;;  %v10353_v13 = vld [vmem:[#allocation26_spill] sm:$0xff] }
 0x51a   :  { %6148 = vmatprep.subr.msk.bf16.mxu0 %vm1274_vm9, %v6143_v41  ;;  %v2726_v40 = vsel %vm1274_vm9, %v6142_v9, 0  ;;  %6150 = vmatprep.subr.msk.bf16.mxu1 %vm1274_vm9, %v6145_v11  ;;  %v10357_v44 = vld [vmem:[#allocation30_spill] sm:$0xff] }
 0x51b   :  { %v2732_v2 = vsel %vm1274_vm9, %v6144_v52, 0 }
 0x51c   :  { %2787 = vmatpush1.bf16.msra.mxu0 %v2726_v40  ;;  %2828 = vmatpush1.bf16.msra.mxu1 %v2732_v2 }
 0x51d   :  { %6640 = vmatprep.subr.bf16.mxu0 %v7669_v21  ;;  %6672 = vmatprep.subr.bf16.mxu1 %v7929_v50 }
 0x51f   :  { %6149 = vmatmul.mubr.msk.bf16.vlgmr.msra.gmra.mrb[20].mxu0 %vm2714_vm2, %v8436_v22  ;;  %6151 = vmatmul.mubr.msk.bf16.vlgmr.msra.gmra.mrb[8].mxu1 %vm2714_vm2, %v8436_v22  ;;  %v10338_v22 = vld [vmem:[#allocation13_spill] sm:$0xff] }
 0x520   :  { %6642 = vmatpush3.bf16.msra.mxu0 %v7680_v63  ;;  %6674 = vmatpush3.bf16.msra.mxu1 %v7944_v23 }
 0x521   :  { %6644 = vmatprep.subr.bf16.mxu0 %v7682_v19  ;;  %6676 = vmatprep.subr.bf16.mxu1 %v7947_v61 }
 0x524   :  { %6646 = vmatpush3.bf16.msra.mxu0 %v7698_v7  ;;  %6678 = vmatpush3.bf16.msra.mxu1 %v7964_v1 }
 0x525   :  { %6648 = vmatprep.subr.bf16.mxu0 %v7701_v14  ;;  %6680 = vmatprep.subr.bf16.mxu1 %v7967_v55 }
 0x528   :  { %6650 = vmatpush3.bf16.msra.mxu0 %v7716_v57  ;;  %6682 = vmatpush3.bf16.msra.mxu1 %v7985_v34 }
 0x529   :  { %6652 = vmatprep.subr.bf16.mxu0 %v7719_v48  ;;  %6684 = vmatprep.subr.bf16.mxu1 %v7998_v20 }
 0x52c   :  { %6654 = vmatpush3.bf16.msra.mxu0 %v7734_v35  ;;  %6686 = vmatpush3.bf16.msra.mxu1 %v8011_v8 }
 0x52d   :  { %6656 = vmatprep.subr.bf16.mxu0 %v7737_v42  ;;  %6688 = vmatprep.subr.bf16.mxu1 %v8022_v26 }
 0x530   :  { %6658 = vmatpush3.bf16.msra.mxu0 %v7752_v58  ;;  %6690 = vmatpush3.bf16.msra.mxu1 %v8030_v54 }
 0x531   :  { %6660 = vmatprep.subr.bf16.mxu0 %v7755_v18  ;;  %6692 = vmatprep.subr.bf16.mxu1 %v8039_v16 }
 0x534   :  { %6662 = vmatpush3.bf16.msra.mxu0 %v7770_v53  ;;  %6694 = vmatpush3.bf16.msra.mxu1 %v8048_v60 }
 0x535   :  { %6664 = vmatprep.subr.bf16.mxu0 %v7773_v6  ;;  %6696 = vmatprep.subr.bf16.mxu1 %v8057_v17 }
 0x538   :  { %6666 = vmatpush3.bf16.msra.mxu0 %v7788_v30  ;;  %6698 = vmatpush3.bf16.msra.mxu1 %v10338_v22 }
 0x539   :  { %6668 = vmatprep.subr.bf16.mxu0 %v10337_v28  ;;  %6700 = vmatprep.subr.bf16.mxu1 %v10339_v32 }
 0x53c   :  { %6670 = vmatpush3.bf16.msra.mxu0 %v10340_v4  ;;  %6702 = vmatpush3.bf16.msra.mxu1 %v10342_v49 }
 0x53d   :  { %6704 = vmatprep.subr.bf16.mxu0 %v10341_v33 }
 0x5d1   :  { %v8545_v56 = vpop.f32.mrb[16].mxu0 }
 0x5d2   :  { %v8547_v15 = vpop.f32.mrb[17].mxu0  ;;  %v2860_v3 = vmul.f32 %v8545_v56, %v8545_v56 }
 0x5d3   :  { %v2861_v37 = vmul.f32 %v8547_v15, %v8547_v15  ;;  %v2775_v27 = vpop.f32.mrb[18].mxu0  ;;  %2930 = vmatprep.mubr.f32.mxu0 %v8547_v15 }
 0x5d4   :  { %v2776_v45 = vpop.f32.mrb[19].mxu0  ;;  %2931 = vmatmul.mubr.f32.vlgmr.msra.gmra.mrb[24].mxu0 %v8545_v56 }
 0x5d5   :  { %2935 = vmatprep.mubr.f32.mxu0 %v2861_v37  ;;  %6706 = vmatpush3.bf16.msra.mxu0 %v10343_v5 }
 0x5d6   :  { %6708 = vmatprep.subr.bf16.mxu0 %v10344_v25 }
 0x5d8   :  { %2936 = vmatmul.mubr.f32.gmra.mrb[26].mxu0 %v2860_v3  ;;  %v10358_v3 = vmov 0  }
 0x5d9   :  { %6710 = vmatpush3.bf16.msra.mxu0 %v10345_v31 }
 0x5da   :  { %6712 = vmatprep.subr.bf16.mxu0 %v10346_v0 }
 0x5dd   :  { %6714 = vmatpush3.bf16.msra.mxu0 %v10347_v39 }
 0x5de   :  { %6716 = vmatprep.subr.bf16.mxu0 %v10348_v46 }
 0x5e1   :  { %6718 = vmatpush3.bf16.msra.mxu0 %v10349_v51 }
 0x5e2   :  { %6720 = vmatprep.subr.bf16.mxu0 %v10350_v12 }
 0x5e5   :  { %6722 = vmatpush3.bf16.msra.mxu0 %v10351_v62 }
 0x5e6   :  { %6724 = vmatprep.subr.bf16.mxu0 %v10352_v38 }
 0x5e9   :  { %6726 = vmatpush3.bf16.msra.mxu0 %v10353_v13 }
 0x5ea   :  { %6728 = vmatprep.subr.bf16.mxu0 %v10354_v24 }
 0x5ed   :  { %6730 = vmatpush3.bf16.msra.mxu0 %v10355_v36 }
 0x5ee   :  { %6732 = vmatprep.subr.bf16.mxu0 %v10356_v47 }
 0x5f1   :  { %6734 = vmatpush3.bf16.msra.mxu0 %v10357_v44 }
 0x5f2   :  { %v2812_v29 = vpop.f32.mrb[20].mxu0  ;;  %v2853_v43 = vpop.f32.mrb[8].mxu1 }
 0x5f3   :  { %v2814_v59 = vpop.f32.mrb[21].mxu0  ;;  %v2855_v9 = vpop.f32.mrb[9].mxu1  ;;  %v2862_v37 = vmul.f32 %v2812_v29, %v2812_v29  ;;  %v2864_v27 = vmul.f32 %v2853_v43, %v2853_v43 }
 0x5f4   :  { %v2863_v10 = vmul.f32 %v2814_v59, %v2814_v59  ;;  %v2816_v41 = vpop.f32.mrb[22].mxu0  ;;  %3005 = vmatprep.mubr.f32.mxu1 %v2814_v59  ;;  %v2865_v52 = vmul.f32 %v2855_v9, %v2855_v9  ;;  %v2857_v40 = vpop.f32.mrb[10].mxu1  ;;  %3080 = vmatprep.mubr.f32.mxu0 %v2855_v9 }
 0x5f5   :  { %v2817_v11 = vpop.f32.mrb[23].mxu0  ;;  %3006 = vmatmul.mubr.f32.vlgmr.msra.gmra.mrb[12].mxu1 %v2812_v29  ;;  %v2858_v2 = vpop.f32.mrb[11].mxu1  ;;  %3081 = vmatmul.mubr.f32.vlgmr.msra.gmra.mrb[28].mxu0 %v2853_v43 }
 0x5f6   :  { %3010 = vmatprep.mubr.f32.mxu1 %v2863_v10  ;;  %3085 = vmatprep.mubr.f32.mxu0 %v2865_v52 }
 0x5f9   :  { %3011 = vmatmul.mubr.f32.gmra.mrb[14].mxu1 %v2862_v37  ;;  %3086 = vmatmul.mubr.f32.gmra.mrb[30].mxu0 %v2864_v27 }
 0x5fa   :  { %3659 = vmatprep.mubr.bf16.mxu1 %v10358_v3  ;;  %3741 = vmatprep.mubr.bf16.mxu0 %v10358_v3 }
 0x6a7   :  { %v6347_v45 = vpop.f32.mrb[24].mxu0 }
 0x6a8   :  { %v6348_v41 = vpop.f32.mrb[25].mxu0 }
 0x6a9   :  { %v6349_v44 = vadd.f32 %v6348_v41, %v6347_v45 }
 0x6ab   :  { %v6350_v11 = vpop.f32.mrb[26].mxu0 }
 0x6ac   :  { %v6351_v47 = vpop.f32.mrb[27].mxu0 }
 0x6ad   :  { %v6352_v36 = vadd.f32 %v6351_v47, %v6350_v11 }
 0x6c8   :  { %v6385_v40 = vpop.f32.mrb[12].mxu1  ;;  %v6423_v10 = vpop.f32.mrb[28].mxu0 }
 0x6c9   :  { %v6386_v24 = vpop.f32.mrb[13].mxu1  ;;  %v6424_v13 = vpop.f32.mrb[29].mxu0 }
 0x6ca   :  { %v6387_v2 = vadd.f32 %v6386_v24, %v6385_v40  ;;  %v6425_v38 = vadd.f32 %v6424_v13, %v6423_v10  ;;  %v6152_v13 = vld [vmem:[%s10209_s4 + $0x8] sm:$0xff] }
 0x6cc   :  { %v3008_v52 = vadd.f32 %v6387_v2, %v6349_v44  ;;  %v6388_v62 = vpop.f32.mrb[14].mxu1  ;;  %v6426_v27 = vpop.f32.mrb[30].mxu0 }
 0x6cd   :  { %v6389_v37 = vpop.f32.mrb[15].mxu1  ;;  %v6427_v46 = vpop.f32.mrb[31].mxu0 }
 0x6ce   :  { %v6390_v12 = vadd.f32 %v6389_v37, %v6388_v62  ;;  %v3083_v51 = vadd.f32 %v6425_v38, %v3008_v52  ;;  %v6428_v39 = vadd.f32 %v6427_v46, %v6426_v27  ;;  %v6153_v62 = vld [vmem:[%s10210_s5 + $0x8] sm:$0xff] }
 0x6d0   :  { %v3013_v0 = vadd.f32 %v6390_v12, %v6352_v36  ;;  %v3091_v31 = vmul.f32 0.001953125, %v3083_v51 }
 0x6d2   :  { %v3088_v45 = vadd.f32 %v6428_v39, %v3013_v0  ;;  %v3093_v41 = vmul.f32 %v3091_v31, %v3091_v31 }
 0x6d4   :  { %v3092_v25 = vmul.f32 0.001953125, %v3088_v45 }
 0x6d6   :  { %v3094_v47 = vsub.f32 %v3092_v25, %v3093_v41 }
 0x6d8   :  { %v3097_v11 = vadd.f32 1e-05, %v3094_v47 }
 0x6da   :  { %6953 = vrsqrt.f32 %v3097_v11 }
 0x6e4   :  { %v6954_v24 = vpop.eup %6953 }
 0x6e5   :  { %v3099_v44 = vmul.f32 %v6954_v24, %v6152_v13 }
 0x6e7   :  { %3106 = vperm.xlu1 %6901, %v3099_v44   ;;  %v3102_v46 = vmul.f32 %v3099_v44, %v3091_v31 }
 0x6e9   :  { %v3103_v12 = vsub.f32 %v6153_v62, %v3102_v46 }
 0x6eb   :  { %3117 = vperm.xlu0 %6902, %v3103_v12   ;;  %v10363_v12 = vld [vmem:[#allocation33_spill] sm:$0xff] }
 0x766   :  { %v3107_v0 = vpop.permute.xlu1 %3106 }
 0x767   :  { %v3111_v39 = vmul.f32 %v3107_v0, %v2812_v29  ;;  %v3112_v51 = vmul.f32 %v3107_v0, %v2814_v59  ;;  %v3109_v25 = vmul.f32 %v3107_v0, %v8545_v56  ;;  %v3110_v38 = vmul.f32 %v3107_v0, %v8547_v15  ;;  %v10359_v59 = vld [vmem:[#allocation37_spill] sm:$0xff]  ;;  %v10360_v56 = vld [vmem:[#allocation38_spill] sm:$0xff]  ;;  %v10361_v15 = vld [vmem:[#allocation35_spill] sm:$0xff] }
 0x768   :  { %v3113_v40 = vmul.f32 %v3107_v0, %v2853_v43  ;;  %v3114_v10 = vmul.f32 %v3107_v0, %v2855_v9  ;;  %v10362_v43 = vld [vmem:[#allocation36_spill] sm:$0xff] }
 0x76a   :  { %v3118_v36 = vpop.permute.xlu0 %3117 }
 0x76b   :  { %v3122_v2 = vadd.f32 %v3118_v36, %v3111_v39  ;;  %v3123_v52 = vadd.f32 %v3118_v36, %v3112_v51  ;;  %v3120_v37 = vadd.f32 %v3118_v36, %v3109_v25  ;;  %v3121_v27 = vadd.f32 %v3118_v36, %v3110_v38  ;;  %v10364_v39 = vld [vmem:[#allocation34_spill] sm:$0xff] }
 0x76c   :  { %v3124_v45 = vadd.f32 %v3118_v36, %v3113_v40  ;;  %v3125_v41 = vadd.f32 %v3118_v36, %v3114_v10 }
 0x76d   :  { %v3128_v47 = vmax.f32 %v3122_v2, 0.0  ;;  %v3129_v31 = vmax.f32 %v3123_v52, 0.0  ;;  %v3126_v11 = vmax.f32 %v3120_v37, 0.0  ;;  %v3127_v13 = vmax.f32 %v3121_v27, 0.0 }
 0x76e   :  { %v3130_v24 = vmax.f32 %v3124_v45, 0.0  ;;  %v3131_v29 = vmax.f32 %v3125_v41, 0.0 }
 0x76f   :  { %v3134_v44 = vmul.f32 %v3128_v47, %v10359_v59  ;;  %v3135_v62 = vmul.f32 %v3129_v31, %v10360_v56  ;;  %v3132_v46 = vmul.f32 %v3126_v11, %v10361_v15  ;;  %v3133_v9 = vmul.f32 %v3127_v13, %v10362_v43  ;;  %v4015_v43 = vld [vmem:[#allocation3 + $0x8] sm:$0xff] }
 0x770   :  { %v3136_v0 = vmul.f32 %v3130_v24, %v10363_v12  ;;  %v3137_v51 = vmul.f32 %v3131_v29, %v10364_v39  ;;  %v4020_v12 = vunpack.c.h.bf16 %v4015_v43  ;;  %v4014_v39 = vld [vmem:[#allocation3] sm:$0xff] }
 0x771   :  { %v6199_v25 = vpack.c.bf16 %v3135_v62, %v3134_v44  ;;  %v6198_v38 = vpack.c.bf16 %v3133_v9, %v3132_v46  ;;  %v4019_v9 = vunpack.c.l.bf16 %v4015_v43 }
 0x772   :  { %v6200_v36 = vpack.c.bf16 %v3137_v51, %v3136_v0 }
 0x773   :  { %3161 = vrot.lane.b32.xlu0 %v6199_v25, %s7017_s6  ;;  %3159 = vrot.lane.b32.xlu1 %v6198_v38, %s7017_s6  ;;  %v6908_v51 = vpack.i.bf16 %v4020_v12, %v4019_v9  ;;  %v4017_v25 = vunpack.c.l.bf16 %v4014_v39  ;;  %v4018_v38 = vunpack.c.h.bf16 %v4014_v39 }
 0x777   :  { %3163 = vrot.lane.b32.xlu1 %v6200_v36, %s7017_s6  ;;  %v4016_v36 = vld [vmem:[#allocation3 + $0x10] sm:$0xff] }
 0x7e5   :  { %v3162_v40 = vpop.permute.xlu0 %3161  ;;  %v3160_v10 = vpop.permute.xlu1 %3159 }
 0x7e6   :  { %v3166_v2 = vrot.slane %v3162_v40, 4  ;;  %v3165_v52 = vrot.slane %v3160_v10, 4 }
 0x7e8   :  { %v3168_v37 = vsel %vm2272_vm7, %v3165_v52, %v3160_v10  ;;  %v3169_v27 = vsel %vm1274_vm9, %v3165_v52, %v3166_v2  ;;  %v4021_v10 = vunpack.c.l.bf16 %v4016_v36 }
 0x7e9   :  { %v8592_v45 = vsel %vm2272_vm7, %v3169_v27, %v3162_v40  ;;  %3177 = vst.msk [vmem:[#allocation4] sm:$0xff] %vm8309_vm8, %v3168_v37  ;;  %v3164_v47 = vpop.permute.xlu1 %3163  ;;  %v6903_v40 = vpack.i.bf16 %v4018_v38, %v4017_v25 }
 0x7ea   :  { %v3167_v31 = vrot.slane %v3164_v47, 4  ;;  %3198 = vrot.lane.b32.xlu1 %v8592_v45, %s7014_s25  ;;  %3186 = vst [vmem:[#allocation5 + $0x8] sm:$0xff] %v8592_v45 }
 0x7ec   :  { %v3171_v11 = vsel %vm1274_vm9, %v3166_v2, %v3167_v31  ;;  %3180 = vst.msk [vmem:[#allocation4 + $0x18] sm:$0xf] %vm135_vm4, %v3167_v31  ;;  %v4022_v2 = vunpack.c.h.bf16 %v4016_v36 }
 0x7ed   :  { %v8602_v13 = vsel %vm2272_vm7, %v3171_v11, %v3164_v47 }
 0x7ee   :  { %3187 = vst [vmem:[#allocation5 + $0x10] sm:$0xff] %v8602_v13  ;;  %3230 = vrot.lane.b32.xlu1 %v8592_v45, %s6992_s24  ;;  %v6913_v52 = vpack.i.bf16 %v4022_v2, %v4021_v10 }
 0x7f0   :  { %v8607_v24 = vld [vmem:[#allocation4] sm:$0xff] }
 0x7f1   :  { %3185 = vst [vmem:[#allocation5] sm:$0xff] %v8607_v24  ;;  %3196 = vrot.lane.b32.xlu0 %v8607_v24, %s7014_s25 }
 0x7f2   :  { %3262 = vrot.lane.b32.xlu1 %v8592_v45, %s7004_s14 }
 0x7f3   :  { %v3191_v29 = vld [vmem:[#allocation4 + $0x18] sm:$0xf] }
 0x7f4   :  { %v3255_v59 = vld [vmem:[#allocation4 + $0x18] sm:$0xf] }
 0x7f5   :  { %3228 = vrot.lane.b32.xlu0 %v8607_v24, %s6992_s24  ;;  %v3223_v44 = vld [vmem:[#allocation4 + $0x18] sm:$0xf] }
 0x7f6   :  { %3294 = vrot.lane.b32.xlu1 %v8592_v45, %s7015_s26  ;;  %v3319_v56 = vld [vmem:[#allocation4 + $0x18] sm:$0xf] }
 0x7f7   :  { %v3287_v62 = vld [vmem:[#allocation4 + $0x18] sm:$0xf] }
 0x7f8   :  { %v3351_v15 = vld [vmem:[#allocation4 + $0x18] sm:$0xf] }
 0x7f9   :  { %3260 = vrot.lane.b32.xlu0 %v8607_v24, %s7004_s14  ;;  %v3383_v46 = vld [vmem:[#allocation4 + $0x18] sm:$0xf] }
 0x7fa   :  { %3326 = vrot.lane.b32.xlu1 %v8592_v45, %s6982_s0  ;;  %v3415_v0 = vld [vmem:[#allocation4 + $0x18] sm:$0xf] }
 0x7fd   :  { %3292 = vrot.lane.b32.xlu0 %v8607_v24, %s7015_s26 }
 0x7fe   :  { %3358 = vrot.lane.b32.xlu1 %v8592_v45, %s7002_s12 }
 0x801   :  { %3324 = vrot.lane.b32.xlu0 %v8607_v24, %s6982_s0 }
 0x802   :  { %3390 = vrot.lane.b32.xlu1 %v8592_v45, %s7016_s27 }
 0x805   :  { %3356 = vrot.lane.b32.xlu0 %v8607_v24, %s7002_s12 }
 0x806   :  { %3422 = vrot.lane.b32.xlu1 %v8592_v45, %s6986_s18 }
 0x809   :  { %3388 = vrot.lane.b32.xlu0 %v8607_v24, %s7016_s27 }
 0x80a   :  { %3202 = vrot.lane.b32.xlu1 %v3191_v29, %s7014_s25 }
 0x80d   :  { %3420 = vrot.lane.b32.xlu0 %v8607_v24, %s6986_s18 }
 0x80e   :  { %3266 = vrot.lane.b32.xlu1 %v3255_v59, %s7004_s14 }
 0x811   :  { %3234 = vrot.lane.b32.xlu0 %v3223_v44, %s6992_s24 }
 0x812   :  { %3330 = vrot.lane.b32.xlu1 %v3319_v56, %s6982_s0 }
 0x815   :  { %3298 = vrot.lane.b32.xlu0 %v3287_v62, %s7015_s26 }
 0x816   :  { %3264 = vrot.lane.b32.xlu1 %v8602_v13, %s7004_s14  ;;  %s7045_s14 = smov 45  }
 0x819   :  { %3362 = vrot.lane.b32.xlu0 %v3351_v15, %s7002_s12 }
 0x81a   :  { %3328 = vrot.lane.b32.xlu1 %v8602_v13, %s6982_s0  ;;  %s7040_s0 = smov 25  }
 0x81d   :  { %3200 = vrot.lane.b32.xlu0 %v8602_v13, %s7014_s25  ;;  %s7021_s25 = smov 37  }
 0x81e   :  { %3392 = vrot.lane.b32.xlu1 %v8602_v13, %s7016_s27 }
 0x821   :  { %3232 = vrot.lane.b32.xlu0 %v8602_v13, %s6992_s24  ;;  %s7043_s24 = smov 81  }
 0x822   :  { %3394 = vrot.lane.b32.xlu1 %v3383_v46, %s7016_s27 }
 0x825   :  { %3296 = vrot.lane.b32.xlu0 %v8602_v13, %s7015_s26 }
 0x826   :  { %3426 = vrot.lane.b32.xlu1 %v3415_v0, %s6986_s18 }
 0x829   :  { %3360 = vrot.lane.b32.xlu0 %v8602_v13, %s7002_s12  ;;  %s10293_s12 = smov 63  }
 0x82a   :  { %6909 = vrot.lane.b32.xlu1 %v6908_v51, %s7015_s26 }
 0x82d   :  { %3424 = vrot.lane.b32.xlu0 %v8602_v13, %s6986_s18  ;;  %s7041_s18 = smov 117  }
 0x831   :  { %6904 = vrot.lane.b32.xlu0 %v6903_v40, %s7015_s26 }
 0x835   :  { %6914 = vrot.lane.b32.xlu0 %v6913_v52, %s7015_s26 }
 0x85c   :  { %v8665_v37 = vpop.permute.xlu1 %3198 }
 0x85d   :  { %v10281_v31 = vrot.slane %v8665_v37, 4 }
 0x860   :  { %v8667_v27 = vpop.permute.xlu1 %3230 }
 0x861   :  { %v10280_v62 = vrot.slane %v8667_v27, 4 }
 0x863   :  { %v3197_v41 = vpop.permute.xlu0 %3196 }
 0x864   :  { %v3204_v47 = vrot.slane %v3197_v41, 4  ;;  %v8670_v11 = vpop.permute.xlu1 %3262 }
 0x865   :  { %v10282_v51 = vrot.slane %v8670_v11, 4 }
 0x866   :  { %v3208_v29 = vsel %vm1274_vm9, %v3204_v47, %v10281_v31 }
 0x867   :  { %v3209_v59 = vsel %vm1276_vm10, %v3197_v41, %v3208_v29  ;;  %v3229_v44 = vpop.permute.xlu0 %3228 }
 0x868   :  { %3217 = vst [vmem:[#allocation5 + $0x18] sm:$0xff] %v3209_v59  ;;  %v3236_v56 = vrot.slane %v3229_v44, 4  ;;  %v8677_v15 = vpop.permute.xlu1 %3294  ;;  %v6157_v46 = vcombine.low %v8607_v24, %v3209_v59  ;;  %v6158_v43 = vcombine.high %v8607_v24, %v3209_v59 }
 0x869   :  { %v10279_v10 = vrot.slane %v8677_v15, 4 }
 0x86a   :  { %v3240_v9 = vsel %vm1274_vm9, %v3236_v56, %v10280_v62  ;;  %3627 = vmatprep.subr.bf16.mxu1 %v6158_v43 }
 0x86b   :  { %v3241_v12 = vsel %vm599_vm1, %v3229_v44, %v3240_v9  ;;  %v3261_v0 = vpop.permute.xlu0 %3260  ;;  %3628 = vmatpush1.bf16.msra.mxu1 %v6157_v46 }
 0x86c   :  { %3249 = vst [vmem:[#allocation5 + $0x30] sm:$0xff] %v3241_v12  ;;  %v3268_v39 = vrot.slane %v3261_v0, 4  ;;  %v8686_v25 = vpop.permute.xlu1 %3326 }
 0x86d   :  { %v3333_v56 = vrot.slane %v8686_v25, 4 }
 0x86e   :  { %v3272_v38 = vsel %vm1274_vm9, %v3268_v39, %v10282_v51 }
 0x86f   :  { %v3273_v24 = vsel %vm1393_vm12, %v3261_v0, %v3272_v38  ;;  %v3293_v36 = vpop.permute.xlu0 %3292 }
 0x870   :  { %3281 = vst [vmem:[#allocation5 + $0x48] sm:$0xff] %v3273_v24  ;;  %v3300_v40 = vrot.slane %v3293_v36, 4  ;;  %v8693_v2 = vpop.permute.xlu1 %3358  ;;  %v6163_v52 = vcombine.low %v3241_v12, %v3273_v24  ;;  %v6164_v41 = vcombine.high %v3241_v12, %v3273_v24 }
 0x871   :  { %v10283_v39 = vrot.slane %v8693_v2, 4 }
 0x872   :  { %v3304_v47 = vsel %vm1274_vm9, %v3300_v40, %v10279_v10  ;;  %3629 = vmatprep.subr.bf16.mxu1 %v6164_v41 }
 0x873   :  { %v3305_v29 = vsel %vm1452_vm11, %v3293_v36, %v3304_v47  ;;  %v3325_v59 = vpop.permute.xlu0 %3324  ;;  %3630 = vmatpush1.bf16.msra.mxu1 %v6163_v52 }
 0x874   :  { %3313 = vst [vmem:[#allocation5 + $0x60] sm:$0xff] %v3305_v29  ;;  %v3332_v44 = vrot.slane %v3325_v59, 4  ;;  %v8700_v46 = vpop.permute.xlu1 %3390 }
 0x876   :  { %v3336_v43 = vsel %vm1274_vm9, %v3332_v44, %v3333_v56 }
 0x877   :  { %v3337_v9 = vsel %vm1511_vm14, %v3325_v59, %v3336_v43  ;;  %v3357_v12 = vpop.permute.xlu0 %3356  ;;  %v3397_v59 = vrot.slane %v8700_v46, 4 }
 0x878   :  { %v3364_v0 = vrot.slane %v3357_v12, 4  ;;  %v8705_v38 = vpop.permute.xlu1 %3422  ;;  %v6169_v24 = vcombine.low %v3305_v29, %v3337_v9  ;;  %v6170_v36 = vcombine.high %v3305_v29, %v3337_v9 }
 0x879   :  { %v10284_v29 = vrot.slane %v8705_v38, 4 }
 0x87a   :  { %v3368_v40 = vsel %vm1274_vm9, %v3364_v0, %v10283_v39  ;;  %3631 = vmatprep.subr.bf16.mxu1 %v6170_v36 }
 0x87b   :  { %v3369_v52 = vsel %vm1570_vm13, %v3357_v12, %v3368_v40  ;;  %v3389_v41 = vpop.permute.xlu0 %3388  ;;  %3632 = vmatpush1.bf16.msra.mxu1 %v6169_v24 }
 0x87c   :  { %v3396_v47 = vrot.slane %v3389_v41, 4  ;;  %v3203_v44 = vpop.permute.xlu1 %3202 }
 0x87e   :  { %v3400_v43 = vsel %vm1274_vm9, %v3396_v47, %v3397_v59 }
 0x87f   :  { %v3401_v10 = vsel %vm1629_vm0, %v3389_v41, %v3400_v43  ;;  %v3421_v62 = vpop.permute.xlu0 %3420 }
 0x880   :  { %v3428_v31 = vrot.slane %v3421_v62, 4  ;;  %v3267_v9 = vpop.permute.xlu1 %3266  ;;  %v6175_v51 = vcombine.low %v3369_v52, %v3401_v10  ;;  %v6176_v0 = vcombine.high %v3369_v52, %v3401_v10  ;;  %v8726_v10 = vld [vmem:[%s10208_s3] sm:$0xf]  ;;  %s7042_s3 = smov 99  }
 0x881   :  { %v3271_v52 = vrot.slane %v3267_v9, 4 }
 0x882   :  { %v3432_v12 = vsel %vm1274_vm9, %v3428_v31, %v10284_v29  ;;  %3633 = vmatprep.subr.bf16.mxu1 %v6176_v0  ;;  %v10366_v0 = vrot.slane %v8670_v11, 4 }
 0x883   :  { %v3433_v24 = vsel %vm1688_vm15, %v3421_v62, %v3432_v12  ;;  %v3235_v36 = vpop.permute.xlu0 %3234  ;;  %3634 = vmatpush1.bf16.msra.mxu1 %v6175_v51 }
 0x884   :  { %v3331_v40 = vpop.permute.xlu1 %3330  ;;  %v6182_v47 = vcombine.high %v3433_v24, %v3433_v24  ;;  %v6181_v39 = vcombine.low %v3433_v24, %v3433_v24 }
 0x886   :  { %6187 = vmatprep.subr.msk.bf16.mxu1 %vm1274_vm9, %v6182_v47  ;;  %v3610_v41 = vsel %vm1274_vm9, %v6181_v39, 0 }
 0x887   :  { %v8721_v43 = vpop.permute.xlu0 %3298  ;;  %3636 = vmatpush1.bf16.msra.mxu1 %v3610_v41  ;;  %v3335_v41 = vrot.slane %v3331_v40, 4 }
 0x888   :  { %v3265_v31 = vpop.permute.xlu1 %3264 }
 0x889   :  { %v3270_v62 = vrot.slane %v3265_v31, 4 }
 0x88a   :  { %6188 = vmatmul.mubr.msk.bf16.vlgmr.msra.gmra.mrb[16].mxu1 %vm2714_vm2, %v8726_v10 }
 0x88b   :  { %v8730_v51 = vpop.permute.xlu0 %3362  ;;  %v3274_v39 = vsel %vm1274_vm9, %v10366_v0, %v3270_v62  ;;  %v3276_v12 = vsel %vm1274_vm9, %v3270_v62, %v3271_v52  ;;  %3700 = vmatprep.mubr.bf16.mxu1 %v10358_v3  ;;  %v3207_v52 = vrot.slane %v3203_v44, 4 }
 0x88c   :  { %v3275_v24 = vsel %vm1393_vm12, %v8670_v11, %v3274_v39  ;;  %v8740_v47 = vsel %vm1393_vm12, %v3265_v31, %v3276_v12  ;;  %v3329_v9 = vpop.permute.xlu1 %3328  ;;  %v10367_v39 = vrot.slane %v8665_v37, 4  ;;  %vm5756_vm12 = vcmask 56320  }
 0x88d   :  { %3282 = vst [vmem:[#allocation5 + $0x50] sm:$0xff] %v3275_v24  ;;  %3283 = vst [vmem:[#allocation5 + $0x58] sm:$0xff] %v8740_v47  ;;  %v3334_v29 = vrot.slane %v3329_v9, 4 }
 0x88f   :  { %v3201_v5 = vpop.permute.xlu0 %3200  ;;  %v3338_v49 = vsel %vm1274_vm9, %v3333_v56, %v3334_v29  ;;  %v3340_v0 = vsel %vm1274_vm9, %v3334_v29, %v3335_v41  ;;  %v3239_v56 = vrot.slane %v3235_v36, 4 }
 0x890   :  { %v3206_v62 = vrot.slane %v3201_v5, 4  ;;  %v8747_v3 = vsel %vm1511_vm14, %v8686_v25, %v3338_v49  ;;  %v8750_v11 = vsel %vm1511_vm14, %v3329_v9, %v3340_v0  ;;  %v3393_v31 = vpop.permute.xlu1 %3392 }
 0x891   :  { %v3398_v40 = vrot.slane %v3393_v31, 4 }
 0x892   :  { %v3210_v12 = vsel %vm1274_vm9, %v10367_v39, %v3206_v62  ;;  %v3212_v33 = vsel %vm1274_vm9, %v3206_v62, %v3207_v52 }
 0x893   :  { %v3211_v44 = vsel %vm1276_vm10, %v8665_v37, %v3210_v12  ;;  %v3213_v29 = vsel %vm1276_vm10, %v3201_v5, %v3212_v33  ;;  %v3233_v41 = vpop.permute.xlu0 %3232  ;;  %v3402_v49 = vsel %vm1274_vm9, %v3397_v59, %v3398_v40  ;;  %v10368_v5 = vrot.slane %v8667_v27, 4 }
 0x894   :  { %3218 = vst [vmem:[#allocation5 + $0x20] sm:$0xff] %v3211_v44  ;;  %3219 = vst [vmem:[#allocation5 + $0x28] sm:$0xff] %v3213_v29  ;;  %v3238_v25 = vrot.slane %v3233_v41, 4  ;;  %v8762_v9 = vsel %vm1629_vm0, %v8700_v46, %v3402_v49  ;;  %v3395_v0 = vpop.permute.xlu1 %3394  ;;  %v6159_v39 = vcombine.low %v8592_v45, %v3211_v44  ;;  %v6160_v36 = vcombine.high %v8592_v45, %v3211_v44 }
 0x895   :  { %v3399_v52 = vrot.slane %v3395_v0, 4  ;;  %v6161_v37 = vcombine.low %v8602_v13, %v3213_v29  ;;  %v6162_v33 = vcombine.high %v8602_v13, %v3213_v29  ;;  %v3303_v46 = vrot.slane %v8721_v43, 4 }
 0x896   :  { %v3242_v59 = vsel %vm1274_vm9, %v10368_v5, %v3238_v25  ;;  %v3244_v62 = vsel %vm1274_vm9, %v3238_v25, %v3239_v56  ;;  %3668 = vmatprep.subr.bf16.mxu1 %v6160_v36  ;;  %vm4929_vm10 = vcmask 23552  }
 0x897   :  { %v3243_v12 = vsel %vm599_vm1, %v8667_v27, %v3242_v59  ;;  %v3245_v49 = vsel %vm599_vm1, %v3233_v41, %v3244_v62  ;;  %v3297_v45 = vpop.permute.xlu0 %3296  ;;  %v3404_v44 = vsel %vm1274_vm9, %v3398_v40, %v3399_v52  ;;  %3709 = vmatprep.subr.bf16.mxu0 %v6162_v33  ;;  %3669 = vmatpush1.bf16.msra.mxu1 %v6159_v39  ;;  %v10369_v27 = vrot.slane %v8677_v15, 4 }
 0x898   :  { %3250 = vst [vmem:[#allocation5 + $0x38] sm:$0xff] %v3243_v12  ;;  %3251 = vst [vmem:[#allocation5 + $0x40] sm:$0xff] %v3245_v49  ;;  %v3302_v13 = vrot.slane %v3297_v45, 4  ;;  %v3405_v29 = vsel %vm1629_vm0, %v3393_v31, %v3404_v44  ;;  %3710 = vmatpush1.bf16.msra.mxu0 %v6161_v37  ;;  %v6165_v56 = vcombine.low %v3243_v12, %v3275_v24  ;;  %v3367_v39 = vrot.slane %v8730_v51, 4 }
 0x899   :  { %v6166_v25 = vcombine.high %v3243_v12, %v3275_v24  ;;  %v6167_v43 = vcombine.low %v3245_v49, %v8740_v47  ;;  %v6168_v0 = vcombine.high %v3245_v49, %v8740_v47  ;;  %v3427_v47 = vpop.permute.xlu1 %3426  ;;  %vm4168_vm1 = vcmask 122880  }
 0x89a   :  { %v3306_v41 = vsel %vm1274_vm9, %v10369_v27, %v3302_v13  ;;  %v3308_v40 = vsel %vm1274_vm9, %v3302_v13, %v3303_v46 }
 0x89b   :  { %3670 = vmatprep.subr.bf16.mxu1 %v6166_v25  ;;  %v3307_v36 = vsel %vm1452_vm11, %v8677_v15, %v3306_v41  ;;  %v3309_v31 = vsel %vm1452_vm11, %v3297_v45, %v3308_v40  ;;  %v3361_v52 = vpop.permute.xlu0 %3360  ;;  %3711 = vmatprep.subr.bf16.mxu0 %v6168_v0  ;;  %v10370_v15 = vrot.slane %v8693_v2, 4  ;;  %v3431_v45 = vrot.slane %v3427_v47, 4 }
 0x89c   :  { %3671 = vmatpush1.bf16.msra.mxu1 %v6165_v56  ;;  %3314 = vst [vmem:[#allocation5 + $0x68] sm:$0xff] %v3307_v36  ;;  %3315 = vst [vmem:[#allocation5 + $0x70] sm:$0xff] %v3309_v31  ;;  %v3366_v24 = vrot.slane %v3361_v52, 4  ;;  %3712 = vmatpush1.bf16.msra.mxu0 %v6167_v43  ;;  %v6171_v37 = vcombine.low %v3307_v36, %v8747_v3  ;;  %v6172_v33 = vcombine.high %v3307_v36, %v8747_v3 }
 0x89d   :  { %v6173_v5 = vcombine.low %v3309_v31, %v8750_v11  ;;  %v6174_v51 = vcombine.high %v3309_v31, %v8750_v11  ;;  %v10371_v25 = vrot.slane %v8705_v38, 4 }
 0x89e   :  { %v3370_v59 = vsel %vm1274_vm9, %v10370_v15, %v3366_v24  ;;  %v3372_v62 = vsel %vm1274_vm9, %v3366_v24, %v3367_v39  ;;  %3672 = vmatprep.subr.bf16.mxu1 %v6172_v33 }
 0x89f   :  { %v3371_v46 = vsel %vm1570_vm13, %v8693_v2, %v3370_v59  ;;  %v3373_v12 = vsel %vm1570_vm13, %v3361_v52, %v3372_v62  ;;  %v3425_v49 = vpop.permute.xlu0 %3424  ;;  %3713 = vmatprep.subr.bf16.mxu0 %v6174_v51 }
 0x8a0   :  { %3673 = vmatpush1.bf16.msra.mxu1 %v6171_v37  ;;  %v3430_v3 = vrot.slane %v3425_v49, 4  ;;  %3714 = vmatpush1.bf16.msra.mxu0 %v6173_v5  ;;  %v6177_v11 = vcombine.low %v3371_v46, %v8762_v9  ;;  %v6178_v44 = vcombine.high %v3371_v46, %v8762_v9  ;;  %v6179_v13 = vcombine.low %v3373_v12, %v3405_v29 }
 0x8a1   :  { %v6180_v56 = vcombine.high %v3373_v12, %v3405_v29 }
 0x8a2   :  { %v3434_v43 = vsel %vm1274_vm9, %v10371_v25, %v3430_v3  ;;  %v3436_v2 = vsel %vm1274_vm9, %v3430_v3, %v3431_v45  ;;  %3674 = vmatprep.subr.bf16.mxu1 %v6178_v44 }
 0x8a3   :  { %v3435_v0 = vsel %vm1688_vm15, %v8705_v38, %v3434_v43  ;;  %v3437_v27 = vsel %vm1688_vm15, %v3425_v49, %v3436_v2  ;;  %3715 = vmatprep.subr.bf16.mxu0 %v6180_v56 }
 0x8a4   :  { %3675 = vmatpush1.bf16.msra.mxu1 %v6177_v11  ;;  %3716 = vmatpush1.bf16.msra.mxu0 %v6179_v13  ;;  %v6184_v41 = vcombine.high %v3435_v0, %v3435_v0  ;;  %v6183_v40 = vcombine.low %v3435_v0, %v3435_v0  ;;  %v6186_v9 = vcombine.high %v3437_v27, %v3437_v27 }
 0x8a5   :  { %v6185_v39 = vcombine.low %v3437_v27, %v3437_v27 }
 0x8a6   :  { %6189 = vmatprep.subr.msk.bf16.mxu1 %vm1274_vm9, %v6184_v41  ;;  %v3616_v29 = vsel %vm1274_vm9, %v6183_v40, 0  ;;  %6191 = vmatprep.subr.msk.bf16.mxu0 %vm1274_vm9, %v6186_v9 }
 0x8a7   :  { %v3622_v36 = vsel %vm1274_vm9, %v6185_v39, 0  ;;  %vm4484_vm9 = vcmask 7168  }
 0x8a8   :  { %3677 = vmatpush1.bf16.msra.mxu1 %v3616_v29  ;;  %3718 = vmatpush1.bf16.msra.mxu0 %v3622_v36  ;;  %v6193_v29 = vld [vmem:[%s10209_s4 + $0x10] sm:$0xff]  ;;  %s7019_s4 = smov 73  }
 0x8a9   :  { %6736 = vmatprep.subr.bf16.mxu1 %v7669_v21  ;;  %6768 = vmatprep.subr.bf16.mxu0 %v7929_v50  ;;  %v10372_v21 = vld [vmem:[#allocation12_spill] sm:$0xff]  ;;  %v10380_v50 = vld [vmem:[#allocation22_spill] sm:$0xff] }
 0x8ab   :  { %6190 = vmatmul.mubr.msk.bf16.vlgmr.msra.gmra.mrb[20].mxu1 %vm2714_vm2, %v8726_v10  ;;  %6192 = vmatmul.mubr.msk.bf16.vlgmr.msra.gmra.mrb[32].mxu0 %vm2714_vm2, %v8726_v10 }
 0x8ac   :  { %6738 = vmatpush3.bf16.msra.mxu1 %v7680_v63  ;;  %6770 = vmatpush3.bf16.msra.mxu0 %v7944_v23  ;;  %v10373_v63 = vld [vmem:[#allocation15_spill] sm:$0xff] }
 0x8ad   :  { %6740 = vmatprep.subr.bf16.mxu1 %v7682_v19  ;;  %6772 = vmatprep.subr.bf16.mxu0 %v7947_v61  ;;  %v10381_v23 = vld [vmem:[#allocation23_spill] sm:$0xff]  ;;  %v10382_v61 = vld [vmem:[#allocation24_spill] sm:$0xff] }
 0x8b0   :  { %6742 = vmatpush3.bf16.msra.mxu1 %v7698_v7  ;;  %6774 = vmatpush3.bf16.msra.mxu0 %v7964_v1  ;;  %v10383_v1 = vld [vmem:[#allocation25_spill] sm:$0xff] }
 0x8b1   :  { %6744 = vmatprep.subr.bf16.mxu1 %v7701_v14  ;;  %6776 = vmatprep.subr.bf16.mxu0 %v7967_v55  ;;  %v10384_v55 = vld [vmem:[#allocation26_spill] sm:$0xff] }
 0x8b4   :  { %6746 = vmatpush3.bf16.msra.mxu1 %v7716_v57  ;;  %6778 = vmatpush3.bf16.msra.mxu0 %v7985_v34  ;;  %v10385_v34 = vld [vmem:[#allocation27_spill] sm:$0xff] }
 0x8b5   :  { %6748 = vmatprep.subr.bf16.mxu1 %v7719_v48  ;;  %6780 = vmatprep.subr.bf16.mxu0 %v7998_v20  ;;  %v10386_v20 = vld [vmem:[#allocation28_spill] sm:$0xff] }
 0x8b8   :  { %6750 = vmatpush3.bf16.msra.mxu1 %v7734_v35  ;;  %6782 = vmatpush3.bf16.msra.mxu0 %v8011_v8  ;;  %v10387_v8 = vld [vmem:[#allocation29_spill] sm:$0xff] }
 0x8b9   :  { %6752 = vmatprep.subr.bf16.mxu1 %v7737_v42  ;;  %6784 = vmatprep.subr.bf16.mxu0 %v8022_v26  ;;  %v10374_v42 = vld [vmem:[#allocation16_spill] sm:$0xff] }
 0x8bc   :  { %6754 = vmatpush3.bf16.msra.mxu1 %v7752_v58  ;;  %6786 = vmatpush3.bf16.msra.mxu0 %v8030_v54  ;;  %v10375_v58 = vld [vmem:[#allocation17_spill] sm:$0xff]  ;;  %v10388_v54 = vld [vmem:[#allocation30_spill] sm:$0xff] }
 0x8bd   :  { %6756 = vmatprep.subr.bf16.mxu1 %v7755_v18  ;;  %6788 = vmatprep.subr.bf16.mxu0 %v8039_v16  ;;  %v10376_v18 = vld [vmem:[#allocation18_spill] sm:$0xff] }
 0x8c0   :  { %6758 = vmatpush3.bf16.msra.mxu1 %v7770_v53  ;;  %6790 = vmatpush3.bf16.msra.mxu0 %v8048_v60  ;;  %v10377_v53 = vld [vmem:[#allocation19_spill] sm:$0xff] }
 0x8c1   :  { %6760 = vmatprep.subr.bf16.mxu1 %v7773_v6  ;;  %6792 = vmatprep.subr.bf16.mxu0 %v8057_v17  ;;  %v10378_v6 = vld [vmem:[#allocation20_spill] sm:$0xff] }
 0x8c4   :  { %6762 = vmatpush3.bf16.msra.mxu1 %v7788_v30  ;;  %6794 = vmatpush3.bf16.msra.mxu0 %v10338_v22  ;;  %v10379_v30 = vld [vmem:[#allocation21_spill] sm:$0xff] }
 0x8c5   :  { %6764 = vmatprep.subr.bf16.mxu1 %v10337_v28  ;;  %6796 = vmatprep.subr.bf16.mxu0 %v10339_v32 }
 0x8c8   :  { %6766 = vmatpush3.bf16.msra.mxu1 %v10340_v4  ;;  %6798 = vmatpush3.bf16.msra.mxu0 %v10373_v63  ;;  %v6194_v63 = vld [vmem:[%s10210_s5 + $0x10] sm:$0xff]  ;;  %s7020_s5 = smov 55  }
 0x8c9   :  { %6800 = vmatprep.subr.bf16.mxu1 %v10372_v21 }
 0x95d   :  { %v8849_v19 = vpop.f32.mrb[16].mxu1 }
 0x95e   :  { %v8851_v7 = vpop.f32.mrb[17].mxu1  ;;  %v3750_v48 = vmul.f32 %v8849_v19, %v8849_v19 }
 0x95f   :  { %v3751_v14 = vmul.f32 %v8851_v7, %v8851_v7  ;;  %v3665_v57 = vpop.f32.mrb[18].mxu1  ;;  %3820 = vmatprep.mubr.f32.mxu1 %v8851_v7 }
 0x960   :  { %v3666_v35 = vpop.f32.mrb[19].mxu1  ;;  %3821 = vmatmul.mubr.f32.vlgmr.msra.gmra.mrb[24].mxu1 %v8849_v19 }
 0x961   :  { %6802 = vmatpush3.bf16.msra.mxu1 %v10374_v42  ;;  %3825 = vmatprep.mubr.f32.mxu1 %v3751_v14  ;;  %v6910_v42 = vpop.permute.xlu1 %6909 }
 0x962   :  { %6804 = vmatprep.subr.bf16.mxu1 %v10375_v58  ;;  %v7018_v58 = vmov 1966171168  }
 0x964   :  { %3826 = vmatmul.mubr.f32.gmra.mrb[26].mxu1 %v3750_v48  ;;  %v6905_v48 = vpop.permute.xlu0 %6904 }
 0x965   :  { %6806 = vmatpush3.bf16.msra.mxu1 %v10376_v18  ;;  %v4065_v18 = vunpack.c.l.s4 %v7018_v58 }
 0x966   :  { %6808 = vmatprep.subr.bf16.mxu1 %v10377_v53  ;;  %v6912_v53 = vunpack.i.h.bf16 %v6910_v42 }
 0x968   :  { %v6915_v35 = vpop.permute.xlu0 %6914 }
 0x969   :  { %6810 = vmatpush3.bf16.msra.mxu1 %v10378_v6  ;;  %v6911_v6 = vunpack.i.l.bf16 %v6910_v42 }
 0x96a   :  { %6812 = vmatprep.subr.bf16.mxu1 %v10379_v30 }
 0x96d   :  { %6814 = vmatpush3.bf16.msra.mxu1 %v10380_v50  ;;  %v6907_v50 = vunpack.i.h.bf16 %v6905_v48 }
 0x96e   :  { %6816 = vmatprep.subr.bf16.mxu1 %v10381_v23  ;;  %v6906_v23 = vunpack.i.l.bf16 %v6905_v48 }
 0x971   :  { %6818 = vmatpush3.bf16.msra.mxu1 %v10382_v61  ;;  %v4066_v61 = vunpack.c.0.s8 %v4065_v18 }
 0x972   :  { %6820 = vmatprep.subr.bf16.mxu1 %v10383_v1 }
 0x975   :  { %6822 = vmatpush3.bf16.msra.mxu1 %v10384_v55 }
 0x976   :  { %6824 = vmatprep.subr.bf16.mxu1 %v10385_v34 }
 0x979   :  { %6826 = vmatpush3.bf16.msra.mxu1 %v10386_v20 }
 0x97a   :  { %6828 = vmatprep.subr.bf16.mxu1 %v10387_v8  ;;  %v4044_v8 = vsel %vm1452_vm11, %v6911_v6, %v6912_v53 }
 0x97d   :  { %6830 = vmatpush3.bf16.msra.mxu1 %v10388_v54  ;;  %v6916_v54 = vunpack.i.l.bf16 %v6915_v35 }
 0x97e   :  { %v8873_v26 = vpop.f32.mrb[20].mxu1  ;;  %v8878_v60 = vpop.f32.mrb[32].mxu0 }
 0x97f   :  { %v8876_v16 = vpop.f32.mrb[21].mxu1  ;;  %v3745_v22 = vpop.f32.mrb[33].mxu0  ;;  %v3752_v31 = vmul.f32 %v8873_v26, %v8873_v26  ;;  %v3754_v52 = vmul.f32 %v8878_v60, %v8878_v60 }
 0x980   :  { %v3753_v17 = vmul.f32 %v8876_v16, %v8876_v16  ;;  %v3706_v28 = vpop.f32.mrb[22].mxu1  ;;  %3895 = vmatprep.mubr.f32.mxu0 %v8876_v16  ;;  %v3755_v32 = vmul.f32 %v3745_v22, %v3745_v22  ;;  %v3747_v38 = vpop.f32.mrb[34].mxu0  ;;  %3970 = vmatprep.mubr.f32.mxu1 %v3745_v22 }
 0x981   :  { %v3707_v4 = vpop.f32.mrb[23].mxu1  ;;  %3896 = vmatmul.mubr.f32.vlgmr.msra.gmra.mrb[36].mxu0 %v8873_v26  ;;  %v3748_v10 = vpop.f32.mrb[35].mxu0  ;;  %3971 = vmatmul.mubr.f32.vlgmr.msra.gmra.mrb[28].mxu1 %v8878_v60  ;;  %v4042_v38 = vsel %vm1452_vm11, %v6906_v23, %v6907_v50 }
 0x982   :  { %3900 = vmatprep.mubr.f32.mxu0 %v3753_v17  ;;  %3975 = vmatprep.mubr.f32.mxu1 %v3755_v32  ;;  %v4043_v10 = vsel %vm1452_vm11, %v6907_v50, %v6911_v6 }
 0x985   :  { %3901 = vmatmul.mubr.f32.gmra.mrb[38].mxu0 %v3752_v31  ;;  %3976 = vmatmul.mubr.f32.gmra.mrb[30].mxu1 %v3754_v52  ;;  %v6917_v31 = vunpack.i.h.bf16 %v6915_v35 }
 0xa33   :  { %v6461_v24 = vpop.f32.mrb[24].mxu1 }
 0xa34   :  { %v6462_v47 = vpop.f32.mrb[25].mxu1 }
 0xa35   :  { %v6463_v37 = vadd.f32 %v6462_v47, %v6461_v24  ;;  %v10389_v24 = vld [vmem:[#allocation9_spill] sm:$0xff]  ;;  %v4045_v47 = vsel %vm1452_vm11, %v6912_v53, %v6916_v54 }
 0xa37   :  { %v6464_v33 = vpop.f32.mrb[26].mxu1 }
 0xa38   :  { %v6465_v5 = vpop.f32.mrb[27].mxu1 }
 0xa39   :  { %v6466_v51 = vadd.f32 %v6465_v5, %v6464_v33 }
 0xa54   :  { %v6499_v15 = vpop.f32.mrb[36].mxu0  ;;  %v6537_v62 = vpop.f32.mrb[28].mxu1 }
 0xa55   :  { %v6500_v59 = vpop.f32.mrb[37].mxu0  ;;  %v6538_v12 = vpop.f32.mrb[29].mxu1 }
 0xa56   :  { %v6501_v46 = vadd.f32 %v6500_v59, %v6499_v15  ;;  %v6539_v49 = vadd.f32 %v6538_v12, %v6537_v62  ;;  %v4046_v59 = vsel %vm1452_vm11, %v6916_v54, %v6917_v31  ;;  %vm5311_vm11 = vcmask 39936  }
 0xa58   :  { %v3898_v45 = vadd.f32 %v6501_v46, %v6463_v37  ;;  %v6502_v3 = vpop.f32.mrb[38].mxu0  ;;  %v6540_v44 = vpop.f32.mrb[30].mxu1 }
 0xa59   :  { %v6503_v11 = vpop.f32.mrb[39].mxu0  ;;  %v6541_v25 = vpop.f32.mrb[31].mxu1 }
 0xa5a   :  { %v3973_v13 = vadd.f32 %v6539_v49, %v3898_v45  ;;  %v6504_v56 = vadd.f32 %v6503_v11, %v6502_v3  ;;  %v6542_v43 = vadd.f32 %v6541_v25, %v6540_v44 }
 0xa5c   :  { %v3981_v2 = vmul.f32 0.001953125, %v3973_v13  ;;  %v3903_v0 = vadd.f32 %v6504_v56, %v6466_v51  ;;  %v10390_v13 = vld [vmem:[#allocation31_spill] sm:$0xff] }
 0xa5e   :  { %v3978_v27 = vadd.f32 %v6542_v43, %v3903_v0  ;;  %v3983_v41 = vmul.f32 %v3981_v2, %v3981_v2 }
 0xa60   :  { %v3982_v40 = vmul.f32 0.001953125, %v3978_v27 }
 0xa62   :  { %v3984_v9 = vsub.f32 %v3982_v40, %v3983_v41 }
 0xa64   :  { %v3987_v39 = vadd.f32 1e-05, %v3984_v9 }
 0xa66   :  { %6955 = vrsqrt.f32 %v3987_v39 }
 0xa70   :  { %v6956_v36 = vpop.eup %6955 }
 0xa71   :  { %v3989_v21 = vmul.f32 %v6956_v36, %v6193_v29 }
 0xa73   :  { %3996 = vperm.xlu0 %6902, %v3989_v21   ;;  %v3992_v14 = vmul.f32 %v3989_v21, %v3981_v2 }
 0xa75   :  { %v3993_v57 = vsub.f32 %v6194_v63, %v3992_v14 }
 0xa77   :  { %4006 = vperm.xlu1 %6901, %v3993_v57  }
 0xaf2   :  { %v3997_v30 = vpop.permute.xlu0 %3996 }
 0xaf3   :  { %v3999_v1 = vmul.f32 %v3997_v30, %v8849_v19  ;;  %v4000_v55 = vmul.f32 %v3997_v30, %v8851_v7  ;;  %v4001_v34 = vmul.f32 %v3997_v30, %v8873_v26  ;;  %v4002_v20 = vmul.f32 %v3997_v30, %v8876_v16 }
 0xaf4   :  { %v4003_v19 = vmul.f32 %v3997_v30, %v8878_v60  ;;  %v8904_v16 = vsub.s32 %v4066_v61, %v10389_v24 }
 0xaf6   :  { %v4007_v17 = vpop.permute.xlu1 %4006 }
 0xaf7   :  { %v4009_v28 = vadd.f32 %v4007_v17, %v3999_v1  ;;  %v4010_v22 = vadd.f32 %v4007_v17, %v4000_v55  ;;  %v4011_v32 = vadd.f32 %v4007_v17, %v4001_v34  ;;  %v4012_v4 = vadd.f32 %v4007_v17, %v4002_v20 }
 0xaf8   :  { %v4013_v37 = vadd.f32 %v4007_v17, %v4003_v19 }
 0xaf9   :  { %v4052_v7 = vadd.f32 %v4042_v38, %v4009_v28  ;;  %v4053_v52 = vadd.f32 %v4043_v10, %v4010_v22  ;;  %v4054_v26 = vadd.f32 %v4044_v8, %v4011_v32  ;;  %v4055_v33 = vadd.f32 %v4045_v47, %v4012_v4 }
 0xafa   :  { %v4056_v46 = vadd.f32 %v4046_v59, %v4013_v37 }
 0xafb   :  { %v4057_v5 = vmax.f32 %v4052_v7, 0.0  ;;  %v8907_v51 = vmax.f32 %v4053_v52, 0.0  ;;  %v8909_v15 = vmax.f32 %v4054_v26, 0.0  ;;  %v8917_v45 = vmax.f32 %v4055_v33, 0.0 }
 0xafc   :  { %v8933_v43 = vmax.f32 %v4056_v46, 0.0 }
 0xafd   :  { %v4070_v62 = vrot.slane %v4057_v5, %v8904_v16  ;;  %v4338_v60 = vcombine.low %v4057_v5, %v8907_v51  ;;  %v4339_v12 = vcombine.high %v4057_v5, %v8907_v51  ;;  %v4783_v49 = vcombine.low %v8907_v51, %v8909_v15 }
 0xafe   :  { %v8924_v44 = vrot.slane %v8909_v15, %v8904_v16  ;;  %v4784_v0 = vcombine.high %v8907_v51, %v8909_v15  ;;  %v5343_v27 = vrot.slane %v8917_v45, %v8904_v16  ;;  %v5165_v39 = vcombine.low %v8909_v15, %v8917_v45 }
 0xaff   :  { %v8920_v3 = vrot.slane %v4070_v62, %v8904_v16  ;;  %v4078_v11 = vcombine.high %v4070_v62, %v4070_v62  ;;  %v5166_v29 = vcombine.high %v8909_v15, %v8917_v45  ;;  %v4063_v36 = vcombine.high %v4057_v5, %v4057_v5 }
 0xb00   :  { %v4969_v41 = vcombine.high %v8924_v44, %v8924_v44  ;;  %v8950_v40 = vrot.slane %v4784_v0, %v8904_v16  ;;  %v8953_v9 = vrot.slane %v5343_v27, %v8904_v16  ;;  %v5788_v63 = vrot.slane %v8933_v43, %v8904_v16  ;;  %v10391_v0 = vld [vmem:[#allocation32_spill] sm:$0xff] }
 0xb01   :  { %v8928_v56 = vrot.slane %v8920_v3, %v10390_v13  ;;  %v8931_v25 = vrot.slane %v4078_v11, %v8904_v16  ;;  %v5351_v14 = vcombine.high %v5343_v27, %v5343_v27  ;;  %v8971_v48 = vrot.slane %v5165_v39, %v8904_v16 }
 0xb02   :  { %v8960_v21 = vrot.slane %v4969_v41, %v8904_v16  ;;  %v8968_v57 = vrot.slane %v8950_v40, %v8904_v16  ;;  %v8974_v35 = vrot.slane %v5166_v29, %v8904_v16  ;;  %v8977_v42 = vrot.slane %v5788_v63, %v8904_v16 }
 0xb03   :  { %4144 = vrot.lane.b32.xlu1 %v8928_v56, %s7015_s26  ;;  %v8939_v2 = vrot.slane %v8931_v25, %v10390_v13  ;;  %v8980_v58 = vrot.slane %v5351_v14, %v8904_v16  ;;  %v8986_v18 = vrot.slane %v8971_v48, %v8904_v16  ;;  %v5610_v6 = vcombine.low %v8917_v45, %v8933_v43 }
 0xb04   :  { %v8990_v53 = vrot.slane %v8974_v35, %v8904_v16  ;;  %v4077_v30 = vrot.slane %v4063_v36, %v8904_v16  ;;  %v5611_v50 = vcombine.high %v8917_v45, %v8933_v43  ;;  %v5796_v61 = vcombine.high %v5788_v63, %v5788_v63 }
 0xb05   :  { %4146 = vrot.lane.b32.xlu0 %v8939_v2, %s7015_s26  ;;  %v9000_v23 = vrot.slane %v5610_v6, %v8904_v16  ;;  %v4346_v1 = vrot.slane %v4338_v60, %v8904_v16  ;;  %v4353_v8 = vrot.slane %v4339_v12, %v8904_v16  ;;  %v4509_v32 = vcombine.high %v8907_v51, %v8907_v51 }
 0xb06   :  { %v9004_v55 = vrot.slane %v4077_v30, %v8904_v16  ;;  %v9007_v34 = vrot.slane %v5611_v50, %v8904_v16  ;;  %v4079_v20 = vcombine.high %v4077_v30, %v4077_v30  ;;  %v9017_v17 = vrot.slane %v5796_v61, %v8904_v16 }
 0xb07   :  { %4177 = vrot.lane.b32.xlu1 %v8928_v56, %s7016_s27  ;;  %v9014_v54 = vrot.slane %v9000_v23, %v8904_v16  ;;  %v4354_v4 = vcombine.high %v4346_v1, %v4346_v1  ;;  %v4516_v38 = vrot.slane %v8907_v51, %v8904_v16  ;;  %v4523_v10 = vrot.slane %v4509_v32, %v8904_v16 }
 0xb08   :  { %v9021_v28 = vrot.slane %v9007_v34, %v8904_v16  ;;  %v9024_v22 = vrot.slane %v4079_v20, %v8904_v16  ;;  %v4355_v31 = vcombine.high %v4353_v8, %v4353_v8  ;;  %v9036_v19 = vrot.slane %v4783_v49, %v8904_v16 }
 0xb09   :  { %4179 = vrot.lane.b32.xlu0 %v8939_v2, %s7016_s27  ;;  %v9039_v7 = vrot.slane %v4354_v4, %v8904_v16  ;;  %v9044_v52 = vrot.slane %v4523_v10, %v8904_v16  ;;  %v4525_v24 = vcombine.high %v4523_v10, %v4523_v10  ;;  %v9052_v47 = vrot.slane %v4516_v38, %v8904_v16 }
 0xb0a   :  { %v9047_v26 = vrot.slane %v4355_v31, %v8904_v16  ;;  %v4954_v33 = vcombine.high %v8909_v15, %v8909_v15  ;;  %v4799_v5 = vcombine.high %v9036_v19, %v9036_v19  ;;  %v9064_v51 = vrot.slane %v4346_v1, %v8904_v16 }
 0xb0b   :  { %4209 = vrot.lane.b32.xlu1 %v8928_v56, %s7019_s4  ;;  %v9055_v37 = vrot.slane %v4525_v24, %v8904_v16  ;;  %v4800_v60 = vcombine.high %v8950_v40, %v8950_v40  ;;  %v5336_v15 = vcombine.high %v8917_v45, %v8917_v45  ;;  %v4561_v46 = vrot.slane %v9052_v47, %v10390_v13 }
 0xb0c   :  { %v4968_v59 = vrot.slane %v4954_v33, %v8904_v16  ;;  %v9068_v62 = vrot.slane %v4799_v5, %v8904_v16  ;;  %v4524_v49 = vcombine.high %v4516_v38, %v4516_v38  ;;  %v4395_v45 = vrot.slane %v9064_v51, %v10391_v0 }
 0xb0d   :  { %4211 = vrot.lane.b32.xlu0 %v8939_v2, %s7019_s4  ;;  %v9082_v11 = vrot.slane %v4800_v60, %v8904_v16  ;;  %v5181_v41 = vcombine.high %v8971_v48, %v8971_v48  ;;  %v5781_v40 = vcombine.high %v8933_v43, %v8933_v43  ;;  %v5182_v63 = vcombine.high %v8974_v35, %v8974_v35 }
 0xb0e   :  { %v9079_v12 = vrot.slane %v4968_v59, %v8904_v16  ;;  %v4970_v27 = vcombine.high %v4968_v59, %v4968_v59  ;;  %v9111_v14 = vrot.slane %v4524_v49, %v8904_v16  ;;  %v5626_v35 = vcombine.high %v9000_v23, %v9000_v23 }
 0xb0f   :  { %4241 = vrot.lane.b32.xlu1 %v8928_v56, %s7020_s5  ;;  %v9103_v36 = vrot.slane %v5181_v41, %v8904_v16  ;;  %v9114_v48 = vrot.slane %v5182_v63, %v8904_v16  ;;  %v5795_v6 = vrot.slane %v5781_v40, %v8904_v16  ;;  %v5627_v1 = vcombine.high %v9007_v34, %v9007_v34 }
 0xb10   :  { %v9100_v29 = vrot.slane %v4970_v27, %v8904_v16  ;;  %v4565_v20 = vrot.slane %v9111_v14, %v10390_v13  ;;  %v9147_v4 = vrot.slane %v8924_v44, %v8904_v16  ;;  %v9158_v44 = vrot.slane %v9036_v19, %v8904_v16 }
 0xb11   :  { %4243 = vrot.lane.b32.xlu0 %v8939_v2, %s7020_s5  ;;  %v9121_v50 = vrot.slane %v5795_v6, %v8904_v16  ;;  %v9135_v23 = vrot.slane %v5627_v1, %v8904_v16  ;;  %v5797_v32 = vcombine.high %v5795_v6, %v5795_v6  ;;  %v4872_v31 = vrot.slane %v8968_v57, %v10391_v0 }
 0xb12   :  { %v5006_v38 = vrot.slane %v9147_v4, %v10390_v13  ;;  %v4840_v10 = vrot.slane %v9158_v44, %v10391_v0  ;;  %v5010_v19 = vrot.slane %v8960_v21, %v10390_v13  ;;  %v5222_v24 = vrot.slane %v8986_v18, %v10391_v0 }
 0xb13   :  { %4273 = vrot.lane.b32.xlu1 %v8928_v56, %s7021_s25  ;;  %v9140_v34 = vrot.slane %v5797_v32, %v8904_v16  ;;  %v5254_v33 = vrot.slane %v8990_v53, %v10391_v0  ;;  %v5833_v5 = vrot.slane %v8977_v42, %v10390_v13  ;;  %v5392_v59 = vrot.slane %v8980_v58, %v10390_v13 }
 0xb14   :  { %v4108_v60 = vcombine.high %v8920_v3, %v8920_v3  ;;  %v9217_v3 = vrot.slane %v9004_v55, %v10390_v13  ;;  %v5837_v40 = vrot.slane %v9017_v17, %v10390_v13 }
 0xb15   :  { %4275 = vrot.lane.b32.xlu0 %v8939_v2, %s7021_s25 }
 0xb17   :  { %4305 = vrot.lane.b32.xlu1 %v8928_v56, %s7017_s6  ;;  %v5350_v56 = vrot.slane %v5336_v15, %v8904_v16  ;;  %v9208_v15 = vrot.slane %v4108_v60, %v10390_v13 }
 0xb19   :  { %4307 = vrot.lane.b32.xlu0 %v8939_v2, %s7017_s6  ;;  %v9089_v2 = vrot.slane %v4353_v8, %v8904_v16  ;;  %v9096_v39 = vrot.slane %v5350_v56, %v8904_v16  ;;  %v5352_v30 = vcombine.high %v5350_v56, %v5350_v56  ;;  %v9132_v8 = vrot.slane %v5626_v35, %v8904_v16 }
 0xb1b   :  { %4590 = vrot.lane.b32.xlu1 %v4561_v46, %s7022_s28  ;;  %v4427_v43 = vrot.slane %v9089_v2, %v10391_v0  ;;  %v9124_v61 = vrot.slane %v5352_v30, %v8904_v16  ;;  %v5388_v16 = vrot.slane %v8953_v9, %v10390_v13 }
 0xb1d   :  { %4454 = vrot.lane.b32.xlu0 %v4395_v45, %s7023_s29  ;;  %v5699_v45 = vrot.slane %v9021_v28, %v10391_v0 }
 0xb1f   :  { %4622 = vrot.lane.b32.xlu1 %v4561_v46, %s7024_s1 }
 0xb21   :  { %4470 = vrot.lane.b32.xlu0 %v4427_v43, %s7023_s29 }
 0xb23   :  { %4654 = vrot.lane.b32.xlu1 %v4561_v46, %s7025_s30 }
 0xb25   :  { %4592 = vrot.lane.b32.xlu0 %v4565_v20, %s7022_s28 }
 0xb27   :  { %4686 = vrot.lane.b32.xlu1 %v4561_v46, %s7026_s9 }
 0xb29   :  { %4624 = vrot.lane.b32.xlu0 %v4565_v20, %s7024_s1 }
 0xb2b   :  { %4718 = vrot.lane.b32.xlu1 %v4561_v46, %s7027_s10 }
 0xb2d   :  { %4656 = vrot.lane.b32.xlu0 %v4565_v20, %s7025_s30 }
 0xb2f   :  { %4750 = vrot.lane.b32.xlu1 %v4561_v46, %s10289_s7  ;;  %v5667_v46 = vrot.slane %v9014_v54, %v10391_v0 }
 0xb31   :  { %4688 = vrot.lane.b32.xlu0 %v4565_v20, %s7026_s9 }
 0xb33   :  { %5035 = vrot.lane.b32.xlu1 %v5006_v38, %s7029_s11 }
 0xb35   :  { %4720 = vrot.lane.b32.xlu0 %v4565_v20, %s7027_s10 }
 0xb37   :  { %5067 = vrot.lane.b32.xlu1 %v5006_v38, %s10291_s13 }
 0xb39   :  { %4752 = vrot.lane.b32.xlu0 %v4565_v20, %s10289_s7 }
 0xb3b   :  { %5099 = vrot.lane.b32.xlu1 %v5006_v38, %s7031_s15 }
 0xb3d   :  { %4899 = vrot.lane.b32.xlu0 %v4840_v10, %s7032_s16 }
 0xb3f   :  { %5132 = vrot.lane.b32.xlu1 %v5006_v38, %s7033_s17 }
 0xb41   :  { %4915 = vrot.lane.b32.xlu0 %v4872_v31, %s7032_s16  ;;  %v4110_v31 = vcombine.high %v8931_v25, %v8931_v25 }
 0xb43   :  { %5417 = vrot.lane.b32.xlu1 %v5388_v16, %s10285_s19 }
 0xb45   :  { %5037 = vrot.lane.b32.xlu0 %v5010_v19, %s7029_s11 }
 0xb47   :  { %5449 = vrot.lane.b32.xlu1 %v5388_v16, %s7035_s20 }
 0xb49   :  { %5069 = vrot.lane.b32.xlu0 %v5010_v19, %s10291_s13 }
 0xb4b   :  { %5481 = vrot.lane.b32.xlu1 %v5388_v16, %s7036_s2 }
 0xb4d   :  { %5101 = vrot.lane.b32.xlu0 %v5010_v19, %s7031_s15 }
 0xb4f   :  { %5513 = vrot.lane.b32.xlu1 %v5388_v16, %s7037_s21 }
 0xb51   :  { %5134 = vrot.lane.b32.xlu0 %v5010_v19, %s7033_s17 }
 0xb53   :  { %5545 = vrot.lane.b32.xlu1 %v5388_v16, %s10287_s22 }
 0xb55   :  { %5281 = vrot.lane.b32.xlu0 %v5222_v24, %s7039_s23  ;;  %v9267_v24 = vrot.slane %v4110_v31, %v10390_v13 }
 0xb57   :  { %5577 = vrot.lane.b32.xlu1 %v5388_v16, %s7040_s0 }
 0xb59   :  { %5297 = vrot.lane.b32.xlu0 %v5254_v33, %s7039_s23 }
 0xb5b   :  { %5862 = vrot.lane.b32.xlu1 %v5833_v5, %s7041_s18 }
 0xb5d   :  { %5419 = vrot.lane.b32.xlu0 %v5392_v59, %s10285_s19  ;;  %s7046_s19 = smov 27  }
 0xb5f   :  { %5894 = vrot.lane.b32.xlu1 %v5833_v5, %s7042_s3 }
 0xb61   :  { %5451 = vrot.lane.b32.xlu0 %v5392_v59, %s7035_s20 }
 0xb63   :  { %5926 = vrot.lane.b32.xlu1 %v5833_v5, %s7043_s24 }
 0xb65   :  { %5483 = vrot.lane.b32.xlu0 %v5392_v59, %s7036_s2 }
 0xb67   :  { %5958 = vrot.lane.b32.xlu1 %v5833_v5, %s10293_s12 }
 0xb69   :  { %5515 = vrot.lane.b32.xlu0 %v5392_v59, %s7037_s21 }
 0xb6b   :  { %5990 = vrot.lane.b32.xlu1 %v5833_v5, %s7045_s14 }
 0xb6d   :  { %5547 = vrot.lane.b32.xlu0 %v5392_v59, %s10287_s22  ;;  %s7047_s22 = smov 7  }
 0xb6f   :  { %6022 = vrot.lane.b32.xlu1 %v5833_v5, %s7046_s19  ;;  %v9276_v5 = vrot.slane %v9024_v22, %v10390_v13 }
 0xb71   :  { %5579 = vrot.lane.b32.xlu0 %v5392_v59, %s7040_s0 }
 0xb73   :  { %4148 = vrot.lane.b32.xlu1 %v9208_v15, %s7015_s26 }
 0xb75   :  { %v4145_v49 = vpop.permute.xlu1 %4144  ;;  %5726 = vrot.lane.b32.xlu0 %v5667_v46, %s7047_s22 }
 0xb76   :  { %4169 = vst.msk [vmem:[#allocation6] sm:$0x1] %vm4168_vm1, %v4145_v49 }
 0xb77   :  { %v4147_v56 = vpop.permute.xlu0 %4146  ;;  %4152 = vrot.lane.b32.xlu1 %v9217_v3, %s7015_s26 }
 0xb78   :  { %4170 = vst.msk [vmem:[#allocation6 + $0x10] sm:$0x1] %vm4168_vm1, %v4147_v56 }
 0xb79   :  { %v4178_v27 = vpop.permute.xlu1 %4177  ;;  %5742 = vrot.lane.b32.xlu0 %v5699_v45, %s7047_s22 }
 0xb7a   :  { %4201 = vst.msk [vmem:[#allocation6 + $0x1] sm:$0x1] %vm4168_vm1, %v4178_v27 }
 0xb7b   :  { %v4180_v41 = vpop.permute.xlu0 %4179  ;;  %4181 = vrot.lane.b32.xlu1 %v9208_v15, %s7016_s27 }
 0xb7c   :  { %4202 = vst.msk [vmem:[#allocation6 + $0x11] sm:$0x1] %vm4168_vm1, %v4180_v41  ;;  %v4554_v41 = vcombine.high %v9052_v47, %v9052_v47 }
 0xb7d   :  { %v4210_v63 = vpop.permute.xlu1 %4209  ;;  %5864 = vrot.lane.b32.xlu0 %v5837_v40, %s7041_s18 }
 0xb7e   :  { %4233 = vst.msk [vmem:[#allocation6 + $0x2] sm:$0x1] %vm4168_vm1, %v4210_v63 }
 0xb7f   :  { %v4212_v43 = vpop.permute.xlu0 %4211  ;;  %4185 = vrot.lane.b32.xlu1 %v9217_v3, %s7016_s27 }
 0xb80   :  { %4234 = vst.msk [vmem:[#allocation6 + $0x12] sm:$0x1] %vm4168_vm1, %v4212_v43  ;;  %v9310_v43 = vrot.slane %v4554_v41, %v10390_v13 }
 0xb81   :  { %v4242_v6 = vpop.permute.xlu1 %4241  ;;  %5896 = vrot.lane.b32.xlu0 %v5837_v40, %s7042_s3 }
 0xb82   :  { %4265 = vst.msk [vmem:[#allocation6 + $0x3] sm:$0x1] %vm4168_vm1, %v4242_v6 }
 0xb83   :  { %v4244_v30 = vpop.permute.xlu0 %4243  ;;  %4213 = vrot.lane.b32.xlu1 %v9208_v15, %s7019_s4 }
 0xb84   :  { %4266 = vst.msk [vmem:[#allocation6 + $0x13] sm:$0x1] %vm4168_vm1, %v4244_v30  ;;  %v9320_v30 = vrot.slane %v9044_v52, %v10390_v13 }
 0xb85   :  { %v4274_v35 = vpop.permute.xlu1 %4273  ;;  %5928 = vrot.lane.b32.xlu0 %v5837_v40, %s7043_s24 }
 0xb86   :  { %4297 = vst.msk [vmem:[#allocation6 + $0x4] sm:$0x1] %vm4168_vm1, %v4274_v35 }
 0xb87   :  { %v4276_v1 = vpop.permute.xlu0 %4275  ;;  %4217 = vrot.lane.b32.xlu1 %v9217_v3, %s7019_s4 }
 0xb88   :  { %4298 = vst.msk [vmem:[#allocation6 + $0x14] sm:$0x1] %vm4168_vm1, %v4276_v1 }
 0xb89   :  { %v4306_v20 = vpop.permute.xlu1 %4305  ;;  %5960 = vrot.lane.b32.xlu0 %v5837_v40, %s10293_s12 }
 0xb8a   :  { %4329 = vst.msk [vmem:[#allocation6 + $0x5] sm:$0x1] %vm4168_vm1, %v4306_v20 }
 0xb8b   :  { %v4308_v32 = vpop.permute.xlu0 %4307  ;;  %4245 = vrot.lane.b32.xlu1 %v9208_v15, %s7020_s5 }
 0xb8c   :  { %4330 = vst.msk [vmem:[#allocation6 + $0x15] sm:$0x1] %vm4168_vm1, %v4308_v32 }
 0xb8d   :  { %v4591_v38 = vpop.permute.xlu1 %4590  ;;  %5992 = vrot.lane.b32.xlu0 %v5837_v40, %s7045_s14 }
 0xb8e   :  { %4614 = vst.msk [vmem:[#allocation6 + $0x7] sm:$0x1] %vm4168_vm1, %v4591_v38 }
 0xb8f   :  { %4249 = vrot.lane.b32.xlu1 %v9217_v3, %s7020_s5  ;;  %v9256_v10 = vpop.permute.xlu0 %4454 }
 0xb91   :  { %v4623_v16 = vpop.permute.xlu1 %4622  ;;  %6024 = vrot.lane.b32.xlu0 %v5837_v40, %s7046_s19 }
 0xb92   :  { %4646 = vst.msk [vmem:[#allocation6 + $0x8] sm:$0x1] %vm4168_vm1, %v4623_v16 }
 0xb93   :  { %4277 = vrot.lane.b32.xlu1 %v9208_v15, %s7021_s25  ;;  %v9264_v19 = vpop.permute.xlu0 %4470 }
 0xb95   :  { %v4655_v33 = vpop.permute.xlu1 %4654  ;;  %4150 = vrot.lane.b32.xlu0 %v9267_v24, %s7015_s26 }
 0xb96   :  { %4678 = vst.msk [vmem:[#allocation6 + $0x9] sm:$0x1] %vm4168_vm1, %v4655_v33 }
 0xb97   :  { %4281 = vrot.lane.b32.xlu1 %v9217_v3, %s7021_s25  ;;  %v4593_v25 = vpop.permute.xlu0 %4592 }
 0xb98   :  { %4615 = vst.msk [vmem:[#allocation6 + $0x17] sm:$0x1] %vm4168_vm1, %v4593_v25 }
 0xb99   :  { %v4687_v59 = vpop.permute.xlu1 %4686  ;;  %4154 = vrot.lane.b32.xlu0 %v9276_v5, %s7015_s26 }
 0xb9a   :  { %4710 = vst.msk [vmem:[#allocation6 + $0xa] sm:$0x1] %vm4168_vm1, %v4687_v59 }
 0xb9b   :  { %4309 = vrot.lane.b32.xlu1 %v9208_v15, %s7017_s6  ;;  %v4625_v60 = vpop.permute.xlu0 %4624  ;;  %v4391_v15 = vrot.slane %v9064_v51, %v10390_v13 }
 0xb9c   :  { %4647 = vst.msk [vmem:[#allocation6 + $0x18] sm:$0x1] %vm4168_vm1, %v4625_v60 }
 0xb9d   :  { %v4719_v46 = vpop.permute.xlu1 %4718  ;;  %4183 = vrot.lane.b32.xlu0 %v9267_v24, %s7016_s27 }
 0xb9e   :  { %4742 = vst.msk [vmem:[#allocation6 + $0xb] sm:$0x1] %vm4168_vm1, %v4719_v46  ;;  %v9361_v46 = vcombine.high %v9064_v51, %v9064_v51 }
 0xb9f   :  { %4313 = vrot.lane.b32.xlu1 %v9217_v3, %s7017_s6  ;;  %v4657_v49 = vpop.permute.xlu0 %4656  ;;  %v4423_v3 = vrot.slane %v9089_v2, %v10390_v13 }
 0xba0   :  { %4679 = vst.msk [vmem:[#allocation6 + $0x19] sm:$0x1] %vm4168_vm1, %v4657_v49 }
 0xba1   :  { %v4751_v56 = vpop.permute.xlu1 %4750  ;;  %4187 = vrot.lane.b32.xlu0 %v9276_v5, %s7016_s27 }
 0xba2   :  { %4774 = vst.msk [vmem:[#allocation6 + $0xc] sm:$0x1] %vm4168_vm1, %v4751_v56  ;;  %v4411_v56 = vrot.slane %v9361_v46, %v10391_v0 }
 0xba3   :  { %v4689_v45 = vpop.permute.xlu0 %4688  ;;  %4452 = vrot.lane.b32.xlu1 %v4391_v15, %s7023_s29 }
 0xba4   :  { %4711 = vst.msk [vmem:[#allocation6 + $0x1a] sm:$0x1] %vm4168_vm1, %v4689_v45  ;;  %v4435_v45 = vrot.slane %v9047_v26, %v10391_v0 }
 0xba5   :  { %v5036_v27 = vpop.permute.xlu1 %5035  ;;  %4215 = vrot.lane.b32.xlu0 %v9267_v24, %s7019_s4 }
 0xba6   :  { %5059 = vst.msk [vmem:[#allocation6 + $0xe] sm:$0x1] %vm4168_vm1, %v5036_v27  ;;  %v9382_v27 = vcombine.high %v9089_v2, %v9089_v2 }
 0xba7   :  { %v4721_v40 = vpop.permute.xlu0 %4720  ;;  %4468 = vrot.lane.b32.xlu1 %v4423_v3, %s7023_s29 }
 0xba8   :  { %4743 = vst.msk [vmem:[#allocation6 + $0x1b] sm:$0x1] %vm4168_vm1, %v4721_v40  ;;  %v4443_v40 = vrot.slane %v9382_v27, %v10391_v0 }
 0xba9   :  { %v5068_v63 = vpop.permute.xlu1 %5067  ;;  %4219 = vrot.lane.b32.xlu0 %v9276_v5, %s7019_s4 }
 0xbaa   :  { %5091 = vst.msk [vmem:[#allocation6 + $0xf] sm:$0x1] %vm4168_vm1, %v5068_v63  ;;  %v4556_v63 = vcombine.high %v9111_v14, %v9111_v14 }
 0xbab   :  { %v4753_v6 = vpop.permute.xlu0 %4752  ;;  %4594 = vrot.lane.b32.xlu1 %v9310_v43, %s7022_s28 }
 0xbac   :  { %4775 = vst.msk [vmem:[#allocation6 + $0x1c] sm:$0x1] %vm4168_vm1, %v4753_v6 }
 0xbad   :  { %v5100_v47 = vpop.permute.xlu1 %5099  ;;  %4247 = vrot.lane.b32.xlu0 %v9267_v24, %s7020_s5 }
 0xbae   :  { %5124 = vst.msk [vmem:[#allocation6 + $0x80] sm:$0x1] %vm4168_vm1, %v5100_v47  ;;  %v9398_v47 = vrot.slane %v4556_v63, %v10390_v13 }
 0xbaf   :  { %v9323_v35 = vpop.permute.xlu0 %4899  ;;  %4598 = vrot.lane.b32.xlu1 %v9320_v30, %s7022_s28 }
 0xbb1   :  { %v5133_v1 = vpop.permute.xlu1 %5132  ;;  %4251 = vrot.lane.b32.xlu0 %v9276_v5, %s7020_s5 }
 0xbb2   :  { %5156 = vst.msk [vmem:[#allocation6 + $0x81] sm:$0x1] %vm4168_vm1, %v5133_v1 }
 0xbb3   :  { %v9330_v20 = vpop.permute.xlu0 %4915  ;;  %4626 = vrot.lane.b32.xlu1 %v9310_v43, %s7024_s1 }
 0xbb5   :  { %v5418_v32 = vpop.permute.xlu1 %5417  ;;  %4279 = vrot.lane.b32.xlu0 %v9267_v24, %s7021_s25 }
 0xbb6   :  { %5441 = vst.msk [vmem:[#allocation6 + $0x83] sm:$0x1] %vm4168_vm1, %v5418_v32  ;;  %v9408_v32 = vrot.slane %v9055_v37, %v10390_v13 }
 0xbb7   :  { %v5038_v38 = vpop.permute.xlu0 %5037  ;;  %4630 = vrot.lane.b32.xlu1 %v9320_v30, %s7024_s1 }
 0xbb8   :  { %5060 = vst.msk [vmem:[#allocation6 + $0x1e] sm:$0x1] %vm4168_vm1, %v5038_v38  ;;  %v4836_v38 = vrot.slane %v9158_v44, %v10390_v13 }
 0xbb9   :  { %v5450_v31 = vpop.permute.xlu1 %5449  ;;  %4283 = vrot.lane.b32.xlu0 %v9276_v5, %s7021_s25 }
 0xbba   :  { %5473 = vst.msk [vmem:[#allocation6 + $0x84] sm:$0x1] %vm4168_vm1, %v5450_v31 }
 0xbbb   :  { %v5070_v16 = vpop.permute.xlu0 %5069  ;;  %4658 = vrot.lane.b32.xlu1 %v9310_v43, %s7025_s30 }
 0xbbc   :  { %5092 = vst.msk [vmem:[#allocation6 + $0x1f] sm:$0x1] %vm4168_vm1, %v5070_v16  ;;  %v4868_v16 = vrot.slane %v8968_v57, %v10390_v13 }
 0xbbd   :  { %v5482_v33 = vpop.permute.xlu1 %5481  ;;  %4311 = vrot.lane.b32.xlu0 %v9267_v24, %s7017_s6  ;;  %v4403_v24 = vrot.slane %v9039_v7, %v10391_v0 }
 0xbbe   :  { %5505 = vst.msk [vmem:[#allocation6 + $0x85] sm:$0x1] %vm4168_vm1, %v5482_v33  ;;  %v4999_v33 = vcombine.high %v9147_v4, %v9147_v4 }
 0xbbf   :  { %v5102_v25 = vpop.permute.xlu0 %5101  ;;  %4662 = vrot.lane.b32.xlu1 %v9320_v30, %s7025_s30 }
 0xbc0   :  { %5125 = vst.msk [vmem:[#allocation6 + $0x90] sm:$0x1] %vm4168_vm1, %v5102_v25 }
 0xbc1   :  { %v5514_v59 = vpop.permute.xlu1 %5513  ;;  %4315 = vrot.lane.b32.xlu0 %v9276_v5, %s7017_s6 }
 0xbc2   :  { %5537 = vst.msk [vmem:[#allocation6 + $0x86] sm:$0x1] %vm4168_vm1, %v5514_v59 }
 0xbc3   :  { %v5135_v60 = vpop.permute.xlu0 %5134  ;;  %4690 = vrot.lane.b32.xlu1 %v9310_v43, %s7026_s9 }
 0xbc4   :  { %5157 = vst.msk [vmem:[#allocation6 + $0x91] sm:$0x1] %vm4168_vm1, %v5135_v60  ;;  %v5014_v60 = vrot.slane %v4999_v33, %v10390_v13  ;;  %v9482_v33 = vcombine.high %v9158_v44, %v9158_v44 }
 0xbc5   :  { %v5546_v49 = vpop.permute.xlu1 %5545  ;;  %4458 = vrot.lane.b32.xlu0 %v4403_v24, %s7023_s29 }
 0xbc6   :  { %5569 = vst.msk [vmem:[#allocation6 + $0x87] sm:$0x1] %vm4168_vm1, %v5546_v49  ;;  %v5022_v49 = vrot.slane %v9079_v12, %v10390_v13  ;;  %v4856_v44 = vrot.slane %v9482_v33, %v10391_v0 }
 0xbc7   :  { %v9366_v5 = vpop.permute.xlu0 %5281  ;;  %4694 = vrot.lane.b32.xlu1 %v9320_v30, %s7026_s9 }
 0xbc9   :  { %v5578_v15 = vpop.permute.xlu1 %5577  ;;  %4462 = vrot.lane.b32.xlu0 %v4411_v56, %s7023_s29 }
 0xbca   :  { %5601 = vst.msk [vmem:[#allocation6 + $0x88] sm:$0x1] %vm4168_vm1, %v5578_v15 }
 0xbcb   :  { %v9374_v51 = vpop.permute.xlu0 %5297  ;;  %4722 = vrot.lane.b32.xlu1 %v9310_v43, %s7027_s10 }
 0xbcd   :  { %v5863_v3 = vpop.permute.xlu1 %5862  ;;  %4474 = vrot.lane.b32.xlu0 %v4435_v45, %s7023_s29 }
 0xbce   :  { %5886 = vst.msk [vmem:[#allocation6 + $0x8a] sm:$0x1] %vm4168_vm1, %v5863_v3 }
 0xbcf   :  { %v5420_v41 = vpop.permute.xlu0 %5419  ;;  %4726 = vrot.lane.b32.xlu1 %v9320_v30, %s7027_s10 }
 0xbd0   :  { %5442 = vst.msk [vmem:[#allocation6 + $0x93] sm:$0x1] %vm4168_vm1, %v5420_v41 }
 0xbd1   :  { %v5895_v6 = vpop.permute.xlu1 %5894  ;;  %4478 = vrot.lane.b32.xlu0 %v4443_v40, %s7023_s29 }
 0xbd2   :  { %5918 = vst.msk [vmem:[#allocation6 + $0x8b] sm:$0x1] %vm4168_vm1, %v5895_v6 }
 0xbd3   :  { %v5452_v2 = vpop.permute.xlu0 %5451  ;;  %4754 = vrot.lane.b32.xlu1 %v9310_v43, %s10289_s7 }
 0xbd4   :  { %5474 = vst.msk [vmem:[#allocation6 + $0x94] sm:$0x1] %vm4168_vm1, %v5452_v2 }
 0xbd5   :  { %v5927_v1 = vpop.permute.xlu1 %5926  ;;  %4596 = vrot.lane.b32.xlu0 %v9398_v47, %s7022_s28 }
 0xbd6   :  { %5950 = vst.msk [vmem:[#allocation6 + $0x8c] sm:$0x1] %vm4168_vm1, %v5927_v1 }
 0xbd7   :  { %v5484_v14 = vpop.permute.xlu0 %5483  ;;  %4758 = vrot.lane.b32.xlu1 %v9320_v30, %s10289_s7 }
 0xbd8   :  { %5506 = vst.msk [vmem:[#allocation6 + $0x95] sm:$0x1] %vm4168_vm1, %v5484_v14 }
 0xbd9   :  { %v5959_v43 = vpop.permute.xlu1 %5958  ;;  %4600 = vrot.lane.b32.xlu0 %v9408_v32, %s7022_s28 }
 0xbda   :  { %5982 = vst.msk [vmem:[#allocation6 + $0x8d] sm:$0x1] %vm4168_vm1, %v5959_v43 }
 0xbdb   :  { %v5516_v31 = vpop.permute.xlu0 %5515  ;;  %4897 = vrot.lane.b32.xlu1 %v4836_v38, %s7032_s16 }
 0xbdc   :  { %5538 = vst.msk [vmem:[#allocation6 + $0x96] sm:$0x1] %vm4168_vm1, %v5516_v31 }
 0xbdd   :  { %v5991_v30 = vpop.permute.xlu1 %5990  ;;  %4628 = vrot.lane.b32.xlu0 %v9398_v47, %s7024_s1 }
 0xbde   :  { %6014 = vst.msk [vmem:[#allocation6 + $0x8e] sm:$0x1] %vm4168_vm1, %v5991_v30  ;;  %v5218_v30 = vrot.slane %v8986_v18, %v10390_v13 }
 0xbdf   :  { %v5548_v25 = vpop.permute.xlu0 %5547  ;;  %4913 = vrot.lane.b32.xlu1 %v4868_v16, %s7032_s16 }
 0xbe0   :  { %5570 = vst.msk [vmem:[#allocation6 + $0x97] sm:$0x1] %vm4168_vm1, %v5548_v25 }
 0xbe1   :  { %v6023_v59 = vpop.permute.xlu1 %6022  ;;  %4632 = vrot.lane.b32.xlu0 %v9408_v32, %s7024_s1 }
 0xbe2   :  { %6046 = vst.msk [vmem:[#allocation6 + $0x8f] sm:$0x1] %vm4168_vm1, %v6023_v59  ;;  %v5381_v59 = vcombine.high %v8953_v9, %v8953_v9  ;;  %v4880_v9 = vrot.slane %v9082_v11, %v10391_v0 }
 0xbe3   :  { %v5580_v24 = vpop.permute.xlu0 %5579  ;;  %5039 = vrot.lane.b32.xlu1 %v5014_v60, %s7029_s11 }
 0xbe4   :  { %5602 = vst.msk [vmem:[#allocation6 + $0x98] sm:$0x1] %vm4168_vm1, %v5580_v24 }
 0xbe5   :  { %v4149_v4 = vpop.permute.xlu1 %4148  ;;  %4660 = vrot.lane.b32.xlu0 %v9398_v47, %s7025_s30 }
 0xbe6   :  { %4171 = vst.msk [vmem:[#allocation6 + $0x20] sm:$0x1] %vm4168_vm1, %v4149_v4  ;;  %v9497_v4 = vrot.slane %v5381_v59, %v10390_v13 }
 0xbe7   :  { %v9438_v56 = vpop.permute.xlu0 %5726  ;;  %5043 = vrot.lane.b32.xlu1 %v5022_v49, %s7029_s11 }
 0xbe9   :  { %v4153_v15 = vpop.permute.xlu1 %4152  ;;  %4664 = vrot.lane.b32.xlu0 %v9408_v32, %s7025_s30 }
 0xbea   :  { %4173 = vst.msk [vmem:[#allocation6 + $0x40] sm:$0x1] %vm4168_vm1, %v4153_v15  ;;  %v9506_v15 = vcombine.high %v8968_v57, %v8968_v57  ;;  %v5001_v57 = vcombine.high %v8960_v21, %v8960_v21 }
 0xbeb   :  { %v9444_v45 = vpop.permute.xlu0 %5742  ;;  %5071 = vrot.lane.b32.xlu1 %v5014_v60, %s10291_s13 }
 0xbed   :  { %v4182_v3 = vpop.permute.xlu1 %4181  ;;  %4692 = vrot.lane.b32.xlu0 %v9398_v47, %s7026_s9 }
 0xbee   :  { %4203 = vst.msk [vmem:[#allocation6 + $0x21] sm:$0x1] %vm4168_vm1, %v4182_v3 }
 0xbef   :  { %v5865_v41 = vpop.permute.xlu0 %5864  ;;  %5075 = vrot.lane.b32.xlu1 %v5022_v49, %s10291_s13 }
 0xbf0   :  { %5887 = vst.msk [vmem:[#allocation6 + $0x9a] sm:$0x1] %vm4168_vm1, %v5865_v41  ;;  %v9512_v41 = vrot.slane %v9096_v39, %v10390_v13 }
 0xbf1   :  { %v4186_v40 = vpop.permute.xlu1 %4185  ;;  %4696 = vrot.lane.b32.xlu0 %v9408_v32, %s7026_s9 }
 0xbf2   :  { %4205 = vst.msk [vmem:[#allocation6 + $0x41] sm:$0x1] %vm4168_vm1, %v4186_v40 }
 0xbf3   :  { %v5897_v63 = vpop.permute.xlu0 %5896  ;;  %5103 = vrot.lane.b32.xlu1 %v5014_v60, %s7031_s15 }
 0xbf4   :  { %5919 = vst.msk [vmem:[#allocation6 + $0x9b] sm:$0x1] %vm4168_vm1, %v5897_v63  ;;  %v4888_v63 = vrot.slane %v9506_v15, %v10391_v0 }
 0xbf5   :  { %v4214_v6 = vpop.permute.xlu1 %4213  ;;  %4724 = vrot.lane.b32.xlu0 %v9398_v47, %s7027_s10 }
 0xbf6   :  { %4235 = vst.msk [vmem:[#allocation6 + $0x22] sm:$0x1] %vm4168_vm1, %v4214_v6 }
 0xbf7   :  { %v5929_v2 = vpop.permute.xlu0 %5928  ;;  %5107 = vrot.lane.b32.xlu1 %v5022_v49, %s7031_s15 }
 0xbf8   :  { %5951 = vst.msk [vmem:[#allocation6 + $0x9c] sm:$0x1] %vm4168_vm1, %v5929_v2 }
 0xbf9   :  { %v4218_v1 = vpop.permute.xlu1 %4217  ;;  %4728 = vrot.lane.b32.xlu0 %v9408_v32, %s7027_s10 }
 0xbfa   :  { %4237 = vst.msk [vmem:[#allocation6 + $0x42] sm:$0x1] %vm4168_vm1, %v4218_v1  ;;  %v5018_v1 = vrot.slane %v5001_v57, %v10390_v13 }
 0xbfb   :  { %v5961_v14 = vpop.permute.xlu0 %5960  ;;  %5136 = vrot.lane.b32.xlu1 %v5014_v60, %s7033_s17 }
 0xbfc   :  { %5983 = vst.msk [vmem:[#allocation6 + $0x9d] sm:$0x1] %vm4168_vm1, %v5961_v14 }
 0xbfd   :  { %v4246_v43 = vpop.permute.xlu1 %4245  ;;  %4756 = vrot.lane.b32.xlu0 %v9398_v47, %s10289_s7  ;;  %v4848_v47 = vrot.slane %v9068_v62, %v10391_v0 }
 0xbfe   :  { %4267 = vst.msk [vmem:[#allocation6 + $0x23] sm:$0x1] %vm4168_vm1, %v4246_v43 }
 0xbff   :  { %v5993_v38 = vpop.permute.xlu0 %5992  ;;  %5140 = vrot.lane.b32.xlu1 %v5022_v49, %s7033_s17 }
 0xc00   :  { %6015 = vst.msk [vmem:[#allocation6 + $0x9e] sm:$0x1] %vm4168_vm1, %v5993_v38  ;;  %v5026_v38 = vrot.slane %v9100_v29, %v10390_v13 }
 0xc01   :  { %v4250_v31 = vpop.permute.xlu1 %4249  ;;  %4760 = vrot.lane.b32.xlu0 %v9408_v32, %s10289_s7  ;;  %v5250_v32 = vrot.slane %v8990_v53, %v10390_v13  ;;  %s10392_s7 = smov 115  }
 0xc02   :  { %4269 = vst.msk [vmem:[#allocation6 + $0x43] sm:$0x1] %vm4168_vm1, %v4250_v31 }
 0xc03   :  { %v6025_v16 = vpop.permute.xlu0 %6024  ;;  %5279 = vrot.lane.b32.xlu1 %v5218_v30, %s7039_s23 }
 0xc04   :  { %6047 = vst.msk [vmem:[#allocation6 + $0x9f] sm:$0x1] %vm4168_vm1, %v6025_v16 }
 0xc05   :  { %v4278_v25 = vpop.permute.xlu1 %4277  ;;  %4903 = vrot.lane.b32.xlu0 %v4848_v47, %s7032_s16 }
 0xc06   :  { %4299 = vst.msk [vmem:[#allocation6 + $0x24] sm:$0x1] %vm4168_vm1, %v4278_v25 }
 0xc07   :  { %v4151_v60 = vpop.permute.xlu0 %4150  ;;  %5295 = vrot.lane.b32.xlu1 %v5250_v32, %s7039_s23 }
 0xc08   :  { %4172 = vst.msk [vmem:[#allocation6 + $0x30] sm:$0x1] %vm4168_vm1, %v4151_v60 }
 0xc09   :  { %v4282_v24 = vpop.permute.xlu1 %4281  ;;  %4907 = vrot.lane.b32.xlu0 %v4856_v44, %s7032_s16 }
 0xc0a   :  { %4301 = vst.msk [vmem:[#allocation6 + $0x44] sm:$0x1] %vm4168_vm1, %v4282_v24 }
 0xc0b   :  { %v4155_v49 = vpop.permute.xlu0 %4154  ;;  %5421 = vrot.lane.b32.xlu1 %v9497_v4, %s10392_s7 }
 0xc0c   :  { %4174 = vst.msk [vmem:[#allocation6 + $0x50] sm:$0x1] %vm4168_vm1, %v4155_v49 }
 0xc0d   :  { %v4310_v3 = vpop.permute.xlu1 %4309  ;;  %4919 = vrot.lane.b32.xlu0 %v4880_v9, %s7032_s16 }
 0xc0e   :  { %4331 = vst.msk [vmem:[#allocation6 + $0x25] sm:$0x1] %vm4168_vm1, %v4310_v3 }
 0xc0f   :  { %v4184_v40 = vpop.permute.xlu0 %4183  ;;  %5425 = vrot.lane.b32.xlu1 %v9512_v41, %s10392_s7 }
 0xc10   :  { %4204 = vst.msk [vmem:[#allocation6 + $0x31] sm:$0x1] %vm4168_vm1, %v4184_v40  ;;  %v5230_v40 = vrot.slane %v9103_v36, %v10391_v0 }
 0xc11   :  { %v4314_v6 = vpop.permute.xlu1 %4313  ;;  %4923 = vrot.lane.b32.xlu0 %v4888_v63, %s7032_s16  ;;  %v9577_v63 = vcombine.high %v8986_v18, %v8986_v18  ;;  %v5663_v18 = vrot.slane %v9014_v54, %v10390_v13 }
 0xc12   :  { %4333 = vst.msk [vmem:[#allocation6 + $0x45] sm:$0x1] %vm4168_vm1, %v4314_v6 }
 0xc13   :  { %v4188_v2 = vpop.permute.xlu0 %4187  ;;  %5453 = vrot.lane.b32.xlu1 %v9497_v4, %s7035_s20 }
 0xc14   :  { %4206 = vst.msk [vmem:[#allocation6 + $0x51] sm:$0x1] %vm4168_vm1, %v4188_v2 }
 0xc15   :  { %v4453_v14 = vpop.permute.xlu1 %4452  ;;  %5041 = vrot.lane.b32.xlu0 %v5018_v1, %s7029_s11 }
 0xc16   :  { %v4485_v21 = vsel %vm4484_vm9, %v4453_v14, %v9256_v10  ;;  %v9599_v14 = vcombine.high %v8990_v53, %v8990_v53  ;;  %v5383_v53 = vcombine.high %v8980_v58, %v8980_v58  ;;  %v9630_v58 = vrot.slane %v9121_v50, %v10390_v13 }
 0xc17   :  { %4501 = vst.msk [vmem:[#allocation6 + $0x6] sm:$0x1] %vm4168_vm1, %v4485_v21  ;;  %v4216_v43 = vpop.permute.xlu0 %4215  ;;  %5457 = vrot.lane.b32.xlu1 %v9512_v41, %s7035_s20 }
 0xc18   :  { %4236 = vst.msk [vmem:[#allocation6 + $0x32] sm:$0x1] %vm4168_vm1, %v4216_v43  ;;  %v5695_v43 = vrot.slane %v9021_v28, %v10390_v13 }
 0xc19   :  { %v4469_v31 = vpop.permute.xlu1 %4468  ;;  %5045 = vrot.lane.b32.xlu0 %v5026_v38, %s7029_s11 }
 0xc1a   :  { %v4489_v30 = vsel %vm4484_vm9, %v4469_v31, %v9264_v19 }
 0xc1b   :  { %4505 = vst.msk [vmem:[#allocation6 + $0x46] sm:$0x1] %vm4168_vm1, %v4489_v30  ;;  %v4220_v10 = vpop.permute.xlu0 %4219  ;;  %5485 = vrot.lane.b32.xlu1 %v9497_v4, %s7036_s2  ;;  %v5270_v30 = vrot.slane %v9599_v14, %v10391_v0 }
 0xc1c   :  { %4238 = vst.msk [vmem:[#allocation6 + $0x52] sm:$0x1] %vm4168_vm1, %v4220_v10 }
 0xc1d   :  { %v4595_v16 = vpop.permute.xlu1 %4594  ;;  %5073 = vrot.lane.b32.xlu0 %v5018_v1, %s10291_s13 }
 0xc1e   :  { %4616 = vst.msk [vmem:[#allocation6 + $0x27] sm:$0x1] %vm4168_vm1, %v4595_v16 }
 0xc1f   :  { %v4248_v47 = vpop.permute.xlu0 %4247  ;;  %5489 = vrot.lane.b32.xlu1 %v9512_v41, %s7036_s2 }
 0xc20   :  { %4268 = vst.msk [vmem:[#allocation6 + $0x33] sm:$0x1] %vm4168_vm1, %v4248_v47  ;;  %v9624_v47 = vrot.slane %v5383_v53, %v10390_v13 }
 0xc21   :  { %v4599_v19 = vpop.permute.xlu1 %4598  ;;  %5077 = vrot.lane.b32.xlu0 %v5026_v38, %s10291_s13  ;;  %s10393_s13 = smov 43  }
 0xc22   :  { %4618 = vst.msk [vmem:[#allocation6 + $0x47] sm:$0x1] %vm4168_vm1, %v4599_v19 }
 0xc23   :  { %v4252_v25 = vpop.permute.xlu0 %4251  ;;  %5517 = vrot.lane.b32.xlu1 %v9497_v4, %s7037_s21 }
 0xc24   :  { %4270 = vst.msk [vmem:[#allocation6 + $0x53] sm:$0x1] %vm4168_vm1, %v4252_v25 }
 0xc25   :  { %v4627_v32 = vpop.permute.xlu1 %4626  ;;  %5105 = vrot.lane.b32.xlu0 %v5018_v1, %s7031_s15 }
 0xc26   :  { %4648 = vst.msk [vmem:[#allocation6 + $0x28] sm:$0x1] %vm4168_vm1, %v4627_v32  ;;  %v9637_v32 = vrot.slane %v9124_v61, %v10390_v13 }
 0xc27   :  { %v4280_v59 = vpop.permute.xlu0 %4279  ;;  %5521 = vrot.lane.b32.xlu1 %v9512_v41, %s7037_s21 }
 0xc28   :  { %4300 = vst.msk [vmem:[#allocation6 + $0x34] sm:$0x1] %vm4168_vm1, %v4280_v59 }
 0xc29   :  { %v4631_v60 = vpop.permute.xlu1 %4630  ;;  %5109 = vrot.lane.b32.xlu0 %v5026_v38, %s7031_s15 }
 0xc2a   :  { %4650 = vst.msk [vmem:[#allocation6 + $0x48] sm:$0x1] %vm4168_vm1, %v4631_v60 }
 0xc2b   :  { %v4284_v44 = vpop.permute.xlu0 %4283  ;;  %5549 = vrot.lane.b32.xlu1 %v9497_v4, %s10393_s13 }
 0xc2c   :  { %4302 = vst.msk [vmem:[#allocation6 + $0x54] sm:$0x1] %vm4168_vm1, %v4284_v44 }
 0xc2d   :  { %v4659_v24 = vpop.permute.xlu1 %4658  ;;  %5138 = vrot.lane.b32.xlu0 %v5018_v1, %s7033_s17 }
 0xc2e   :  { %4680 = vst.msk [vmem:[#allocation6 + $0x29] sm:$0x1] %vm4168_vm1, %v4659_v24 }
 0xc2f   :  { %v4312_v49 = vpop.permute.xlu0 %4311  ;;  %5553 = vrot.lane.b32.xlu1 %v9512_v41, %s10393_s13 }
 0xc30   :  { %4332 = vst.msk [vmem:[#allocation6 + $0x35] sm:$0x1] %vm4168_vm1, %v4312_v49 }
 0xc31   :  { %v4663_v9 = vpop.permute.xlu1 %4662  ;;  %5142 = vrot.lane.b32.xlu0 %v5026_v38, %s7033_s17  ;;  %v5826_v38 = vcombine.high %v8977_v42, %v8977_v42 }
 0xc32   :  { %4682 = vst.msk [vmem:[#allocation6 + $0x49] sm:$0x1] %vm4168_vm1, %v4663_v9 }
 0xc33   :  { %v4316_v3 = vpop.permute.xlu0 %4315  ;;  %5581 = vrot.lane.b32.xlu1 %v9497_v4, %s7040_s0  ;;  %v5238_v4 = vrot.slane %v9577_v63, %v10391_v0  ;;  %v9616_v16 = vrot.slane %v5826_v38, %v10390_v13 }
 0xc34   :  { %4334 = vst.msk [vmem:[#allocation6 + $0x55] sm:$0x1] %vm4168_vm1, %v4316_v3 }
 0xc35   :  { %v4691_v57 = vpop.permute.xlu1 %4690  ;;  %5285 = vrot.lane.b32.xlu0 %v5230_v40, %s7039_s23 }
 0xc36   :  { %4712 = vst.msk [vmem:[#allocation6 + $0x2a] sm:$0x1] %vm4168_vm1, %v4691_v57 }
 0xc37   :  { %5585 = vrot.lane.b32.xlu1 %v9512_v41, %s7040_s0  ;;  %v9584_v6 = vpop.permute.xlu0 %4458  ;;  %v5262_v41 = vrot.slane %v9114_v48, %v10391_v0 }
 0xc39   :  { %v4695_v2 = vpop.permute.xlu1 %4694  ;;  %5289 = vrot.lane.b32.xlu0 %v5238_v4, %s7039_s23 }
 0xc3a   :  { %4714 = vst.msk [vmem:[#allocation6 + $0x4a] sm:$0x1] %vm4168_vm1, %v4695_v2 }
 0xc3b   :  { %5724 = vrot.lane.b32.xlu1 %v5663_v18, %s7047_s22  ;;  %v9593_v1 = vpop.permute.xlu0 %4462 }
 0xc3d   :  { %v4723_v21 = vpop.permute.xlu1 %4722  ;;  %5301 = vrot.lane.b32.xlu0 %v5262_v41, %s7039_s23 }
 0xc3e   :  { %4744 = vst.msk [vmem:[#allocation6 + $0x2b] sm:$0x1] %vm4168_vm1, %v4723_v21 }
 0xc3f   :  { %5740 = vrot.lane.b32.xlu1 %v5695_v43, %s7047_s22  ;;  %v9608_v31 = vpop.permute.xlu0 %4474 }
 0xc41   :  { %v4727_v10 = vpop.permute.xlu1 %4726  ;;  %5305 = vrot.lane.b32.xlu0 %v5270_v30, %s7039_s23 }
 0xc42   :  { %4746 = vst.msk [vmem:[#allocation6 + $0x4b] sm:$0x1] %vm4168_vm1, %v4727_v10 }
 0xc43   :  { %5866 = vrot.lane.b32.xlu1 %v9616_v16, %s7041_s18  ;;  %v9621_v42 = vpop.permute.xlu0 %4478 }
 0xc45   :  { %v4755_v19 = vpop.permute.xlu1 %4754  ;;  %5423 = vrot.lane.b32.xlu0 %v9624_v47, %s10392_s7 }
 0xc46   :  { %4776 = vst.msk [vmem:[#allocation6 + $0x2c] sm:$0x1] %vm4168_vm1, %v4755_v19  ;;  %v4109_v19 = vcombine.high %v9004_v55, %v9004_v55  ;;  %v5675_v55 = vrot.slane %v9132_v8, %v10391_v0 }
 0xc47   :  { %5870 = vrot.lane.b32.xlu1 %v9630_v58, %s7041_s18  ;;  %v4597_v25 = vpop.permute.xlu0 %4596 }
 0xc48   :  { %4617 = vst.msk [vmem:[#allocation6 + $0x37] sm:$0x1] %vm4168_vm1, %v4597_v25 }
 0xc49   :  { %v4759_v59 = vpop.permute.xlu1 %4758  ;;  %5427 = vrot.lane.b32.xlu0 %v9637_v32, %s10392_s7 }
 0xc4a   :  { %4778 = vst.msk [vmem:[#allocation6 + $0x4c] sm:$0x1] %vm4168_vm1, %v4759_v59 }
 0xc4b   :  { %5898 = vrot.lane.b32.xlu1 %v9616_v16, %s7042_s3  ;;  %v4601_v60 = vpop.permute.xlu0 %4600 }
 0xc4c   :  { %4619 = vst.msk [vmem:[#allocation6 + $0x57] sm:$0x1] %vm4168_vm1, %v4601_v60 }
 0xc4d   :  { %v4898_v44 = vpop.permute.xlu1 %4897  ;;  %5455 = vrot.lane.b32.xlu0 %v9624_v47, %s7035_s20 }
 0xc4e   :  { %v4930_v24 = vsel %vm4929_vm10, %v4898_v44, %v9323_v35 }
 0xc4f   :  { %4946 = vst.msk [vmem:[#allocation6 + $0xd] sm:$0x1] %vm4168_vm1, %v4930_v24  ;;  %5902 = vrot.lane.b32.xlu1 %v9630_v58, %s7042_s3  ;;  %v4629_v49 = vpop.permute.xlu0 %4628 }
 0xc50   :  { %4649 = vst.msk [vmem:[#allocation6 + $0x38] sm:$0x1] %vm4168_vm1, %v4629_v49 }
 0xc51   :  { %v4914_v9 = vpop.permute.xlu1 %4913  ;;  %5459 = vrot.lane.b32.xlu0 %v9637_v32, %s7035_s20 }
 0xc52   :  { %v4934_v3 = vsel %vm4929_vm10, %v4914_v9, %v9330_v20  ;;  %v5707_v9 = vrot.slane %v9135_v23, %v10391_v0 }
 0xc53   :  { %4950 = vst.msk [vmem:[#allocation6 + $0x4d] sm:$0x1] %vm4168_vm1, %v4934_v3  ;;  %5930 = vrot.lane.b32.xlu1 %v9616_v16, %s7043_s24  ;;  %v4633_v35 = vpop.permute.xlu0 %4632  ;;  %v9738_v3 = vcombine.high %v9021_v28, %v9021_v28 }
 0xc54   :  { %4651 = vst.msk [vmem:[#allocation6 + $0x58] sm:$0x1] %vm4168_vm1, %v4633_v35 }
 0xc55   :  { %v5040_v40 = vpop.permute.xlu1 %5039  ;;  %5487 = vrot.lane.b32.xlu0 %v9624_v47, %s7036_s2 }
 0xc56   :  { %5061 = vst.msk [vmem:[#allocation6 + $0x2e] sm:$0x1] %vm4168_vm1, %v5040_v40  ;;  %v5715_v40 = vrot.slane %v9738_v3, %v10391_v0 }
 0xc57   :  { %5934 = vrot.lane.b32.xlu1 %v9630_v58, %s7043_s24  ;;  %v4661_v57 = vpop.permute.xlu0 %4660 }
 0xc58   :  { %4681 = vst.msk [vmem:[#allocation6 + $0x39] sm:$0x1] %vm4168_vm1, %v4661_v57  ;;  %v5828_v57 = vcombine.high %v9017_v17, %v9017_v17 }
 0xc59   :  { %v5044_v20 = vpop.permute.xlu1 %5043  ;;  %5491 = vrot.lane.b32.xlu0 %v9637_v32, %s7036_s2 }
 0xc5a   :  { %5063 = vst.msk [vmem:[#allocation6 + $0x4e] sm:$0x1] %vm4168_vm1, %v5044_v20 }
 0xc5b   :  { %5962 = vrot.lane.b32.xlu1 %v9616_v16, %s10293_s12  ;;  %v4665_v4 = vpop.permute.xlu0 %4664 }
 0xc5c   :  { %4683 = vst.msk [vmem:[#allocation6 + $0x59] sm:$0x1] %vm4168_vm1, %v4665_v4  ;;  %v9755_v4 = vrot.slane %v5828_v57, %v10390_v13 }
 0xc5d   :  { %v5072_v2 = vpop.permute.xlu1 %5071  ;;  %5519 = vrot.lane.b32.xlu0 %v9624_v47, %s7037_s21 }
 0xc5e   :  { %5093 = vst.msk [vmem:[#allocation6 + $0x2f] sm:$0x1] %vm4168_vm1, %v5072_v2 }
 0xc5f   :  { %5966 = vrot.lane.b32.xlu1 %v9630_v58, %s10293_s12  ;;  %v4693_v18 = vpop.permute.xlu0 %4692 }
 0xc60   :  { %4713 = vst.msk [vmem:[#allocation6 + $0x3a] sm:$0x1] %vm4168_vm1, %v4693_v18  ;;  %v9763_v18 = vrot.slane %v9140_v34, %v10390_v13 }
 0xc61   :  { %v5076_v41 = vpop.permute.xlu1 %5075  ;;  %5523 = vrot.lane.b32.xlu0 %v9637_v32, %s7037_s21 }
 0xc62   :  { %5095 = vst.msk [vmem:[#allocation6 + $0x4f] sm:$0x1] %vm4168_vm1, %v5076_v41 }
 0xc63   :  { %5994 = vrot.lane.b32.xlu1 %v9616_v16, %s7045_s14  ;;  %v4697_v21 = vpop.permute.xlu0 %4696 }
 0xc64   :  { %4715 = vst.msk [vmem:[#allocation6 + $0x5a] sm:$0x1] %vm4168_vm1, %v4697_v21  ;;  %v4399_v21 = vrot.slane %v9039_v7, %v10390_v13 }
 0xc65   :  { %v5104_v43 = vpop.permute.xlu1 %5103  ;;  %5551 = vrot.lane.b32.xlu0 %v9624_v47, %s10393_s13 }
 0xc66   :  { %5126 = vst.msk [vmem:[#allocation6 + $0xa0] sm:$0x1] %vm4168_vm1, %v5104_v43 }
 0xc67   :  { %5998 = vrot.lane.b32.xlu1 %v9630_v58, %s7045_s14  ;;  %v4725_v38 = vpop.permute.xlu0 %4724 }
 0xc68   :  { %4745 = vst.msk [vmem:[#allocation6 + $0x3b] sm:$0x1] %vm4168_vm1, %v4725_v38 }
 0xc69   :  { %v5108_v30 = vpop.permute.xlu1 %5107  ;;  %5555 = vrot.lane.b32.xlu0 %v9637_v32, %s10393_s13 }
 0xc6a   :  { %5128 = vst.msk [vmem:[#allocation6 + $0xc0] sm:$0x1] %vm4168_vm1, %v5108_v30  ;;  %v4407_v30 = vrot.slane %v9361_v46, %v10390_v13 }
 0xc6b   :  { %6026 = vrot.lane.b32.xlu1 %v9616_v16, %s7046_s19  ;;  %v4729_v53 = vpop.permute.xlu0 %4728  ;;  %v4139_v16 = vrot.slane %v4109_v19, %v10390_v13  ;;  %v4431_v19 = vrot.slane %v9047_v26, %v10390_v13 }
 0xc6c   :  { %4747 = vst.msk [vmem:[#allocation6 + $0x5b] sm:$0x1] %vm4168_vm1, %v4729_v53 }
 0xc6d   :  { %v5137_v10 = vpop.permute.xlu1 %5136  ;;  %5583 = vrot.lane.b32.xlu0 %v9624_v47, %s7040_s0 }
 0xc6e   :  { %5158 = vst.msk [vmem:[#allocation6 + $0xa1] sm:$0x1] %vm4168_vm1, %v5137_v10 }
 0xc6f   :  { %6030 = vrot.lane.b32.xlu1 %v9630_v58, %s7046_s19  ;;  %v4757_v25 = vpop.permute.xlu0 %4756  ;;  %v9715_v58 = vcombine.high %v9014_v54, %v9014_v54 }
 0xc70   :  { %4777 = vst.msk [vmem:[#allocation6 + $0x3c] sm:$0x1] %vm4168_vm1, %v4757_v25 }
 0xc71   :  { %v5141_v59 = vpop.permute.xlu1 %5140  ;;  %5587 = vrot.lane.b32.xlu0 %v9637_v32, %s7040_s0  ;;  %v5683_v24 = vrot.slane %v9715_v58, %v10391_v0 }
 0xc72   :  { %5160 = vst.msk [vmem:[#allocation6 + $0xc1] sm:$0x1] %vm4168_vm1, %v5141_v59  ;;  %v4439_v59 = vrot.slane %v9382_v27, %v10390_v13 }
 0xc73   :  { %4156 = vrot.lane.b32.xlu1 %v4139_v16, %s7015_s26  ;;  %v4761_v47 = vpop.permute.xlu0 %4760 }
 0xc74   :  { %4779 = vst.msk [vmem:[#allocation6 + $0x5c] sm:$0x1] %vm4168_vm1, %v4761_v47 }
 0xc75   :  { %v5280_v60 = vpop.permute.xlu1 %5279  ;;  %5730 = vrot.lane.b32.xlu0 %v5675_v55, %s7047_s22 }
 0xc76   :  { %v5312_v32 = vsel %vm5311_vm11, %v5280_v60, %v9366_v5 }
 0xc77   :  { %5328 = vst.msk [vmem:[#allocation6 + $0x82] sm:$0x1] %vm4168_vm1, %v5312_v32  ;;  %4189 = vrot.lane.b32.xlu1 %v4139_v16, %s7016_s27  ;;  %v9723_v44 = vpop.permute.xlu0 %4903 }
 0xc79   :  { %v5296_v49 = vpop.permute.xlu1 %5295  ;;  %5734 = vrot.lane.b32.xlu0 %v5683_v24, %s7047_s22 }
 0xc7a   :  { %v5316_v54 = vsel %vm5311_vm11, %v5296_v49, %v9374_v51 }
 0xc7b   :  { %5332 = vst.msk [vmem:[#allocation6 + $0xc2] sm:$0x1] %vm4168_vm1, %v5316_v54  ;;  %4221 = vrot.lane.b32.xlu1 %v4139_v16, %s7019_s4  ;;  %v9732_v5 = vpop.permute.xlu0 %4907 }
 0xc7d   :  { %v5422_v35 = vpop.permute.xlu1 %5421  ;;  %5746 = vrot.lane.b32.xlu0 %v5707_v9, %s7047_s22 }
 0xc7e   :  { %5443 = vst.msk [vmem:[#allocation6 + $0xa3] sm:$0x1] %vm4168_vm1, %v5422_v35 }
 0xc7f   :  { %4253 = vrot.lane.b32.xlu1 %v4139_v16, %s7020_s5  ;;  %v9743_v51 = vpop.permute.xlu0 %4919 }
 0xc81   :  { %v5426_v20 = vpop.permute.xlu1 %5425  ;;  %5750 = vrot.lane.b32.xlu0 %v5715_v40, %s7047_s22 }
 0xc82   :  { %5445 = vst.msk [vmem:[#allocation6 + $0xc3] sm:$0x1] %vm4168_vm1, %v5426_v20 }
 0xc83   :  { %4285 = vrot.lane.b32.xlu1 %v4139_v16, %s7021_s25  ;;  %v9752_v28 = vpop.permute.xlu0 %4923 }
 0xc85   :  { %v5454_v2 = vpop.permute.xlu1 %5453  ;;  %5868 = vrot.lane.b32.xlu0 %v9755_v4, %s7041_s18 }
 0xc86   :  { %5475 = vst.msk [vmem:[#allocation6 + $0xa4] sm:$0x1] %vm4168_vm1, %v5454_v2 }
 0xc87   :  { %4317 = vrot.lane.b32.xlu1 %v4139_v16, %s7017_s6  ;;  %v5042_v17 = vpop.permute.xlu0 %5041  ;;  %v4555_v16 = vcombine.high %v9044_v52, %v9044_v52 }
 0xc88   :  { %5062 = vst.msk [vmem:[#allocation6 + $0x3e] sm:$0x1] %vm4168_vm1, %v5042_v17  ;;  %v4111_v17 = vcombine.high %v9024_v22, %v9024_v22  ;;  %v4852_v22 = vrot.slane %v9482_v33, %v10390_v13 }
 0xc89   :  { %v5458_v41 = vpop.permute.xlu1 %5457  ;;  %5872 = vrot.lane.b32.xlu0 %v9763_v18, %s7041_s18  ;;  %v4585_v60 = vrot.slane %v4555_v16, %v10390_v13 }
 0xc8a   :  { %5477 = vst.msk [vmem:[#allocation6 + $0xc4] sm:$0x1] %vm4168_vm1, %v5458_v41 }
 0xc8b   :  { %v5046_v43 = vpop.permute.xlu0 %5045  ;;  %4456 = vrot.lane.b32.xlu1 %v4399_v21, %s7023_s29  ;;  %v4844_v21 = vrot.slane %v9068_v62, %v10390_v13 }
 0xc8c   :  { %5064 = vst.msk [vmem:[#allocation6 + $0x5e] sm:$0x1] %vm4168_vm1, %v5046_v43  ;;  %v4143_v43 = vrot.slane %v4111_v17, %v10390_v13 }
 0xc8d   :  { %v5486_v38 = vpop.permute.xlu1 %5485  ;;  %5900 = vrot.lane.b32.xlu0 %v9755_v4, %s7042_s3 }
 0xc8e   :  { %5507 = vst.msk [vmem:[#allocation6 + $0xa5] sm:$0x1] %vm4168_vm1, %v5486_v38 }
 0xc8f   :  { %v5074_v53 = vpop.permute.xlu0 %5073  ;;  %4460 = vrot.lane.b32.xlu1 %v4407_v30, %s7023_s29  ;;  %v4876_v30 = vrot.slane %v9082_v11, %v10390_v13 }
 0xc90   :  { %5094 = vst.msk [vmem:[#allocation6 + $0x3f] sm:$0x1] %vm4168_vm1, %v5074_v53 }
 0xc91   :  { %v5490_v10 = vpop.permute.xlu1 %5489  ;;  %5904 = vrot.lane.b32.xlu0 %v9763_v18, %s7042_s3 }
 0xc92   :  { %5509 = vst.msk [vmem:[#allocation6 + $0xc5] sm:$0x1] %vm4168_vm1, %v5490_v10  ;;  %v4884_v10 = vrot.slane %v9506_v15, %v10390_v13 }
 0xc93   :  { %v5078_v25 = vpop.permute.xlu0 %5077  ;;  %4472 = vrot.lane.b32.xlu1 %v4431_v19, %s7023_s29  ;;  %v5000_v19 = vcombine.high %v9079_v12, %v9079_v12 }
 0xc94   :  { %5096 = vst.msk [vmem:[#allocation6 + $0x5f] sm:$0x1] %vm4168_vm1, %v5078_v25 }
 0xc95   :  { %v5518_v46 = vpop.permute.xlu1 %5517  ;;  %5932 = vrot.lane.b32.xlu0 %v9755_v4, %s7043_s24 }
 0xc96   :  { %5539 = vst.msk [vmem:[#allocation6 + $0xa6] sm:$0x1] %vm4168_vm1, %v5518_v46 }
 0xc97   :  { %v5106_v47 = vpop.permute.xlu0 %5105  ;;  %4476 = vrot.lane.b32.xlu1 %v4439_v59, %s7023_s29  ;;  %v5030_v59 = vrot.slane %v5000_v19, %v10390_v13 }
 0xc98   :  { %5127 = vst.msk [vmem:[#allocation6 + $0xb0] sm:$0x1] %vm4168_vm1, %v5106_v47  ;;  %v9875_v47 = vcombine.high %v9039_v7, %v9039_v7 }
 0xc99   :  { %v5522_v55 = vpop.permute.xlu1 %5521  ;;  %5936 = vrot.lane.b32.xlu0 %v9763_v18, %s7043_s24 }
 0xc9a   :  { %5541 = vst.msk [vmem:[#allocation6 + $0xc6] sm:$0x1] %vm4168_vm1, %v5522_v55 }
 0xc9b   :  { %v5110_v32 = vpop.permute.xlu0 %5109  ;;  %4602 = vrot.lane.b32.xlu1 %v4585_v60, %s7022_s28 }
 0xc9c   :  { %5129 = vst.msk [vmem:[#allocation6 + $0xd0] sm:$0x1] %vm4168_vm1, %v5110_v32  ;;  %v4419_v32 = vrot.slane %v9875_v47, %v10391_v0 }
 0xc9d   :  { %v5550_v52 = vpop.permute.xlu1 %5549  ;;  %5964 = vrot.lane.b32.xlu0 %v9755_v4, %s10293_s12 }
 0xc9e   :  { %5571 = vst.msk [vmem:[#allocation6 + $0xa7] sm:$0x1] %vm4168_vm1, %v5550_v52  ;;  %v9885_v52 = vcombine.high %v9047_v26, %v9047_v26 }
 0xc9f   :  { %v5139_v27 = vpop.permute.xlu0 %5138  ;;  %4634 = vrot.lane.b32.xlu1 %v4585_v60, %s7024_s1 }
 0xca0   :  { %5159 = vst.msk [vmem:[#allocation6 + $0xb1] sm:$0x1] %vm4168_vm1, %v5139_v27 }
 0xca1   :  { %v5554_v24 = vpop.permute.xlu1 %5553  ;;  %5968 = vrot.lane.b32.xlu0 %v9763_v18, %s10293_s12  ;;  %s10394_s12 = smov 21  }
 0xca2   :  { %5573 = vst.msk [vmem:[#allocation6 + $0xc7] sm:$0x1] %vm4168_vm1, %v5554_v24  ;;  %v4451_v24 = vrot.slane %v9885_v52, %v10391_v0 }
 0xca3   :  { %v5143_v49 = vpop.permute.xlu0 %5142  ;;  %4666 = vrot.lane.b32.xlu1 %v4585_v60, %s7025_s30 }
 0xca4   :  { %5161 = vst.msk [vmem:[#allocation6 + $0xd1] sm:$0x1] %vm4168_vm1, %v5143_v49  ;;  %v4557_v49 = vcombine.high %v9055_v37, %v9055_v37  ;;  %v5234_v37 = vrot.slane %v9577_v63, %v10390_v13 }
 0xca5   :  { %v5582_v54 = vpop.permute.xlu1 %5581  ;;  %5996 = vrot.lane.b32.xlu0 %v9755_v4, %s7045_s14 }
 0xca6   :  { %5603 = vst.msk [vmem:[#allocation6 + $0xa8] sm:$0x1] %vm4168_vm1, %v5582_v54  ;;  %v5226_v54 = vrot.slane %v9103_v36, %v10390_v13 }
 0xca7   :  { %v9815_v9 = vpop.permute.xlu0 %5285  ;;  %4698 = vrot.lane.b32.xlu1 %v4585_v60, %s7026_s9 }
 0xca9   :  { %v5586_v35 = vpop.permute.xlu1 %5585  ;;  %6000 = vrot.lane.b32.xlu0 %v9763_v18, %s7045_s14 }
 0xcaa   :  { %5605 = vst.msk [vmem:[#allocation6 + $0xc8] sm:$0x1] %vm4168_vm1, %v5586_v35 }
 0xcab   :  { %v9821_v40 = vpop.permute.xlu0 %5289  ;;  %4730 = vrot.lane.b32.xlu1 %v4585_v60, %s7027_s10 }
 0xcad   :  { %v5725_v57 = vpop.permute.xlu1 %5724  ;;  %6028 = vrot.lane.b32.xlu0 %v9755_v4, %s7046_s19 }
 0xcae   :  { %v5757_v20 = vsel %vm5756_vm12, %v5725_v57, %v9438_v56  ;;  %v4589_v57 = vrot.slane %v4557_v49, %v10390_v13 }
 0xcaf   :  { %5773 = vst.msk [vmem:[#allocation6 + $0x89] sm:$0x1] %vm4168_vm1, %v5757_v20  ;;  %v9829_v2 = vpop.permute.xlu0 %5301  ;;  %4762 = vrot.lane.b32.xlu1 %v4585_v60, %s10394_s12 }
 0xcb1   :  { %v5741_v41 = vpop.permute.xlu1 %5740  ;;  %6032 = vrot.lane.b32.xlu0 %v9763_v18, %s7046_s19 }
 0xcb2   :  { %v5761_v4 = vsel %vm5756_vm12, %v5741_v41, %v9444_v45 }
 0xcb3   :  { %5777 = vst.msk [vmem:[#allocation6 + $0xc9] sm:$0x1] %vm4168_vm1, %v5761_v4  ;;  %v9841_v56 = vpop.permute.xlu0 %5305  ;;  %4901 = vrot.lane.b32.xlu1 %v4844_v21, %s7032_s16  ;;  %v5258_v21 = vrot.slane %v9114_v48, %v10390_v13 }
 0xcb5   :  { %v5867_v38 = vpop.permute.xlu1 %5866  ;;  %4158 = vrot.lane.b32.xlu0 %v4143_v43, %s7015_s26  ;;  %s10395_s26 = smov 95  }
 0xcb6   :  { %5888 = vst.msk [vmem:[#allocation6 + $0xaa] sm:$0x1] %vm4168_vm1, %v5867_v38  ;;  %v5382_v38 = vcombine.high %v9096_v39, %v9096_v39 }
 0xcb7   :  { %v5424_v18 = vpop.permute.xlu0 %5423  ;;  %4905 = vrot.lane.b32.xlu1 %v4852_v22, %s7032_s16 }
 0xcb8   :  { %5444 = vst.msk [vmem:[#allocation6 + $0xb3] sm:$0x1] %vm4168_vm1, %v5424_v18 }
 0xcb9   :  { %v5871_v45 = vpop.permute.xlu1 %5870  ;;  %4191 = vrot.lane.b32.xlu0 %v4143_v43, %s7016_s27  ;;  %s10396_s27 = smov 63  }
 0xcba   :  { %5890 = vst.msk [vmem:[#allocation6 + $0xca] sm:$0x1] %vm4168_vm1, %v5871_v45  ;;  %v5412_v45 = vrot.slane %v5382_v38, %v10390_v13 }
 0xcbb   :  { %v5428_v53 = vpop.permute.xlu0 %5427  ;;  %4917 = vrot.lane.b32.xlu1 %v4876_v30, %s7032_s16 }
 0xcbc   :  { %5446 = vst.msk [vmem:[#allocation6 + $0xd3] sm:$0x1] %vm4168_vm1, %v5428_v53  ;;  %v9935_v53 = vcombine.high %v9068_v62, %v9068_v62 }
 0xcbd   :  { %v5899_v33 = vpop.permute.xlu1 %5898  ;;  %4223 = vrot.lane.b32.xlu0 %v4143_v43, %s7019_s4 }
 0xcbe   :  { %5920 = vst.msk [vmem:[#allocation6 + $0xab] sm:$0x1] %vm4168_vm1, %v5899_v33  ;;  %v4864_v19 = vrot.slane %v9935_v53, %v10391_v0 }
 0xcbf   :  { %v5456_v25 = vpop.permute.xlu0 %5455  ;;  %4921 = vrot.lane.b32.xlu1 %v4884_v10, %s7032_s16 }
 0xcc0   :  { %5476 = vst.msk [vmem:[#allocation6 + $0xb4] sm:$0x1] %vm4168_vm1, %v5456_v25  ;;  %v9946_v25 = vcombine.high %v9082_v11, %v9082_v11 }
 0xcc1   :  { %v5903_v46 = vpop.permute.xlu1 %5902  ;;  %4255 = vrot.lane.b32.xlu0 %v4143_v43, %s7020_s5 }
 0xcc2   :  { %5922 = vst.msk [vmem:[#allocation6 + $0xcb] sm:$0x1] %vm4168_vm1, %v5903_v46 }
 0xcc3   :  { %v5460_v16 = vpop.permute.xlu0 %5459  ;;  %5047 = vrot.lane.b32.xlu1 %v5030_v59, %s7029_s11 }
 0xcc4   :  { %5478 = vst.msk [vmem:[#allocation6 + $0xd4] sm:$0x1] %vm4168_vm1, %v5460_v16  ;;  %v5002_v16 = vcombine.high %v9100_v29, %v9100_v29 }
 0xcc5   :  { %v5931_v12 = vpop.permute.xlu1 %5930  ;;  %4287 = vrot.lane.b32.xlu0 %v4143_v43, %s7021_s25 }
 0xcc6   :  { %5952 = vst.msk [vmem:[#allocation6 + $0xac] sm:$0x1] %vm4168_vm1, %v5931_v12 }
 0xcc7   :  { %v5488_v15 = vpop.permute.xlu0 %5487  ;;  %5079 = vrot.lane.b32.xlu1 %v5030_v59, %s10395_s26 }
 0xcc8   :  { %5508 = vst.msk [vmem:[#allocation6 + $0xb5] sm:$0x1] %vm4168_vm1, %v5488_v15  ;;  %v5034_v15 = vrot.slane %v5002_v16, %v10390_v13 }
 0xcc9   :  { %v5935_v55 = vpop.permute.xlu1 %5934  ;;  %4319 = vrot.lane.b32.xlu0 %v4143_v43, %s7017_s6  ;;  %v5266_v43 = vrot.slane %v9599_v14, %v10390_v13  ;;  %s7048_s6 = smov [#allocation6]  }
 0xcca   :  { %5954 = vst.msk [vmem:[#allocation6 + $0xcc] sm:$0x1] %vm4168_vm1, %v5935_v55  ;;  %s6059_s4 = sshll.u32 %s7048_s6, 4  ;;  %s6060_s4 = int_to_ptr.vmem [resolvable:$true] %s6059_s4 }
 0xccb   :  { %v5492_v60 = vpop.permute.xlu0 %5491  ;;  %5111 = vrot.lane.b32.xlu1 %v5030_v59, %s7031_s15  ;;  %s6957_s5 = scalar_lea.vmem %s6060_s4, 4096  ;;  %p6962_p1 = scmp.lt.s32.totalorder %s6060_s4, %s6060_s4 }
 0xccc   :  { %5510 = vst.msk [vmem:[#allocation6 + $0xd5] sm:$0x1] %vm4168_vm1, %v5492_v60  ;;  %p6958_p0 = scmp.ne.s32.totalorder %s6060_s4, %s6957_s5  ;;  %p6963_p2 = scmp.lt.s32.totalorder %s6957_s5, %s6957_s5 }
 0xccd   :  { %v5963_v7 = vpop.permute.xlu1 %5962  ;;  %4466 = vrot.lane.b32.xlu0 %v4419_v32, %s7023_s29  ;;  %v5671_v32 = vrot.slane %v9132_v8, %v10390_v13 }
 0xcce   :  { %5984 = vst.msk [vmem:[#allocation6 + $0xad] sm:$0x1] %vm4168_vm1, %v5963_v7  ;;  %p6964_p3 = por %p6963_p2, %p6962_p1 }
 0xccf   :  { %v5520_v27 = vpop.permute.xlu0 %5519  ;;  %5144 = vrot.lane.b32.xlu1 %v5030_v59, %s7033_s17  ;;  %v4896_v59 = vrot.slane %v9946_v25, %v10391_v0 }
 0xcd0   :  { %5540 = vst.msk [vmem:[#allocation6 + $0xb6] sm:$0x1] %vm4168_vm1, %v5520_v27  ;;  %p6965_p4 = pnand %p6964_p3, %p6958_p0 }
 0xcd1   :  { %v5967_v26 = vpop.permute.xlu1 %5966  ;;  %4482 = vrot.lane.b32.xlu0 %v4451_v24, %s7023_s29  ;;  %v5679_v24 = vrot.slane %v9715_v58, %v10390_v13  ;;  %v5703_v58 = vrot.slane %v9135_v23, %v10390_v13 }
 0xcd2   :  { %5986 = vst.msk [vmem:[#allocation6 + $0xcd] sm:$0x1] %vm4168_vm1, %v5967_v26 }
 0xcd3   :  { %v5524_v35 = vpop.permute.xlu0 %5523  ;;  %5283 = vrot.lane.b32.xlu1 %v5226_v54, %s7039_s23  ;;  %v9982_v54 = vcombine.high %v9103_v36, %v9103_v36 }
 0xcd4   :  { %5542 = vst.msk [vmem:[#allocation6 + $0xd6] sm:$0x1] %vm4168_vm1, %v5524_v35 }
 0xcd5   :  { %v5995_v20 = vpop.permute.xlu1 %5994  ;;  %4604 = vrot.lane.b32.xlu0 %v4589_v57, %s7022_s28  ;;  %v5246_v36 = vrot.slane %v9982_v54, %v10391_v0 }
 0xcd6   :  { %6016 = vst.msk [vmem:[#allocation6 + $0xae] sm:$0x1] %vm4168_vm1, %v5995_v20  ;;  %v9996_v20 = vcombine.high %v9114_v48, %v9114_v48 }
 0xcd7   :  { %v5552_v17 = vpop.permute.xlu0 %5551  ;;  %5287 = vrot.lane.b32.xlu1 %v5234_v37, %s7039_s23 }
 0xcd8   :  { %5572 = vst.msk [vmem:[#allocation6 + $0xb7] sm:$0x1] %vm4168_vm1, %v5552_v17  ;;  %v5827_v17 = vcombine.high %v9121_v50, %v9121_v50  ;;  %v5278_v48 = vrot.slane %v9996_v20, %v10391_v0 }
 0xcd9   :  { %v5999_v41 = vpop.permute.xlu1 %5998  ;;  %4636 = vrot.lane.b32.xlu0 %v4589_v57, %s7024_s1 }
 0xcda   :  { %6018 = vst.msk [vmem:[#allocation6 + $0xce] sm:$0x1] %vm4168_vm1, %v5999_v41  ;;  %v10015_v50 = vrot.slane %v5827_v17, %v10390_v13 }
 0xcdb   :  { %v5556_v4 = vpop.permute.xlu0 %5555  ;;  %5299 = vrot.lane.b32.xlu1 %v5258_v21, %s7039_s23 }
 0xcdc   :  { %5574 = vst.msk [vmem:[#allocation6 + $0xd7] sm:$0x1] %vm4168_vm1, %v5556_v4  ;;  %v5384_v4 = vcombine.high %v9124_v61, %v9124_v61 }
 0xcdd   :  { %v6027_v63 = vpop.permute.xlu1 %6026  ;;  %4668 = vrot.lane.b32.xlu0 %v4589_v57, %s7025_s30 }
 0xcde   :  { %6048 = vst.msk [vmem:[#allocation6 + $0xaf] sm:$0x1] %vm4168_vm1, %v6027_v63 }
 0xcdf   :  { %v5584_v22 = vpop.permute.xlu0 %5583  ;;  %5303 = vrot.lane.b32.xlu1 %v5266_v43, %s7039_s23  ;;  %v5416_v43 = vrot.slane %v5384_v4, %v10390_v13 }
 0xce0   :  { %5604 = vst.msk [vmem:[#allocation6 + $0xb8] sm:$0x1] %vm4168_vm1, %v5584_v22 }
 0xce1   :  { %v6031_v18 = vpop.permute.xlu1 %6030  ;;  %4700 = vrot.lane.b32.xlu0 %v4589_v57, %s7026_s9 }
 0xce2   :  { %6050 = vst.msk [vmem:[#allocation6 + $0xcf] sm:$0x1] %vm4168_vm1, %v6031_v18 }
 0xce3   :  { %v5588_v30 = vpop.permute.xlu0 %5587  ;;  %5429 = vrot.lane.b32.xlu1 %v5412_v45, %s10392_s7 }
 0xce4   :  { %5606 = vst.msk [vmem:[#allocation6 + $0xd8] sm:$0x1] %vm4168_vm1, %v5588_v30 }
 0xce5   :  { %v4157_v39 = vpop.permute.xlu1 %4156  ;;  %4732 = vrot.lane.b32.xlu0 %v4589_v57, %s7027_s10 }
 0xce6   :  { %4175 = vst.msk [vmem:[#allocation6 + $0x60] sm:$0x1] %vm4168_vm1, %v4157_v39 }
 0xce7   :  { %v9930_v14 = vpop.permute.xlu0 %5730  ;;  %5461 = vrot.lane.b32.xlu1 %v5412_v45, %s7035_s20 }
 0xce9   :  { %v4190_v33 = vpop.permute.xlu1 %4189  ;;  %4764 = vrot.lane.b32.xlu0 %v4589_v57, %s10394_s12 }
 0xcea   :  { %4207 = vst.msk [vmem:[#allocation6 + $0x61] sm:$0x1] %vm4168_vm1, %v4190_v33 }
 0xceb   :  { %v9939_v10 = vpop.permute.xlu0 %5734  ;;  %5493 = vrot.lane.b32.xlu1 %v5412_v45, %s7036_s2 }
 0xced   :  { %v4222_v46 = vpop.permute.xlu1 %4221  ;;  %4911 = vrot.lane.b32.xlu0 %v4864_v19, %s7032_s16  ;;  %v4415_v19 = vrot.slane %v9875_v47, %v10390_v13 }
 0xcee   :  { %4239 = vst.msk [vmem:[#allocation6 + $0x62] sm:$0x1] %vm4168_vm1, %v4222_v46 }
 0xcef   :  { %v9950_v62 = vpop.permute.xlu0 %5746  ;;  %5525 = vrot.lane.b32.xlu1 %v5412_v45, %s7037_s21 }
 0xcf1   :  { %v4254_v12 = vpop.permute.xlu1 %4253  ;;  %4927 = vrot.lane.b32.xlu0 %v4896_v59, %s7032_s16  ;;  %v5658_v59 = vcombine.high %v9132_v8, %v9132_v8 }
 0xcf2   :  { %4271 = vst.msk [vmem:[#allocation6 + $0x63] sm:$0x1] %vm4168_vm1, %v4254_v12  ;;  %v4447_v12 = vrot.slane %v9885_v52, %v10390_v13 }
 0xcf3   :  { %v9959_v11 = vpop.permute.xlu0 %5750  ;;  %5557 = vrot.lane.b32.xlu1 %v5412_v45, %s10393_s13  ;;  %v5691_v47 = vrot.slane %v5658_v59, %v10391_v0 }
 0xcf5   :  { %v4286_v55 = vpop.permute.xlu1 %4285  ;;  %5049 = vrot.lane.b32.xlu0 %v5034_v15, %s7029_s11 }
 0xcf6   :  { %4303 = vst.msk [vmem:[#allocation6 + $0x64] sm:$0x1] %vm4168_vm1, %v4286_v55  ;;  %v5659_v55 = vcombine.high %v9135_v23, %v9135_v23  ;;  %v5829_v23 = vcombine.high %v9140_v34, %v9140_v34 }
 0xcf7   :  { %v5869_v60 = vpop.permute.xlu0 %5868  ;;  %5589 = vrot.lane.b32.xlu1 %v5412_v45, %s7040_s0 }
 0xcf8   :  { %5889 = vst.msk [vmem:[#allocation6 + $0xba] sm:$0x1] %vm4168_vm1, %v5869_v60  ;;  %v4860_v60 = vrot.slane %v9935_v53, %v10390_v13  ;;  %v4892_v53 = vrot.slane %v9946_v25, %v10390_v13 }
 0xcf9   :  { %v4318_v29 = vpop.permute.xlu1 %4317  ;;  %5081 = vrot.lane.b32.xlu0 %v5034_v15, %s10395_s26 }
 0xcfa   :  { %4335 = vst.msk [vmem:[#allocation6 + $0x65] sm:$0x1] %vm4168_vm1, %v4318_v29 }
 0xcfb   :  { %v5873_v7 = vpop.permute.xlu0 %5872  ;;  %5728 = vrot.lane.b32.xlu1 %v5671_v32, %s7047_s22  ;;  %v5723_v32 = vrot.slane %v5659_v55, %v10391_v0  ;;  %v5861_v0 = vrot.slane %v5829_v23, %v10390_v13 }
 0xcfc   :  { %5891 = vst.msk [vmem:[#allocation6 + $0xda] sm:$0x1] %vm4168_vm1, %v5873_v7 }
 0xcfd   :  { %v4457_v27 = vpop.permute.xlu1 %4456  ;;  %5113 = vrot.lane.b32.xlu0 %v5034_v15, %s7031_s15 }
 0xcfe   :  { %v4486_v49 = vsel %vm4484_vm9, %v4457_v27, %v9584_v6 }
 0xcff   :  { %4502 = vst.msk [vmem:[#allocation6 + $0x16] sm:$0x1] %vm4168_vm1, %v4486_v49  ;;  %v5901_v26 = vpop.permute.xlu0 %5900  ;;  %5732 = vrot.lane.b32.xlu1 %v5679_v24, %s7047_s22  ;;  %v5242_v24 = vrot.slane %v9982_v54, %v10390_v13 }
 0xd00   :  { %5921 = vst.msk [vmem:[#allocation6 + $0xbb] sm:$0x1] %vm4168_vm1, %v5901_v26  ;;  %v5274_v26 = vrot.slane %v9996_v20, %v10390_v13 }
 0xd01   :  { %v4461_v35 = vpop.permute.xlu1 %4460  ;;  %5146 = vrot.lane.b32.xlu0 %v5034_v15, %s7033_s17 }
 0xd02   :  { %v4487_v6 = vsel %vm4484_vm9, %v4461_v35, %v9593_v1  ;;  %v5711_v1 = vrot.slane %v9738_v3, %v10390_v13 }
 0xd03   :  { %4503 = vst.msk [vmem:[#allocation6 + $0x26] sm:$0x1] %vm4168_vm1, %v4487_v6  ;;  %v5905_v57 = vpop.permute.xlu0 %5904  ;;  %5744 = vrot.lane.b32.xlu1 %v5703_v58, %s7047_s22  ;;  %v5687_v58 = vrot.slane %v5658_v59, %v10390_v13 }
 0xd04   :  { %5923 = vst.msk [vmem:[#allocation6 + $0xdb] sm:$0x1] %vm4168_vm1, %v5905_v57  ;;  %v5719_v57 = vrot.slane %v5659_v55, %v10390_v13 }
 0xd05   :  { %v4473_v37 = vpop.permute.xlu1 %4472  ;;  %5293 = vrot.lane.b32.xlu0 %v5246_v36, %s7039_s23 }
 0xd06   :  { %v4490_v41 = vsel %vm4484_vm9, %v4473_v37, %v9608_v31 }
 0xd07   :  { %4506 = vst.msk [vmem:[#allocation6 + $0x56] sm:$0x1] %vm4168_vm1, %v4490_v41  ;;  %v5933_v21 = vpop.permute.xlu0 %5932  ;;  %5748 = vrot.lane.b32.xlu1 %v5711_v1, %s7047_s22 }
 0xd08   :  { %5953 = vst.msk [vmem:[#allocation6 + $0xbc] sm:$0x1] %vm4168_vm1, %v5933_v21 }
 0xd09   :  { %v4477_v3 = vpop.permute.xlu1 %4476  ;;  %5309 = vrot.lane.b32.xlu0 %v5278_v48, %s7039_s23 }
 0xd0a   :  { %v4491_v31 = vsel %vm4484_vm9, %v4477_v3, %v9621_v42 }
 0xd0b   :  { %4507 = vst.msk [vmem:[#allocation6 + $0x66] sm:$0x1] %vm4168_vm1, %v4491_v31  ;;  %v5937_v63 = vpop.permute.xlu0 %5936  ;;  %5874 = vrot.lane.b32.xlu1 %v10015_v50, %s7041_s18 }
 0xd0c   :  { %5955 = vst.msk [vmem:[#allocation6 + $0xdc] sm:$0x1] %vm4168_vm1, %v5937_v63 }
 0xd0d   :  { %v4603_v61 = vpop.permute.xlu1 %4602  ;;  %5431 = vrot.lane.b32.xlu0 %v5416_v43, %s10392_s7 }
 0xd0e   :  { %4620 = vst.msk [vmem:[#allocation6 + $0x67] sm:$0x1] %vm4168_vm1, %v4603_v61 }
 0xd0f   :  { %v5965_v38 = vpop.permute.xlu0 %5964  ;;  %5906 = vrot.lane.b32.xlu1 %v10015_v50, %s7042_s3 }
 0xd10   :  { %5985 = vst.msk [vmem:[#allocation6 + $0xbd] sm:$0x1] %vm4168_vm1, %v5965_v38 }
 0xd11   :  { %v4635_v42 = vpop.permute.xlu1 %4634  ;;  %5463 = vrot.lane.b32.xlu0 %v5416_v43, %s7035_s20 }
 0xd12   :  { %4652 = vst.msk [vmem:[#allocation6 + $0x68] sm:$0x1] %vm4168_vm1, %v4635_v42 }
 0xd13   :  { %v5969_v22 = vpop.permute.xlu0 %5968  ;;  %5938 = vrot.lane.b32.xlu1 %v10015_v50, %s7043_s24 }
 0xd14   :  { %5987 = vst.msk [vmem:[#allocation6 + $0xdd] sm:$0x1] %vm4168_vm1, %v5969_v22 }
 0xd15   :  { %v4667_v18 = vpop.permute.xlu1 %4666  ;;  %5495 = vrot.lane.b32.xlu0 %v5416_v43, %s7036_s2 }
 0xd16   :  { %4684 = vst.msk [vmem:[#allocation6 + $0x69] sm:$0x1] %vm4168_vm1, %v4667_v18 }
 0xd17   :  { %v5997_v45 = vpop.permute.xlu0 %5996  ;;  %5970 = vrot.lane.b32.xlu1 %v10015_v50, %s10396_s27 }
 0xd18   :  { %6017 = vst.msk [vmem:[#allocation6 + $0xbe] sm:$0x1] %vm4168_vm1, %v5997_v45 }
 0xd19   :  { %v4699_v30 = vpop.permute.xlu1 %4698  ;;  %5527 = vrot.lane.b32.xlu0 %v5416_v43, %s7037_s21 }
 0xd1a   :  { %4716 = vst.msk [vmem:[#allocation6 + $0x6a] sm:$0x1] %vm4168_vm1, %v4699_v30 }
 0xd1b   :  { %v6001_v39 = vpop.permute.xlu0 %6000  ;;  %6002 = vrot.lane.b32.xlu1 %v10015_v50, %s7045_s14 }
 0xd1c   :  { %6019 = vst.msk [vmem:[#allocation6 + $0xde] sm:$0x1] %vm4168_vm1, %v6001_v39 }
 0xd1d   :  { %v4731_v33 = vpop.permute.xlu1 %4730  ;;  %5559 = vrot.lane.b32.xlu0 %v5416_v43, %s10393_s13 }
 0xd1e   :  { %4748 = vst.msk [vmem:[#allocation6 + $0x6b] sm:$0x1] %vm4168_vm1, %v4731_v33 }
 0xd1f   :  { %v6029_v46 = vpop.permute.xlu0 %6028  ;;  %4464 = vrot.lane.b32.xlu1 %v4415_v19, %s7023_s29 }
 0xd20   :  { %6049 = vst.msk [vmem:[#allocation6 + $0xbf] sm:$0x1] %vm4168_vm1, %v6029_v46 }
 0xd21   :  { %v4763_v16 = vpop.permute.xlu1 %4762  ;;  %5591 = vrot.lane.b32.xlu0 %v5416_v43, %s7040_s0 }
 0xd22   :  { %4780 = vst.msk [vmem:[#allocation6 + $0x6c] sm:$0x1] %vm4168_vm1, %v4763_v16 }
 0xd23   :  { %v6033_v15 = vpop.permute.xlu0 %6032  ;;  %4480 = vrot.lane.b32.xlu1 %v4447_v12, %s7023_s29 }
 0xd24   :  { %6051 = vst.msk [vmem:[#allocation6 + $0xdf] sm:$0x1] %vm4168_vm1, %v6033_v15 }
 0xd25   :  { %v4902_v8 = vpop.permute.xlu1 %4901  ;;  %5738 = vrot.lane.b32.xlu0 %v5691_v47, %s7047_s22 }
 0xd26   :  { %v4931_v52 = vsel %vm4929_vm10, %v4902_v8, %v9723_v44 }
 0xd27   :  { %4947 = vst.msk [vmem:[#allocation6 + $0x1d] sm:$0x1] %vm4168_vm1, %v4931_v52  ;;  %v4159_v29 = vpop.permute.xlu0 %4158  ;;  %4909 = vrot.lane.b32.xlu1 %v4860_v60, %s7032_s16 }
 0xd28   :  { %4176 = vst.msk [vmem:[#allocation6 + $0x70] sm:$0x1] %vm4168_vm1, %v4159_v29 }
 0xd29   :  { %v4906_v7 = vpop.permute.xlu1 %4905  ;;  %5754 = vrot.lane.b32.xlu0 %v5723_v32, %s7047_s22 }
 0xd2a   :  { %v4932_v44 = vsel %vm4929_vm10, %v4906_v7, %v9732_v5 }
 0xd2b   :  { %4948 = vst.msk [vmem:[#allocation6 + $0x2d] sm:$0x1] %vm4168_vm1, %v4932_v44  ;;  %v4192_v27 = vpop.permute.xlu0 %4191  ;;  %4925 = vrot.lane.b32.xlu1 %v4892_v53, %s7032_s16 }
 0xd2c   :  { %4208 = vst.msk [vmem:[#allocation6 + $0x71] sm:$0x1] %vm4168_vm1, %v4192_v27 }
 0xd2d   :  { %v4918_v34 = vpop.permute.xlu1 %4917  ;;  %5876 = vrot.lane.b32.xlu0 %v5861_v0, %s7041_s18 }
 0xd2e   :  { %v4935_v25 = vsel %vm4929_vm10, %v4918_v34, %v9743_v51 }
 0xd2f   :  { %4951 = vst.msk [vmem:[#allocation6 + $0x5d] sm:$0x1] %vm4168_vm1, %v4935_v25  ;;  %v4224_v5 = vpop.permute.xlu0 %4223  ;;  %5291 = vrot.lane.b32.xlu1 %v5242_v24, %s7039_s23 }
 0xd30   :  { %4240 = vst.msk [vmem:[#allocation6 + $0x72] sm:$0x1] %vm4168_vm1, %v4224_v5 }
 0xd31   :  { %v4922_v49 = vpop.permute.xlu1 %4921  ;;  %5908 = vrot.lane.b32.xlu0 %v5861_v0, %s7042_s3 }
 0xd32   :  { %v4936_v35 = vsel %vm4929_vm10, %v4922_v49, %v9752_v28 }
 0xd33   :  { %4952 = vst.msk [vmem:[#allocation6 + $0x6d] sm:$0x1] %vm4168_vm1, %v4936_v35  ;;  %v4256_v54 = vpop.permute.xlu0 %4255  ;;  %5307 = vrot.lane.b32.xlu1 %v5274_v26, %s7039_s23 }
 0xd34   :  { %4272 = vst.msk [vmem:[#allocation6 + $0x73] sm:$0x1] %vm4168_vm1, %v4256_v54 }
 0xd35   :  { %v5048_v51 = vpop.permute.xlu1 %5047  ;;  %5940 = vrot.lane.b32.xlu0 %v5861_v0, %s7043_s24 }
 0xd36   :  { %5065 = vst.msk [vmem:[#allocation6 + $0x6e] sm:$0x1] %vm4168_vm1, %v5048_v51 }
 0xd37   :  { %v4288_v6 = vpop.permute.xlu0 %4287  ;;  %5736 = vrot.lane.b32.xlu1 %v5687_v58, %s7047_s22 }
 0xd38   :  { %4304 = vst.msk [vmem:[#allocation6 + $0x74] sm:$0x1] %vm4168_vm1, %v4288_v6 }
 0xd39   :  { %v5080_v28 = vpop.permute.xlu1 %5079  ;;  %5972 = vrot.lane.b32.xlu0 %v5861_v0, %s10396_s27 }
 0xd3a   :  { %5097 = vst.msk [vmem:[#allocation6 + $0x6f] sm:$0x1] %vm4168_vm1, %v5080_v28 }
 0xd3b   :  { %v4320_v36 = vpop.permute.xlu0 %4319  ;;  %5752 = vrot.lane.b32.xlu1 %v5719_v57, %s7047_s22 }
 0xd3c   :  { %4336 = vst.msk [vmem:[#allocation6 + $0x75] sm:$0x1] %vm4168_vm1, %v4320_v36 }
 0xd3d   :  { %v5112_v20 = vpop.permute.xlu1 %5111  ;;  %6004 = vrot.lane.b32.xlu0 %v5861_v0, %s7045_s14 }
 0xd3e   :  { %5130 = vst.msk [vmem:[#allocation6 + $0xe0] sm:$0x1] %vm4168_vm1, %v5112_v20 }
 0xd3f   :  { %v10109_v37 = vpop.permute.xlu0 %4466  ;;  %6034 = vrot.lane.b32.xlu1 %v10015_v50, %s7046_s19 }
 0xd41   :  { %v5145_v1 = vpop.permute.xlu1 %5144  ;;  %6036 = vrot.lane.b32.xlu0 %v5861_v0, %s7046_s19 }
 0xd42   :  { %5162 = vst.msk [vmem:[#allocation6 + $0xe1] sm:$0x1] %vm4168_vm1, %v5145_v1 }
 0xd43   :  { %v10115_v13 = vpop.permute.xlu0 %4482 }
 0xd45   :  { %v5284_v17 = vpop.permute.xlu1 %5283 }
 0xd46   :  { %v5313_v41 = vsel %vm5311_vm11, %v5284_v17, %v9815_v9 }
 0xd47   :  { %5329 = vst.msk [vmem:[#allocation6 + $0x92] sm:$0x1] %vm4168_vm1, %v5313_v41  ;;  %v4605_v21 = vpop.permute.xlu0 %4604 }
 0xd48   :  { %4621 = vst.msk [vmem:[#allocation6 + $0x77] sm:$0x1] %vm4168_vm1, %v4605_v21 }
 0xd49   :  { %v5288_v48 = vpop.permute.xlu1 %5287 }
 0xd4a   :  { %v5314_v4 = vsel %vm5311_vm11, %v5288_v48, %v9821_v40 }
 0xd4b   :  { %5330 = vst.msk [vmem:[#allocation6 + $0xa2] sm:$0x1] %vm4168_vm1, %v5314_v4  ;;  %v4637_v3 = vpop.permute.xlu0 %4636 }
 0xd4c   :  { %4653 = vst.msk [vmem:[#allocation6 + $0x78] sm:$0x1] %vm4168_vm1, %v4637_v3 }
 0xd4d   :  { %v5300_v50 = vpop.permute.xlu1 %5299 }
 0xd4e   :  { %v5317_v31 = vsel %vm5311_vm11, %v5300_v50, %v9829_v2 }
 0xd4f   :  { %5333 = vst.msk [vmem:[#allocation6 + $0xd2] sm:$0x1] %vm4168_vm1, %v5317_v31  ;;  %v4669_v9 = vpop.permute.xlu0 %4668 }
 0xd50   :  { %4685 = vst.msk [vmem:[#allocation6 + $0x79] sm:$0x1] %vm4168_vm1, %v4669_v9 }
 0xd51   :  { %v5304_v63 = vpop.permute.xlu1 %5303 }
 0xd52   :  { %v5318_v43 = vsel %vm5311_vm11, %v5304_v63, %v9841_v56 }
 0xd53   :  { %5334 = vst.msk [vmem:[#allocation6 + $0xe2] sm:$0x1] %vm4168_vm1, %v5318_v43  ;;  %v4701_v40 = vpop.permute.xlu0 %4700 }
 0xd54   :  { %4717 = vst.msk [vmem:[#allocation6 + $0x7a] sm:$0x1] %vm4168_vm1, %v4701_v40 }
 0xd55   :  { %v5430_v61 = vpop.permute.xlu1 %5429 }
 0xd56   :  { %5447 = vst.msk [vmem:[#allocation6 + $0xe3] sm:$0x1] %vm4168_vm1, %v5430_v61 }
 0xd57   :  { %v4733_v38 = vpop.permute.xlu0 %4732 }
 0xd58   :  { %4749 = vst.msk [vmem:[#allocation6 + $0x7b] sm:$0x1] %vm4168_vm1, %v4733_v38 }
 0xd59   :  { %v5462_v2 = vpop.permute.xlu1 %5461 }
 0xd5a   :  { %5479 = vst.msk [vmem:[#allocation6 + $0xe4] sm:$0x1] %vm4168_vm1, %v5462_v2 }
 0xd5b   :  { %v4765_v42 = vpop.permute.xlu0 %4764 }
 0xd5c   :  { %4781 = vst.msk [vmem:[#allocation6 + $0x7c] sm:$0x1] %vm4168_vm1, %v4765_v42 }
 0xd5d   :  { %v5494_v22 = vpop.permute.xlu1 %5493 }
 0xd5e   :  { %5511 = vst.msk [vmem:[#allocation6 + $0xe5] sm:$0x1] %vm4168_vm1, %v5494_v22 }
 0xd5f   :  { %v4912_v56 = vpop.permute.xlu0 %4911 }
 0xd61   :  { %v5526_v18 = vpop.permute.xlu1 %5525 }
 0xd62   :  { %5543 = vst.msk [vmem:[#allocation6 + $0xe6] sm:$0x1] %vm4168_vm1, %v5526_v18 }
 0xd63   :  { %v4928_v45 = vpop.permute.xlu0 %4927 }
 0xd65   :  { %v5558_v30 = vpop.permute.xlu1 %5557 }
 0xd66   :  { %5575 = vst.msk [vmem:[#allocation6 + $0xe7] sm:$0x1] %vm4168_vm1, %v5558_v30 }
 0xd67   :  { %v5050_v39 = vpop.permute.xlu0 %5049 }
 0xd68   :  { %5066 = vst.msk [vmem:[#allocation6 + $0x7e] sm:$0x1] %vm4168_vm1, %v5050_v39 }
 0xd69   :  { %v5590_v33 = vpop.permute.xlu1 %5589 }
 0xd6a   :  { %5607 = vst.msk [vmem:[#allocation6 + $0xe8] sm:$0x1] %vm4168_vm1, %v5590_v33 }
 0xd6b   :  { %v5082_v19 = vpop.permute.xlu0 %5081 }
 0xd6c   :  { %5098 = vst.msk [vmem:[#allocation6 + $0x7f] sm:$0x1] %vm4168_vm1, %v5082_v19 }
 0xd6d   :  { %v5729_v46 = vpop.permute.xlu1 %5728 }
 0xd6e   :  { %v5758_v59 = vsel %vm5756_vm12, %v5729_v46, %v9930_v14 }
 0xd6f   :  { %5774 = vst.msk [vmem:[#allocation6 + $0x99] sm:$0x1] %vm4168_vm1, %v5758_v59  ;;  %v5114_v16 = vpop.permute.xlu0 %5113 }
 0xd70   :  { %5131 = vst.msk [vmem:[#allocation6 + $0xf0] sm:$0x1] %vm4168_vm1, %v5114_v16 }
 0xd71   :  { %v5733_v12 = vpop.permute.xlu1 %5732 }
 0xd72   :  { %v5759_v15 = vsel %vm5756_vm12, %v5733_v12, %v9939_v10 }
 0xd73   :  { %5775 = vst.msk [vmem:[#allocation6 + $0xa9] sm:$0x1] %vm4168_vm1, %v5759_v15  ;;  %v5147_v47 = vpop.permute.xlu0 %5146 }
 0xd74   :  { %5163 = vst.msk [vmem:[#allocation6 + $0xf1] sm:$0x1] %vm4168_vm1, %v5147_v47 }
 0xd75   :  { %v5745_v55 = vpop.permute.xlu1 %5744 }
 0xd76   :  { %v5762_v8 = vsel %vm5756_vm12, %v5745_v55, %v9950_v62 }
 0xd77   :  { %5778 = vst.msk [vmem:[#allocation6 + $0xd9] sm:$0x1] %vm4168_vm1, %v5762_v8  ;;  %v5294_v14 = vpop.permute.xlu0 %5293 }
 0xd79   :  { %v5749_v60 = vpop.permute.xlu1 %5748 }
 0xd7a   :  { %v5763_v52 = vsel %vm5756_vm12, %v5749_v60, %v9959_v11 }
 0xd7b   :  { %5779 = vst.msk [vmem:[#allocation6 + $0xe9] sm:$0x1] %vm4168_vm1, %v5763_v52  ;;  %v5310_v29 = vpop.permute.xlu0 %5309 }
 0xd7d   :  { %v5875_v10 = vpop.permute.xlu1 %5874 }
 0xd7e   :  { %5892 = vst.msk [vmem:[#allocation6 + $0xea] sm:$0x1] %vm4168_vm1, %v5875_v10 }
 0xd7f   :  { %v5432_v32 = vpop.permute.xlu0 %5431 }
 0xd80   :  { %5448 = vst.msk [vmem:[#allocation6 + $0xf3] sm:$0x1] %vm4168_vm1, %v5432_v32 }
 0xd81   :  { %v5907_v23 = vpop.permute.xlu1 %5906 }
 0xd82   :  { %5924 = vst.msk [vmem:[#allocation6 + $0xeb] sm:$0x1] %vm4168_vm1, %v5907_v23 }
 0xd83   :  { %v5464_v62 = vpop.permute.xlu0 %5463 }
 0xd84   :  { %5480 = vst.msk [vmem:[#allocation6 + $0xf4] sm:$0x1] %vm4168_vm1, %v5464_v62 }
 0xd85   :  { %v5939_v7 = vpop.permute.xlu1 %5938 }
 0xd86   :  { %5956 = vst.msk [vmem:[#allocation6 + $0xec] sm:$0x1] %vm4168_vm1, %v5939_v7 }
 0xd87   :  { %v5496_v53 = vpop.permute.xlu0 %5495 }
 0xd88   :  { %5512 = vst.msk [vmem:[#allocation6 + $0xf5] sm:$0x1] %vm4168_vm1, %v5496_v53 }
 0xd89   :  { %v5971_v11 = vpop.permute.xlu1 %5970 }
 0xd8a   :  { %5988 = vst.msk [vmem:[#allocation6 + $0xed] sm:$0x1] %vm4168_vm1, %v5971_v11 }
 0xd8b   :  { %v5528_v44 = vpop.permute.xlu0 %5527 }
 0xd8c   :  { %5544 = vst.msk [vmem:[#allocation6 + $0xf6] sm:$0x1] %vm4168_vm1, %v5528_v44 }
 0xd8d   :  { %v6003_v27 = vpop.permute.xlu1 %6002 }
 0xd8e   :  { %6020 = vst.msk [vmem:[#allocation6 + $0xee] sm:$0x1] %vm4168_vm1, %v6003_v27 }
 0xd8f   :  { %v5560_v0 = vpop.permute.xlu0 %5559 }
 0xd90   :  { %5576 = vst.msk [vmem:[#allocation6 + $0xf7] sm:$0x1] %vm4168_vm1, %v5560_v0 }
 0xd91   :  { %v4465_v34 = vpop.permute.xlu1 %4464 }
 0xd92   :  { %v4488_v24 = vsel %vm4484_vm9, %v4465_v34, %v10109_v37 }
 0xd93   :  { %4504 = vst.msk [vmem:[#allocation6 + $0x36] sm:$0x1] %vm4168_vm1, %v4488_v24  ;;  %v5592_v25 = vpop.permute.xlu0 %5591 }
 0xd94   :  { %5608 = vst.msk [vmem:[#allocation6 + $0xf8] sm:$0x1] %vm4168_vm1, %v5592_v25 }
 0xd95   :  { %v4481_v5 = vpop.permute.xlu1 %4480 }
 0xd96   :  { %v4492_v49 = vsel %vm4484_vm9, %v4481_v5, %v10115_v13 }
 0xd97   :  { %4508 = vst.msk [vmem:[#allocation6 + $0x76] sm:$0x1] %vm4168_vm1, %v4492_v49  ;;  %v5739_v26 = vpop.permute.xlu0 %5738 }
 0xd99   :  { %v4910_v35 = vpop.permute.xlu1 %4909 }
 0xd9a   :  { %v4933_v54 = vsel %vm4929_vm10, %v4910_v35, %v4912_v56 }
 0xd9b   :  { %4949 = vst.msk [vmem:[#allocation6 + $0x3d] sm:$0x1] %vm4168_vm1, %v4933_v54  ;;  %v5755_v51 = vpop.permute.xlu0 %5754 }
 0xd9d   :  { %v4926_v58 = vpop.permute.xlu1 %4925 }
 0xd9e   :  { %v4937_v6 = vsel %vm4929_vm10, %v4926_v58, %v4928_v45 }
 0xd9f   :  { %4953 = vst.msk [vmem:[#allocation6 + $0x7d] sm:$0x1] %vm4168_vm1, %v4937_v6  ;;  %v5877_v28 = vpop.permute.xlu0 %5876 }
 0xda0   :  { %5893 = vst.msk [vmem:[#allocation6 + $0xfa] sm:$0x1] %vm4168_vm1, %v5877_v28 }
 0xda1   :  { %v5292_v57 = vpop.permute.xlu1 %5291 }
 0xda2   :  { %v5315_v36 = vsel %vm5311_vm11, %v5292_v57, %v5294_v14 }
 0xda3   :  { %5331 = vst.msk [vmem:[#allocation6 + $0xb2] sm:$0x1] %vm4168_vm1, %v5315_v36  ;;  %v5909_v20 = vpop.permute.xlu0 %5908 }
 0xda4   :  { %5925 = vst.msk [vmem:[#allocation6 + $0xfb] sm:$0x1] %vm4168_vm1, %v5909_v20 }
 0xda5   :  { %v5308_v37 = vpop.permute.xlu1 %5307 }
 0xda6   :  { %v5319_v1 = vsel %vm5311_vm11, %v5308_v37, %v5310_v29 }
 0xda7   :  { %5335 = vst.msk [vmem:[#allocation6 + $0xf2] sm:$0x1] %vm4168_vm1, %v5319_v1  ;;  %v5941_v13 = vpop.permute.xlu0 %5940 }
 0xda8   :  { %5957 = vst.msk [vmem:[#allocation6 + $0xfc] sm:$0x1] %vm4168_vm1, %v5941_v13 }
 0xda9   :  { %v5737_v17 = vpop.permute.xlu1 %5736 }
 0xdaa   :  { %v5760_v41 = vsel %vm5756_vm12, %v5737_v17, %v5739_v26 }
 0xdab   :  { %5776 = vst.msk [vmem:[#allocation6 + $0xb9] sm:$0x1] %vm4168_vm1, %v5760_v41  ;;  %v5973_v21 = vpop.permute.xlu0 %5972 }
 0xdac   :  { %5989 = vst.msk [vmem:[#allocation6 + $0xfd] sm:$0x1] %vm4168_vm1, %v5973_v21 }
 0xdad   :  { %v5753_v48 = vpop.permute.xlu1 %5752 }
 0xdae   :  { %v5764_v4 = vsel %vm5756_vm12, %v5753_v48, %v5755_v51 }
 0xdaf   :  { %5780 = vst.msk [vmem:[#allocation6 + $0xf9] sm:$0x1] %vm4168_vm1, %v5764_v4  ;;  %v6005_v3 = vpop.permute.xlu0 %6004 }
 0xdb0   :  { %6021 = vst.msk [vmem:[#allocation6 + $0xfe] sm:$0x1] %vm4168_vm1, %v6005_v3 }
 0xdb1   :  { %v6035_v50 = vpop.permute.xlu1 %6034 }
 0xdb2   :  { %6052 = vst.msk [vmem:[#allocation6 + $0xef] sm:$0x1] %vm4168_vm1, %v6035_v50 }
 0xdb3   :  { %v6037_v31 = vpop.permute.xlu0 %6036 }
 0xdb4   :  { %6053 = vst.msk [vmem:[#allocation6 + $0xff] sm:$0x1] %vm4168_vm1, %v6037_v31 }
 0xdb5   :  { %6968 = shalt.err (!%p6965_p4)
}
 0xdb6   :  { %s6969_s29 = scalar_lea.hbm %s10213_s8, 4096 }
 0xdb7   :  { %p6970_p5 = scmp.ne.s32.totalorder %s10213_s8, %s6969_s29  ;;  %p6973_p6 = scmp.lt.u32.totalorder %s6969_s29, %s10213_s8 }
 0xdb9   :  { %p6975_p7 = pnand %p6973_p6, %p6970_p5 }
 0xdbb   :  { %6978 = shalt.err (!%p6975_p7)
}
 0xdbc   :  { %s7049_s7 = smov 128   ;;  %s7050_s11 = smov 8  }
 0xdbd   :  { %6065 = dma.vmem_to_hbm [thread:$0]  %s6060_s4, 4096, %s10213_s8, [#allocation7], %s7049_s7, %s7049_s7, %s7050_s11  }
 0xdbe   :  { %6979 = dma.done.wait [#allocation7], 4096  }
 0xdbf   :  { %6980 = vsyncadd [#allocation7], 4294963200 }
 0xdc0   :  { %6069 = vsyncpa [#allocation7], 1 }

</bundles_post_ra>
